<compile_context>
chip_gen: v7x
topology: tpu7x:2x2x1
jax: 0.10.0
libtpu: 0.0.40
codegen_flags: <defaults>
</compile_context>

<pallas_src>
import functools

import jax
import jax.numpy as jnp
from jax.experimental import pallas as pl
from jax.experimental.pallas import tpu as pltpu


def _round_up(x, m):
    return (x + m - 1) // m * m


def _cdiv(a, b):
    return (a + b - 1) // b


def _pick_row_tile(ho, wo, batch, target_pixels=2048):
    """Output rows per tile: big tiles (amortize ~0.35us/grid step, long DMAs)
    while guaranteeing >= 2 total grid steps so a megacore can split work."""
    th = max(1, min(ho, max(1, target_pixels // max(wo, 1))))
    nt = _cdiv(ho, th)
    if batch * nt < 2 and ho > 1:
        th = _cdiv(ho, 2)
        nt = _cdiv(ho, th)
    return th, nt


def _conv_kernel(x_ref, w_ref, b_ref, out_ref, *, kh, kw, th, wo_t, wo, cin,
                 relu):
    """Direct conv for one (batch, row-tile) grid cell.

    x_ref:   (1, Hp, Wp, Cin)    bf16/f32 whole padded image (resident per n)
    w_ref:   (KH*KW, Cin, Cout)  bf16/f32 (resident)
    b_ref:   (1, Cout)           f32      (resident)
    out_ref: (1, TH, Wo, Cout)
    """
    r = pl.program_id(1)
    row0 = r * th
    # Haloed row slab for this output row tile (leading-dim dynamic slice).
    x = x_ref[0, pl.ds(row0, th + kh - 1), :, :]          # (th+kh-1, Wp, Cin)

    acc = None
    for i in range(kh):
        for j in range(kw):
            # Shifted tap window; wo_t is sublane-aligned so the collapse
            # reshape is layout-trivial.
            sl = x[i:i + th, j:j + wo_t, :].reshape(th * wo_t, cin)
            p = jnp.dot(sl, w_ref[i * kw + j],
                        preferred_element_type=jnp.float32)
            acc = p if acc is None else acc + p

    acc = acc + b_ref[...]                                 # f32 bias epilogue
    if relu:
        acc = jnp.maximum(acc, 0.0)
    out = acc.reshape(th, wo_t, -1)[:, :wo, :]             # drop W pad columns
    out_ref[0] = out.astype(out_ref.dtype)


def _conv2d_pallas(x_nhwc, w_oihw, b, *, padding, relu, compute_dtype):
    """Stride-1 Conv2d (3x3 pad=1 or 1x1 pad=0) + optional fused ReLU, NHWC.

    Stride-2 "convdown" layers are handled by the caller with an exact spatial
    subsample (kernel_size=1, padding=0)."""
    n, h, w, cin = x_nhwc.shape
    cout, cin_w, kh, kw = w_oihw.shape
    assert cin == cin_w
    ho = h + 2 * padding - kh + 1
    wo = w + 2 * padding - kw + 1

    th, nt = _pick_row_tile(ho, wo, n)
    ho_pad = th * nt
    wo_t = _round_up(wo, 16)   # sublane-friendly width (bf16 packs 16 rows)

    # Zero-pad: conv halo + extra rows/cols so every tile has a full window.
    pad_h = (padding, padding + (ho_pad - ho))
    pad_w = (padding, padding + (wo_t - wo))
    xp = jnp.pad(x_nhwc.astype(compute_dtype), ((0, 0), pad_h, pad_w, (0, 0)))
    hp, wp = xp.shape[1], xp.shape[2]

    # (Cout,Cin,KH,KW) -> (KH*KW, Cin, Cout); bias stays f32.
    w_taps = jnp.transpose(w_oihw, (2, 3, 1, 0)).reshape(kh * kw, cin, cout)
    w_taps = w_taps.astype(compute_dtype)
    b2d = b.reshape(1, cout).astype(jnp.float32)

    kernel = functools.partial(_conv_kernel, kh=kh, kw=kw, th=th, wo_t=wo_t,
                               wo=wo, cin=cin, relu=relu)
    out = pl.pallas_call(
        kernel,
        out_shape=jax.ShapeDtypeStruct((n, ho_pad, wo, cout), compute_dtype),
        grid_spec=pltpu.PrefetchScalarGridSpec(
            num_scalar_prefetch=0,
            grid=(n, nt),
            in_specs=[
                # Whole padded image of one batch element; block index is
                # constant across the row-tile axis -> fetched once per n.
                pl.BlockSpec((1, hp, wp, cin), lambda i, r: (i, 0, 0, 0)),
                pl.BlockSpec((kh * kw, cin, cout), lambda i, r: (0, 0, 0)),
                pl.BlockSpec((1, cout), lambda i, r: (0, 0)),
            ],
            out_specs=pl.BlockSpec((1, th, wo, cout), lambda i, r: (i, r, 0, 0)),
        ),
        compiler_params=pltpu.CompilerParams(
            dimension_semantics=("parallel", "parallel"),
            vmem_limit_bytes=48 * 1024 * 1024,   # stays under v7x 64 MiB/TC
        ),
    )(xp, w_taps, b2d)

    if ho_pad != ho:                      # only when th does not divide Ho
        out = out[:, :ho, :, :]
    return out


def lte_forward(x_nchw, params, *, compute_dtype):
    """Matches PyTorch LTE.forward: returns (x_lv1, x_lv2, x_lv3), NCHW f32."""
    conv = functools.partial(_conv2d_pallas, compute_dtype=compute_dtype)
    x = jnp.transpose(x_nchw, (0, 2, 3, 1))               # NHWC, once

    # conv_head: conv3x3(3, F) + ReLU
    x = conv(x, params["w_head"], params["b_head"], padding=1, relu=True)
    # slice1: conv3x3 + ReLU + conv3x3
    x = conv(x, params["w_s1a"], params["b_s1a"], padding=1, relu=True)
    x = conv(x, params["w_s1b"], params["b_s1b"], padding=1, relu=False)
    x_lv1 = x
    # slice2: convdown(1x1, stride 2) + ReLU + conv3x3
    x = conv(x[:, ::2, ::2, :], params["w_s2a"], params["b_s2a"],
             padding=0, relu=True)
    x = conv(x, params["w_s2b"], params["b_s2b"], padding=1, relu=False)
    x_lv2 = x
    # slice3: convdown(1x1, stride 2) + ReLU + conv3x3
    x = conv(x[:, ::2, ::2, :], params["w_s3a"], params["b_s3a"],
             padding=0, relu=True)
    x = conv(x, params["w_s3b"], params["b_s3b"], padding=1, relu=False)
    x_lv3 = x

    to_nchw = lambda t: jnp.transpose(t, (0, 3, 1, 2)).astype(jnp.float32)
    return to_nchw(x_lv1), to_nchw(x_lv2), to_nchw(x_lv3)


lte_forward_bf16 = jax.jit(
    functools.partial(lte_forward, compute_dtype=jnp.bfloat16))
lte_forward_f32 = jax.jit(
    functools.partial(lte_forward, compute_dtype=jnp.float32))


# ----------------------------- reference (pure JAX) -------------------------

def _conv_ref(x_nchw, w, b, stride, padding):
    dn = jax.lax.conv_dimension_numbers(x_nchw.shape, w.shape,
                                        ("NCHW", "OIHW", "NCHW"))
    y = jax.lax.conv_general_dilated(
        x_nchw, w, (stride, stride),
        [(padding, padding), (padding, padding)], dimension_numbers=dn)
    return y + b[None, :, None, None]


def _lte_reference(x, p):
    x = jax.nn.relu(_conv_ref(x, p["w_head"], p["b_head"], 1, 1))
    x = jax.nn.relu(_conv_ref(x, p["w_s1a"], p["b_s1a"], 1, 1))
    x = _conv_ref(x, p["w_s1b"], p["b_s1b"], 1, 1)
    x_lv1 = x
    x = jax.nn.relu(_conv_ref(x, p["w_s2a"], p["b_s2a"], 2, 0))
    x = _conv_ref(x, p["w_s2b"], p["b_s2b"], 1, 1)
    x_lv2 = x
    x = jax.nn.relu(_conv_ref(x, p["w_s3a"], p["b_s3a"], 2, 0))
    x = _conv_ref(x, p["w_s3b"], p["b_s3b"], 1, 1)
    x_lv3 = x
    return x_lv1, x_lv2, x_lv3


def _init_conv(key, cout, cin, kh, kw):
    k1, k2 = jax.random.split(key)
    fan_in = cin * kh * kw
    std = (2.0 / fan_in) ** 0.5
    w = std * jax.random.normal(k1, (cout, cin, kh, kw), dtype=jnp.float32)
    b = 0.1 * jax.random.normal(k2, (cout,), dtype=jnp.float32)
    return w, b


if __name__ == "__main__":
    key = jax.random.PRNGKey(0)
    n_feats = 32
    n, cin, h, w = 2, 3, 16, 16

    keys = jax.random.split(key, 8)
    x = jax.random.normal(keys[0], (n, cin, h, w), dtype=jnp.float32)

    params = {}
    params["w_head"], params["b_head"] = _init_conv(keys[1], n_feats, cin, 3, 3)
    params["w_s1a"], params["b_s1a"] = _init_conv(keys[2], n_feats, n_feats, 3, 3)
    params["w_s1b"], params["b_s1b"] = _init_conv(keys[3], n_feats, n_feats, 3, 3)
    params["w_s2a"], params["b_s2a"] = _init_conv(keys[4], n_feats, n_feats, 1, 1)
    params["w_s2b"], params["b_s2b"] = _init_conv(keys[5], n_feats, n_feats, 3, 3)
    params["w_s3a"], params["b_s3a"] = _init_conv(keys[6], n_feats, n_feats, 1, 1)
    params["w_s3b"], params["b_s3b"] = _init_conv(keys[7], n_feats, n_feats, 3, 3)

    refs = _lte_reference(x, params)
    names = ("x_lv1", "x_lv2", "x_lv3")
    expect_shapes = ((n, n_feats, h, w),
                     (n, n_feats, h // 2, w // 2),
                     (n, n_feats, h // 4, w // 4))

    # 1) f32 kernel path: tight check of the kernel math vs the XLA reference.
    outs = lte_forward_f32(x, params)
    jax.block_until_ready(outs)
    for o, r, nm, es in zip(outs, refs, names, expect_shapes):
        assert o.shape == es, (nm, o.shape, es)
        err = float(jnp.max(jnp.abs(o - r)))
        assert jnp.allclose(o, r, atol=2e-2, rtol=2e-2), (nm, err)

    # 2) bf16 streaming path (production config per perf feedback):
    #    normalized-error check (bf16 operand rounding, f32 accumulation).
    outs16 = lte_forward_bf16(x, params)
    jax.block_until_ready(outs16)
    for o, r, nm in zip(outs16, refs, names):
        nerr = float(jnp.max(jnp.abs(o - r)) /
                     jnp.maximum(jnp.max(jnp.abs(r)), 1e-6))
        assert nerr < 5e-2, (nm, nerr)

    print("KERNEL_OK")
</pallas_src>

<mosaic_0001>
module attributes {stable_mosaic.version = 11 : i64} {
  func.func @_conv_kernel(%arg0: i32, %arg1: i32, %arg2: memref<1x18x18x3xf32, #tpu.memory_space<vmem>>, %arg3: memref<9x3x32xf32, #tpu.memory_space<vmem>>, %arg4: memref<1x32xf32, #tpu.memory_space<vmem>>, %arg5: memref<1x16x16x32xf32, #tpu.memory_space<vmem>>) attributes {dimension_semantics = [#tpu.dimension_semantics<parallel>, #tpu.dimension_semantics<parallel>], iteration_bounds = array<i64: 2, 1>, scalar_prefetch = 0 : i64, scratch_operands = 0 : i64, tpu.core_type = #tpu.core_type<tc>, window_params = [{transform_indices = @transform_0, window_bounds = array<i64: 1, 18, 18, 3>}, {pipeline_mode = #tpu.pipeline_mode<synchronous>, transform_indices = @transform_1, window_bounds = array<i64: 9, 3, 32>}, {pipeline_mode = #tpu.pipeline_mode<synchronous>, transform_indices = @transform_2, window_bounds = array<i64: 1, 32>}, {transform_indices = @transform_3, window_bounds = array<i64: 1, 16, 16, 32>}]} {
    %c16_i32 = arith.constant 16 : i32
    %0 = arith.muli %arg1, %c16_i32 : i32
    %c0 = arith.constant 0 : index
    %1 = arith.index_cast %0 : i32 to index
    %c0_0 = arith.constant 0 : index
    %c0_1 = arith.constant 0 : index
    %2 = vector.load %arg2[%c0, %1, %c0_0, %c0_1] : memref<1x18x18x3xf32, #tpu.memory_space<vmem>>, vector<1x18x18x3xf32>
    %3 = vector.shape_cast %2 : vector<1x18x18x3xf32> to vector<18x18x3xf32>
    %4 = vector.extract_strided_slice %3 {offsets = [0, 0, 0], sizes = [16, 16, 3], strides = [1, 1, 1]} : vector<18x18x3xf32> to vector<16x16x3xf32>
    %5 = vector.shape_cast %4 : vector<16x16x3xf32> to vector<256x3xf32>
    %c0_2 = arith.constant 0 : index
    %c0_3 = arith.constant 0 : index
    %c0_4 = arith.constant 0 : index
    %6 = vector.load %arg3[%c0_2, %c0_3, %c0_4] : memref<9x3x32xf32, #tpu.memory_space<vmem>>, vector<1x3x32xf32>
    %7 = vector.shape_cast %6 : vector<1x3x32xf32> to vector<3x32xf32>
    %cst = arith.constant dense<0.000000e+00> : vector<256x32xf32>
    %8 = tpu.matmul %5, %7, %cst {dimension_numbers = #tpu.dot_dimension_numbers<[1], [0], [0], [1], [0, 0, 1, 1], [], []>} : vector<256x3xf32>, vector<3x32xf32>, vector<256x32xf32> -> vector<256x32xf32>
    %9 = vector.extract_strided_slice %3 {offsets = [0, 1, 0], sizes = [16, 16, 3], strides = [1, 1, 1]} : vector<18x18x3xf32> to vector<16x16x3xf32>
    %10 = vector.shape_cast %9 : vector<16x16x3xf32> to vector<256x3xf32>
    %c1 = arith.constant 1 : index
    %c0_5 = arith.constant 0 : index
    %c0_6 = arith.constant 0 : index
    %11 = vector.load %arg3[%c1, %c0_5, %c0_6] : memref<9x3x32xf32, #tpu.memory_space<vmem>>, vector<1x3x32xf32>
    %12 = vector.shape_cast %11 : vector<1x3x32xf32> to vector<3x32xf32>
    %cst_7 = arith.constant dense<0.000000e+00> : vector<256x32xf32>
    %13 = tpu.matmul %10, %12, %cst_7 {dimension_numbers = #tpu.dot_dimension_numbers<[1], [0], [0], [1], [0, 0, 1, 1], [], []>} : vector<256x3xf32>, vector<3x32xf32>, vector<256x32xf32> -> vector<256x32xf32>
    %14 = arith.addf %8, %13 : vector<256x32xf32>
    %15 = vector.extract_strided_slice %3 {offsets = [0, 2, 0], sizes = [16, 16, 3], strides = [1, 1, 1]} : vector<18x18x3xf32> to vector<16x16x3xf32>
    %16 = vector.shape_cast %15 : vector<16x16x3xf32> to vector<256x3xf32>
    %c2 = arith.constant 2 : index
    %c0_8 = arith.constant 0 : index
    %c0_9 = arith.constant 0 : index
    %17 = vector.load %arg3[%c2, %c0_8, %c0_9] : memref<9x3x32xf32, #tpu.memory_space<vmem>>, vector<1x3x32xf32>
    %18 = vector.shape_cast %17 : vector<1x3x32xf32> to vector<3x32xf32>
    %cst_10 = arith.constant dense<0.000000e+00> : vector<256x32xf32>
    %19 = tpu.matmul %16, %18, %cst_10 {dimension_numbers = #tpu.dot_dimension_numbers<[1], [0], [0], [1], [0, 0, 1, 1], [], []>} : vector<256x3xf32>, vector<3x32xf32>, vector<256x32xf32> -> vector<256x32xf32>
    %20 = arith.addf %14, %19 : vector<256x32xf32>
    %21 = vector.extract_strided_slice %3 {offsets = [1, 0, 0], sizes = [16, 16, 3], strides = [1, 1, 1]} : vector<18x18x3xf32> to vector<16x16x3xf32>
    %22 = vector.shape_cast %21 : vector<16x16x3xf32> to vector<256x3xf32>
    %c3 = arith.constant 3 : index
    %c0_11 = arith.constant 0 : index
    %c0_12 = arith.constant 0 : index
    %23 = vector.load %arg3[%c3, %c0_11, %c0_12] : memref<9x3x32xf32, #tpu.memory_space<vmem>>, vector<1x3x32xf32>
    %24 = vector.shape_cast %23 : vector<1x3x32xf32> to vector<3x32xf32>
    %cst_13 = arith.constant dense<0.000000e+00> : vector<256x32xf32>
    %25 = tpu.matmul %22, %24, %cst_13 {dimension_numbers = #tpu.dot_dimension_numbers<[1], [0], [0], [1], [0, 0, 1, 1], [], []>} : vector<256x3xf32>, vector<3x32xf32>, vector<256x32xf32> -> vector<256x32xf32>
    %26 = arith.addf %20, %25 : vector<256x32xf32>
    %27 = vector.extract_strided_slice %3 {offsets = [1, 1, 0], sizes = [16, 16, 3], strides = [1, 1, 1]} : vector<18x18x3xf32> to vector<16x16x3xf32>
    %28 = vector.shape_cast %27 : vector<16x16x3xf32> to vector<256x3xf32>
    %c4 = arith.constant 4 : index
    %c0_14 = arith.constant 0 : index
    %c0_15 = arith.constant 0 : index
    %29 = vector.load %arg3[%c4, %c0_14, %c0_15] : memref<9x3x32xf32, #tpu.memory_space<vmem>>, vector<1x3x32xf32>
    %30 = vector.shape_cast %29 : vector<1x3x32xf32> to vector<3x32xf32>
    %cst_16 = arith.constant dense<0.000000e+00> : vector<256x32xf32>
    %31 = tpu.matmul %28, %30, %cst_16 {dimension_numbers = #tpu.dot_dimension_numbers<[1], [0], [0], [1], [0, 0, 1, 1], [], []>} : vector<256x3xf32>, vector<3x32xf32>, vector<256x32xf32> -> vector<256x32xf32>
    %32 = arith.addf %26, %31 : vector<256x32xf32>
    %33 = vector.extract_strided_slice %3 {offsets = [1, 2, 0], sizes = [16, 16, 3], strides = [1, 1, 1]} : vector<18x18x3xf32> to vector<16x16x3xf32>
    %34 = vector.shape_cast %33 : vector<16x16x3xf32> to vector<256x3xf32>
    %c5 = arith.constant 5 : index
    %c0_17 = arith.constant 0 : index
    %c0_18 = arith.constant 0 : index
    %35 = vector.load %arg3[%c5, %c0_17, %c0_18] : memref<9x3x32xf32, #tpu.memory_space<vmem>>, vector<1x3x32xf32>
    %36 = vector.shape_cast %35 : vector<1x3x32xf32> to vector<3x32xf32>
    %cst_19 = arith.constant dense<0.000000e+00> : vector<256x32xf32>
    %37 = tpu.matmul %34, %36, %cst_19 {dimension_numbers = #tpu.dot_dimension_numbers<[1], [0], [0], [1], [0, 0, 1, 1], [], []>} : vector<256x3xf32>, vector<3x32xf32>, vector<256x32xf32> -> vector<256x32xf32>
    %38 = arith.addf %32, %37 : vector<256x32xf32>
    %39 = vector.extract_strided_slice %3 {offsets = [2, 0, 0], sizes = [16, 16, 3], strides = [1, 1, 1]} : vector<18x18x3xf32> to vector<16x16x3xf32>
    %40 = vector.shape_cast %39 : vector<16x16x3xf32> to vector<256x3xf32>
    %c6 = arith.constant 6 : index
    %c0_20 = arith.constant 0 : index
    %c0_21 = arith.constant 0 : index
    %41 = vector.load %arg3[%c6, %c0_20, %c0_21] : memref<9x3x32xf32, #tpu.memory_space<vmem>>, vector<1x3x32xf32>
    %42 = vector.shape_cast %41 : vector<1x3x32xf32> to vector<3x32xf32>
    %cst_22 = arith.constant dense<0.000000e+00> : vector<256x32xf32>
    %43 = tpu.matmul %40, %42, %cst_22 {dimension_numbers = #tpu.dot_dimension_numbers<[1], [0], [0], [1], [0, 0, 1, 1], [], []>} : vector<256x3xf32>, vector<3x32xf32>, vector<256x32xf32> -> vector<256x32xf32>
    %44 = arith.addf %38, %43 : vector<256x32xf32>
    %45 = vector.extract_strided_slice %3 {offsets = [2, 1, 0], sizes = [16, 16, 3], strides = [1, 1, 1]} : vector<18x18x3xf32> to vector<16x16x3xf32>
    %46 = vector.shape_cast %45 : vector<16x16x3xf32> to vector<256x3xf32>
    %c7 = arith.constant 7 : index
    %c0_23 = arith.constant 0 : index
    %c0_24 = arith.constant 0 : index
    %47 = vector.load %arg3[%c7, %c0_23, %c0_24] : memref<9x3x32xf32, #tpu.memory_space<vmem>>, vector<1x3x32xf32>
    %48 = vector.shape_cast %47 : vector<1x3x32xf32> to vector<3x32xf32>
    %cst_25 = arith.constant dense<0.000000e+00> : vector<256x32xf32>
    %49 = tpu.matmul %46, %48, %cst_25 {dimension_numbers = #tpu.dot_dimension_numbers<[1], [0], [0], [1], [0, 0, 1, 1], [], []>} : vector<256x3xf32>, vector<3x32xf32>, vector<256x32xf32> -> vector<256x32xf32>
    %50 = arith.addf %44, %49 : vector<256x32xf32>
    %51 = vector.extract_strided_slice %3 {offsets = [2, 2, 0], sizes = [16, 16, 3], strides = [1, 1, 1]} : vector<18x18x3xf32> to vector<16x16x3xf32>
    %52 = vector.shape_cast %51 : vector<16x16x3xf32> to vector<256x3xf32>
    %c8 = arith.constant 8 : index
    %c0_26 = arith.constant 0 : index
    %c0_27 = arith.constant 0 : index
    %53 = vector.load %arg3[%c8, %c0_26, %c0_27] : memref<9x3x32xf32, #tpu.memory_space<vmem>>, vector<1x3x32xf32>
    %54 = vector.shape_cast %53 : vector<1x3x32xf32> to vector<3x32xf32>
    %cst_28 = arith.constant dense<0.000000e+00> : vector<256x32xf32>
    %55 = tpu.matmul %52, %54, %cst_28 {dimension_numbers = #tpu.dot_dimension_numbers<[1], [0], [0], [1], [0, 0, 1, 1], [], []>} : vector<256x3xf32>, vector<3x32xf32>, vector<256x32xf32> -> vector<256x32xf32>
    %56 = arith.addf %50, %55 : vector<256x32xf32>
    %c0_29 = arith.constant 0 : index
    %c0_30 = arith.constant 0 : index
    %57 = vector.load %arg4[%c0_29, %c0_30] : memref<1x32xf32, #tpu.memory_space<vmem>>, vector<1x32xf32>
    %58 = vector.broadcast %57 : vector<1x32xf32> to vector<256x32xf32>
    %59 = arith.addf %56, %58 : vector<256x32xf32>
    %cst_31 = arith.constant 0.000000e+00 : f32
    %60 = vector.broadcast %cst_31 : f32 to vector<256x32xf32>
    %61 = arith.maximumf %59, %60 : vector<256x32xf32>
    %62 = vector.shape_cast %61 : vector<256x32xf32> to vector<16x16x32xf32>
    %c0_32 = arith.constant 0 : index
    %c0_33 = arith.constant 0 : index
    %c0_34 = arith.constant 0 : index
    %c0_35 = arith.constant 0 : index
    %63 = vector.load %arg5[%c0_32, %c0_33, %c0_34, %c0_35] : memref<1x16x16x32xf32, #tpu.memory_space<vmem>>, vector<1x16x16x32xf32>
    %64 = vector.shape_cast %63 : vector<1x16x16x32xf32> to vector<16x16x32xf32>
    %65 = vector.shape_cast %62 : vector<16x16x32xf32> to vector<1x16x16x32xf32>
    tpu.vector_store %arg5[%c0_32, %c0_33, %c0_34, %c0_35], %65 {strides = array<i32>} : memref<1x16x16x32xf32, #tpu.memory_space<vmem>>, vector<1x16x16x32xf32>,
    return
  }
  func.func @transform_0(%arg0: i32, %arg1: i32) -> (i32, i32, i32, i32) {
    %c0_i32 = arith.constant 0 : i32
    %c0_i32_0 = arith.constant 0 : i32
    %c0_i32_1 = arith.constant 0 : i32
    %c0_i32_2 = arith.constant 0 : i32
    return %arg0, %c0_i32, %c0_i32_0, %c0_i32_1 : i32, i32, i32, i32
  }
  func.func @transform_1(%arg0: i32, %arg1: i32) -> (i32, i32, i32) {
    %c0_i32 = arith.constant 0 : i32
    %c0_i32_0 = arith.constant 0 : i32
    %c0_i32_1 = arith.constant 0 : i32
    %c0_i32_2 = arith.constant 0 : i32
    return %c0_i32, %c0_i32_0, %c0_i32_1 : i32, i32, i32
  }
  func.func @transform_2(%arg0: i32, %arg1: i32) -> (i32, i32) {
    %c0_i32 = arith.constant 0 : i32
    %c0_i32_0 = arith.constant 0 : i32
    %c0_i32_1 = arith.constant 0 : i32
    return %c0_i32, %c0_i32_0 : i32, i32
  }
  func.func @transform_3(%arg0: i32, %arg1: i32) -> (i32, i32, i32, i32) {
    %c0_i32 = arith.constant 0 : i32
    %c0_i32_0 = arith.constant 0 : i32
    %c0_i32_1 = arith.constant 0 : i32
    return %arg0, %arg1, %c0_i32, %c0_i32_0 : i32, i32, i32, i32
  }
}

module attributes {stable_mosaic.version = 11 : i64} {
  func.func @_conv_kernel(%arg0: i32, %arg1: i32, %arg2: memref<1x18x18x32xf32, #tpu.memory_space<vmem>>, %arg3: memref<9x32x32xf32, #tpu.memory_space<vmem>>, %arg4: memref<1x32xf32, #tpu.memory_space<vmem>>, %arg5: memref<1x16x16x32xf32, #tpu.memory_space<vmem>>) attributes {dimension_semantics = [#tpu.dimension_semantics<parallel>, #tpu.dimension_semantics<parallel>], iteration_bounds = array<i64: 2, 1>, scalar_prefetch = 0 : i64, scratch_operands = 0 : i64, tpu.core_type = #tpu.core_type<tc>, window_params = [{transform_indices = @transform_0, window_bounds = array<i64: 1, 18, 18, 32>}, {pipeline_mode = #tpu.pipeline_mode<synchronous>, transform_indices = @transform_1, window_bounds = array<i64: 9, 32, 32>}, {pipeline_mode = #tpu.pipeline_mode<synchronous>, transform_indices = @transform_2, window_bounds = array<i64: 1, 32>}, {transform_indices = @transform_3, window_bounds = array<i64: 1, 16, 16, 32>}]} {
    %c16_i32 = arith.constant 16 : i32
    %0 = arith.muli %arg1, %c16_i32 : i32
    %c0 = arith.constant 0 : index
    %1 = arith.index_cast %0 : i32 to index
    %c0_0 = arith.constant 0 : index
    %c0_1 = arith.constant 0 : index
    %2 = vector.load %arg2[%c0, %1, %c0_0, %c0_1] : memref<1x18x18x32xf32, #tpu.memory_space<vmem>>, vector<1x18x18x32xf32>
    %3 = vector.shape_cast %2 : vector<1x18x18x32xf32> to vector<18x18x32xf32>
    %4 = vector.extract_strided_slice %3 {offsets = [0, 0, 0], sizes = [16, 16, 32], strides = [1, 1, 1]} : vector<18x18x32xf32> to vector<16x16x32xf32>
    %5 = vector.shape_cast %4 : vector<16x16x32xf32> to vector<256x32xf32>
    %c0_2 = arith.constant 0 : index
    %c0_3 = arith.constant 0 : index
    %c0_4 = arith.constant 0 : index
    %6 = vector.load %arg3[%c0_2, %c0_3, %c0_4] : memref<9x32x32xf32, #tpu.memory_space<vmem>>, vector<1x32x32xf32>
    %7 = vector.shape_cast %6 : vector<1x32x32xf32> to vector<32x32xf32>
    %cst = arith.constant dense<0.000000e+00> : vector<256x32xf32>
    %8 = tpu.matmul %5, %7, %cst {dimension_numbers = #tpu.dot_dimension_numbers<[1], [0], [0], [1], [0, 0, 1, 1], [], []>} : vector<256x32xf32>, vector<32x32xf32>, vector<256x32xf32> -> vector<256x32xf32>
    %9 = vector.extract_strided_slice %3 {offsets = [0, 1, 0], sizes = [16, 16, 32], strides = [1, 1, 1]} : vector<18x18x32xf32> to vector<16x16x32xf32>
    %10 = vector.shape_cast %9 : vector<16x16x32xf32> to vector<256x32xf32>
    %c1 = arith.constant 1 : index
    %c0_5 = arith.constant 0 : index
    %c0_6 = arith.constant 0 : index
    %11 = vector.load %arg3[%c1, %c0_5, %c0_6] : memref<9x32x32xf32, #tpu.memory_space<vmem>>, vector<1x32x32xf32>
    %12 = vector.shape_cast %11 : vector<1x32x32xf32> to vector<32x32xf32>
    %cst_7 = arith.constant dense<0.000000e+00> : vector<256x32xf32>
    %13 = tpu.matmul %10, %12, %cst_7 {dimension_numbers = #tpu.dot_dimension_numbers<[1], [0], [0], [1], [0, 0, 1, 1], [], []>} : vector<256x32xf32>, vector<32x32xf32>, vector<256x32xf32> -> vector<256x32xf32>
    %14 = arith.addf %8, %13 : vector<256x32xf32>
    %15 = vector.extract_strided_slice %3 {offsets = [0, 2, 0], sizes = [16, 16, 32], strides = [1, 1, 1]} : vector<18x18x32xf32> to vector<16x16x32xf32>
    %16 = vector.shape_cast %15 : vector<16x16x32xf32> to vector<256x32xf32>
    %c2 = arith.constant 2 : index
    %c0_8 = arith.constant 0 : index
    %c0_9 = arith.constant 0 : index
    %17 = vector.load %arg3[%c2, %c0_8, %c0_9] : memref<9x32x32xf32, #tpu.memory_space<vmem>>, vector<1x32x32xf32>
    %18 = vector.shape_cast %17 : vector<1x32x32xf32> to vector<32x32xf32>
    %cst_10 = arith.constant dense<0.000000e+00> : vector<256x32xf32>
    %19 = tpu.matmul %16, %18, %cst_10 {dimension_numbers = #tpu.dot_dimension_numbers<[1], [0], [0], [1], [0, 0, 1, 1], [], []>} : vector<256x32xf32>, vector<32x32xf32>, vector<256x32xf32> -> vector<256x32xf32>
    %20 = arith.addf %14, %19 : vector<256x32xf32>
    %21 = vector.extract_strided_slice %3 {offsets = [1, 0, 0], sizes = [16, 16, 32], strides = [1, 1, 1]} : vector<18x18x32xf32> to vector<16x16x32xf32>
    %22 = vector.shape_cast %21 : vector<16x16x32xf32> to vector<256x32xf32>
    %c3 = arith.constant 3 : index
    %c0_11 = arith.constant 0 : index
    %c0_12 = arith.constant 0 : index
    %23 = vector.load %arg3[%c3, %c0_11, %c0_12] : memref<9x32x32xf32, #tpu.memory_space<vmem>>, vector<1x32x32xf32>
    %24 = vector.shape_cast %23 : vector<1x32x32xf32> to vector<32x32xf32>
    %cst_13 = arith.constant dense<0.000000e+00> : vector<256x32xf32>
    %25 = tpu.matmul %22, %24, %cst_13 {dimension_numbers = #tpu.dot_dimension_numbers<[1], [0], [0], [1], [0, 0, 1, 1], [], []>} : vector<256x32xf32>, vector<32x32xf32>, vector<256x32xf32> -> vector<256x32xf32>
    %26 = arith.addf %20, %25 : vector<256x32xf32>
    %27 = vector.extract_strided_slice %3 {offsets = [1, 1, 0], sizes = [16, 16, 32], strides = [1, 1, 1]} : vector<18x18x32xf32> to vector<16x16x32xf32>
    %28 = vector.shape_cast %27 : vector<16x16x32xf32> to vector<256x32xf32>
    %c4 = arith.constant 4 : index
    %c0_14 = arith.constant 0 : index
    %c0_15 = arith.constant 0 : index
    %29 = vector.load %arg3[%c4, %c0_14, %c0_15] : memref<9x32x32xf32, #tpu.memory_space<vmem>>, vector<1x32x32xf32>
    %30 = vector.shape_cast %29 : vector<1x32x32xf32> to vector<32x32xf32>
    %cst_16 = arith.constant dense<0.000000e+00> : vector<256x32xf32>
    %31 = tpu.matmul %28, %30, %cst_16 {dimension_numbers = #tpu.dot_dimension_numbers<[1], [0], [0], [1], [0, 0, 1, 1], [], []>} : vector<256x32xf32>, vector<32x32xf32>, vector<256x32xf32> -> vector<256x32xf32>
    %32 = arith.addf %26, %31 : vector<256x32xf32>
    %33 = vector.extract_strided_slice %3 {offsets = [1, 2, 0], sizes = [16, 16, 32], strides = [1, 1, 1]} : vector<18x18x32xf32> to vector<16x16x32xf32>
    %34 = vector.shape_cast %33 : vector<16x16x32xf32> to vector<256x32xf32>
    %c5 = arith.constant 5 : index
    %c0_17 = arith.constant 0 : index
    %c0_18 = arith.constant 0 : index
    %35 = vector.load %arg3[%c5, %c0_17, %c0_18] : memref<9x32x32xf32, #tpu.memory_space<vmem>>, vector<1x32x32xf32>
    %36 = vector.shape_cast %35 : vector<1x32x32xf32> to vector<32x32xf32>
    %cst_19 = arith.constant dense<0.000000e+00> : vector<256x32xf32>
    %37 = tpu.matmul %34, %36, %cst_19 {dimension_numbers = #tpu.dot_dimension_numbers<[1], [0], [0], [1], [0, 0, 1, 1], [], []>} : vector<256x32xf32>, vector<32x32xf32>, vector<256x32xf32> -> vector<256x32xf32>
    %38 = arith.addf %32, %37 : vector<256x32xf32>
    %39 = vector.extract_strided_slice %3 {offsets = [2, 0, 0], sizes = [16, 16, 32], strides = [1, 1, 1]} : vector<18x18x32xf32> to vector<16x16x32xf32>
    %40 = vector.shape_cast %39 : vector<16x16x32xf32> to vector<256x32xf32>
    %c6 = arith.constant 6 : index
    %c0_20 = arith.constant 0 : index
    %c0_21 = arith.constant 0 : index
    %41 = vector.load %arg3[%c6, %c0_20, %c0_21] : memref<9x32x32xf32, #tpu.memory_space<vmem>>, vector<1x32x32xf32>
    %42 = vector.shape_cast %41 : vector<1x32x32xf32> to vector<32x32xf32>
    %cst_22 = arith.constant dense<0.000000e+00> : vector<256x32xf32>
    %43 = tpu.matmul %40, %42, %cst_22 {dimension_numbers = #tpu.dot_dimension_numbers<[1], [0], [0], [1], [0, 0, 1, 1], [], []>} : vector<256x32xf32>, vector<32x32xf32>, vector<256x32xf32> -> vector<256x32xf32>
    %44 = arith.addf %38, %43 : vector<256x32xf32>
    %45 = vector.extract_strided_slice %3 {offsets = [2, 1, 0], sizes = [16, 16, 32], strides = [1, 1, 1]} : vector<18x18x32xf32> to vector<16x16x32xf32>
    %46 = vector.shape_cast %45 : vector<16x16x32xf32> to vector<256x32xf32>
    %c7 = arith.constant 7 : index
    %c0_23 = arith.constant 0 : index
    %c0_24 = arith.constant 0 : index
    %47 = vector.load %arg3[%c7, %c0_23, %c0_24] : memref<9x32x32xf32, #tpu.memory_space<vmem>>, vector<1x32x32xf32>
    %48 = vector.shape_cast %47 : vector<1x32x32xf32> to vector<32x32xf32>
    %cst_25 = arith.constant dense<0.000000e+00> : vector<256x32xf32>
    %49 = tpu.matmul %46, %48, %cst_25 {dimension_numbers = #tpu.dot_dimension_numbers<[1], [0], [0], [1], [0, 0, 1, 1], [], []>} : vector<256x32xf32>, vector<32x32xf32>, vector<256x32xf32> -> vector<256x32xf32>
    %50 = arith.addf %44, %49 : vector<256x32xf32>
    %51 = vector.extract_strided_slice %3 {offsets = [2, 2, 0], sizes = [16, 16, 32], strides = [1, 1, 1]} : vector<18x18x32xf32> to vector<16x16x32xf32>
    %52 = vector.shape_cast %51 : vector<16x16x32xf32> to vector<256x32xf32>
    %c8 = arith.constant 8 : index
    %c0_26 = arith.constant 0 : index
    %c0_27 = arith.constant 0 : index
    %53 = vector.load %arg3[%c8, %c0_26, %c0_27] : memref<9x32x32xf32, #tpu.memory_space<vmem>>, vector<1x32x32xf32>
    %54 = vector.shape_cast %53 : vector<1x32x32xf32> to vector<32x32xf32>
    %cst_28 = arith.constant dense<0.000000e+00> : vector<256x32xf32>
    %55 = tpu.matmul %52, %54, %cst_28 {dimension_numbers = #tpu.dot_dimension_numbers<[1], [0], [0], [1], [0, 0, 1, 1], [], []>} : vector<256x32xf32>, vector<32x32xf32>, vector<256x32xf32> -> vector<256x32xf32>
    %56 = arith.addf %50, %55 : vector<256x32xf32>
    %c0_29 = arith.constant 0 : index
    %c0_30 = arith.constant 0 : index
    %57 = vector.load %arg4[%c0_29, %c0_30] : memref<1x32xf32, #tpu.memory_space<vmem>>, vector<1x32xf32>
    %58 = vector.broadcast %57 : vector<1x32xf32> to vector<256x32xf32>
    %59 = arith.addf %56, %58 : vector<256x32xf32>
    %60 = vector.shape_cast %59 : vector<256x32xf32> to vector<16x16x32xf32>
    %c0_31 = arith.constant 0 : index
    %c0_32 = arith.constant 0 : index
    %c0_33 = arith.constant 0 : index
    %c0_34 = arith.constant 0 : index
    %61 = vector.load %arg5[%c0_31, %c0_32, %c0_33, %c0_34] : memref<1x16x16x32xf32, #tpu.memory_space<vmem>>, vector<1x16x16x32xf32>
    %62 = vector.shape_cast %61 : vector<1x16x16x32xf32> to vector<16x16x32xf32>
    %63 = vector.shape_cast %60 : vector<16x16x32xf32> to vector<1x16x16x32xf32>
    tpu.vector_store %arg5[%c0_31, %c0_32, %c0_33, %c0_34], %63 {strides = array<i32>} : memref<1x16x16x32xf32, #tpu.memory_space<vmem>>, vector<1x16x16x32xf32>,
    return
  }
  func.func @transform_0(%arg0: i32, %arg1: i32) -> (i32, i32, i32, i32) {
    %c0_i32 = arith.constant 0 : i32
    %c0_i32_0 = arith.constant 0 : i32
    %c0_i32_1 = arith.constant 0 : i32
    %c0_i32_2 = arith.constant 0 : i32
    return %arg0, %c0_i32, %c0_i32_0, %c0_i32_1 : i32, i32, i32, i32
  }
  func.func @transform_1(%arg0: i32, %arg1: i32) -> (i32, i32, i32) {
    %c0_i32 = arith.constant 0 : i32
    %c0_i32_0 = arith.constant 0 : i32
    %c0_i32_1 = arith.constant 0 : i32
    %c0_i32_2 = arith.constant 0 : i32
    return %c0_i32, %c0_i32_0, %c0_i32_1 : i32, i32, i32
  }
  func.func @transform_2(%arg0: i32, %arg1: i32) -> (i32, i32) {
    %c0_i32 = arith.constant 0 : i32
    %c0_i32_0 = arith.constant 0 : i32
    %c0_i32_1 = arith.constant 0 : i32
    return %c0_i32, %c0_i32_0 : i32, i32
  }
  func.func @transform_3(%arg0: i32, %arg1: i32) -> (i32, i32, i32, i32) {
    %c0_i32 = arith.constant 0 : i32
    %c0_i32_0 = arith.constant 0 : i32
    %c0_i32_1 = arith.constant 0 : i32
    return %arg0, %arg1, %c0_i32, %c0_i32_0 : i32, i32, i32, i32
  }
}

module attributes {stable_mosaic.version = 11 : i64} {
  func.func @_conv_kernel(%arg0: i32, %arg1: i32, %arg2: memref<1x18x18x32xf32, #tpu.memory_space<vmem>>, %arg3: memref<9x32x32xf32, #tpu.memory_space<vmem>>, %arg4: memref<1x32xf32, #tpu.memory_space<vmem>>, %arg5: memref<1x16x16x32xf32, #tpu.memory_space<vmem>>) attributes {dimension_semantics = [#tpu.dimension_semantics<parallel>, #tpu.dimension_semantics<parallel>], iteration_bounds = array<i64: 2, 1>, scalar_prefetch = 0 : i64, scratch_operands = 0 : i64, tpu.core_type = #tpu.core_type<tc>, window_params = [{transform_indices = @transform_0, window_bounds = array<i64: 1, 18, 18, 32>}, {pipeline_mode = #tpu.pipeline_mode<synchronous>, transform_indices = @transform_1, window_bounds = array<i64: 9, 32, 32>}, {pipeline_mode = #tpu.pipeline_mode<synchronous>, transform_indices = @transform_2, window_bounds = array<i64: 1, 32>}, {transform_indices = @transform_3, window_bounds = array<i64: 1, 16, 16, 32>}]} {
    %c16_i32 = arith.constant 16 : i32
    %0 = arith.muli %arg1, %c16_i32 : i32
    %c0 = arith.constant 0 : index
    %1 = arith.index_cast %0 : i32 to index
    %c0_0 = arith.constant 0 : index
    %c0_1 = arith.constant 0 : index
    %2 = vector.load %arg2[%c0, %1, %c0_0, %c0_1] : memref<1x18x18x32xf32, #tpu.memory_space<vmem>>, vector<1x18x18x32xf32>
    %3 = vector.shape_cast %2 : vector<1x18x18x32xf32> to vector<18x18x32xf32>
    %4 = vector.extract_strided_slice %3 {offsets = [0, 0, 0], sizes = [16, 16, 32], strides = [1, 1, 1]} : vector<18x18x32xf32> to vector<16x16x32xf32>
    %5 = vector.shape_cast %4 : vector<16x16x32xf32> to vector<256x32xf32>
    %c0_2 = arith.constant 0 : index
    %c0_3 = arith.constant 0 : index
    %c0_4 = arith.constant 0 : index
    %6 = vector.load %arg3[%c0_2, %c0_3, %c0_4] : memref<9x32x32xf32, #tpu.memory_space<vmem>>, vector<1x32x32xf32>
    %7 = vector.shape_cast %6 : vector<1x32x32xf32> to vector<32x32xf32>
    %cst = arith.constant dense<0.000000e+00> : vector<256x32xf32>
    %8 = tpu.matmul %5, %7, %cst {dimension_numbers = #tpu.dot_dimension_numbers<[1], [0], [0], [1], [0, 0, 1, 1], [], []>} : vector<256x32xf32>, vector<32x32xf32>, vector<256x32xf32> -> vector<256x32xf32>
    %9 = vector.extract_strided_slice %3 {offsets = [0, 1, 0], sizes = [16, 16, 32], strides = [1, 1, 1]} : vector<18x18x32xf32> to vector<16x16x32xf32>
    %10 = vector.shape_cast %9 : vector<16x16x32xf32> to vector<256x32xf32>
    %c1 = arith.constant 1 : index
    %c0_5 = arith.constant 0 : index
    %c0_6 = arith.constant 0 : index
    %11 = vector.load %arg3[%c1, %c0_5, %c0_6] : memref<9x32x32xf32, #tpu.memory_space<vmem>>, vector<1x32x32xf32>
    %12 = vector.shape_cast %11 : vector<1x32x32xf32> to vector<32x32xf32>
    %cst_7 = arith.constant dense<0.000000e+00> : vector<256x32xf32>
    %13 = tpu.matmul %10, %12, %cst_7 {dimension_numbers = #tpu.dot_dimension_numbers<[1], [0], [0], [1], [0, 0, 1, 1], [], []>} : vector<256x32xf32>, vector<32x32xf32>, vector<256x32xf32> -> vector<256x32xf32>
    %14 = arith.addf %8, %13 : vector<256x32xf32>
    %15 = vector.extract_strided_slice %3 {offsets = [0, 2, 0], sizes = [16, 16, 32], strides = [1, 1, 1]} : vector<18x18x32xf32> to vector<16x16x32xf32>
    %16 = vector.shape_cast %15 : vector<16x16x32xf32> to vector<256x32xf32>
    %c2 = arith.constant 2 : index
    %c0_8 = arith.constant 0 : index
    %c0_9 = arith.constant 0 : index
    %17 = vector.load %arg3[%c2, %c0_8, %c0_9] : memref<9x32x32xf32, #tpu.memory_space<vmem>>, vector<1x32x32xf32>
    %18 = vector.shape_cast %17 : vector<1x32x32xf32> to vector<32x32xf32>
    %cst_10 = arith.constant dense<0.000000e+00> : vector<256x32xf32>
    %19 = tpu.matmul %16, %18, %cst_10 {dimension_numbers = #tpu.dot_dimension_numbers<[1], [0], [0], [1], [0, 0, 1, 1], [], []>} : vector<256x32xf32>, vector<32x32xf32>, vector<256x32xf32> -> vector<256x32xf32>
    %20 = arith.addf %14, %19 : vector<256x32xf32>
    %21 = vector.extract_strided_slice %3 {offsets = [1, 0, 0], sizes = [16, 16, 32], strides = [1, 1, 1]} : vector<18x18x32xf32> to vector<16x16x32xf32>
    %22 = vector.shape_cast %21 : vector<16x16x32xf32> to vector<256x32xf32>
    %c3 = arith.constant 3 : index
    %c0_11 = arith.constant 0 : index
    %c0_12 = arith.constant 0 : index
    %23 = vector.load %arg3[%c3, %c0_11, %c0_12] : memref<9x32x32xf32, #tpu.memory_space<vmem>>, vector<1x32x32xf32>
    %24 = vector.shape_cast %23 : vector<1x32x32xf32> to vector<32x32xf32>
    %cst_13 = arith.constant dense<0.000000e+00> : vector<256x32xf32>
    %25 = tpu.matmul %22, %24, %cst_13 {dimension_numbers = #tpu.dot_dimension_numbers<[1], [0], [0], [1], [0, 0, 1, 1], [], []>} : vector<256x32xf32>, vector<32x32xf32>, vector<256x32xf32> -> vector<256x32xf32>
    %26 = arith.addf %20, %25 : vector<256x32xf32>
    %27 = vector.extract_strided_slice %3 {offsets = [1, 1, 0], sizes = [16, 16, 32], strides = [1, 1, 1]} : vector<18x18x32xf32> to vector<16x16x32xf32>
    %28 = vector.shape_cast %27 : vector<16x16x32xf32> to vector<256x32xf32>
    %c4 = arith.constant 4 : index
    %c0_14 = arith.constant 0 : index
    %c0_15 = arith.constant 0 : index
    %29 = vector.load %arg3[%c4, %c0_14, %c0_15] : memref<9x32x32xf32, #tpu.memory_space<vmem>>, vector<1x32x32xf32>
    %30 = vector.shape_cast %29 : vector<1x32x32xf32> to vector<32x32xf32>
    %cst_16 = arith.constant dense<0.000000e+00> : vector<256x32xf32>
    %31 = tpu.matmul %28, %30, %cst_16 {dimension_numbers = #tpu.dot_dimension_numbers<[1], [0], [0], [1], [0, 0, 1, 1], [], []>} : vector<256x32xf32>, vector<32x32xf32>, vector<256x32xf32> -> vector<256x32xf32>
    %32 = arith.addf %26, %31 : vector<256x32xf32>
    %33 = vector.extract_strided_slice %3 {offsets = [1, 2, 0], sizes = [16, 16, 32], strides = [1, 1, 1]} : vector<18x18x32xf32> to vector<16x16x32xf32>
    %34 = vector.shape_cast %33 : vector<16x16x32xf32> to vector<256x32xf32>
    %c5 = arith.constant 5 : index
    %c0_17 = arith.constant 0 : index
    %c0_18 = arith.constant 0 : index
    %35 = vector.load %arg3[%c5, %c0_17, %c0_18] : memref<9x32x32xf32, #tpu.memory_space<vmem>>, vector<1x32x32xf32>
    %36 = vector.shape_cast %35 : vector<1x32x32xf32> to vector<32x32xf32>
    %cst_19 = arith.constant dense<0.000000e+00> : vector<256x32xf32>
    %37 = tpu.matmul %34, %36, %cst_19 {dimension_numbers = #tpu.dot_dimension_numbers<[1], [0], [0], [1], [0, 0, 1, 1], [], []>} : vector<256x32xf32>, vector<32x32xf32>, vector<256x32xf32> -> vector<256x32xf32>
    %38 = arith.addf %32, %37 : vector<256x32xf32>
    %39 = vector.extract_strided_slice %3 {offsets = [2, 0, 0], sizes = [16, 16, 32], strides = [1, 1, 1]} : vector<18x18x32xf32> to vector<16x16x32xf32>
    %40 = vector.shape_cast %39 : vector<16x16x32xf32> to vector<256x32xf32>
    %c6 = arith.constant 6 : index
    %c0_20 = arith.constant 0 : index
    %c0_21 = arith.constant 0 : index
    %41 = vector.load %arg3[%c6, %c0_20, %c0_21] : memref<9x32x32xf32, #tpu.memory_space<vmem>>, vector<1x32x32xf32>
    %42 = vector.shape_cast %41 : vector<1x32x32xf32> to vector<32x32xf32>
    %cst_22 = arith.constant dense<0.000000e+00> : vector<256x32xf32>
    %43 = tpu.matmul %40, %42, %cst_22 {dimension_numbers = #tpu.dot_dimension_numbers<[1], [0], [0], [1], [0, 0, 1, 1], [], []>} : vector<256x32xf32>, vector<32x32xf32>, vector<256x32xf32> -> vector<256x32xf32>
    %44 = arith.addf %38, %43 : vector<256x32xf32>
    %45 = vector.extract_strided_slice %3 {offsets = [2, 1, 0], sizes = [16, 16, 32], strides = [1, 1, 1]} : vector<18x18x32xf32> to vector<16x16x32xf32>
    %46 = vector.shape_cast %45 : vector<16x16x32xf32> to vector<256x32xf32>
    %c7 = arith.constant 7 : index
    %c0_23 = arith.constant 0 : index
    %c0_24 = arith.constant 0 : index
    %47 = vector.load %arg3[%c7, %c0_23, %c0_24] : memref<9x32x32xf32, #tpu.memory_space<vmem>>, vector<1x32x32xf32>
    %48 = vector.shape_cast %47 : vector<1x32x32xf32> to vector<32x32xf32>
    %cst_25 = arith.constant dense<0.000000e+00> : vector<256x32xf32>
    %49 = tpu.matmul %46, %48, %cst_25 {dimension_numbers = #tpu.dot_dimension_numbers<[1], [0], [0], [1], [0, 0, 1, 1], [], []>} : vector<256x32xf32>, vector<32x32xf32>, vector<256x32xf32> -> vector<256x32xf32>
    %50 = arith.addf %44, %49 : vector<256x32xf32>
    %51 = vector.extract_strided_slice %3 {offsets = [2, 2, 0], sizes = [16, 16, 32], strides = [1, 1, 1]} : vector<18x18x32xf32> to vector<16x16x32xf32>
    %52 = vector.shape_cast %51 : vector<16x16x32xf32> to vector<256x32xf32>
    %c8 = arith.constant 8 : index
    %c0_26 = arith.constant 0 : index
    %c0_27 = arith.constant 0 : index
    %53 = vector.load %arg3[%c8, %c0_26, %c0_27] : memref<9x32x32xf32, #tpu.memory_space<vmem>>, vector<1x32x32xf32>
    %54 = vector.shape_cast %53 : vector<1x32x32xf32> to vector<32x32xf32>
    %cst_28 = arith.constant dense<0.000000e+00> : vector<256x32xf32>
    %55 = tpu.matmul %52, %54, %cst_28 {dimension_numbers = #tpu.dot_dimension_numbers<[1], [0], [0], [1], [0, 0, 1, 1], [], []>} : vector<256x32xf32>, vector<32x32xf32>, vector<256x32xf32> -> vector<256x32xf32>
    %56 = arith.addf %50, %55 : vector<256x32xf32>
    %c0_29 = arith.constant 0 : index
    %c0_30 = arith.constant 0 : index
    %57 = vector.load %arg4[%c0_29, %c0_30] : memref<1x32xf32, #tpu.memory_space<vmem>>, vector<1x32xf32>
    %58 = vector.broadcast %57 : vector<1x32xf32> to vector<256x32xf32>
    %59 = arith.addf %56, %58 : vector<256x32xf32>
    %cst_31 = arith.constant 0.000000e+00 : f32
    %60 = vector.broadcast %cst_31 : f32 to vector<256x32xf32>
    %61 = arith.maximumf %59, %60 : vector<256x32xf32>
    %62 = vector.shape_cast %61 : vector<256x32xf32> to vector<16x16x32xf32>
    %c0_32 = arith.constant 0 : index
    %c0_33 = arith.constant 0 : index
    %c0_34 = arith.constant 0 : index
    %c0_35 = arith.constant 0 : index
    %63 = vector.load %arg5[%c0_32, %c0_33, %c0_34, %c0_35] : memref<1x16x16x32xf32, #tpu.memory_space<vmem>>, vector<1x16x16x32xf32>
    %64 = vector.shape_cast %63 : vector<1x16x16x32xf32> to vector<16x16x32xf32>
    %65 = vector.shape_cast %62 : vector<16x16x32xf32> to vector<1x16x16x32xf32>
    tpu.vector_store %arg5[%c0_32, %c0_33, %c0_34, %c0_35], %65 {strides = array<i32>} : memref<1x16x16x32xf32, #tpu.memory_space<vmem>>, vector<1x16x16x32xf32>,
    return
  }
  func.func @transform_0(%arg0: i32, %arg1: i32) -> (i32, i32, i32, i32) {
    %c0_i32 = arith.constant 0 : i32
    %c0_i32_0 = arith.constant 0 : i32
    %c0_i32_1 = arith.constant 0 : i32
    %c0_i32_2 = arith.constant 0 : i32
    return %arg0, %c0_i32, %c0_i32_0, %c0_i32_1 : i32, i32, i32, i32
  }
  func.func @transform_1(%arg0: i32, %arg1: i32) -> (i32, i32, i32) {
    %c0_i32 = arith.constant 0 : i32
    %c0_i32_0 = arith.constant 0 : i32
    %c0_i32_1 = arith.constant 0 : i32
    %c0_i32_2 = arith.constant 0 : i32
    return %c0_i32, %c0_i32_0, %c0_i32_1 : i32, i32, i32
  }
  func.func @transform_2(%arg0: i32, %arg1: i32) -> (i32, i32) {
    %c0_i32 = arith.constant 0 : i32
    %c0_i32_0 = arith.constant 0 : i32
    %c0_i32_1 = arith.constant 0 : i32
    return %c0_i32, %c0_i32_0 : i32, i32
  }
  func.func @transform_3(%arg0: i32, %arg1: i32) -> (i32, i32, i32, i32) {
    %c0_i32 = arith.constant 0 : i32
    %c0_i32_0 = arith.constant 0 : i32
    %c0_i32_1 = arith.constant 0 : i32
    return %arg0, %arg1, %c0_i32, %c0_i32_0 : i32, i32, i32, i32
  }
}

module attributes {stable_mosaic.version = 11 : i64} {
  func.func @_conv_kernel(%arg0: i32, %arg1: i32, %arg2: memref<1x8x16x32xf32, #tpu.memory_space<vmem>>, %arg3: memref<1x32x32xf32, #tpu.memory_space<vmem>>, %arg4: memref<1x32xf32, #tpu.memory_space<vmem>>, %arg5: memref<1x8x8x32xf32, #tpu.memory_space<vmem>>) attributes {dimension_semantics = [#tpu.dimension_semantics<parallel>, #tpu.dimension_semantics<parallel>], iteration_bounds = array<i64: 2, 1>, scalar_prefetch = 0 : i64, scratch_operands = 0 : i64, tpu.core_type = #tpu.core_type<tc>, window_params = [{transform_indices = @transform_0, window_bounds = array<i64: 1, 8, 16, 32>}, {pipeline_mode = #tpu.pipeline_mode<synchronous>, transform_indices = @transform_1, window_bounds = array<i64: 1, 32, 32>}, {pipeline_mode = #tpu.pipeline_mode<synchronous>, transform_indices = @transform_2, window_bounds = array<i64: 1, 32>}, {transform_indices = @transform_3, window_bounds = array<i64: 1, 8, 8, 32>}]} {
    %c8_i32 = arith.constant 8 : i32
    %0 = arith.muli %arg1, %c8_i32 : i32
    %c0 = arith.constant 0 : index
    %1 = arith.index_cast %0 : i32 to index
    %c0_0 = arith.constant 0 : index
    %c0_1 = arith.constant 0 : index
    %2 = vector.load %arg2[%c0, %1, %c0_0, %c0_1] : memref<1x8x16x32xf32, #tpu.memory_space<vmem>>, vector<1x8x16x32xf32>
    %3 = vector.shape_cast %2 : vector<1x8x16x32xf32> to vector<8x16x32xf32>
    %4 = vector.shape_cast %3 : vector<8x16x32xf32> to vector<128x32xf32>
    %c0_2 = arith.constant 0 : index
    %c0_3 = arith.constant 0 : index
    %c0_4 = arith.constant 0 : index
    %5 = vector.load %arg3[%c0_2, %c0_3, %c0_4] : memref<1x32x32xf32, #tpu.memory_space<vmem>>, vector<1x32x32xf32>
    %6 = vector.shape_cast %5 : vector<1x32x32xf32> to vector<32x32xf32>
    %cst = arith.constant dense<0.000000e+00> : vector<128x32xf32>
    %7 = tpu.matmul %4, %6, %cst {dimension_numbers = #tpu.dot_dimension_numbers<[1], [0], [0], [1], [0, 0, 1, 1], [], []>} : vector<128x32xf32>, vector<32x32xf32>, vector<128x32xf32> -> vector<128x32xf32>
    %c0_5 = arith.constant 0 : index
    %c0_6 = arith.constant 0 : index
    %8 = vector.load %arg4[%c0_5, %c0_6] : memref<1x32xf32, #tpu.memory_space<vmem>>, vector<1x32xf32>
    %9 = vector.broadcast %8 : vector<1x32xf32> to vector<128x32xf32>
    %10 = arith.addf %7, %9 : vector<128x32xf32>
    %cst_7 = arith.constant 0.000000e+00 : f32
    %11 = vector.broadcast %cst_7 : f32 to vector<128x32xf32>
    %12 = arith.maximumf %10, %11 : vector<128x32xf32>
    %13 = vector.shape_cast %12 : vector<128x32xf32> to vector<8x16x32xf32>
    %14 = vector.extract_strided_slice %13 {offsets = [0, 0, 0], sizes = [8, 8, 32], strides = [1, 1, 1]} : vector<8x16x32xf32> to vector<8x8x32xf32>
    %c0_8 = arith.constant 0 : index
    %c0_9 = arith.constant 0 : index
    %c0_10 = arith.constant 0 : index
    %c0_11 = arith.constant 0 : index
    %15 = vector.load %arg5[%c0_8, %c0_9, %c0_10, %c0_11] : memref<1x8x8x32xf32, #tpu.memory_space<vmem>>, vector<1x8x8x32xf32>
    %16 = vector.shape_cast %15 : vector<1x8x8x32xf32> to vector<8x8x32xf32>
    %17 = vector.shape_cast %14 : vector<8x8x32xf32> to vector<1x8x8x32xf32>
    tpu.vector_store %arg5[%c0_8, %c0_9, %c0_10, %c0_11], %17 {strides = array<i32>} : memref<1x8x8x32xf32, #tpu.memory_space<vmem>>, vector<1x8x8x32xf32>,
    return
  }
  func.func @transform_0(%arg0: i32, %arg1: i32) -> (i32, i32, i32, i32) {
    %c0_i32 = arith.constant 0 : i32
    %c0_i32_0 = arith.constant 0 : i32
    %c0_i32_1 = arith.constant 0 : i32
    %c0_i32_2 = arith.constant 0 : i32
    return %arg0, %c0_i32, %c0_i32_0, %c0_i32_1 : i32, i32, i32, i32
  }
  func.func @transform_1(%arg0: i32, %arg1: i32) -> (i32, i32, i32) {
    %c0_i32 = arith.constant 0 : i32
    %c0_i32_0 = arith.constant 0 : i32
    %c0_i32_1 = arith.constant 0 : i32
    %c0_i32_2 = arith.constant 0 : i32
    return %c0_i32, %c0_i32_0, %c0_i32_1 : i32, i32, i32
  }
  func.func @transform_2(%arg0: i32, %arg1: i32) -> (i32, i32) {
    %c0_i32 = arith.constant 0 : i32
    %c0_i32_0 = arith.constant 0 : i32
    %c0_i32_1 = arith.constant 0 : i32
    return %c0_i32, %c0_i32_0 : i32, i32
  }
  func.func @transform_3(%arg0: i32, %arg1: i32) -> (i32, i32, i32, i32) {
    %c0_i32 = arith.constant 0 : i32
    %c0_i32_0 = arith.constant 0 : i32
    %c0_i32_1 = arith.constant 0 : i32
    return %arg0, %arg1, %c0_i32, %c0_i32_0 : i32, i32, i32, i32
  }
}

module attributes {stable_mosaic.version = 11 : i64} {
  func.func @_conv_kernel(%arg0: i32, %arg1: i32, %arg2: memref<1x10x18x32xf32, #tpu.memory_space<vmem>>, %arg3: memref<9x32x32xf32, #tpu.memory_space<vmem>>, %arg4: memref<1x32xf32, #tpu.memory_space<vmem>>, %arg5: memref<1x8x8x32xf32, #tpu.memory_space<vmem>>) attributes {dimension_semantics = [#tpu.dimension_semantics<parallel>, #tpu.dimension_semantics<parallel>], iteration_bounds = array<i64: 2, 1>, scalar_prefetch = 0 : i64, scratch_operands = 0 : i64, tpu.core_type = #tpu.core_type<tc>, window_params = [{transform_indices = @transform_0, window_bounds = array<i64: 1, 10, 18, 32>}, {pipeline_mode = #tpu.pipeline_mode<synchronous>, transform_indices = @transform_1, window_bounds = array<i64: 9, 32, 32>}, {pipeline_mode = #tpu.pipeline_mode<synchronous>, transform_indices = @transform_2, window_bounds = array<i64: 1, 32>}, {transform_indices = @transform_3, window_bounds = array<i64: 1, 8, 8, 32>}]} {
    %c8_i32 = arith.constant 8 : i32
    %0 = arith.muli %arg1, %c8_i32 : i32
    %c0 = arith.constant 0 : index
    %1 = arith.index_cast %0 : i32 to index
    %c0_0 = arith.constant 0 : index
    %c0_1 = arith.constant 0 : index
    %2 = vector.load %arg2[%c0, %1, %c0_0, %c0_1] : memref<1x10x18x32xf32, #tpu.memory_space<vmem>>, vector<1x10x18x32xf32>
    %3 = vector.shape_cast %2 : vector<1x10x18x32xf32> to vector<10x18x32xf32>
    %4 = vector.extract_strided_slice %3 {offsets = [0, 0, 0], sizes = [8, 16, 32], strides = [1, 1, 1]} : vector<10x18x32xf32> to vector<8x16x32xf32>
    %5 = vector.shape_cast %4 : vector<8x16x32xf32> to vector<128x32xf32>
    %c0_2 = arith.constant 0 : index
    %c0_3 = arith.constant 0 : index
    %c0_4 = arith.constant 0 : index
    %6 = vector.load %arg3[%c0_2, %c0_3, %c0_4] : memref<9x32x32xf32, #tpu.memory_space<vmem>>, vector<1x32x32xf32>
    %7 = vector.shape_cast %6 : vector<1x32x32xf32> to vector<32x32xf32>
    %cst = arith.constant dense<0.000000e+00> : vector<128x32xf32>
    %8 = tpu.matmul %5, %7, %cst {dimension_numbers = #tpu.dot_dimension_numbers<[1], [0], [0], [1], [0, 0, 1, 1], [], []>} : vector<128x32xf32>, vector<32x32xf32>, vector<128x32xf32> -> vector<128x32xf32>
    %9 = vector.extract_strided_slice %3 {offsets = [0, 1, 0], sizes = [8, 16, 32], strides = [1, 1, 1]} : vector<10x18x32xf32> to vector<8x16x32xf32>
    %10 = vector.shape_cast %9 : vector<8x16x32xf32> to vector<128x32xf32>
    %c1 = arith.constant 1 : index
    %c0_5 = arith.constant 0 : index
    %c0_6 = arith.constant 0 : index
    %11 = vector.load %arg3[%c1, %c0_5, %c0_6] : memref<9x32x32xf32, #tpu.memory_space<vmem>>, vector<1x32x32xf32>
    %12 = vector.shape_cast %11 : vector<1x32x32xf32> to vector<32x32xf32>
    %cst_7 = arith.constant dense<0.000000e+00> : vector<128x32xf32>
    %13 = tpu.matmul %10, %12, %cst_7 {dimension_numbers = #tpu.dot_dimension_numbers<[1], [0], [0], [1], [0, 0, 1, 1], [], []>} : vector<128x32xf32>, vector<32x32xf32>, vector<128x32xf32> -> vector<128x32xf32>
    %14 = arith.addf %8, %13 : vector<128x32xf32>
    %15 = vector.extract_strided_slice %3 {offsets = [0, 2, 0], sizes = [8, 16, 32], strides = [1, 1, 1]} : vector<10x18x32xf32> to vector<8x16x32xf32>
    %16 = vector.shape_cast %15 : vector<8x16x32xf32> to vector<128x32xf32>
    %c2 = arith.constant 2 : index
    %c0_8 = arith.constant 0 : index
    %c0_9 = arith.constant 0 : index
    %17 = vector.load %arg3[%c2, %c0_8, %c0_9] : memref<9x32x32xf32, #tpu.memory_space<vmem>>, vector<1x32x32xf32>
    %18 = vector.shape_cast %17 : vector<1x32x32xf32> to vector<32x32xf32>
    %cst_10 = arith.constant dense<0.000000e+00> : vector<128x32xf32>
    %19 = tpu.matmul %16, %18, %cst_10 {dimension_numbers = #tpu.dot_dimension_numbers<[1], [0], [0], [1], [0, 0, 1, 1], [], []>} : vector<128x32xf32>, vector<32x32xf32>, vector<128x32xf32> -> vector<128x32xf32>
    %20 = arith.addf %14, %19 : vector<128x32xf32>
    %21 = vector.extract_strided_slice %3 {offsets = [1, 0, 0], sizes = [8, 16, 32], strides = [1, 1, 1]} : vector<10x18x32xf32> to vector<8x16x32xf32>
    %22 = vector.shape_cast %21 : vector<8x16x32xf32> to vector<128x32xf32>
    %c3 = arith.constant 3 : index
    %c0_11 = arith.constant 0 : index
    %c0_12 = arith.constant 0 : index
    %23 = vector.load %arg3[%c3, %c0_11, %c0_12] : memref<9x32x32xf32, #tpu.memory_space<vmem>>, vector<1x32x32xf32>
    %24 = vector.shape_cast %23 : vector<1x32x32xf32> to vector<32x32xf32>
    %cst_13 = arith.constant dense<0.000000e+00> : vector<128x32xf32>
    %25 = tpu.matmul %22, %24, %cst_13 {dimension_numbers = #tpu.dot_dimension_numbers<[1], [0], [0], [1], [0, 0, 1, 1], [], []>} : vector<128x32xf32>, vector<32x32xf32>, vector<128x32xf32> -> vector<128x32xf32>
    %26 = arith.addf %20, %25 : vector<128x32xf32>
    %27 = vector.extract_strided_slice %3 {offsets = [1, 1, 0], sizes = [8, 16, 32], strides = [1, 1, 1]} : vector<10x18x32xf32> to vector<8x16x32xf32>
    %28 = vector.shape_cast %27 : vector<8x16x32xf32> to vector<128x32xf32>
    %c4 = arith.constant 4 : index
    %c0_14 = arith.constant 0 : index
    %c0_15 = arith.constant 0 : index
    %29 = vector.load %arg3[%c4, %c0_14, %c0_15] : memref<9x32x32xf32, #tpu.memory_space<vmem>>, vector<1x32x32xf32>
    %30 = vector.shape_cast %29 : vector<1x32x32xf32> to vector<32x32xf32>
    %cst_16 = arith.constant dense<0.000000e+00> : vector<128x32xf32>
    %31 = tpu.matmul %28, %30, %cst_16 {dimension_numbers = #tpu.dot_dimension_numbers<[1], [0], [0], [1], [0, 0, 1, 1], [], []>} : vector<128x32xf32>, vector<32x32xf32>, vector<128x32xf32> -> vector<128x32xf32>
    %32 = arith.addf %26, %31 : vector<128x32xf32>
    %33 = vector.extract_strided_slice %3 {offsets = [1, 2, 0], sizes = [8, 16, 32], strides = [1, 1, 1]} : vector<10x18x32xf32> to vector<8x16x32xf32>
    %34 = vector.shape_cast %33 : vector<8x16x32xf32> to vector<128x32xf32>
    %c5 = arith.constant 5 : index
    %c0_17 = arith.constant 0 : index
    %c0_18 = arith.constant 0 : index
    %35 = vector.load %arg3[%c5, %c0_17, %c0_18] : memref<9x32x32xf32, #tpu.memory_space<vmem>>, vector<1x32x32xf32>
    %36 = vector.shape_cast %35 : vector<1x32x32xf32> to vector<32x32xf32>
    %cst_19 = arith.constant dense<0.000000e+00> : vector<128x32xf32>
    %37 = tpu.matmul %34, %36, %cst_19 {dimension_numbers = #tpu.dot_dimension_numbers<[1], [0], [0], [1], [0, 0, 1, 1], [], []>} : vector<128x32xf32>, vector<32x32xf32>, vector<128x32xf32> -> vector<128x32xf32>
    %38 = arith.addf %32, %37 : vector<128x32xf32>
    %39 = vector.extract_strided_slice %3 {offsets = [2, 0, 0], sizes = [8, 16, 32], strides = [1, 1, 1]} : vector<10x18x32xf32> to vector<8x16x32xf32>
    %40 = vector.shape_cast %39 : vector<8x16x32xf32> to vector<128x32xf32>
    %c6 = arith.constant 6 : index
    %c0_20 = arith.constant 0 : index
    %c0_21 = arith.constant 0 : index
    %41 = vector.load %arg3[%c6, %c0_20, %c0_21] : memref<9x32x32xf32, #tpu.memory_space<vmem>>, vector<1x32x32xf32>
    %42 = vector.shape_cast %41 : vector<1x32x32xf32> to vector<32x32xf32>
    %cst_22 = arith.constant dense<0.000000e+00> : vector<128x32xf32>
    %43 = tpu.matmul %40, %42, %cst_22 {dimension_numbers = #tpu.dot_dimension_numbers<[1], [0], [0], [1], [0, 0, 1, 1], [], []>} : vector<128x32xf32>, vector<32x32xf32>, vector<128x32xf32> -> vector<128x32xf32>
    %44 = arith.addf %38, %43 : vector<128x32xf32>
    %45 = vector.extract_strided_slice %3 {offsets = [2, 1, 0], sizes = [8, 16, 32], strides = [1, 1, 1]} : vector<10x18x32xf32> to vector<8x16x32xf32>
    %46 = vector.shape_cast %45 : vector<8x16x32xf32> to vector<128x32xf32>
    %c7 = arith.constant 7 : index
    %c0_23 = arith.constant 0 : index
    %c0_24 = arith.constant 0 : index
    %47 = vector.load %arg3[%c7, %c0_23, %c0_24] : memref<9x32x32xf32, #tpu.memory_space<vmem>>, vector<1x32x32xf32>
    %48 = vector.shape_cast %47 : vector<1x32x32xf32> to vector<32x32xf32>
    %cst_25 = arith.constant dense<0.000000e+00> : vector<128x32xf32>
    %49 = tpu.matmul %46, %48, %cst_25 {dimension_numbers = #tpu.dot_dimension_numbers<[1], [0], [0], [1], [0, 0, 1, 1], [], []>} : vector<128x32xf32>, vector<32x32xf32>, vector<128x32xf32> -> vector<128x32xf32>
    %50 = arith.addf %44, %49 : vector<128x32xf32>
    %51 = vector.extract_strided_slice %3 {offsets = [2, 2, 0], sizes = [8, 16, 32], strides = [1, 1, 1]} : vector<10x18x32xf32> to vector<8x16x32xf32>
    %52 = vector.shape_cast %51 : vector<8x16x32xf32> to vector<128x32xf32>
    %c8 = arith.constant 8 : index
    %c0_26 = arith.constant 0 : index
    %c0_27 = arith.constant 0 : index
    %53 = vector.load %arg3[%c8, %c0_26, %c0_27] : memref<9x32x32xf32, #tpu.memory_space<vmem>>, vector<1x32x32xf32>
    %54 = vector.shape_cast %53 : vector<1x32x32xf32> to vector<32x32xf32>
    %cst_28 = arith.constant dense<0.000000e+00> : vector<128x32xf32>
    %55 = tpu.matmul %52, %54, %cst_28 {dimension_numbers = #tpu.dot_dimension_numbers<[1], [0], [0], [1], [0, 0, 1, 1], [], []>} : vector<128x32xf32>, vector<32x32xf32>, vector<128x32xf32> -> vector<128x32xf32>
    %56 = arith.addf %50, %55 : vector<128x32xf32>
    %c0_29 = arith.constant 0 : index
    %c0_30 = arith.constant 0 : index
    %57 = vector.load %arg4[%c0_29, %c0_30] : memref<1x32xf32, #tpu.memory_space<vmem>>, vector<1x32xf32>
    %58 = vector.broadcast %57 : vector<1x32xf32> to vector<128x32xf32>
    %59 = arith.addf %56, %58 : vector<128x32xf32>
    %60 = vector.shape_cast %59 : vector<128x32xf32> to vector<8x16x32xf32>
    %61 = vector.extract_strided_slice %60 {offsets = [0, 0, 0], sizes = [8, 8, 32], strides = [1, 1, 1]} : vector<8x16x32xf32> to vector<8x8x32xf32>
    %c0_31 = arith.constant 0 : index
    %c0_32 = arith.constant 0 : index
    %c0_33 = arith.constant 0 : index
    %c0_34 = arith.constant 0 : index
    %62 = vector.load %arg5[%c0_31, %c0_32, %c0_33, %c0_34] : memref<1x8x8x32xf32, #tpu.memory_space<vmem>>, vector<1x8x8x32xf32>
    %63 = vector.shape_cast %62 : vector<1x8x8x32xf32> to vector<8x8x32xf32>
    %64 = vector.shape_cast %61 : vector<8x8x32xf32> to vector<1x8x8x32xf32>
    tpu.vector_store %arg5[%c0_31, %c0_32, %c0_33, %c0_34], %64 {strides = array<i32>} : memref<1x8x8x32xf32, #tpu.memory_space<vmem>>, vector<1x8x8x32xf32>,
    return
  }
  func.func @transform_0(%arg0: i32, %arg1: i32) -> (i32, i32, i32, i32) {
    %c0_i32 = arith.constant 0 : i32
    %c0_i32_0 = arith.constant 0 : i32
    %c0_i32_1 = arith.constant 0 : i32
    %c0_i32_2 = arith.constant 0 : i32
    return %arg0, %c0_i32, %c0_i32_0, %c0_i32_1 : i32, i32, i32, i32
  }
  func.func @transform_1(%arg0: i32, %arg1: i32) -> (i32, i32, i32) {
    %c0_i32 = arith.constant 0 : i32
    %c0_i32_0 = arith.constant 0 : i32
    %c0_i32_1 = arith.constant 0 : i32
    %c0_i32_2 = arith.constant 0 : i32
    return %c0_i32, %c0_i32_0, %c0_i32_1 : i32, i32, i32
  }
  func.func @transform_2(%arg0: i32, %arg1: i32) -> (i32, i32) {
    %c0_i32 = arith.constant 0 : i32
    %c0_i32_0 = arith.constant 0 : i32
    %c0_i32_1 = arith.constant 0 : i32
    return %c0_i32, %c0_i32_0 : i32, i32
  }
  func.func @transform_3(%arg0: i32, %arg1: i32) -> (i32, i32, i32, i32) {
    %c0_i32 = arith.constant 0 : i32
    %c0_i32_0 = arith.constant 0 : i32
    %c0_i32_1 = arith.constant 0 : i32
    return %arg0, %arg1, %c0_i32, %c0_i32_0 : i32, i32, i32, i32
  }
}

module attributes {stable_mosaic.version = 11 : i64} {
  func.func @_conv_kernel(%arg0: i32, %arg1: i32, %arg2: memref<1x4x16x32xf32, #tpu.memory_space<vmem>>, %arg3: memref<1x32x32xf32, #tpu.memory_space<vmem>>, %arg4: memref<1x32xf32, #tpu.memory_space<vmem>>, %arg5: memref<1x4x4x32xf32, #tpu.memory_space<vmem>>) attributes {dimension_semantics = [#tpu.dimension_semantics<parallel>, #tpu.dimension_semantics<parallel>], iteration_bounds = array<i64: 2, 1>, scalar_prefetch = 0 : i64, scratch_operands = 0 : i64, tpu.core_type = #tpu.core_type<tc>, window_params = [{transform_indices = @transform_0, window_bounds = array<i64: 1, 4, 16, 32>}, {pipeline_mode = #tpu.pipeline_mode<synchronous>, transform_indices = @transform_1, window_bounds = array<i64: 1, 32, 32>}, {pipeline_mode = #tpu.pipeline_mode<synchronous>, transform_indices = @transform_2, window_bounds = array<i64: 1, 32>}, {transform_indices = @transform_3, window_bounds = array<i64: 1, 4, 4, 32>}]} {
    %c4_i32 = arith.constant 4 : i32
    %0 = arith.muli %arg1, %c4_i32 : i32
    %c0 = arith.constant 0 : index
    %1 = arith.index_cast %0 : i32 to index
    %c0_0 = arith.constant 0 : index
    %c0_1 = arith.constant 0 : index
    %2 = vector.load %arg2[%c0, %1, %c0_0, %c0_1] : memref<1x4x16x32xf32, #tpu.memory_space<vmem>>, vector<1x4x16x32xf32>
    %3 = vector.shape_cast %2 : vector<1x4x16x32xf32> to vector<4x16x32xf32>
    %4 = vector.shape_cast %3 : vector<4x16x32xf32> to vector<64x32xf32>
    %c0_2 = arith.constant 0 : index
    %c0_3 = arith.constant 0 : index
    %c0_4 = arith.constant 0 : index
    %5 = vector.load %arg3[%c0_2, %c0_3, %c0_4] : memref<1x32x32xf32, #tpu.memory_space<vmem>>, vector<1x32x32xf32>
    %6 = vector.shape_cast %5 : vector<1x32x32xf32> to vector<32x32xf32>
    %cst = arith.constant dense<0.000000e+00> : vector<64x32xf32>
    %7 = tpu.matmul %4, %6, %cst {dimension_numbers = #tpu.dot_dimension_numbers<[1], [0], [0], [1], [0, 0, 1, 1], [], []>} : vector<64x32xf32>, vector<32x32xf32>, vector<64x32xf32> -> vector<64x32xf32>
    %c0_5 = arith.constant 0 : index
    %c0_6 = arith.constant 0 : index
    %8 = vector.load %arg4[%c0_5, %c0_6] : memref<1x32xf32, #tpu.memory_space<vmem>>, vector<1x32xf32>
    %9 = vector.broadcast %8 : vector<1x32xf32> to vector<64x32xf32>
    %10 = arith.addf %7, %9 : vector<64x32xf32>
    %cst_7 = arith.constant 0.000000e+00 : f32
    %11 = vector.broadcast %cst_7 : f32 to vector<64x32xf32>
    %12 = arith.maximumf %10, %11 : vector<64x32xf32>
    %13 = vector.shape_cast %12 : vector<64x32xf32> to vector<4x16x32xf32>
    %14 = vector.extract_strided_slice %13 {offsets = [0, 0, 0], sizes = [4, 4, 32], strides = [1, 1, 1]} : vector<4x16x32xf32> to vector<4x4x32xf32>
    %c0_8 = arith.constant 0 : index
    %c0_9 = arith.constant 0 : index
    %c0_10 = arith.constant 0 : index
    %c0_11 = arith.constant 0 : index
    %15 = vector.load %arg5[%c0_8, %c0_9, %c0_10, %c0_11] : memref<1x4x4x32xf32, #tpu.memory_space<vmem>>, vector<1x4x4x32xf32>
    %16 = vector.shape_cast %15 : vector<1x4x4x32xf32> to vector<4x4x32xf32>
    %17 = vector.shape_cast %14 : vector<4x4x32xf32> to vector<1x4x4x32xf32>
    tpu.vector_store %arg5[%c0_8, %c0_9, %c0_10, %c0_11], %17 {strides = array<i32>} : memref<1x4x4x32xf32, #tpu.memory_space<vmem>>, vector<1x4x4x32xf32>,
    return
  }
  func.func @transform_0(%arg0: i32, %arg1: i32) -> (i32, i32, i32, i32) {
    %c0_i32 = arith.constant 0 : i32
    %c0_i32_0 = arith.constant 0 : i32
    %c0_i32_1 = arith.constant 0 : i32
    %c0_i32_2 = arith.constant 0 : i32
    return %arg0, %c0_i32, %c0_i32_0, %c0_i32_1 : i32, i32, i32, i32
  }
  func.func @transform_1(%arg0: i32, %arg1: i32) -> (i32, i32, i32) {
    %c0_i32 = arith.constant 0 : i32
    %c0_i32_0 = arith.constant 0 : i32
    %c0_i32_1 = arith.constant 0 : i32
    %c0_i32_2 = arith.constant 0 : i32
    return %c0_i32, %c0_i32_0, %c0_i32_1 : i32, i32, i32
  }
  func.func @transform_2(%arg0: i32, %arg1: i32) -> (i32, i32) {
    %c0_i32 = arith.constant 0 : i32
    %c0_i32_0 = arith.constant 0 : i32
    %c0_i32_1 = arith.constant 0 : i32
    return %c0_i32, %c0_i32_0 : i32, i32
  }
  func.func @transform_3(%arg0: i32, %arg1: i32) -> (i32, i32, i32, i32) {
    %c0_i32 = arith.constant 0 : i32
    %c0_i32_0 = arith.constant 0 : i32
    %c0_i32_1 = arith.constant 0 : i32
    return %arg0, %arg1, %c0_i32, %c0_i32_0 : i32, i32, i32, i32
  }
}

module attributes {stable_mosaic.version = 11 : i64} {
  func.func @_conv_kernel(%arg0: i32, %arg1: i32, %arg2: memref<1x6x18x32xf32, #tpu.memory_space<vmem>>, %arg3: memref<9x32x32xf32, #tpu.memory_space<vmem>>, %arg4: memref<1x32xf32, #tpu.memory_space<vmem>>, %arg5: memref<1x4x4x32xf32, #tpu.memory_space<vmem>>) attributes {dimension_semantics = [#tpu.dimension_semantics<parallel>, #tpu.dimension_semantics<parallel>], iteration_bounds = array<i64: 2, 1>, scalar_prefetch = 0 : i64, scratch_operands = 0 : i64, tpu.core_type = #tpu.core_type<tc>, window_params = [{transform_indices = @transform_0, window_bounds = array<i64: 1, 6, 18, 32>}, {pipeline_mode = #tpu.pipeline_mode<synchronous>, transform_indices = @transform_1, window_bounds = array<i64: 9, 32, 32>}, {pipeline_mode = #tpu.pipeline_mode<synchronous>, transform_indices = @transform_2, window_bounds = array<i64: 1, 32>}, {transform_indices = @transform_3, window_bounds = array<i64: 1, 4, 4, 32>}]} {
    %c4_i32 = arith.constant 4 : i32
    %0 = arith.muli %arg1, %c4_i32 : i32
    %c0 = arith.constant 0 : index
    %1 = arith.index_cast %0 : i32 to index
    %c0_0 = arith.constant 0 : index
    %c0_1 = arith.constant 0 : index
    %2 = vector.load %arg2[%c0, %1, %c0_0, %c0_1] : memref<1x6x18x32xf32, #tpu.memory_space<vmem>>, vector<1x6x18x32xf32>
    %3 = vector.shape_cast %2 : vector<1x6x18x32xf32> to vector<6x18x32xf32>
    %4 = vector.extract_strided_slice %3 {offsets = [0, 0, 0], sizes = [4, 16, 32], strides = [1, 1, 1]} : vector<6x18x32xf32> to vector<4x16x32xf32>
    %5 = vector.shape_cast %4 : vector<4x16x32xf32> to vector<64x32xf32>
    %c0_2 = arith.constant 0 : index
    %c0_3 = arith.constant 0 : index
    %c0_4 = arith.constant 0 : index
    %6 = vector.load %arg3[%c0_2, %c0_3, %c0_4] : memref<9x32x32xf32, #tpu.memory_space<vmem>>, vector<1x32x32xf32>
    %7 = vector.shape_cast %6 : vector<1x32x32xf32> to vector<32x32xf32>
    %cst = arith.constant dense<0.000000e+00> : vector<64x32xf32>
    %8 = tpu.matmul %5, %7, %cst {dimension_numbers = #tpu.dot_dimension_numbers<[1], [0], [0], [1], [0, 0, 1, 1], [], []>} : vector<64x32xf32>, vector<32x32xf32>, vector<64x32xf32> -> vector<64x32xf32>
    %9 = vector.extract_strided_slice %3 {offsets = [0, 1, 0], sizes = [4, 16, 32], strides = [1, 1, 1]} : vector<6x18x32xf32> to vector<4x16x32xf32>
    %10 = vector.shape_cast %9 : vector<4x16x32xf32> to vector<64x32xf32>
    %c1 = arith.constant 1 : index
    %c0_5 = arith.constant 0 : index
    %c0_6 = arith.constant 0 : index
    %11 = vector.load %arg3[%c1, %c0_5, %c0_6] : memref<9x32x32xf32, #tpu.memory_space<vmem>>, vector<1x32x32xf32>
    %12 = vector.shape_cast %11 : vector<1x32x32xf32> to vector<32x32xf32>
    %cst_7 = arith.constant dense<0.000000e+00> : vector<64x32xf32>
    %13 = tpu.matmul %10, %12, %cst_7 {dimension_numbers = #tpu.dot_dimension_numbers<[1], [0], [0], [1], [0, 0, 1, 1], [], []>} : vector<64x32xf32>, vector<32x32xf32>, vector<64x32xf32> -> vector<64x32xf32>
    %14 = arith.addf %8, %13 : vector<64x32xf32>
    %15 = vector.extract_strided_slice %3 {offsets = [0, 2, 0], sizes = [4, 16, 32], strides = [1, 1, 1]} : vector<6x18x32xf32> to vector<4x16x32xf32>
    %16 = vector.shape_cast %15 : vector<4x16x32xf32> to vector<64x32xf32>
    %c2 = arith.constant 2 : index
    %c0_8 = arith.constant 0 : index
    %c0_9 = arith.constant 0 : index
    %17 = vector.load %arg3[%c2, %c0_8, %c0_9] : memref<9x32x32xf32, #tpu.memory_space<vmem>>, vector<1x32x32xf32>
    %18 = vector.shape_cast %17 : vector<1x32x32xf32> to vector<32x32xf32>
    %cst_10 = arith.constant dense<0.000000e+00> : vector<64x32xf32>
    %19 = tpu.matmul %16, %18, %cst_10 {dimension_numbers = #tpu.dot_dimension_numbers<[1], [0], [0], [1], [0, 0, 1, 1], [], []>} : vector<64x32xf32>, vector<32x32xf32>, vector<64x32xf32> -> vector<64x32xf32>
    %20 = arith.addf %14, %19 : vector<64x32xf32>
    %21 = vector.extract_strided_slice %3 {offsets = [1, 0, 0], sizes = [4, 16, 32], strides = [1, 1, 1]} : vector<6x18x32xf32> to vector<4x16x32xf32>
    %22 = vector.shape_cast %21 : vector<4x16x32xf32> to vector<64x32xf32>
    %c3 = arith.constant 3 : index
    %c0_11 = arith.constant 0 : index
    %c0_12 = arith.constant 0 : index
    %23 = vector.load %arg3[%c3, %c0_11, %c0_12] : memref<9x32x32xf32, #tpu.memory_space<vmem>>, vector<1x32x32xf32>
    %24 = vector.shape_cast %23 : vector<1x32x32xf32> to vector<32x32xf32>
    %cst_13 = arith.constant dense<0.000000e+00> : vector<64x32xf32>
    %25 = tpu.matmul %22, %24, %cst_13 {dimension_numbers = #tpu.dot_dimension_numbers<[1], [0], [0], [1], [0, 0, 1, 1], [], []>} : vector<64x32xf32>, vector<32x32xf32>, vector<64x32xf32> -> vector<64x32xf32>
    %26 = arith.addf %20, %25 : vector<64x32xf32>
    %27 = vector.extract_strided_slice %3 {offsets = [1, 1, 0], sizes = [4, 16, 32], strides = [1, 1, 1]} : vector<6x18x32xf32> to vector<4x16x32xf32>
    %28 = vector.shape_cast %27 : vector<4x16x32xf32> to vector<64x32xf32>
    %c4 = arith.constant 4 : index
    %c0_14 = arith.constant 0 : index
    %c0_15 = arith.constant 0 : index
    %29 = vector.load %arg3[%c4, %c0_14, %c0_15] : memref<9x32x32xf32, #tpu.memory_space<vmem>>, vector<1x32x32xf32>
    %30 = vector.shape_cast %29 : vector<1x32x32xf32> to vector<32x32xf32>
    %cst_16 = arith.constant dense<0.000000e+00> : vector<64x32xf32>
    %31 = tpu.matmul %28, %30, %cst_16 {dimension_numbers = #tpu.dot_dimension_numbers<[1], [0], [0], [1], [0, 0, 1, 1], [], []>} : vector<64x32xf32>, vector<32x32xf32>, vector<64x32xf32> -> vector<64x32xf32>
    %32 = arith.addf %26, %31 : vector<64x32xf32>
    %33 = vector.extract_strided_slice %3 {offsets = [1, 2, 0], sizes = [4, 16, 32], strides = [1, 1, 1]} : vector<6x18x32xf32> to vector<4x16x32xf32>
    %34 = vector.shape_cast %33 : vector<4x16x32xf32> to vector<64x32xf32>
    %c5 = arith.constant 5 : index
    %c0_17 = arith.constant 0 : index
    %c0_18 = arith.constant 0 : index
    %35 = vector.load %arg3[%c5, %c0_17, %c0_18] : memref<9x32x32xf32, #tpu.memory_space<vmem>>, vector<1x32x32xf32>
    %36 = vector.shape_cast %35 : vector<1x32x32xf32> to vector<32x32xf32>
    %cst_19 = arith.constant dense<0.000000e+00> : vector<64x32xf32>
    %37 = tpu.matmul %34, %36, %cst_19 {dimension_numbers = #tpu.dot_dimension_numbers<[1], [0], [0], [1], [0, 0, 1, 1], [], []>} : vector<64x32xf32>, vector<32x32xf32>, vector<64x32xf32> -> vector<64x32xf32>
    %38 = arith.addf %32, %37 : vector<64x32xf32>
    %39 = vector.extract_strided_slice %3 {offsets = [2, 0, 0], sizes = [4, 16, 32], strides = [1, 1, 1]} : vector<6x18x32xf32> to vector<4x16x32xf32>
    %40 = vector.shape_cast %39 : vector<4x16x32xf32> to vector<64x32xf32>
    %c6 = arith.constant 6 : index
    %c0_20 = arith.constant 0 : index
    %c0_21 = arith.constant 0 : index
    %41 = vector.load %arg3[%c6, %c0_20, %c0_21] : memref<9x32x32xf32, #tpu.memory_space<vmem>>, vector<1x32x32xf32>
    %42 = vector.shape_cast %41 : vector<1x32x32xf32> to vector<32x32xf32>
    %cst_22 = arith.constant dense<0.000000e+00> : vector<64x32xf32>
    %43 = tpu.matmul %40, %42, %cst_22 {dimension_numbers = #tpu.dot_dimension_numbers<[1], [0], [0], [1], [0, 0, 1, 1], [], []>} : vector<64x32xf32>, vector<32x32xf32>, vector<64x32xf32> -> vector<64x32xf32>
    %44 = arith.addf %38, %43 : vector<64x32xf32>
    %45 = vector.extract_strided_slice %3 {offsets = [2, 1, 0], sizes = [4, 16, 32], strides = [1, 1, 1]} : vector<6x18x32xf32> to vector<4x16x32xf32>
    %46 = vector.shape_cast %45 : vector<4x16x32xf32> to vector<64x32xf32>
    %c7 = arith.constant 7 : index
    %c0_23 = arith.constant 0 : index
    %c0_24 = arith.constant 0 : index
    %47 = vector.load %arg3[%c7, %c0_23, %c0_24] : memref<9x32x32xf32, #tpu.memory_space<vmem>>, vector<1x32x32xf32>
    %48 = vector.shape_cast %47 : vector<1x32x32xf32> to vector<32x32xf32>
    %cst_25 = arith.constant dense<0.000000e+00> : vector<64x32xf32>
    %49 = tpu.matmul %46, %48, %cst_25 {dimension_numbers = #tpu.dot_dimension_numbers<[1], [0], [0], [1], [0, 0, 1, 1], [], []>} : vector<64x32xf32>, vector<32x32xf32>, vector<64x32xf32> -> vector<64x32xf32>
    %50 = arith.addf %44, %49 : vector<64x32xf32>
    %51 = vector.extract_strided_slice %3 {offsets = [2, 2, 0], sizes = [4, 16, 32], strides = [1, 1, 1]} : vector<6x18x32xf32> to vector<4x16x32xf32>
    %52 = vector.shape_cast %51 : vector<4x16x32xf32> to vector<64x32xf32>
    %c8 = arith.constant 8 : index
    %c0_26 = arith.constant 0 : index
    %c0_27 = arith.constant 0 : index
    %53 = vector.load %arg3[%c8, %c0_26, %c0_27] : memref<9x32x32xf32, #tpu.memory_space<vmem>>, vector<1x32x32xf32>
    %54 = vector.shape_cast %53 : vector<1x32x32xf32> to vector<32x32xf32>
    %cst_28 = arith.constant dense<0.000000e+00> : vector<64x32xf32>
    %55 = tpu.matmul %52, %54, %cst_28 {dimension_numbers = #tpu.dot_dimension_numbers<[1], [0], [0], [1], [0, 0, 1, 1], [], []>} : vector<64x32xf32>, vector<32x32xf32>, vector<64x32xf32> -> vector<64x32xf32>
    %56 = arith.addf %50, %55 : vector<64x32xf32>
    %c0_29 = arith.constant 0 : index
    %c0_30 = arith.constant 0 : index
    %57 = vector.load %arg4[%c0_29, %c0_30] : memref<1x32xf32, #tpu.memory_space<vmem>>, vector<1x32xf32>
    %58 = vector.broadcast %57 : vector<1x32xf32> to vector<64x32xf32>
    %59 = arith.addf %56, %58 : vector<64x32xf32>
    %60 = vector.shape_cast %59 : vector<64x32xf32> to vector<4x16x32xf32>
    %61 = vector.extract_strided_slice %60 {offsets = [0, 0, 0], sizes = [4, 4, 32], strides = [1, 1, 1]} : vector<4x16x32xf32> to vector<4x4x32xf32>
    %c0_31 = arith.constant 0 : index
    %c0_32 = arith.constant 0 : index
    %c0_33 = arith.constant 0 : index
    %c0_34 = arith.constant 0 : index
    %62 = vector.load %arg5[%c0_31, %c0_32, %c0_33, %c0_34] : memref<1x4x4x32xf32, #tpu.memory_space<vmem>>, vector<1x4x4x32xf32>
    %63 = vector.shape_cast %62 : vector<1x4x4x32xf32> to vector<4x4x32xf32>
    %64 = vector.shape_cast %61 : vector<4x4x32xf32> to vector<1x4x4x32xf32>
    tpu.vector_store %arg5[%c0_31, %c0_32, %c0_33, %c0_34], %64 {strides = array<i32>} : memref<1x4x4x32xf32, #tpu.memory_space<vmem>>, vector<1x4x4x32xf32>,
    return
  }
  func.func @transform_0(%arg0: i32, %arg1: i32) -> (i32, i32, i32, i32) {
    %c0_i32 = arith.constant 0 : i32
    %c0_i32_0 = arith.constant 0 : i32
    %c0_i32_1 = arith.constant 0 : i32
    %c0_i32_2 = arith.constant 0 : i32
    return %arg0, %c0_i32, %c0_i32_0, %c0_i32_1 : i32, i32, i32, i32
  }
  func.func @transform_1(%arg0: i32, %arg1: i32) -> (i32, i32, i32) {
    %c0_i32 = arith.constant 0 : i32
    %c0_i32_0 = arith.constant 0 : i32
    %c0_i32_1 = arith.constant 0 : i32
    %c0_i32_2 = arith.constant 0 : i32
    return %c0_i32, %c0_i32_0, %c0_i32_1 : i32, i32, i32
  }
  func.func @transform_2(%arg0: i32, %arg1: i32) -> (i32, i32) {
    %c0_i32 = arith.constant 0 : i32
    %c0_i32_0 = arith.constant 0 : i32
    %c0_i32_1 = arith.constant 0 : i32
    return %c0_i32, %c0_i32_0 : i32, i32
  }
  func.func @transform_3(%arg0: i32, %arg1: i32) -> (i32, i32, i32, i32) {
    %c0_i32 = arith.constant 0 : i32
    %c0_i32_0 = arith.constant 0 : i32
    %c0_i32_1 = arith.constant 0 : i32
    return %arg0, %arg1, %c0_i32, %c0_i32_0 : i32, i32, i32, i32
  }
}

</mosaic_0001>

<bundles_post_ra>
// kernel: lte_forward.10
= control target key start
LH: loop header
LB: loop body
LE: loop exit
PB: predicated region body
PF: predicated region fallthrough
CT: control target
= control target key end

     0   :  { %s671_s12 = smov 0   ;;  %s673_s13 = smov 0   ;;  %s775_s0 = inlined_call_operand.vmem [shape: f32[2,8,16,32], index: 0, kind: input, shape index: {}]   ;;  %s776_s1 = inlined_call_operand.vmem [shape: f32[1,32,32], index: 1, kind: input, shape index: {}]   ;;  %s777_s2 = inlined_call_operand.vmem [shape: f32[1,32], index: 2, kind: input, shape index: {}]   ;;  %s778_s3 = inlined_call_operand.vmem [shape: f32[2,8,8,32], index: 3, kind: output, shape index: {}]  }
   0x1   :  { %s675_s14 = smov 0  }
   0x2 LB: > { %s25_s15 = sadd.s32 1, %s645_s13  ;;  %p513_p0 = scmp.ge.s32.totalorder %s649_s14, 1  ;;  %s649_s14 = sphi %s675_s14, %s13_s14   ;;  %s645_s13 = sphi %s673_s13, %s780_s13   ;;  %s641_s12 = sphi %s671_s12, %s779_s12  }
   0x3   : > { %p27_p1 = scmp.ge.s32.totalorder %s25_s15, 2  ;;  %p151_p2 = scmp.lt.s32.totalorder %s649_s14, 3 }
   0x5   : > { %s782_s15 = smov (%p27_p1, %s25_s15), 0  ;;  %p152_p3 = pnand %p513_p0, %p151_p2 }
   0x6   : > { %v213_v0 = vld [vmem:[%s776_s1] sm:$0xff] (!%p152_p3)  ;;  %v214_v1 = vld [vmem:[%s776_s1 + $0x8] sm:$0xff] (!%p152_p3)  ;;  %v215_v2 = vld [vmem:[%s776_s1 + $0x10] sm:$0xff] (!%p152_p3)  ;;  %p179_p4 = scmp.lt.s32.totalorder (!%p152_p3), %s641_s12, 1  ;;  %vm224_vm0 = vcmask (!%p152_p3), 261120  }
   0x7   : > { %155 = sbr.rel (%p152_p3) target bundleno = 250 (0xfa), region = 32  ;;  %v591_v3 = vpack.c.bf16 (!%p152_p3), %v214_v1, %v213_v0  ;;  %v216_v4 = vld [vmem:[%s776_s1 + $0x18] sm:$0xff] (!%p152_p3)  ;;  %v518_v22 = vld [vmem:[%s777_s2] ss:$0 sm:$0xff] (!%p152_p3) }
   0x8   : > { %v595_v5 = vpack.c.bf16 (!%p152_p3), %v216_v4, %v215_v2 }
   0x9   : > { %592 = vmatprep.subr.bf16.mxu0 (!%p152_p3), %v591_v3  ;;  %599 = vmatprep.subr.bf16.mxu1 (!%p152_p3), %v591_v3 }
   0xa   : > { %594 = vmatpush3.bf16.msra.mxu0 (!%p152_p3), %v591_v3  ;;  %601 = vmatpush3.bf16.msra.mxu1 (!%p152_p3), %v591_v3 }
   0xb   : > { %596 = vmatprep.subr.bf16.mxu0 (!%p152_p3), %v595_v5  ;;  %600 = vmatprep.subr.bf16.mxu1 (!%p152_p3), %v595_v5 }
   0xe   : > { %s784_s12 = smov (!%p179_p4, %s641_s12), 1  ;;  %598 = vmatpush3.bf16.msra.mxu0 %v595_v5  ;;  %602 = vmatpush3.bf16.msra.mxu1 %v595_v5 }
   0xf   : > { %s537_s24 = sshll.u32 %s784_s12, 7  ;;  %s538_s30 = sshll.u32 %s784_s12, 6 }
  0x10   : > { %s707_s27 = scalar_lea.vmem %s775_s0, %s537_s24  ;;  %s748_s6 = scalar_lea.vmem %s778_s3, %s538_s30 }
  0x11   : > { %v197_v6 = vld [vmem:[%s707_s27] sm:$0xff]  ;;  %v198_v8 = vld [vmem:[%s707_s27 + $0x8] sm:$0xff]  ;;  %v199_v10 = vld [vmem:[%s707_s27 + $0x10] sm:$0xff] }
  0x12   : > { %v205_v7 = vld [vmem:[%s707_s27 + $0x40] sm:$0xff]  ;;  %567 = vmatprep.mubr.msk.f32.mxu0 %vm224_vm0, %v197_v6  ;;  %v206_v9 = vld [vmem:[%s707_s27 + $0x48] sm:$0xff]  ;;  %v207_v11 = vld [vmem:[%s707_s27 + $0x50] sm:$0xff] }
  0x13   : > { %579 = vmatprep.mubr.msk.f32.mxu1 %vm224_vm0, %v205_v7  ;;  %568 = vmatmul.mubr.msk.f32.vlgmr.msra.gmra.mrb[0].mxu0 %vm224_vm0, %v198_v8  ;;  %v200_v12 = vld [vmem:[%s707_s27 + $0x18] sm:$0xff]  ;;  %v201_v14 = vld [vmem:[%s707_s27 + $0x20] sm:$0xff]  ;;  %v202_v16 = vld [vmem:[%s707_s27 + $0x28] sm:$0xff] }
  0x14   : > { %580 = vmatmul.mubr.msk.f32.vlgmr.msra.gmra.mrb[0].mxu1 %vm224_vm0, %v206_v9  ;;  %570 = vmatprep.mubr.msk.f32.mxu0 %vm224_vm0, %v199_v10  ;;  %v208_v13 = vld [vmem:[%s707_s27 + $0x58] sm:$0xff]  ;;  %v209_v15 = vld [vmem:[%s707_s27 + $0x60] sm:$0xff]  ;;  %v210_v17 = vld [vmem:[%s707_s27 + $0x68] sm:$0xff] }
  0x15   : > { %582 = vmatprep.mubr.msk.f32.mxu1 %vm224_vm0, %v207_v11  ;;  %v203_v18 = vld [vmem:[%s707_s27 + $0x30] sm:$0xff]  ;;  %v204_v20 = vld [vmem:[%s707_s27 + $0x38] sm:$0xff] }
  0x16   : > { %v211_v19 = vld [vmem:[%s707_s27 + $0x70] sm:$0xff]  ;;  %v212_v21 = vld [vmem:[%s707_s27 + $0x78] sm:$0xff] }
  0x17   : > { %571 = vmatmul.mubr.msk.f32.gmra.mrb[2].mxu0 %vm224_vm0, %v200_v12 }
  0x18   : > { %583 = vmatmul.mubr.msk.f32.gmra.mrb[2].mxu1 %vm224_vm0, %v208_v13  ;;  %573 = vmatprep.mubr.msk.f32.mxu0 %vm224_vm0, %v201_v14 }
  0x19   : > { %585 = vmatprep.mubr.msk.f32.mxu1 %vm224_vm0, %v209_v15 }
  0x1b   : > { %574 = vmatmul.mubr.msk.f32.gmra.mrb[4].mxu0 %vm224_vm0, %v202_v16 }
  0x1c   : > { %586 = vmatmul.mubr.msk.f32.gmra.mrb[4].mxu1 %vm224_vm0, %v210_v17  ;;  %576 = vmatprep.mubr.msk.f32.mxu0 %vm224_vm0, %v203_v18 }
  0x1d   : > { %588 = vmatprep.mubr.msk.f32.mxu1 %vm224_vm0, %v211_v19 }
  0x1f   : > { %577 = vmatmul.mubr.msk.f32.gmra.mrb[6].mxu0 %vm224_vm0, %v204_v20 }
  0x20   : > { %589 = vmatmul.mubr.msk.f32.gmra.mrb[6].mxu1 %vm224_vm0, %v212_v21 }
  0xe6   : > { %v569_v23 = vpop.f32.mrb[0].mxu0 }
  0xe7   : > { %v581_v24 = vpop.f32.mrb[0].mxu1  ;;  %v339_v25 = vpop.f32.mrb[1].mxu0 }
  0xe8   : > { %v375_v26 = vpop.f32.mrb[1].mxu1  ;;  %v340_v27 = vadd.f32 %v518_v22, %v339_v25 }
  0xe9   : > { %v376_v28 = vadd.f32 %v518_v22, %v375_v26 }
  0xea   : > { %v410_v29 = vmax.f32 %v340_v27, 0.0  ;;  %v572_v31 = vpop.f32.mrb[2].mxu0 }
  0xeb   : > { %v414_v30 = vmax.f32 %v376_v28, 0.0  ;;  %v584_v32 = vpop.f32.mrb[2].mxu1  ;;  %v348_v33 = vpop.f32.mrb[3].mxu0 }
  0xec   : > { %v384_v34 = vpop.f32.mrb[3].mxu1  ;;  %418 = vst.msk [vmem:[%s748_s6] sm:$0xff] %vm224_vm0, %v410_v29  ;;  %v349_v35 = vadd.f32 %v518_v22, %v348_v33 }
  0xed   : > { %422 = vst.msk [vmem:[%s748_s6 + $0x20] sm:$0xff] %vm224_vm0, %v414_v30  ;;  %v385_v36 = vadd.f32 %v518_v22, %v384_v34 }
  0xee   : > { %v411_v37 = vmax.f32 %v349_v35, 0.0  ;;  %v575_v39 = vpop.f32.mrb[4].mxu0 }
  0xef   : > { %v415_v38 = vmax.f32 %v385_v36, 0.0  ;;  %v587_v40 = vpop.f32.mrb[4].mxu1  ;;  %v357_v41 = vpop.f32.mrb[5].mxu0 }
  0xf0   : > { %v393_v42 = vpop.f32.mrb[5].mxu1  ;;  %419 = vst.msk [vmem:[%s748_s6 + $0x8] sm:$0xff] %vm224_vm0, %v411_v37  ;;  %v358_v43 = vadd.f32 %v518_v22, %v357_v41 }
  0xf1   : > { %423 = vst.msk [vmem:[%s748_s6 + $0x28] sm:$0xff] %vm224_vm0, %v415_v38  ;;  %v394_v44 = vadd.f32 %v518_v22, %v393_v42 }
  0xf2   : > { %v412_v45 = vmax.f32 %v358_v43, 0.0  ;;  %v578_v47 = vpop.f32.mrb[6].mxu0 }
  0xf3   : > { %v416_v46 = vmax.f32 %v394_v44, 0.0  ;;  %v590_v48 = vpop.f32.mrb[6].mxu1  ;;  %v366_v49 = vpop.f32.mrb[7].mxu0 }
  0xf4   : > { %v402_v50 = vpop.f32.mrb[7].mxu1  ;;  %420 = vst.msk [vmem:[%s748_s6 + $0x10] sm:$0xff] %vm224_vm0, %v412_v45  ;;  %v367_v51 = vadd.f32 %v518_v22, %v366_v49 }
  0xf5   : > { %424 = vst.msk [vmem:[%s748_s6 + $0x30] sm:$0xff] %vm224_vm0, %v416_v46  ;;  %v403_v52 = vadd.f32 %v518_v22, %v402_v50 }
  0xf6   : > { %v413_v53 = vmax.f32 %v367_v51, 0.0 }
  0xf7   : > { %v417_v54 = vmax.f32 %v403_v52, 0.0 }
  0xf8   : > { %421 = vst.msk [vmem:[%s748_s6 + $0x18] sm:$0xff] %vm224_vm0, %v413_v53 }
  0xf9   : > { %425 = vst.msk [vmem:[%s748_s6 + $0x38] sm:$0xff] %vm224_vm0, %v417_v54 }
  0xfa PF: > { %s13_s14 = sadd.s32 1, %s649_s14   ;;  %s779_s12 = smov %s645_s13 }
  0xfb   : > { %p10_p5 = scmp.ge.s32.totalorder %s13_s14, 4   ;;  %s780_s13 = smov %s782_s15 }
  0xfd   :  { %12 = sbr.rel (!%p10_p5) target bundleno = 2 (0x2), region = 63 }

// kernel: lte_forward.7
= control target key start
LH: loop header
LB: loop body
LE: loop exit
PB: predicated region body
PF: predicated region fallthrough
CT: control target
= control target key end

     0   :  { %s4584_s12 = smov 0   ;;  %s4586_s13 = smov 0   ;;  %s5841_s0 = inlined_call_operand.vmem [shape: f32[2,18,18,3], index: 0, kind: input, shape index: {}]   ;;  %s5842_s1 = inlined_call_operand.vmem [shape: f32[9,3,32], index: 1, kind: input, shape index: {}]   ;;  %s5843_s2 = inlined_call_operand.vmem [shape: f32[1,32], index: 2, kind: input, shape index: {}]   ;;  %s5844_s3 = inlined_call_operand.vmem [shape: f32[2,16,16,32], index: 3, kind: output, shape index: {}]  }
   0x1   :  { %s4588_s14 = smov 0  }
   0x2 LB: > { %s25_s15 = sadd.s32 1, %s4558_s13  ;;  %p3197_p0 = scmp.ge.s32.totalorder %s4562_s14, 1  ;;  %s4562_s14 = sphi %s4588_s14, %s13_s14   ;;  %s4558_s13 = sphi %s4586_s13, %s6020_s13   ;;  %s4554_s12 = sphi %s4584_s12, %s6019_s12  }
   0x3   : > { %p27_p1 = scmp.ge.s32.totalorder %s25_s15, 2  ;;  %p151_p2 = scmp.lt.s32.totalorder %s4562_s14, 3 }
   0x5   : > { %s6022_s15 = smov (%p27_p1, %s25_s15), 0  ;;  %p152_p3 = pnand %p3197_p0, %p151_p2 }
   0x7   : > { %155 = sbr.rel (%p152_p3) target bundleno = 530 (0x212), region = 32 }
   0xe   : > { %v3201_v0 = vld [vmem:[%s5842_s1 + $0x4] sm:$0x7]  ;;  %vm450_vm0 = vcmask 1042432   ;;  %v4608_v1 = vld [vmem:[%s5842_s1 + $0x10] sm:$0x7]  ;;  %p180_p4 = scmp.lt.s32.totalorder %s4554_s12, 1 }
   0xf   : > { %3807 = vmatprep.subr.msk.mxu1 %vm450_vm0, %v3201_v0  ;;  %4007 = vmatprep.subr.msk.mxu0 %vm450_vm0, %v4608_v1  ;;  %v253_v2 = vld [vmem:[%s5842_s1] sm:$0x7]  ;;  %v3370_v3 = vld [vmem:[%s5842_s1 + $0x14] sm:$0x7]  ;;  %vm302_vm1 = vcmask 1046528   ;;  %vm385_vm2 = vcmask 23552  }
  0x10   : > { %3808 = vmatpush3.msk.msra.mxu1 %vm450_vm0, %v3201_v0  ;;  %4008 = vmatpush3.msk.msra.mxu0 %vm450_vm0, %v4608_v1  ;;  %s6024_s12 = smov (!%p180_p4, %s4554_s12), 1  ;;  %v4695_v33 = vld [vmem:[%s5842_s1 + $0x18] sm:$0x7]  ;;  %v4705_v35 = vld [vmem:[%s5842_s1 + $0x8] sm:$0x7]  ;;  %vm971_vm3 = vcmask 1045504  }
  0x11   : > { %3857 = vmatprep.subr.msk.mxu1 %vm450_vm0, %v253_v2  ;;  %4057 = vmatprep.subr.msk.mxu0 %vm450_vm0, %v3370_v3  ;;  %s4515_s24 = smul.u32 432, %s6024_s12  ;;  %s3509_s17 = sshll.u32 %s6024_s12, 8  ;;  %vm3071_vm4 = vcmask 261120  }
  0x12   : > { %s5731_s20 = scalar_lea.vmem %s5844_s3, %s3509_s17 }
  0x13   : > { %s4630_s27 = scalar_lea.vmem %s5841_s0, %s4515_s24 }
  0x14   : > { %v4633_v4 = vld [vmem:[%s4630_s27] sm:$0xff]  ;;  %v4636_v5 = vld [vmem:[%s4630_s27 + $0x8] sm:$0xff]  ;;  %v4639_v6 = vld [vmem:[%s4630_s27 + $0x18] sm:$0xff] }
  0x15   : > { %5918 = vst [vmem:[#allocation2_spill] sm:$0xff] %v4639_v6  ;;  %v303_v7 = vrot.slane %v4633_v4, 1  ;;  %v304_v8 = vrot.slane %v4636_v5, 1  ;;  %v4644_v9 = vld [vmem:[%s4630_s27 + $0x20] sm:$0xff]  ;;  %v308_v10 = vrot.slane %v4639_v6, 1  ;;  %v4656_v15 = vld [vmem:[%s4630_s27 + $0x30] sm:$0xff] }
  0x16   : > { %5919 = vst [vmem:[#allocation3_spill] sm:$0xff] %v4644_v9  ;;  %v4648_v11 = vld [vmem:[%s4630_s27 + $0x10] sm:$0x3]  ;;  %v309_v12 = vrot.slane %v4644_v9, 1  ;;  %v4653_v14 = vld [vmem:[%s4630_s27 + $0x28] sm:$0x3] }
  0x17   : > { %v306_v13 = vrot.slane %v4648_v11, 1  ;;  %v305_v16 = vsel %vm302_vm1, %v303_v7, %v304_v8  ;;  %v311_v17 = vrot.slane %v4653_v14, 1  ;;  %v4661_v18 = vld [vmem:[%s4630_s27 + $0x38] sm:$0xff]  ;;  %v313_v19 = vrot.slane %v4656_v15, 1  ;;  %v4665_v20 = vld [vmem:[%s4630_s27 + $0x40] sm:$0x3] }
  0x18   : > { %3809 = vmatprep.mubr.msk.f32.mxu1 %vm385_vm2, %v305_v16  ;;  %v310_v21 = vsel %vm302_vm1, %v308_v10, %v309_v12  ;;  %v314_v23 = vrot.slane %v4661_v18, 1  ;;  %v316_v24 = vrot.slane %v4665_v20, 1  ;;  %v4673_v25 = vld [vmem:[%s4630_s27 + $0x48] sm:$0xff]  ;;  %v4676_v26 = vld [vmem:[%s4630_s27 + $0x50] sm:$0xff]  ;;  %v4679_v27 = vld [vmem:[%s4630_s27 + $0x58] sm:$0x3] }
  0x19   : > { %v307_v22 = vsel %vm302_vm1, %v304_v8, %v306_v13  ;;  %4009 = vmatprep.mubr.msk.f32.mxu0 %vm385_vm2, %v310_v21  ;;  %v312_v28 = vsel %vm302_vm1, %v309_v12, %v311_v17  ;;  %v318_v29 = vrot.slane %v4673_v25, 1  ;;  %v319_v30 = vrot.slane %v4676_v26, 1  ;;  %v4687_v31 = vld [vmem:[%s4630_s27 + $0x60] sm:$0xff]  ;;  %v4690_v32 = vld [vmem:[%s4630_s27 + $0x68] sm:$0xff]  ;;  %v4721_v41 = vld [vmem:[%s4630_s27 + $0x70] sm:$0x3] }
  0x1a   : > { %3810 = vmatmul.mubr.msk.f32.vlgmr.msra.gmra.mrb[0].mxu1 %vm385_vm2, %v307_v22  ;;  %4010 = vmatmul.mubr.msk.f32.vlgmr.msra.gmra.mrb[0].mxu0 %vm385_vm2, %v312_v28  ;;  %v4700_v34 = vsel %vm302_vm1, %v313_v19, %v314_v23  ;;  %v4710_v36 = vsel %vm302_vm1, %v314_v23, %v316_v24  ;;  %v321_v37 = vrot.slane %v4679_v27, 1  ;;  %v323_v39 = vrot.slane %v4687_v31, 1  ;;  %v4727_v42 = vld [vmem:[%s4630_s27 + $0x78] sm:$0xff]  ;;  %v4730_v43 = vld [vmem:[%s4630_s27 + $0x80] sm:$0xff]  ;;  %v4750_v49 = vld [vmem:[%s4630_s27 + $0x88] sm:$0x3] }
  0x1b   : > { %3858 = vmatpush3.msk.msra.mxu1 %vm450_vm0, %v253_v2  ;;  %5920 = vst [vmem:[#allocation4_spill] sm:$0xff] %v4700_v34  ;;  %4058 = vmatpush3.msk.msra.mxu0 %vm450_vm0, %v3370_v3  ;;  %5921 = vst [vmem:[#allocation5_spill] sm:$0xff] %v4710_v36  ;;  %v4716_v38 = vsel %vm302_vm1, %v318_v29, %v319_v30  ;;  %v324_v40 = vrot.slane %v4690_v32, 1  ;;  %v326_v45 = vrot.slane %v4721_v41, 1  ;;  %v328_v47 = vrot.slane %v4727_v42, 1  ;;  %v4755_v50 = vld [vmem:[%s4630_s27 + $0x90] sm:$0xff] }
  0x1c   : > { %3812 = vmatprep.mubr.msk.f32.mxu1 %vm385_vm2, %v310_v21  ;;  %4012 = vmatprep.mubr.msk.f32.mxu0 %vm385_vm2, %v4700_v34  ;;  %5922 = vst [vmem:[#allocation6_spill] sm:$0xff] %v4716_v38  ;;  %v4741_v44 = vsel %vm302_vm1, %v319_v30, %v321_v37  ;;  %v329_v48 = vrot.slane %v4730_v43, 1  ;;  %v4758_v51 = vld [vmem:[%s4630_s27 + $0x98] sm:$0xff]  ;;  %v331_v53 = vrot.slane %v4750_v49, 1  ;;  %v333_v55 = vrot.slane %v4755_v50, 1  ;;  %v4781_v58 = vld [vmem:[%s4630_s27 + $0xa8] sm:$0xff] }
  0x1d   : > { %4107 = vmatprep.subr.msk.mxu0 %vm450_vm0, %v4695_v33  ;;  %3907 = vmatprep.subr.msk.mxu1 %vm450_vm0, %v4705_v35  ;;  %5923 = vst [vmem:[#allocation7_spill] sm:$0xff] %v4741_v44  ;;  %v4745_v46 = vsel %vm302_vm1, %v323_v39, %v324_v40  ;;  %v4767_v52 = vsel %vm302_vm1, %v324_v40, %v326_v45  ;;  %v334_v56 = vrot.slane %v4758_v51, 1  ;;  %v4776_v57 = vld [vmem:[%s4630_s27 + $0xa0] sm:$0x3]  ;;  %v4784_v59 = vld [vmem:[%s4630_s27 + $0xb0] sm:$0xff]  ;;  %v338_v63 = vrot.slane %v4781_v58, 1 }
  0x1e   : > { %3813 = vmatmul.mubr.msk.f32.gmra.mrb[2].mxu1 %vm385_vm2, %v312_v28  ;;  %4013 = vmatmul.mubr.msk.f32.gmra.mrb[2].mxu0 %vm385_vm2, %v4710_v36  ;;  %5924 = vst [vmem:[#allocation8_spill] sm:$0xff] %v4745_v46  ;;  %5925 = vst [vmem:[#allocation9_spill] sm:$0xff] %v4767_v52  ;;  %v4771_v54 = vsel %vm302_vm1, %v328_v47, %v329_v48  ;;  %v4793_v60 = vsel %vm302_vm1, %v329_v48, %v331_v53  ;;  %v336_v61 = vrot.slane %v4776_v57, 1  ;;  %v4802_v2 = vld [vmem:[%s4630_s27 + $0xb8] sm:$0x3]  ;;  %v4807_v3 = vld [vmem:[%s4630_s27 + $0xc0] sm:$0xff] }
  0x1f   : > { %3815 = vmatprep.mubr.msk.f32.mxu1 %vm385_vm2, %v4700_v34  ;;  %4015 = vmatprep.mubr.msk.f32.mxu0 %vm385_vm2, %v4716_v38  ;;  %5926 = vst [vmem:[#allocation10_spill] sm:$0xff] %v4771_v54  ;;  %5927 = vst [vmem:[#allocation11_spill] sm:$0xff] %v4793_v60  ;;  %v4797_v62 = vsel %vm302_vm1, %v333_v55, %v334_v56  ;;  %v339_v0 = vrot.slane %v4784_v59, 1  ;;  %v4810_v7 = vld [vmem:[%s4630_s27 + $0xc8] sm:$0xff]  ;;  %v341_v10 = vrot.slane %v4802_v2, 1  ;;  %v343_v13 = vrot.slane %v4807_v3, 1 }
  0x20   : > { %5928 = vst [vmem:[#allocation12_spill] sm:$0xff] %v4797_v62  ;;  %v4819_v8 = vsel %vm302_vm1, %v334_v56, %v336_v61  ;;  %v344_v16 = vrot.slane %v4810_v7, 1  ;;  %v4828_v17 = vld [vmem:[%s4630_s27 + $0xd0] sm:$0x3]  ;;  %v977_v23 = vrot.slane %v4639_v6, 2  ;;  %v978_v24 = vrot.slane %v4644_v9, 2 }
  0x21   : > { %5929 = vst [vmem:[#allocation13_spill] sm:$0xff] %v4819_v8  ;;  %v4823_v12 = vsel %vm302_vm1, %v338_v63, %v339_v0  ;;  %v4839_v19 = vsel %vm302_vm1, %v339_v0, %v341_v10  ;;  %v346_v21 = vrot.slane %v4828_v17, 1  ;;  %v4848_v28 = vld [vmem:[%s4630_s27 + $0xd8] sm:$0xff]  ;;  %v4851_v29 = vld [vmem:[%s4630_s27 + $0xe0] sm:$0xff]  ;;  %v980_v30 = vrot.slane %v4653_v14, 2  ;;  %v4876_v53 = vld [vmem:[%s4630_s27 + $0xf0] sm:$0xff] }
  0x22   : > { %3816 = vmatmul.mubr.msk.f32.gmra.mrb[4].mxu1 %vm385_vm2, %v4710_v36  ;;  %4016 = vmatmul.mubr.msk.f32.gmra.mrb[4].mxu0 %vm385_vm2, %v4741_v44  ;;  %5930 = vst [vmem:[#allocation14_spill] sm:$0xff] %v4823_v12  ;;  %5931 = vst [vmem:[#allocation15_spill] sm:$0xff] %v4839_v19  ;;  %v4843_v22 = vsel %vm302_vm1, %v343_v13, %v344_v16  ;;  %v348_v39 = vrot.slane %v4848_v28, 1  ;;  %v349_v40 = vrot.slane %v4851_v29, 1  ;;  %v4868_v45 = vld [vmem:[%s4630_s27 + $0xe8] sm:$0x3] }
  0x23   : > { %3818 = vmatprep.mubr.msk.f32.mxu1 %vm385_vm2, %v4716_v38  ;;  %4018 = vmatprep.mubr.msk.f32.mxu0 %vm385_vm2, %v4745_v46  ;;  %5932 = vst [vmem:[#allocation16_spill] sm:$0xff] %v4843_v22  ;;  %v4863_v37 = vsel %vm302_vm1, %v344_v16, %v346_v21  ;;  %v4871_v47 = vsel %vm971_vm3, %v977_v23, %v978_v24  ;;  %v982_v48 = vrot.slane %v4656_v15, 2  ;;  %v983_v14 = vrot.slane %v4661_v18, 2  ;;  %v4879_v55 = vld [vmem:[%s4630_s27 + $0xf8] sm:$0xff]  ;;  %v4900_v16 = vld [vmem:[%s4630_s27 + $0x100] sm:$0x3] }
  0x24   : > { %5933 = vst [vmem:[#allocation17_spill] sm:$0xff] %v4863_v37  ;;  %v351_v56 = vrot.slane %v4868_v45, 1  ;;  %v985_v61 = vrot.slane %v4665_v20, 2  ;;  %v4892_v63 = vsel %vm971_vm3, %v978_v24, %v980_v30  ;;  %v4895_v0 = vsel %vm302_vm1, %v348_v39, %v349_v40  ;;  %v4911_v24 = vld [vmem:[%s4630_s27 + $0x110] sm:$0xff]  ;;  %v4918_v30 = vld [vmem:[%s5842_s1 + $0x1c] sm:$0x7] }
  0x25   : > { %5934 = vst [vmem:[#allocation18_spill] sm:$0xff] %v4895_v0  ;;  %v353_v10 = vrot.slane %v4876_v53, 1  ;;  %v354_v13 = vrot.slane %v4879_v55, 1  ;;  %v4903_v21 = vsel %vm971_vm3, %v982_v48, %v983_v14  ;;  %v987_v20 = vrot.slane %v4673_v25, 2  ;;  %v5014_v36 = vld [vmem:[%s4630_s27 + $0x148] sm:$0x3] }
  0x26   : > { %3819 = vmatmul.mubr.msk.f32.gmra.mrb[6].mxu1 %vm385_vm2, %v4741_v44  ;;  %4019 = vmatmul.mubr.msk.f32.gmra.mrb[6].mxu0 %vm385_vm2, %v4767_v52  ;;  %v988_v23 = vrot.slane %v4676_v26, 2  ;;  %v4925_v39 = vsel %vm302_vm1, %v349_v40, %v351_v56  ;;  %v4928_v48 = vsel %vm971_vm3, %v983_v14, %v985_v61  ;;  %v359_v40 = vrot.slane %v4911_v24, 1  ;;  %v4942_v56 = vld [vmem:[%s4630_s27 + $0x118] sm:$0x3] }
  0x27   : > { %3821 = vmatprep.mubr.msk.f32.mxu1 %vm385_vm2, %v4745_v46  ;;  %4021 = vmatprep.mubr.msk.f32.mxu0 %vm385_vm2, %v4771_v54  ;;  %5935 = vst [vmem:[#allocation19_spill] sm:$0xff] %v4925_v39  ;;  %5936 = vst [vmem:[#allocation20_spill] sm:$0xff] %v4928_v48  ;;  %v992_v61 = vrot.slane %v4687_v31, 2  ;;  %v4987_v46 = vld [vmem:[%s4630_s27 + $0x138] sm:$0xff]  ;;  %v1000_v44 = vrot.slane %v4750_v49, 2  ;;  %v1005_v34 = vrot.slane %v4776_v57, 2 }
  0x28   : > { %v4945_v14 = vsel %vm971_vm3, %v987_v20, %v988_v23  ;;  %v361_v20 = vrot.slane %v4942_v56, 1  ;;  %v368_v38 = vrot.slane %v4987_v46, 1  ;;  %v1007_v57 = vrot.slane %v4781_v58, 2 }
  0x29   : > { %5938 = vst [vmem:[#allocation22_spill] sm:$0xff] %v4945_v14 }
  0x2a   : > { %3822 = vmatmul.mubr.msk.f32.gmra.mrb[8].mxu1 %vm385_vm2, %v4767_v52  ;;  %4022 = vmatmul.mubr.msk.f32.gmra.mrb[8].mxu0 %vm385_vm2, %v4793_v60  ;;  %v4979_v52 = vld [vmem:[%s4630_s27 + $0x130] sm:$0x3] }
  0x2b   : > { %3824 = vmatprep.mubr.msk.f32.mxu1 %vm385_vm2, %v4771_v54  ;;  %4024 = vmatprep.mubr.msk.f32.mxu0 %vm385_vm2, %v4797_v62 }
  0x2e   : > { %3825 = vmatmul.mubr.msk.f32.gmra.mrb[10].mxu1 %vm385_vm2, %v4793_v60  ;;  %4025 = vmatmul.mubr.msk.f32.gmra.mrb[10].mxu0 %vm385_vm2, %v4819_v8 }
  0x2f   : > { %3827 = vmatprep.mubr.msk.f32.mxu1 %vm385_vm2, %v4797_v62  ;;  %4027 = vmatprep.mubr.msk.f32.mxu0 %vm385_vm2, %v4823_v12  ;;  %v995_v62 = vrot.slane %v4721_v41, 2  ;;  %v997_v41 = vrot.slane %v4727_v42, 2 }
  0x32   : > { %3828 = vmatmul.mubr.msk.f32.gmra.mrb[12].mxu1 %vm385_vm2, %v4819_v8  ;;  %4028 = vmatmul.mubr.msk.f32.gmra.mrb[12].mxu0 %vm385_vm2, %v4839_v19  ;;  %v4950_v8 = vld [vmem:[%s4630_s27 + $0x120] sm:$0xff] }
  0x33   : > { %3830 = vmatprep.mubr.msk.f32.mxu1 %vm385_vm2, %v4823_v12  ;;  %4030 = vmatprep.mubr.msk.f32.mxu0 %vm385_vm2, %v4843_v22  ;;  %v990_v12 = vrot.slane %v4679_v27, 2  ;;  %v363_v54 = vrot.slane %v4950_v8, 1 }
  0x35   : > { %v4971_v60 = vsel %vm971_vm3, %v988_v23, %v990_v12  ;;  %v4990_v12 = vld [vmem:[%s4630_s27 + $0x140] sm:$0xff] }
  0x36   : > { %3831 = vmatmul.mubr.msk.f32.gmra.mrb[14].mxu1 %vm385_vm2, %v4839_v19  ;;  %4031 = vmatmul.mubr.msk.f32.gmra.mrb[14].mxu0 %vm385_vm2, %v4863_v37  ;;  %v4936_v19 = vsel %vm302_vm1, %v353_v10, %v354_v13  ;;  %v4953_v10 = vld [vmem:[%s4630_s27 + $0x128] sm:$0xff]  ;;  %5940 = vst [vmem:[#allocation24_spill] sm:$0xff] %v4971_v60 }
  0x37   : > { %3833 = vmatprep.mubr.msk.f32.mxu1 %vm385_vm2, %v4843_v22  ;;  %4059 = vmatprep.mubr.msk.f32.mxu0 %vm385_vm2, %v4871_v47  ;;  %v4908_v22 = vld [vmem:[%s4630_s27 + $0x108] sm:$0xff]  ;;  %5937 = vst [vmem:[#allocation21_spill] sm:$0xff] %v4936_v19 }
  0x3a   : > { %3834 = vmatmul.mubr.msk.f32.gmra.mrb[16].mxu1 %vm385_vm2, %v4863_v37  ;;  %4060 = vmatmul.mubr.msk.f32.vlgmr.msra.gmra.mrb[0].mxu0 %vm385_vm2, %v4892_v63  ;;  %v356_v37 = vrot.slane %v4900_v16, 1 }
  0x3b   : > { %3836 = vmatprep.mubr.msk.f32.mxu1 %vm385_vm2, %v4895_v0  ;;  %4108 = vmatpush3.msk.msra.mxu0 %vm450_vm0, %v4695_v33  ;;  %v358_v0 = vrot.slane %v4908_v22, 1  ;;  %v993_v33 = vrot.slane %v4690_v32, 2 }
  0x3c   : > { %4062 = vmatprep.mubr.msk.f32.mxu0 %vm385_vm2, %v4903_v21  ;;  %4157 = vmatprep.subr.msk.mxu0 %vm450_vm0, %v4918_v30  ;;  %v4964_v27 = vsel %vm302_vm1, %v354_v13, %v356_v37  ;;  %v998_v13 = vrot.slane %v4730_v43, 2 }
  0x3d   : > { %5939 = vst [vmem:[#allocation23_spill] sm:$0xff] %v4964_v27  ;;  %v4982_v37 = vsel %vm971_vm3, %v992_v61, %v993_v33  ;;  %v5002_v23 = vsel %vm971_vm3, %v993_v33, %v995_v62  ;;  %v366_v61 = vrot.slane %v4979_v52, 1  ;;  %v1002_v62 = vrot.slane %v4755_v50, 2 }
  0x3e   : > { %3837 = vmatmul.mubr.msk.f32.gmra.mrb[18].mxu1 %vm385_vm2, %v4925_v39  ;;  %4063 = vmatmul.mubr.msk.f32.gmra.mrb[2].mxu0 %vm385_vm2, %v4928_v48  ;;  %v4974_v39 = vsel %vm302_vm1, %v358_v0, %v359_v40  ;;  %5942 = vst [vmem:[#allocation26_spill] sm:$0xff] %v4982_v37  ;;  %v4999_v0 = vsel %vm302_vm1, %v359_v40, %v361_v20  ;;  %5944 = vst [vmem:[#allocation28_spill] sm:$0xff] %v5002_v23  ;;  %v1003_v33 = vrot.slane %v4758_v51, 2  ;;  %v5022_v20 = vld [vmem:[%s4630_s27 + $0x150] sm:$0xff]  ;;  %v5084_v48 = vld [vmem:[%s4630_s27 + $0x178] sm:$0x3] }
  0x3f   : > { %3839 = vmatprep.mubr.msk.f32.mxu1 %vm385_vm2, %v4936_v19  ;;  %4065 = vmatprep.mubr.msk.f32.mxu0 %vm385_vm2, %v4945_v14  ;;  %5941 = vst [vmem:[#allocation25_spill] sm:$0xff] %v4974_v39  ;;  %v364_v19 = vrot.slane %v4953_v10, 1  ;;  %5943 = vst [vmem:[#allocation27_spill] sm:$0xff] %v4999_v0  ;;  %v5017_v40 = vsel %vm971_vm3, %v997_v41, %v998_v13  ;;  %v371_v41 = vrot.slane %v5014_v36, 1 }
  0x40   : > { %5946 = vst [vmem:[#allocation30_spill] sm:$0xff] %v5017_v40 }
  0x41   : > { %v5034_v49 = vsel %vm302_vm1, %v364_v19, %v366_v61  ;;  %v1008_v61 = vrot.slane %v4784_v59, 2 }
  0x42   : > { %3840 = vmatmul.mubr.msk.f32.gmra.mrb[20].mxu1 %vm385_vm2, %v4964_v27  ;;  %4066 = vmatmul.mubr.msk.f32.gmra.mrb[4].mxu0 %vm385_vm2, %v4971_v60  ;;  %v5008_v27 = vsel %vm302_vm1, %v363_v54, %v364_v19  ;;  %v5025_v54 = vld [vmem:[%s4630_s27 + $0x158] sm:$0xff]  ;;  %5947 = vst [vmem:[#allocation31_spill] sm:$0xff] %v5034_v49  ;;  %v5049_v60 = vld [vmem:[%s4630_s27 + $0x160] sm:$0x3]  ;;  %v5052_v19 = vsel %vm971_vm3, %v1002_v62, %v1003_v33 }
  0x43   : > { %3842 = vmatprep.mubr.msk.f32.mxu1 %vm385_vm2, %v4974_v39  ;;  %4068 = vmatprep.mubr.msk.f32.mxu0 %vm385_vm2, %v4982_v37  ;;  %5945 = vst [vmem:[#allocation29_spill] sm:$0xff] %v5008_v27  ;;  %v369_v39 = vrot.slane %v4990_v12, 1  ;;  %v5041_v37 = vsel %vm971_vm3, %v998_v13, %v1000_v44  ;;  %v5060_v44 = vld [vmem:[%s4630_s27 + $0x170] sm:$0xff]  ;;  %v5072_v13 = vsel %vm971_vm3, %v1003_v33, %v1005_v34  ;;  %v376_v62 = vrot.slane %v5049_v60, 1 }
  0x44   : > { %5948 = vst [vmem:[#allocation32_spill] sm:$0xff] %v5041_v37  ;;  %5950 = vst [vmem:[#allocation34_spill] sm:$0xff] %v5060_v44  ;;  %v1012_v34 = vrot.slane %v4807_v3, 2  ;;  %v1013_v33 = vrot.slane %v4810_v7, 2 }
  0x45   : > { %5952 = vst [vmem:[#allocation36_spill] sm:$0xff] %v5072_v13 }
  0x46   : > { %3843 = vmatmul.mubr.msk.f32.gmra.mrb[22].mxu1 %vm385_vm2, %v4999_v0  ;;  %4069 = vmatmul.mubr.msk.f32.gmra.mrb[6].mxu0 %vm385_vm2, %v5002_v23  ;;  %v5044_v0 = vsel %vm302_vm1, %v368_v38, %v369_v39  ;;  %v373_v23 = vrot.slane %v5022_v20, 1  ;;  %v5069_v38 = vsel %vm302_vm1, %v369_v39, %v371_v41  ;;  %v5087_v39 = vsel %vm971_vm3, %v1007_v57, %v1008_v61 }
  0x47   : > { %3845 = vmatprep.mubr.msk.f32.mxu1 %vm385_vm2, %v5008_v27  ;;  %4071 = vmatprep.mubr.msk.f32.mxu0 %vm385_vm2, %v5017_v40  ;;  %5949 = vst [vmem:[#allocation33_spill] sm:$0xff] %v5044_v0  ;;  %v374_v27 = vrot.slane %v5025_v54, 1  ;;  %v5057_v40 = vld [vmem:[%s4630_s27 + $0x168] sm:$0xff]  ;;  %5951 = vst [vmem:[#allocation35_spill] sm:$0xff] %v5069_v38 }
  0x49   : > { %v5078_v14 = vsel %vm302_vm1, %v373_v23, %v374_v27  ;;  %v381_v23 = vrot.slane %v5084_v48, 1 }
  0x4a   : > { %3846 = vmatmul.mubr.msk.f32.gmra.mrb[24].mxu1 %vm385_vm2, %v5034_v49  ;;  %4072 = vmatmul.mubr.msk.f32.gmra.mrb[8].mxu0 %vm385_vm2, %v5041_v37  ;;  %5953 = vst [vmem:[#allocation37_spill] sm:$0xff] %v5078_v14  ;;  %v1010_v49 = vrot.slane %v4802_v2, 2  ;;  %v378_v37 = vrot.slane %v5057_v40, 1  ;;  %v5098_v2 = vsel %vm302_vm1, %v374_v27, %v376_v62  ;;  %v1018_v27 = vrot.slane %v4851_v29, 2 }
  0x4b   : > { %3848 = vmatprep.mubr.msk.f32.mxu1 %vm385_vm2, %v5044_v0  ;;  %4074 = vmatprep.mubr.msk.f32.mxu0 %vm385_vm2, %v5052_v19  ;;  %v379_v0 = vrot.slane %v5060_v44, 1  ;;  %5954 = vst [vmem:[#allocation38_spill] sm:$0xff] %v5098_v2  ;;  %v1022_v62 = vrot.slane %v4876_v53, 2 }
  0x4c   : > { %v5104_v41 = vsel %vm971_vm3, %v1008_v61, %v1010_v49  ;;  %v1020_v49 = vrot.slane %v4868_v45, 2 }
  0x4d   : > { %v5107_v57 = vsel %vm302_vm1, %v378_v37, %v379_v0  ;;  %v5122_v37 = vsel %vm302_vm1, %v379_v0, %v381_v23  ;;  %v5157_v23 = vld [vmem:[%s5842_s1 + $0xc] sm:$0x7] }
  0x4e   : > { %3849 = vmatmul.mubr.msk.f32.gmra.mrb[26].mxu1 %vm385_vm2, %v5069_v38  ;;  %4075 = vmatmul.mubr.msk.f32.gmra.mrb[10].mxu0 %vm385_vm2, %v5072_v13  ;;  %5955 = vst [vmem:[#allocation39_spill] sm:$0xff] %v5107_v57  ;;  %v1015_v38 = vrot.slane %v4828_v17, 2  ;;  %v5111_v13 = vsel %vm971_vm3, %v1012_v34, %v1013_v33  ;;  %5956 = vst [vmem:[#allocation40_spill] sm:$0xff] %v5122_v37  ;;  %v1023_v34 = vrot.slane %v4879_v55, 2 }
  0x4f   : > { %3851 = vmatprep.mubr.msk.f32.mxu1 %vm385_vm2, %v5078_v14  ;;  %4077 = vmatprep.mubr.msk.f32.mxu0 %vm385_vm2, %v5087_v39  ;;  %v1017_v14 = vrot.slane %v4848_v28, 2  ;;  %v5144_v45 = vsel %vm971_vm3, %v1018_v27, %v1020_v49 }
  0x50   : > { %v5127_v17 = vsel %vm971_vm3, %v1013_v33, %v1015_v38  ;;  %v5148_v0 = vsel %vm971_vm3, %v1022_v62, %v1023_v34  ;;  %v1027_v38 = vrot.slane %v4908_v22, 2  ;;  %v1028_v33 = vrot.slane %v4911_v24, 2 }
  0x51   : > { %v5131_v61 = vsel %vm971_vm3, %v1017_v14, %v1018_v27  ;;  %v1025_v14 = vrot.slane %v4900_v16, 2  ;;  %v1030_v27 = vrot.slane %v4942_v56, 2  ;;  %v1032_v62 = vrot.slane %v4950_v8, 2 }
  0x52   : > { %3852 = vmatmul.mubr.msk.f32.gmra.mrb[28].mxu1 %vm385_vm2, %v5098_v2  ;;  %4078 = vmatmul.mubr.msk.f32.gmra.mrb[12].mxu0 %vm385_vm2, %v5104_v41  ;;  %v5172_v49 = vsel %vm971_vm3, %v1027_v38, %v1028_v33  ;;  %v1037_v38 = vrot.slane %v4987_v46, 2  ;;  %v1048_v2 = vrot.slane %v5060_v44, 2 }
  0x53   : > { %3854 = vmatprep.mubr.msk.f32.mxu1 %vm385_vm2, %v5107_v57  ;;  %4080 = vmatprep.mubr.msk.f32.mxu0 %vm385_vm2, %v5111_v13  ;;  %v5168_v16 = vsel %vm971_vm3, %v1023_v34, %v1025_v14  ;;  %5957 = vst [vmem:[#allocation41_spill] sm:$0xff] %v5172_v49  ;;  %v5187_v56 = vsel %vm971_vm3, %v1028_v33, %v1030_v27  ;;  %v1035_v34 = vrot.slane %v4979_v52, 2  ;;  %v1040_v33 = vrot.slane %v5014_v36, 2 }
  0x54   : > { %v1043_v57 = vrot.slane %v5025_v54, 2 }
  0x56   : > { %3855 = vmatmul.mubr.msk.f32.gmra.mrb[30].mxu1 %vm385_vm2, %v5122_v37  ;;  %4081 = vmatmul.mubr.msk.f32.gmra.mrb[14].mxu0 %vm385_vm2, %v5127_v17  ;;  %v1038_v37 = vrot.slane %v4990_v12, 2 }
  0x57   : > { %3859 = vmatprep.mubr.msk.f32.mxu1 %vm385_vm2, %v4633_v4  ;;  %4083 = vmatprep.mubr.msk.f32.mxu0 %vm385_vm2, %v5131_v61 }
  0x58   : > { %v5208_v27 = vsel %vm971_vm3, %v1037_v38, %v1038_v37  ;;  %v5221_v36 = vsel %vm971_vm3, %v1038_v37, %v1040_v33  ;;  %v1047_v38 = vrot.slane %v5057_v40, 2  ;;  %v1050_v37 = vrot.slane %v5084_v48, 2 }
  0x59   : > { %5959 = vst [vmem:[#allocation43_spill] sm:$0xff] %v5208_v27  ;;  %5960 = vst [vmem:[#allocation44_spill] sm:$0xff] %v5221_v36 }
  0x5a   : > { %3860 = vmatmul.mubr.msk.f32.vlgmr.msra.gmra.mrb[0].mxu1 %vm385_vm2, %v4636_v5  ;;  %4084 = vmatmul.mubr.msk.f32.gmra.mrb[16].mxu0 %vm385_vm2, %v5144_v45  ;;  %v5248_v33 = vsel %vm971_vm3, %v1047_v38, %v1048_v2  ;;  %v5264_v48 = vsel %vm971_vm3, %v1048_v2, %v1050_v37  ;;  %v973_v38 = vrot.slane %v4636_v5, 2  ;;  %v975_v37 = vrot.slane %v4648_v11, 2  ;;  %v5967_v5 = vld [vmem:[#allocation20_spill] sm:$0xff]  ;;  %v5968_v11 = vld [vmem:[#allocation22_spill] sm:$0xff] }
  0x5b   : > { %3908 = vmatpush3.msk.msra.mxu1 %vm450_vm0, %v4705_v35  ;;  %3862 = vmatprep.mubr.msk.f32.mxu1 %vm385_vm2, %v4639_v6  ;;  %v1033_v35 = vrot.slane %v4953_v10, 2  ;;  %v5235_v6 = vld [vmem:[%s4630_s27 + $0x188] sm:$0xff]  ;;  %5963 = vst [vmem:[#allocation47_spill] sm:$0xff] %v5248_v33  ;;  %5964 = vst [vmem:[#allocation48_spill] sm:$0xff] %v5264_v48 }
  0x5c   : > { %4086 = vmatprep.mubr.msk.f32.mxu0 %vm385_vm2, %v5148_v0  ;;  %3957 = vmatprep.subr.msk.mxu1 %vm450_vm0, %v5157_v23 }
  0x5d   : > { %v5191_v14 = vsel %vm971_vm3, %v1032_v62, %v1033_v35  ;;  %v5204_v52 = vsel %vm971_vm3, %v1033_v35, %v1035_v34  ;;  %v1042_v62 = vrot.slane %v5022_v20, 2  ;;  %v1045_v35 = vrot.slane %v5049_v60, 2 }
  0x5e   : > { %3863 = vmatmul.mubr.msk.f32.gmra.mrb[2].mxu1 %vm385_vm2, %v4644_v9  ;;  %4087 = vmatmul.mubr.msk.f32.gmra.mrb[18].mxu0 %vm385_vm2, %v5168_v16  ;;  %5958 = vst [vmem:[#allocation42_spill] sm:$0xff] %v5204_v52  ;;  %v5232_v9 = vld [vmem:[%s4630_s27 + $0x180] sm:$0xff] }
  0x5f   : > { %3865 = vmatprep.mubr.msk.f32.mxu1 %vm385_vm2, %v4656_v15  ;;  %4089 = vmatprep.mubr.msk.f32.mxu0 %vm385_vm2, %v5172_v49  ;;  %v5225_v34 = vsel %vm971_vm3, %v1042_v62, %v1043_v57  ;;  %v5244_v60 = vsel %vm971_vm3, %v1043_v57, %v1045_v35  ;;  %v1918_v62 = vrot.slane %v5232_v9, 2 }
  0x60   : > { %5961 = vst [vmem:[#allocation45_spill] sm:$0xff] %v5225_v34  ;;  %5962 = vst [vmem:[#allocation46_spill] sm:$0xff] %v5244_v60 }
  0x62   : > { %3866 = vmatmul.mubr.msk.f32.gmra.mrb[4].mxu1 %vm385_vm2, %v4661_v18  ;;  %4090 = vmatmul.mubr.msk.f32.gmra.mrb[20].mxu0 %vm385_vm2, %v5187_v56 }
  0x63   : > { %3868 = vmatprep.mubr.msk.f32.mxu1 %vm385_vm2, %v4673_v25  ;;  %4092 = vmatprep.mubr.msk.f32.mxu0 %vm385_vm2, %v5191_v14 }
  0x66   : > { %3869 = vmatmul.mubr.msk.f32.gmra.mrb[6].mxu1 %vm385_vm2, %v4676_v26  ;;  %4093 = vmatmul.mubr.msk.f32.gmra.mrb[22].mxu0 %vm385_vm2, %v5204_v52  ;;  %v5253_v52 = vld [vmem:[%s4630_s27 + $0x190] sm:$0x3] }
  0x67   : > { %3871 = vmatprep.mubr.msk.f32.mxu1 %vm385_vm2, %v4687_v31  ;;  %4095 = vmatprep.mubr.msk.f32.mxu0 %vm385_vm2, %v5208_v27  ;;  %v1919_v27 = vrot.slane %v5235_v6, 2  ;;  %v1921_v57 = vrot.slane %v5253_v52, 2 }
  0x69   : > { %v5268_v35 = vsel %vm971_vm3, %v1918_v62, %v1919_v27  ;;  %v5279_v2 = vsel %vm971_vm3, %v1919_v27, %v1921_v57  ;;  %v5294_v27 = vld [vmem:[%s5842_s1 + $0x20] sm:$0x7] }
  0x6a   : > { %3872 = vmatmul.mubr.msk.f32.gmra.mrb[8].mxu1 %vm385_vm2, %v4690_v32  ;;  %4096 = vmatmul.mubr.msk.f32.gmra.mrb[24].mxu0 %vm385_vm2, %v5221_v36  ;;  %5965 = vst [vmem:[#allocation49_spill] sm:$0xff] %v5268_v35  ;;  %5966 = vst [vmem:[#allocation50_spill] sm:$0xff] %v5279_v2  ;;  %v5972_v57 = vld [vmem:[#allocation30_spill] sm:$0xff] }
  0x6b   : > { %3874 = vmatprep.mubr.msk.f32.mxu1 %vm385_vm2, %v4727_v42  ;;  %4098 = vmatprep.mubr.msk.f32.mxu0 %vm385_vm2, %v5225_v34 }
  0x6e   : > { %3875 = vmatmul.mubr.msk.f32.gmra.mrb[10].mxu1 %vm385_vm2, %v4730_v43  ;;  %4099 = vmatmul.mubr.msk.f32.gmra.mrb[26].mxu0 %vm385_vm2, %v5244_v60 }
  0x6f   : > { %3877 = vmatprep.mubr.msk.f32.mxu1 %vm385_vm2, %v4755_v50  ;;  %4101 = vmatprep.mubr.msk.f32.mxu0 %vm385_vm2, %v5248_v33 }
  0x72   : > { %3878 = vmatmul.mubr.msk.f32.gmra.mrb[12].mxu1 %vm385_vm2, %v4758_v51  ;;  %4102 = vmatmul.mubr.msk.f32.gmra.mrb[28].mxu0 %vm385_vm2, %v5264_v48 }
  0x73   : > { %3880 = vmatprep.mubr.msk.f32.mxu1 %vm385_vm2, %v4781_v58  ;;  %4104 = vmatprep.mubr.msk.f32.mxu0 %vm385_vm2, %v5268_v35  ;;  %v5977_v35 = vld [vmem:[#allocation6_spill] sm:$0xff] }
  0x76   : > { %3881 = vmatmul.mubr.msk.f32.gmra.mrb[14].mxu1 %vm385_vm2, %v4784_v59  ;;  %4105 = vmatmul.mubr.msk.f32.gmra.mrb[30].mxu0 %vm385_vm2, %v5279_v2  ;;  %v5976_v2 = vld [vmem:[#allocation5_spill] sm:$0xff] }
  0x77   : > { %3883 = vmatprep.mubr.msk.f32.mxu1 %vm385_vm2, %v4807_v3  ;;  %4109 = vmatprep.mubr.msk.f32.mxu0 %vm385_vm2, %v4656_v15 }
  0x7a   : > { %3884 = vmatmul.mubr.msk.f32.gmra.mrb[16].mxu1 %vm385_vm2, %v4810_v7  ;;  %4110 = vmatmul.mubr.msk.f32.vlgmr.msra.gmra.mrb[0].mxu0 %vm385_vm2, %v4661_v18 }
  0x7b   : > { %3886 = vmatprep.mubr.msk.f32.mxu1 %vm385_vm2, %v4848_v28  ;;  %4158 = vmatpush3.msk.msra.mxu0 %vm450_vm0, %v4918_v30  ;;  %v972_v30 = vrot.slane %v4633_v4, 2  ;;  %v976_v4 = vsel %vm971_vm3, %v973_v38, %v975_v37  ;;  %v5974_v37 = vld [vmem:[#allocation36_spill] sm:$0xff] }
  0x7c   : > { %4112 = vmatprep.mubr.msk.f32.mxu0 %vm385_vm2, %v4673_v25  ;;  %4207 = vmatprep.subr.msk.mxu0 %vm450_vm0, %v5294_v27 }
  0x7d   : > { %v974_v62 = vsel %vm971_vm3, %v972_v30, %v973_v38  ;;  %v5973_v30 = vld [vmem:[#allocation32_spill] sm:$0xff]  ;;  %v5418_v38 = vld [vmem:[%s4630_s27 + $0x198] sm:$0xff] }
  0x7e   : > { %3887 = vmatmul.mubr.msk.f32.gmra.mrb[18].mxu1 %vm385_vm2, %v4851_v29  ;;  %4113 = vmatmul.mubr.msk.f32.gmra.mrb[2].mxu0 %vm385_vm2, %v4676_v26 }
  0x7f   : > { %3889 = vmatprep.mubr.msk.f32.mxu1 %vm385_vm2, %v4876_v53  ;;  %4115 = vmatprep.mubr.msk.f32.mxu0 %vm385_vm2, %v4687_v31 }
  0x82   : > { %3890 = vmatmul.mubr.msk.f32.gmra.mrb[20].mxu1 %vm385_vm2, %v4879_v55  ;;  %4116 = vmatmul.mubr.msk.f32.gmra.mrb[4].mxu0 %vm385_vm2, %v4690_v32 }
  0x83   : > { %3892 = vmatprep.mubr.msk.f32.mxu1 %vm385_vm2, %v4908_v22  ;;  %4118 = vmatprep.mubr.msk.f32.mxu0 %vm385_vm2, %v4727_v42 }
  0x86   : > { %3893 = vmatmul.mubr.msk.f32.gmra.mrb[22].mxu1 %vm385_vm2, %v4911_v24  ;;  %4119 = vmatmul.mubr.msk.f32.gmra.mrb[6].mxu0 %vm385_vm2, %v4730_v43 }
  0x87   : > { %3895 = vmatprep.mubr.msk.f32.mxu1 %vm385_vm2, %v4950_v8  ;;  %4121 = vmatprep.mubr.msk.f32.mxu0 %vm385_vm2, %v4755_v50 }
  0x8a   : > { %3896 = vmatmul.mubr.msk.f32.gmra.mrb[24].mxu1 %vm385_vm2, %v4953_v10  ;;  %4122 = vmatmul.mubr.msk.f32.gmra.mrb[8].mxu0 %vm385_vm2, %v4758_v51 }
  0x8b   : > { %3898 = vmatprep.mubr.msk.f32.mxu1 %vm385_vm2, %v4987_v46  ;;  %4124 = vmatprep.mubr.msk.f32.mxu0 %vm385_vm2, %v4781_v58 }
  0x8e   : > { %3899 = vmatmul.mubr.msk.f32.gmra.mrb[26].mxu1 %vm385_vm2, %v4990_v12  ;;  %4125 = vmatmul.mubr.msk.f32.gmra.mrb[10].mxu0 %vm385_vm2, %v4784_v59 }
  0x8f   : > { %3901 = vmatprep.mubr.msk.f32.mxu1 %vm385_vm2, %v5022_v20  ;;  %4127 = vmatprep.mubr.msk.f32.mxu0 %vm385_vm2, %v4807_v3 }
  0x92   : > { %3902 = vmatmul.mubr.msk.f32.gmra.mrb[28].mxu1 %vm385_vm2, %v5025_v54  ;;  %4128 = vmatmul.mubr.msk.f32.gmra.mrb[12].mxu0 %vm385_vm2, %v4810_v7 }
  0x93   : > { %3904 = vmatprep.mubr.msk.f32.mxu1 %vm385_vm2, %v5057_v40  ;;  %4130 = vmatprep.mubr.msk.f32.mxu0 %vm385_vm2, %v4848_v28 }
  0x96   : > { %3905 = vmatmul.mubr.msk.f32.gmra.mrb[30].mxu1 %vm385_vm2, %v5060_v44  ;;  %4131 = vmatmul.mubr.msk.f32.gmra.mrb[14].mxu0 %vm385_vm2, %v4851_v29 }
  0x97   : > { %3909 = vmatprep.mubr.msk.f32.mxu1 %vm385_vm2, %v974_v62  ;;  %4133 = vmatprep.mubr.msk.f32.mxu0 %vm385_vm2, %v4876_v53  ;;  %v5429_v62 = vld [vmem:[%s4630_s27 + $0x1a0] sm:$0xff] }
  0x9a   : > { %3910 = vmatmul.mubr.msk.f32.vlgmr.msra.gmra.mrb[0].mxu1 %vm385_vm2, %v976_v4  ;;  %4134 = vmatmul.mubr.msk.f32.gmra.mrb[16].mxu0 %vm385_vm2, %v4879_v55  ;;  %v5975_v4 = vld [vmem:[#allocation4_spill] sm:$0xff] }
  0x9b   : > { %3958 = vmatpush3.msk.msra.mxu1 %vm450_vm0, %v5157_v23  ;;  %3912 = vmatprep.mubr.msk.f32.mxu1 %vm385_vm2, %v4871_v47  ;;  %v5969_v47 = vld [vmem:[#allocation24_spill] sm:$0xff] }
  0x9c   : > { %4136 = vmatprep.mubr.msk.f32.mxu0 %vm385_vm2, %v4908_v22  ;;  %4257 = vmatprep.subr.msk.mxu1 %vm450_vm0, %v4608_v1  ;;  %v5971_v23 = vld [vmem:[#allocation28_spill] sm:$0xff] }
  0x9e   : > { %3913 = vmatmul.mubr.msk.f32.gmra.mrb[2].mxu1 %vm385_vm2, %v4892_v63  ;;  %4137 = vmatmul.mubr.msk.f32.gmra.mrb[18].mxu0 %vm385_vm2, %v4911_v24  ;;  %v5970_v63 = vld [vmem:[#allocation26_spill] sm:$0xff] }
  0x9f   : > { %3915 = vmatprep.mubr.msk.f32.mxu1 %vm385_vm2, %v4903_v21  ;;  %4139 = vmatprep.mubr.msk.f32.mxu0 %vm385_vm2, %v4950_v8 }
  0xa2   : > { %3916 = vmatmul.mubr.msk.f32.gmra.mrb[4].mxu1 %vm385_vm2, %v5967_v5  ;;  %4140 = vmatmul.mubr.msk.f32.gmra.mrb[20].mxu0 %vm385_vm2, %v4953_v10 }
  0xa3   : > { %3918 = vmatprep.mubr.msk.f32.mxu1 %vm385_vm2, %v5968_v11  ;;  %4142 = vmatprep.mubr.msk.f32.mxu0 %vm385_vm2, %v4987_v46 }
  0xa6   : > { %3919 = vmatmul.mubr.msk.f32.gmra.mrb[6].mxu1 %vm385_vm2, %v5969_v47  ;;  %4143 = vmatmul.mubr.msk.f32.gmra.mrb[22].mxu0 %vm385_vm2, %v4990_v12 }
  0xa7   : > { %3921 = vmatprep.mubr.msk.f32.mxu1 %vm385_vm2, %v5970_v63  ;;  %4145 = vmatprep.mubr.msk.f32.mxu0 %vm385_vm2, %v5022_v20 }
  0xaa   : > { %3922 = vmatmul.mubr.msk.f32.gmra.mrb[8].mxu1 %vm385_vm2, %v5971_v23  ;;  %4146 = vmatmul.mubr.msk.f32.gmra.mrb[24].mxu0 %vm385_vm2, %v5025_v54 }
  0xab   : > { %3924 = vmatprep.mubr.msk.f32.mxu1 %vm385_vm2, %v5972_v57  ;;  %4148 = vmatprep.mubr.msk.f32.mxu0 %vm385_vm2, %v5057_v40 }
  0xae   : > { %3925 = vmatmul.mubr.msk.f32.gmra.mrb[10].mxu1 %vm385_vm2, %v5973_v30  ;;  %4149 = vmatmul.mubr.msk.f32.gmra.mrb[26].mxu0 %vm385_vm2, %v5060_v44  ;;  %v5978_v44 = vld [vmem:[#allocation7_spill] sm:$0xff] }
  0xaf   : > { %3927 = vmatprep.mubr.msk.f32.mxu1 %vm385_vm2, %v5052_v19  ;;  %4151 = vmatprep.mubr.msk.f32.mxu0 %vm385_vm2, %v5232_v9 }
  0xb2   : > { %3928 = vmatmul.mubr.msk.f32.gmra.mrb[12].mxu1 %vm385_vm2, %v5974_v37  ;;  %4152 = vmatmul.mubr.msk.f32.gmra.mrb[28].mxu0 %vm385_vm2, %v5235_v6 }
  0xb3   : > { %3930 = vmatprep.mubr.msk.f32.mxu1 %vm385_vm2, %v5087_v39  ;;  %4154 = vmatprep.mubr.msk.f32.mxu0 %vm385_vm2, %v5418_v38 }
  0xb6   : > { %3931 = vmatmul.mubr.msk.f32.gmra.mrb[14].mxu1 %vm385_vm2, %v5104_v41  ;;  %4155 = vmatmul.mubr.msk.f32.gmra.mrb[30].mxu0 %vm385_vm2, %v5429_v62 }
  0xb7   : > { %3933 = vmatprep.mubr.msk.f32.mxu1 %vm385_vm2, %v5111_v13  ;;  %4159 = vmatprep.mubr.msk.f32.mxu0 %vm385_vm2, %v5975_v4  ;;  %v5979_v4 = vld [vmem:[#allocation8_spill] sm:$0xff] }
  0xba   : > { %3934 = vmatmul.mubr.msk.f32.gmra.mrb[16].mxu1 %vm385_vm2, %v5127_v17  ;;  %4160 = vmatmul.mubr.msk.f32.vlgmr.msra.gmra.mrb[0].mxu0 %vm385_vm2, %v5976_v2  ;;  %v5980_v2 = vld [vmem:[#allocation9_spill] sm:$0xff] }
  0xbb   : > { %3936 = vmatprep.mubr.msk.f32.mxu1 %vm385_vm2, %v5131_v61  ;;  %4208 = vmatpush3.msk.msra.mxu0 %vm450_vm0, %v5294_v27  ;;  %v5983_v27 = vld [vmem:[#allocation12_spill] sm:$0xff] }
  0xbc   : > { %4162 = vmatprep.mubr.msk.f32.mxu0 %vm385_vm2, %v5977_v35  ;;  %v5981_v35 = vld [vmem:[#allocation10_spill] sm:$0xff] }
  0xbe   : > { %3937 = vmatmul.mubr.msk.f32.gmra.mrb[18].mxu1 %vm385_vm2, %v5144_v45  ;;  %4163 = vmatmul.mubr.msk.f32.gmra.mrb[2].mxu0 %vm385_vm2, %v5978_v44  ;;  %v5982_v44 = vld [vmem:[#allocation11_spill] sm:$0xff] }
  0xbf   : > { %3939 = vmatprep.mubr.msk.f32.mxu1 %vm385_vm2, %v5148_v0  ;;  %4165 = vmatprep.mubr.msk.f32.mxu0 %vm385_vm2, %v5979_v4  ;;  %v5984_v4 = vld [vmem:[#allocation42_spill] sm:$0xff] }
  0xc2   : > { %3940 = vmatmul.mubr.msk.f32.gmra.mrb[20].mxu1 %vm385_vm2, %v5168_v16  ;;  %4166 = vmatmul.mubr.msk.f32.gmra.mrb[4].mxu0 %vm385_vm2, %v5980_v2  ;;  %v5985_v2 = vld [vmem:[#allocation13_spill] sm:$0xff] }
  0xc3   : > { %3942 = vmatprep.mubr.msk.f32.mxu1 %vm385_vm2, %v5172_v49  ;;  %4168 = vmatprep.mubr.msk.f32.mxu0 %vm385_vm2, %v5981_v35  ;;  %v5986_v49 = vld [vmem:[#allocation43_spill] sm:$0xff]  ;;  %v5987_v35 = vld [vmem:[#allocation14_spill] sm:$0xff] }
  0xc6   : > { %3943 = vmatmul.mubr.msk.f32.gmra.mrb[22].mxu1 %vm385_vm2, %v5187_v56  ;;  %4169 = vmatmul.mubr.msk.f32.gmra.mrb[6].mxu0 %vm385_vm2, %v5982_v44  ;;  %v5988_v44 = vld [vmem:[#allocation15_spill] sm:$0xff] }
  0xc7   : > { %3945 = vmatprep.mubr.msk.f32.mxu1 %vm385_vm2, %v5191_v14  ;;  %4171 = vmatprep.mubr.msk.f32.mxu0 %vm385_vm2, %v5983_v27  ;;  %v5989_v27 = vld [vmem:[#allocation16_spill] sm:$0xff] }
  0xca   : > { %3946 = vmatmul.mubr.msk.f32.gmra.mrb[24].mxu1 %vm385_vm2, %v5984_v4  ;;  %4172 = vmatmul.mubr.msk.f32.gmra.mrb[8].mxu0 %vm385_vm2, %v5985_v2  ;;  %v5990_v2 = vld [vmem:[#allocation17_spill] sm:$0xff] }
  0xcb   : > { %3948 = vmatprep.mubr.msk.f32.mxu1 %vm385_vm2, %v5986_v49  ;;  %4174 = vmatprep.mubr.msk.f32.mxu0 %vm385_vm2, %v5987_v35  ;;  %v5991_v35 = vld [vmem:[#allocation18_spill] sm:$0xff] }
  0xce   : > { %3949 = vmatmul.mubr.msk.f32.gmra.mrb[26].mxu1 %vm385_vm2, %v5221_v36  ;;  %4175 = vmatmul.mubr.msk.f32.gmra.mrb[10].mxu0 %vm385_vm2, %v5988_v44  ;;  %v5992_v44 = vld [vmem:[#allocation19_spill] sm:$0xff] }
  0xcf   : > { %3951 = vmatprep.mubr.msk.f32.mxu1 %vm385_vm2, %v5225_v34  ;;  %4177 = vmatprep.mubr.msk.f32.mxu0 %vm385_vm2, %v5989_v27  ;;  %v5993_v34 = vld [vmem:[#allocation2_spill] sm:$0xff]  ;;  %v5994_v27 = vld [vmem:[#allocation21_spill] sm:$0xff]  ;;  %v5556_v36 = vld [vmem:[%s4630_s27 + $0x1a8] sm:$0x3] }
  0xd2   : > { %3952 = vmatmul.mubr.msk.f32.gmra.mrb[28].mxu1 %vm385_vm2, %v5244_v60  ;;  %4178 = vmatmul.mubr.msk.f32.gmra.mrb[12].mxu0 %vm385_vm2, %v5990_v2  ;;  %v5995_v60 = vld [vmem:[#allocation3_spill] sm:$0xff] }
  0xd3   : > { %3954 = vmatprep.mubr.msk.f32.mxu1 %vm385_vm2, %v5248_v33  ;;  %4180 = vmatprep.mubr.msk.f32.mxu0 %vm385_vm2, %v5991_v35  ;;  %v5996_v2 = vld [vmem:[#allocation23_spill] sm:$0xff]  ;;  %v6004_v33 = vld [vmem:[#allocation38_spill] sm:$0xff] }
  0xd6   : > { %3955 = vmatmul.mubr.msk.f32.gmra.mrb[30].mxu1 %vm385_vm2, %v5264_v48  ;;  %4181 = vmatmul.mubr.msk.f32.gmra.mrb[14].mxu0 %vm385_vm2, %v5992_v44  ;;  %v5997_v48 = vld [vmem:[#allocation25_spill] sm:$0xff] }
  0xd7   : > { %3959 = vmatprep.mubr.msk.f32.mxu1 %vm385_vm2, %v5993_v34  ;;  %4183 = vmatprep.mubr.msk.f32.mxu0 %vm385_vm2, %v5994_v27  ;;  %v5998_v34 = vld [vmem:[#allocation27_spill] sm:$0xff] }
  0xda   : > { %3960 = vmatmul.mubr.msk.f32.vlgmr.msra.gmra.mrb[0].mxu1 %vm385_vm2, %v5995_v60  ;;  %4184 = vmatmul.mubr.msk.f32.gmra.mrb[16].mxu0 %vm385_vm2, %v5996_v2  ;;  %v5999_v60 = vld [vmem:[#allocation29_spill] sm:$0xff] }
  0xdb   : > { %4258 = vmatpush3.msk.msra.mxu1 %vm450_vm0, %v4608_v1  ;;  %3962 = vmatprep.mubr.msk.f32.mxu1 %vm385_vm2, %v4656_v15  ;;  %v6000_v1 = vld [vmem:[#allocation31_spill] sm:$0xff]  ;;  %v6001_v15 = vld [vmem:[#allocation33_spill] sm:$0xff] }
  0xdc   : > { %4186 = vmatprep.mubr.msk.f32.mxu0 %vm385_vm2, %v5997_v48 }
  0xde   : > { %3963 = vmatmul.mubr.msk.f32.gmra.mrb[2].mxu1 %vm385_vm2, %v4661_v18  ;;  %4187 = vmatmul.mubr.msk.f32.gmra.mrb[18].mxu0 %vm385_vm2, %v5998_v34  ;;  %v6002_v18 = vld [vmem:[#allocation35_spill] sm:$0xff] }
  0xdf   : > { %3965 = vmatprep.mubr.msk.f32.mxu1 %vm385_vm2, %v4673_v25  ;;  %4189 = vmatprep.mubr.msk.f32.mxu0 %vm385_vm2, %v5999_v60  ;;  %v6003_v25 = vld [vmem:[#allocation37_spill] sm:$0xff] }
  0xe2   : > { %3966 = vmatmul.mubr.msk.f32.gmra.mrb[4].mxu1 %vm385_vm2, %v4676_v26  ;;  %4190 = vmatmul.mubr.msk.f32.gmra.mrb[20].mxu0 %vm385_vm2, %v6000_v1  ;;  %v1647_v26 = vrot.slane %v5232_v9, 1 }
  0xe3   : > { %3968 = vmatprep.mubr.msk.f32.mxu1 %vm385_vm2, %v4687_v31  ;;  %4192 = vmatprep.mubr.msk.f32.mxu0 %vm385_vm2, %v6001_v15  ;;  %v1648_v31 = vrot.slane %v5235_v6, 1 }
  0xe5   : > { %v5553_v15 = vsel %vm302_vm1, %v1647_v26, %v1648_v31 }
  0xe6   : > { %3969 = vmatmul.mubr.msk.f32.gmra.mrb[6].mxu1 %vm385_vm2, %v4690_v32  ;;  %4193 = vmatmul.mubr.msk.f32.gmra.mrb[22].mxu0 %vm385_vm2, %v6002_v18  ;;  %v6005_v32 = vld [vmem:[#allocation39_spill] sm:$0xff]  ;;  %v2459_v18 = vrot.slane %v5429_v62, 1 }
  0xe7   : > { %3971 = vmatprep.mubr.msk.f32.mxu1 %vm385_vm2, %v4727_v42  ;;  %4195 = vmatprep.mubr.msk.f32.mxu0 %vm385_vm2, %v6003_v25  ;;  %v1650_v42 = vrot.slane %v5253_v52, 1  ;;  %v2458_v25 = vrot.slane %v5418_v38, 1  ;;  %v2461_v52 = vrot.slane %v5556_v36, 1 }
  0xe9   : > { %v2460_v26 = vsel %vm302_vm1, %v2458_v25, %v2459_v18 }
  0xea   : > { %3972 = vmatmul.mubr.msk.f32.gmra.mrb[8].mxu1 %vm385_vm2, %v4730_v43  ;;  %4196 = vmatmul.mubr.msk.f32.gmra.mrb[24].mxu0 %vm385_vm2, %v6004_v33  ;;  %v6006_v43 = vld [vmem:[#allocation40_spill] sm:$0xff] }
  0xeb   : > { %3974 = vmatprep.mubr.msk.f32.mxu1 %vm385_vm2, %v4755_v50  ;;  %4198 = vmatprep.mubr.msk.f32.mxu0 %vm385_vm2, %v6005_v32  ;;  %v5567_v50 = vsel %vm302_vm1, %v1648_v31, %v1650_v42 }
  0xee   : > { %3975 = vmatmul.mubr.msk.f32.gmra.mrb[10].mxu1 %vm385_vm2, %v4758_v51  ;;  %4199 = vmatmul.mubr.msk.f32.gmra.mrb[26].mxu0 %vm385_vm2, %v6006_v43  ;;  %v2462_v51 = vsel %vm302_vm1, %v2459_v18, %v2461_v52 }
  0xef   : > { %3977 = vmatprep.mubr.msk.f32.mxu1 %vm385_vm2, %v4781_v58  ;;  %4201 = vmatprep.mubr.msk.f32.mxu0 %vm385_vm2, %v5553_v15  ;;  %v6010_v58 = vld [vmem:[#allocation33_spill] sm:$0xff] }
  0xf2   : > { %3978 = vmatmul.mubr.msk.f32.gmra.mrb[12].mxu1 %vm385_vm2, %v4784_v59  ;;  %4202 = vmatmul.mubr.msk.f32.gmra.mrb[28].mxu0 %vm385_vm2, %v5567_v50  ;;  %v6011_v59 = vld [vmem:[#allocation45_spill] sm:$0xff] }
  0xf3   : > { %3980 = vmatprep.mubr.msk.f32.mxu1 %vm385_vm2, %v4807_v3  ;;  %4204 = vmatprep.mubr.msk.f32.mxu0 %vm385_vm2, %v2460_v26  ;;  %v6012_v3 = vld [vmem:[#allocation35_spill] sm:$0xff] }
  0xf6   : > { %3981 = vmatmul.mubr.msk.f32.gmra.mrb[14].mxu1 %vm385_vm2, %v4810_v7  ;;  %4205 = vmatmul.mubr.msk.f32.gmra.mrb[30].mxu0 %vm385_vm2, %v2462_v51  ;;  %v6013_v7 = vld [vmem:[#allocation46_spill] sm:$0xff] }
  0xf7   : > { %3983 = vmatprep.mubr.msk.f32.mxu1 %vm385_vm2, %v4848_v28  ;;  %4209 = vmatprep.mubr.msk.f32.mxu0 %vm385_vm2, %v4903_v21  ;;  %v2729_v28 = vrot.slane %v5418_v38, 2  ;;  %v2732_v21 = vrot.slane %v5556_v36, 2 }
  0xfa   : > { %3984 = vmatmul.mubr.msk.f32.gmra.mrb[16].mxu1 %vm385_vm2, %v4851_v29  ;;  %4210 = vmatmul.mubr.msk.f32.vlgmr.msra.gmra.mrb[0].mxu0 %vm385_vm2, %v5967_v5  ;;  %v2730_v29 = vrot.slane %v5429_v62, 2 }
  0xfb   : > { %3986 = vmatprep.mubr.msk.f32.mxu1 %vm385_vm2, %v4876_v53  ;;  %4212 = vmatprep.mubr.msk.f32.mxu0 %vm385_vm2, %v5968_v11  ;;  %v6016_v53 = vld [vmem:[#allocation48_spill] sm:$0xff] }
  0xfe   : > { %3987 = vmatmul.mubr.msk.f32.gmra.mrb[18].mxu1 %vm385_vm2, %v4879_v55  ;;  %4213 = vmatmul.mubr.msk.f32.gmra.mrb[2].mxu0 %vm385_vm2, %v5969_v47  ;;  %v6017_v55 = vld [vmem:[#allocation49_spill] sm:$0xff] }
  0xff   : > { %3989 = vmatprep.mubr.msk.f32.mxu1 %vm385_vm2, %v4908_v22  ;;  %4215 = vmatprep.mubr.msk.f32.mxu0 %vm385_vm2, %v5970_v63  ;;  %v6015_v22 = vld [vmem:[#allocation47_spill] sm:$0xff] }
 0x102   : > { %3990 = vmatmul.mubr.msk.f32.gmra.mrb[20].mxu1 %vm385_vm2, %v4911_v24  ;;  %4216 = vmatmul.mubr.msk.f32.gmra.mrb[4].mxu0 %vm385_vm2, %v5971_v23  ;;  %v2731_v24 = vsel %vm971_vm3, %v2729_v28, %v2730_v29 }
 0x103   : > { %3992 = vmatprep.mubr.msk.f32.mxu1 %vm385_vm2, %v4950_v8  ;;  %4218 = vmatprep.mubr.msk.f32.mxu0 %vm385_vm2, %v5972_v57  ;;  %v6014_v8 = vld [vmem:[#allocation37_spill] sm:$0xff] }
 0x106   : > { %3993 = vmatmul.mubr.msk.f32.gmra.mrb[22].mxu1 %vm385_vm2, %v4953_v10  ;;  %4219 = vmatmul.mubr.msk.f32.gmra.mrb[6].mxu0 %vm385_vm2, %v5973_v30  ;;  %v6018_v10 = vld [vmem:[#allocation50_spill] sm:$0xff] }
 0x107   : > { %3995 = vmatprep.mubr.msk.f32.mxu1 %vm385_vm2, %v4987_v46  ;;  %4221 = vmatprep.mubr.msk.f32.mxu0 %vm385_vm2, %v5052_v19  ;;  %v6007_v46 = vld [vmem:[#allocation34_spill] sm:$0xff] }
 0x10a   : > { %3996 = vmatmul.mubr.msk.f32.gmra.mrb[24].mxu1 %vm385_vm2, %v4990_v12  ;;  %4222 = vmatmul.mubr.msk.f32.gmra.mrb[8].mxu0 %vm385_vm2, %v5974_v37  ;;  %v2733_v12 = vsel %vm971_vm3, %v2730_v29, %v2732_v21 }
 0x10b   : > { %3998 = vmatprep.mubr.msk.f32.mxu1 %vm385_vm2, %v5022_v20  ;;  %4224 = vmatprep.mubr.msk.f32.mxu0 %vm385_vm2, %v5087_v39 }
 0x10e   : > { %3999 = vmatmul.mubr.msk.f32.gmra.mrb[26].mxu1 %vm385_vm2, %v5025_v54  ;;  %4225 = vmatmul.mubr.msk.f32.gmra.mrb[10].mxu0 %vm385_vm2, %v5104_v41 }
 0x10f   : > { %4001 = vmatprep.mubr.msk.f32.mxu1 %vm385_vm2, %v5057_v40  ;;  %4227 = vmatprep.mubr.msk.f32.mxu0 %vm385_vm2, %v5111_v13 }
 0x112   : > { %4002 = vmatmul.mubr.msk.f32.gmra.mrb[28].mxu1 %vm385_vm2, %v6007_v46  ;;  %4228 = vmatmul.mubr.msk.f32.gmra.mrb[12].mxu0 %vm385_vm2, %v5127_v17 }
 0x113   : > { %4004 = vmatprep.mubr.msk.f32.mxu1 %vm385_vm2, %v5232_v9  ;;  %4230 = vmatprep.mubr.msk.f32.mxu0 %vm385_vm2, %v5131_v61  ;;  %v6008_v9 = vld [vmem:[#allocation41_spill] sm:$0xff] }
 0x116   : > { %4005 = vmatmul.mubr.msk.f32.gmra.mrb[30].mxu1 %vm385_vm2, %v5235_v6  ;;  %4231 = vmatmul.mubr.msk.f32.gmra.mrb[14].mxu0 %vm385_vm2, %v5144_v45  ;;  %v6009_v6 = vld [vmem:[#allocation44_spill] sm:$0xff] }
 0x117   : > { %4033 = vmatprep.mubr.msk.f32.mxu1 %vm385_vm2, %v5991_v35  ;;  %4233 = vmatprep.mubr.msk.f32.mxu0 %vm385_vm2, %v5148_v0 }
 0x11a   : > { %4034 = vmatmul.mubr.msk.f32.vlgmr.msra.gmra.mrb[16].mxu1 %vm385_vm2, %v5992_v44  ;;  %4234 = vmatmul.mubr.msk.f32.gmra.mrb[16].mxu0 %vm385_vm2, %v5168_v16 }
 0x11b   : > { %4036 = vmatprep.mubr.msk.f32.mxu1 %vm385_vm2, %v5994_v27  ;;  %4236 = vmatprep.mubr.msk.f32.mxu0 %vm385_vm2, %v6008_v9 }
 0x11e   : > { %4037 = vmatmul.mubr.msk.f32.gmra.mrb[18].mxu1 %vm385_vm2, %v5996_v2  ;;  %4237 = vmatmul.mubr.msk.f32.gmra.mrb[18].mxu0 %vm385_vm2, %v5187_v56 }
 0x11f   : > { %4039 = vmatprep.mubr.msk.f32.mxu1 %vm385_vm2, %v5997_v48  ;;  %4239 = vmatprep.mubr.msk.f32.mxu0 %vm385_vm2, %v5191_v14  ;;  %v5724_v48 = vld [vmem:[%s5843_s2] ss:$0 sm:$0xff] }
 0x122   : > { %4040 = vmatmul.mubr.msk.f32.gmra.mrb[20].mxu1 %vm385_vm2, %v5998_v34  ;;  %4240 = vmatmul.mubr.msk.f32.gmra.mrb[20].mxu0 %vm385_vm2, %v5984_v4 }
 0x123   : > { %4042 = vmatprep.mubr.msk.f32.mxu1 %vm385_vm2, %v5999_v60  ;;  %4242 = vmatprep.mubr.msk.f32.mxu0 %vm385_vm2, %v5986_v49 }
 0x126   : > { %4043 = vmatmul.mubr.msk.f32.gmra.mrb[22].mxu1 %vm385_vm2, %v6000_v1  ;;  %4243 = vmatmul.mubr.msk.f32.gmra.mrb[22].mxu0 %vm385_vm2, %v6009_v6 }
 0x127   : > { %4045 = vmatprep.mubr.msk.f32.mxu1 %vm385_vm2, %v6010_v58  ;;  %4245 = vmatprep.mubr.msk.f32.mxu0 %vm385_vm2, %v6011_v59 }
 0x12a   : > { %4046 = vmatmul.mubr.msk.f32.gmra.mrb[24].mxu1 %vm385_vm2, %v6012_v3  ;;  %4246 = vmatmul.mubr.msk.f32.gmra.mrb[24].mxu0 %vm385_vm2, %v6013_v7 }
 0x12b   : > { %4048 = vmatprep.mubr.msk.f32.mxu1 %vm385_vm2, %v6014_v8  ;;  %4248 = vmatprep.mubr.msk.f32.mxu0 %vm385_vm2, %v6015_v22 }
 0x12e   : > { %4049 = vmatmul.mubr.msk.f32.gmra.mrb[26].mxu1 %vm385_vm2, %v6004_v33  ;;  %4249 = vmatmul.mubr.msk.f32.gmra.mrb[26].mxu0 %vm385_vm2, %v6016_v53 }
 0x12f   : > { %4051 = vmatprep.mubr.msk.f32.mxu1 %vm385_vm2, %v6005_v32  ;;  %4251 = vmatprep.mubr.msk.f32.mxu0 %vm385_vm2, %v6017_v55 }
 0x132   : > { %4052 = vmatmul.mubr.msk.f32.gmra.mrb[28].mxu1 %vm385_vm2, %v6006_v43  ;;  %4252 = vmatmul.mubr.msk.f32.gmra.mrb[28].mxu0 %vm385_vm2, %v6018_v10 }
 0x133   : > { %4054 = vmatprep.mubr.msk.f32.mxu1 %vm385_vm2, %v5553_v15  ;;  %4254 = vmatprep.mubr.msk.f32.mxu0 %vm385_vm2, %v2731_v24 }
 0x136   : > { %4055 = vmatmul.mubr.msk.f32.gmra.mrb[30].mxu1 %vm385_vm2, %v5567_v50  ;;  %4255 = vmatmul.mubr.msk.f32.gmra.mrb[30].mxu0 %vm385_vm2, %v2733_v12 }
 0x1ad   : > { %v3961_v40 = vpop.f32.mrb[0].mxu1 }
 0x1ae   : > { %v1455_v20 = vpop.f32.mrb[1].mxu1 }
 0x1b1   : > { %v3964_v54 = vpop.f32.mrb[2].mxu1 }
 0x1b2   : > { %v1465_v19 = vpop.f32.mrb[3].mxu1 }
 0x1b5   : > { %v3967_v13 = vpop.f32.mrb[4].mxu1 }
 0x1b6   : > { %v1475_v39 = vpop.f32.mrb[5].mxu1 }
 0x1b9   : > { %v3970_v41 = vpop.f32.mrb[6].mxu1 }
 0x1ba   : > { %v1485_v17 = vpop.f32.mrb[7].mxu1 }
 0x1bd   : > { %v3973_v61 = vpop.f32.mrb[8].mxu1 }
 0x1be   : > { %v1495_v45 = vpop.f32.mrb[9].mxu1 }
 0x1c1   : > { %v3976_v0 = vpop.f32.mrb[10].mxu1 }
 0x1c2   : > { %v1505_v16 = vpop.f32.mrb[11].mxu1 }
 0x1c5   : > { %v5713_v49 = vpop.f32.mrb[12].mxu1 }
 0x1c6   : > { %v5715_v56 = vpop.f32.mrb[13].mxu1 }
 0x1c9   : > { %v5717_v14 = vpop.f32.mrb[14].mxu1 }
 0x1ca   : > { %v5719_v36 = vpop.f32.mrb[15].mxu1 }
 0x1cd   : > { %v4211_v33 = vpop.f32.mrb[0].mxu0 }
 0x1ce   : > { %v4259_v5 = vadd.f32 %v4211_v33, %v3961_v40  ;;  %v2809_v11 = vpop.f32.mrb[1].mxu0 }
 0x1cf   : > { %v4260_v47 = vadd.f32 %v2809_v11, %v1455_v20 }
 0x1d0   : > { %v3008_v63 = vadd.f32 %v4259_v5, %v5724_v48 }
 0x1d1   : > { %v3007_v23 = vadd.f32 %v4260_v47, %v5724_v48  ;;  %v4214_v57 = vpop.f32.mrb[2].mxu0 }
 0x1d2   : > { %v3040_v30 = vmax.f32 %v3008_v63, 0.0  ;;  %v4261_v38 = vadd.f32 %v4214_v57, %v3964_v54  ;;  %v2819_v37 = vpop.f32.mrb[3].mxu0 }
 0x1d3   : > { %v3039_v62 = vmax.f32 %v3007_v23, 0.0  ;;  %v4262_v4 = vadd.f32 %v2819_v37, %v1465_v19 }
 0x1d4   : > { %3073 = vst.msk [vmem:[%s5731_s20 + $0x8] sm:$0xff] %vm3071_vm4, %v3040_v30  ;;  %v3010_v35 = vadd.f32 %v4261_v38, %v5724_v48 }
 0x1d5   : > { %3072 = vst.msk [vmem:[%s5731_s20] sm:$0xff] %vm3071_vm4, %v3039_v62  ;;  %v3009_v44 = vadd.f32 %v4262_v4, %v5724_v48  ;;  %v4217_v27 = vpop.f32.mrb[4].mxu0 }
 0x1d6   : > { %v3042_v2 = vmax.f32 %v3010_v35, 0.0  ;;  %v4263_v34 = vadd.f32 %v4217_v27, %v3967_v13  ;;  %v2829_v60 = vpop.f32.mrb[5].mxu0 }
 0x1d7   : > { %v3041_v1 = vmax.f32 %v3009_v44, 0.0  ;;  %v4264_v15 = vadd.f32 %v2829_v60, %v1475_v39 }
 0x1d8   : > { %3075 = vst.msk [vmem:[%s5731_s20 + $0x18] sm:$0xff] %vm3071_vm4, %v3042_v2  ;;  %v3012_v18 = vadd.f32 %v4263_v34, %v5724_v48 }
 0x1d9   : > { %3074 = vst.msk [vmem:[%s5731_s20 + $0x10] sm:$0xff] %vm3071_vm4, %v3041_v1  ;;  %v3011_v25 = vadd.f32 %v4264_v15, %v5724_v48  ;;  %v4220_v31 = vpop.f32.mrb[6].mxu0 }
 0x1da   : > { %v3044_v32 = vmax.f32 %v3012_v18, 0.0  ;;  %v4265_v42 = vadd.f32 %v4220_v31, %v3970_v41  ;;  %v2839_v43 = vpop.f32.mrb[7].mxu0 }
 0x1db   : > { %v3043_v50 = vmax.f32 %v3011_v25, 0.0  ;;  %v4266_v52 = vadd.f32 %v2839_v43, %v1485_v17 }
 0x1dc   : > { %3077 = vst.msk [vmem:[%s5731_s20 + $0x28] sm:$0xff] %vm3071_vm4, %v3044_v32  ;;  %v3014_v26 = vadd.f32 %v4265_v42, %v5724_v48 }
 0x1dd   : > { %3076 = vst.msk [vmem:[%s5731_s20 + $0x20] sm:$0xff] %vm3071_vm4, %v3043_v50  ;;  %v3013_v51 = vadd.f32 %v4266_v52, %v5724_v48  ;;  %v4223_v46 = vpop.f32.mrb[8].mxu0 }
 0x1de   : > { %v3046_v9 = vmax.f32 %v3014_v26, 0.0  ;;  %v4267_v6 = vadd.f32 %v4223_v46, %v3973_v61  ;;  %v2849_v58 = vpop.f32.mrb[9].mxu0 }
 0x1df   : > { %v3045_v59 = vmax.f32 %v3013_v51, 0.0  ;;  %v4268_v3 = vadd.f32 %v2849_v58, %v1495_v45 }
 0x1e0   : > { %3079 = vst.msk [vmem:[%s5731_s20 + $0x38] sm:$0xff] %vm3071_vm4, %v3046_v9  ;;  %v3016_v7 = vadd.f32 %v4267_v6, %v5724_v48 }
 0x1e1   : > { %3078 = vst.msk [vmem:[%s5731_s20 + $0x30] sm:$0xff] %vm3071_vm4, %v3045_v59  ;;  %v3015_v8 = vadd.f32 %v4268_v3, %v5724_v48  ;;  %v4226_v22 = vpop.f32.mrb[10].mxu0 }
 0x1e2   : > { %v3048_v28 = vmax.f32 %v3016_v7, 0.0  ;;  %v4269_v29 = vadd.f32 %v4226_v22, %v3976_v0  ;;  %v2859_v53 = vpop.f32.mrb[11].mxu0 }
 0x1e3   : > { %v3047_v55 = vmax.f32 %v3015_v8, 0.0  ;;  %v4270_v21 = vadd.f32 %v2859_v53, %v1505_v16 }
 0x1e4   : > { %3081 = vst.msk [vmem:[%s5731_s20 + $0x48] sm:$0xff] %vm3071_vm4, %v3048_v28  ;;  %v3018_v24 = vadd.f32 %v4269_v29, %v5724_v48 }
 0x1e5   : > { %3080 = vst.msk [vmem:[%s5731_s20 + $0x40] sm:$0xff] %vm3071_vm4, %v3047_v55  ;;  %v3017_v10 = vadd.f32 %v4270_v21, %v5724_v48  ;;  %v4229_v12 = vpop.f32.mrb[12].mxu0 }
 0x1e6   : > { %v3050_v40 = vmax.f32 %v3018_v24, 0.0  ;;  %v4271_v20 = vadd.f32 %v4229_v12, %v5713_v49  ;;  %v2869_v54 = vpop.f32.mrb[13].mxu0 }
 0x1e7   : > { %v3049_v19 = vmax.f32 %v3017_v10, 0.0  ;;  %v4272_v13 = vadd.f32 %v2869_v54, %v5715_v56 }
 0x1e8   : > { %3083 = vst.msk [vmem:[%s5731_s20 + $0x58] sm:$0xff] %vm3071_vm4, %v3050_v40  ;;  %v3020_v39 = vadd.f32 %v4271_v20, %v5724_v48 }
 0x1e9   : > { %3082 = vst.msk [vmem:[%s5731_s20 + $0x50] sm:$0xff] %vm3071_vm4, %v3049_v19  ;;  %v3019_v41 = vadd.f32 %v4272_v13, %v5724_v48  ;;  %v4232_v17 = vpop.f32.mrb[14].mxu0 }
 0x1ea   : > { %v3052_v61 = vmax.f32 %v3020_v39, 0.0  ;;  %v4273_v45 = vadd.f32 %v4232_v17, %v5717_v14  ;;  %v2879_v0 = vpop.f32.mrb[15].mxu0 }
 0x1eb   : > { %v3051_v16 = vmax.f32 %v3019_v41, 0.0  ;;  %v4274_v49 = vadd.f32 %v2879_v0, %v5719_v36 }
 0x1ec   : > { %3085 = vst.msk [vmem:[%s5731_s20 + $0x68] sm:$0xff] %vm3071_vm4, %v3052_v61  ;;  %v3022_v56 = vadd.f32 %v4273_v45, %v5724_v48 }
 0x1ed   : > { %v4035_v33 = vpop.f32.mrb[16].mxu1  ;;  %3084 = vst.msk [vmem:[%s5731_s20 + $0x60] sm:$0xff] %vm3071_vm4, %v3051_v16  ;;  %v3021_v5 = vadd.f32 %v4274_v49, %v5724_v48  ;;  %v4235_v11 = vpop.f32.mrb[16].mxu0 }
 0x1ee   : > { %v1807_v47 = vpop.f32.mrb[17].mxu1  ;;  %v3054_v63 = vmax.f32 %v3022_v56, 0.0  ;;  %v4275_v23 = vadd.f32 %v4235_v11, %v4035_v33  ;;  %v2889_v14 = vpop.f32.mrb[17].mxu0 }
 0x1ef   : > { %v3053_v57 = vmax.f32 %v3021_v5, 0.0  ;;  %v4276_v30 = vadd.f32 %v2889_v14, %v1807_v47 }
 0x1f0   : > { %3087 = vst.msk [vmem:[%s5731_s20 + $0x78] sm:$0xff] %vm3071_vm4, %v3054_v63  ;;  %v3024_v36 = vadd.f32 %v4275_v23, %v5724_v48 }
 0x1f1   : > { %v4038_v38 = vpop.f32.mrb[18].mxu1  ;;  %3086 = vst.msk [vmem:[%s5731_s20 + $0x70] sm:$0xff] %vm3071_vm4, %v3053_v57  ;;  %v3023_v37 = vadd.f32 %v4276_v30, %v5724_v48  ;;  %v4238_v62 = vpop.f32.mrb[18].mxu0 }
 0x1f2   : > { %v1817_v4 = vpop.f32.mrb[19].mxu1  ;;  %v3056_v35 = vmax.f32 %v3024_v36, 0.0  ;;  %v4277_v44 = vadd.f32 %v4238_v62, %v4038_v38  ;;  %v2899_v27 = vpop.f32.mrb[19].mxu0 }
 0x1f3   : > { %v3055_v2 = vmax.f32 %v3023_v37, 0.0  ;;  %v4278_v34 = vadd.f32 %v2899_v27, %v1817_v4 }
 0x1f4   : > { %3089 = vst.msk [vmem:[%s5731_s20 + $0x88] sm:$0xff] %vm3071_vm4, %v3056_v35  ;;  %v3026_v60 = vadd.f32 %v4277_v44, %v5724_v48 }
 0x1f5   : > { %v4041_v1 = vpop.f32.mrb[20].mxu1  ;;  %3088 = vst.msk [vmem:[%s5731_s20 + $0x80] sm:$0xff] %vm3071_vm4, %v3055_v2  ;;  %v3025_v15 = vadd.f32 %v4278_v34, %v5724_v48  ;;  %v4241_v18 = vpop.f32.mrb[20].mxu0 }
 0x1f6   : > { %v1827_v25 = vpop.f32.mrb[21].mxu1  ;;  %v3058_v31 = vmax.f32 %v3026_v60, 0.0  ;;  %v4279_v32 = vadd.f32 %v4241_v18, %v4041_v1  ;;  %v2909_v42 = vpop.f32.mrb[21].mxu0 }
 0x1f7   : > { %v3057_v43 = vmax.f32 %v3025_v15, 0.0  ;;  %v4280_v50 = vadd.f32 %v2909_v42, %v1827_v25 }
 0x1f8   : > { %3091 = vst.msk [vmem:[%s5731_s20 + $0x98] sm:$0xff] %vm3071_vm4, %v3058_v31  ;;  %v3028_v52 = vadd.f32 %v4279_v32, %v5724_v48 }
 0x1f9   : > { %v4044_v26 = vpop.f32.mrb[22].mxu1  ;;  %3090 = vst.msk [vmem:[%s5731_s20 + $0x90] sm:$0xff] %vm3071_vm4, %v3057_v43  ;;  %v3027_v51 = vadd.f32 %v4280_v50, %v5724_v48  ;;  %v4244_v46 = vpop.f32.mrb[22].mxu0 }
 0x1fa   : > { %v1837_v9 = vpop.f32.mrb[23].mxu1  ;;  %v3060_v6 = vmax.f32 %v3028_v52, 0.0  ;;  %v4281_v58 = vadd.f32 %v4244_v46, %v4044_v26  ;;  %v2919_v59 = vpop.f32.mrb[23].mxu0 }
 0x1fb   : > { %v3059_v3 = vmax.f32 %v3027_v51, 0.0  ;;  %v4282_v7 = vadd.f32 %v2919_v59, %v1837_v9 }
 0x1fc   : > { %3093 = vst.msk [vmem:[%s5731_s20 + $0xa8] sm:$0xff] %vm3071_vm4, %v3060_v6  ;;  %v3030_v8 = vadd.f32 %v4281_v58, %v5724_v48 }
 0x1fd   : > { %v4047_v22 = vpop.f32.mrb[24].mxu1  ;;  %3092 = vst.msk [vmem:[%s5731_s20 + $0xa0] sm:$0xff] %vm3071_vm4, %v3059_v3  ;;  %v3029_v28 = vadd.f32 %v4282_v7, %v5724_v48  ;;  %v4247_v29 = vpop.f32.mrb[24].mxu0 }
 0x1fe   : > { %v1847_v53 = vpop.f32.mrb[25].mxu1  ;;  %v3062_v55 = vmax.f32 %v3030_v8, 0.0  ;;  %v4283_v21 = vadd.f32 %v4247_v29, %v4047_v22  ;;  %v2929_v24 = vpop.f32.mrb[25].mxu0 }
 0x1ff   : > { %v3061_v10 = vmax.f32 %v3029_v28, 0.0  ;;  %v4284_v12 = vadd.f32 %v2929_v24, %v1847_v53 }
 0x200   : > { %3095 = vst.msk [vmem:[%s5731_s20 + $0xb8] sm:$0xff] %vm3071_vm4, %v3062_v55  ;;  %v3032_v40 = vadd.f32 %v4283_v21, %v5724_v48 }
 0x201   : > { %v4050_v20 = vpop.f32.mrb[26].mxu1  ;;  %3094 = vst.msk [vmem:[%s5731_s20 + $0xb0] sm:$0xff] %vm3071_vm4, %v3061_v10  ;;  %v3031_v54 = vadd.f32 %v4284_v12, %v5724_v48  ;;  %v4250_v19 = vpop.f32.mrb[26].mxu0 }
 0x202   : > { %v1857_v13 = vpop.f32.mrb[27].mxu1  ;;  %v3064_v39 = vmax.f32 %v3032_v40, 0.0  ;;  %v4285_v41 = vadd.f32 %v4250_v19, %v4050_v20  ;;  %v2939_v17 = vpop.f32.mrb[27].mxu0 }
 0x203   : > { %v3063_v61 = vmax.f32 %v3031_v54, 0.0  ;;  %v4286_v45 = vadd.f32 %v2939_v17, %v1857_v13 }
 0x204   : > { %3097 = vst.msk [vmem:[%s5731_s20 + $0xc8] sm:$0xff] %vm3071_vm4, %v3064_v39  ;;  %v3034_v0 = vadd.f32 %v4285_v41, %v5724_v48 }
 0x205   : > { %v4053_v16 = vpop.f32.mrb[28].mxu1  ;;  %3096 = vst.msk [vmem:[%s5731_s20 + $0xc0] sm:$0xff] %vm3071_vm4, %v3063_v61  ;;  %v3033_v49 = vadd.f32 %v4286_v45, %v5724_v48  ;;  %v4253_v56 = vpop.f32.mrb[28].mxu0 }
 0x206   : > { %v1867_v33 = vpop.f32.mrb[29].mxu1  ;;  %v3066_v5 = vmax.f32 %v3034_v0, 0.0  ;;  %v4287_v11 = vadd.f32 %v4253_v56, %v4053_v16  ;;  %v2949_v47 = vpop.f32.mrb[29].mxu0 }
 0x207   : > { %v3065_v63 = vmax.f32 %v3033_v49, 0.0  ;;  %v4288_v23 = vadd.f32 %v2949_v47, %v1867_v33 }
 0x208   : > { %3099 = vst.msk [vmem:[%s5731_s20 + $0xd8] sm:$0xff] %vm3071_vm4, %v3066_v5  ;;  %v3036_v14 = vadd.f32 %v4287_v11, %v5724_v48 }
 0x209   : > { %v4056_v57 = vpop.f32.mrb[30].mxu1  ;;  %3098 = vst.msk [vmem:[%s5731_s20 + $0xd0] sm:$0xff] %vm3071_vm4, %v3065_v63  ;;  %v3035_v30 = vadd.f32 %v4288_v23, %v5724_v48  ;;  %v4256_v36 = vpop.f32.mrb[30].mxu0 }
 0x20a   : > { %v1877_v38 = vpop.f32.mrb[31].mxu1  ;;  %v3068_v37 = vmax.f32 %v3036_v14, 0.0  ;;  %v4289_v62 = vadd.f32 %v4256_v36, %v4056_v57  ;;  %v2959_v4 = vpop.f32.mrb[31].mxu0 }
 0x20b   : > { %v3067_v35 = vmax.f32 %v3035_v30, 0.0  ;;  %v4290_v44 = vadd.f32 %v2959_v4, %v1877_v38 }
 0x20c   : > { %3101 = vst.msk [vmem:[%s5731_s20 + $0xe8] sm:$0xff] %vm3071_vm4, %v3068_v37  ;;  %v3038_v27 = vadd.f32 %v4289_v62, %v5724_v48 }
 0x20d   : > { %3100 = vst.msk [vmem:[%s5731_s20 + $0xe0] sm:$0xff] %vm3071_vm4, %v3067_v35  ;;  %v3037_v2 = vadd.f32 %v4290_v44, %v5724_v48 }
 0x20e   : > { %v3070_v34 = vmax.f32 %v3038_v27, 0.0 }
 0x20f   : > { %v3069_v60 = vmax.f32 %v3037_v2, 0.0 }
 0x210   : > { %3103 = vst.msk [vmem:[%s5731_s20 + $0xf8] sm:$0xff] %vm3071_vm4, %v3070_v34 }
 0x211   : > { %3102 = vst.msk [vmem:[%s5731_s20 + $0xf0] sm:$0xff] %vm3071_vm4, %v3069_v60 }
 0x212 PF: > { %s13_s14 = sadd.s32 1, %s4562_s14   ;;  %s6019_s12 = smov %s4558_s13 }
 0x213   : > { %p10_p5 = scmp.ge.s32.totalorder %s13_s14, 4   ;;  %s6020_s13 = smov %s6022_s15 }
 0x215   :  { %12 = sbr.rel (!%p10_p5) target bundleno = 2 (0x2), region = 71 }

// kernel: lte_forward.9
= control target key start
LH: loop header
LB: loop body
LE: loop exit
PB: predicated region body
PF: predicated region fallthrough
CT: control target
= control target key end

     0   :  { %s4720_s12 = smov 0   ;;  %s4722_s13 = smov 0   ;;  %s6035_s0 = inlined_call_operand.vmem [shape: f32[2,18,18,32], index: 0, kind: input, shape index: {}]   ;;  %s6036_s1 = inlined_call_operand.vmem [shape: f32[9,32,32], index: 1, kind: input, shape index: {}]   ;;  %s6037_s2 = inlined_call_operand.vmem [shape: f32[1,32], index: 2, kind: input, shape index: {}]   ;;  %s6038_s3 = inlined_call_operand.vmem [shape: f32[2,16,16,32], index: 3, kind: output, shape index: {}]  }
   0x1   :  { %s4724_s14 = smov 0  }
   0x2 LB: > { %s25_s15 = sadd.s32 1, %s4694_s13  ;;  %p3163_p0 = scmp.ge.s32.totalorder %s4698_s14, 1  ;;  %s4698_s14 = sphi %s4724_s14, %s13_s14   ;;  %s4694_s13 = sphi %s4722_s13, %s6218_s13   ;;  %s4690_s12 = sphi %s4720_s12, %s6217_s12  }
   0x3   : > { %p27_p1 = scmp.ge.s32.totalorder %s25_s15, 2  ;;  %p151_p2 = scmp.lt.s32.totalorder %s4698_s14, 3 }
   0x5   : > { %s6220_s15 = smov (%p27_p1, %s25_s15), 0  ;;  %p152_p3 = pnand %p3163_p0, %p151_p2 }
   0x7   : > { %155 = sbr.rel (%p152_p3) target bundleno = 528 (0x210), region = 32 }
   0xe   : > { %v3167_v0 = vld [vmem:[%s6036_s1 + $0x20] sm:$0xff]  ;;  %v3168_v1 = vld [vmem:[%s6036_s1 + $0x28] sm:$0xff]  ;;  %p180_p4 = scmp.lt.s32.totalorder %s4690_s12, 1  ;;  %v3169_v5 = vld [vmem:[%s6036_s1 + $0x30] sm:$0xff]  ;;  %vm305_vm0 = vcmask 1046528   ;;  %vm391_vm1 = vcmask 261120  }
   0xf   : > { %v3307_v2 = vld [vmem:[%s6036_s1 + $0x80] sm:$0xff]  ;;  %v4319_v3 = vpack.c.bf16 %v3168_v1, %v3167_v0  ;;  %v3308_v4 = vld [vmem:[%s6036_s1 + $0x88] sm:$0xff]  ;;  %v3170_v6 = vld [vmem:[%s6036_s1 + $0x38] sm:$0xff]  ;;  %vm970_vm2 = vcmask 1045504  }
  0x10   : > { %v4756_v7 = vpack.c.bf16 %v3308_v4, %v3307_v2  ;;  %v4323_v8 = vpack.c.bf16 %v3170_v6, %v3169_v5  ;;  %v3309_v9 = vld [vmem:[%s6036_s1 + $0x90] sm:$0xff]  ;;  %v3310_v10 = vld [vmem:[%s6036_s1 + $0x98] sm:$0xff]  ;;  %s6222_s12 = smov (!%p180_p4, %s4690_s12), 1  ;;  %v253_v11 = vld [vmem:[%s6036_s1] sm:$0xff] }
  0x11   : > { %4320 = vmatprep.subr.bf16.mxu1 %v4319_v3  ;;  %v4769_v12 = vpack.c.bf16 %v3310_v10, %v3309_v9  ;;  %v254_v13 = vld [vmem:[%s6036_s1 + $0x8] sm:$0xff]  ;;  %v3343_v14 = vld [vmem:[%s6036_s1 + $0xa0] sm:$0xff]  ;;  %s4651_s17 = smul.u32 432, %s6222_s12  ;;  %v3345_v18 = vld [vmem:[%s6036_s1 + $0xb0] sm:$0xff] }
  0x12   : > { %v3344_v15 = vld [vmem:[%s6036_s1 + $0xa8] sm:$0xff]  ;;  %4352 = vmatprep.subr.bf16.mxu0 %v4756_v7  ;;  %4322 = vmatpush3.bf16.msra.mxu1 %v4319_v3  ;;  %v4327_v16 = vpack.c.bf16 %v254_v13, %v253_v11  ;;  %v3346_v19 = vld [vmem:[%s6036_s1 + $0xb8] sm:$0xff]  ;;  %v255_v23 = vld [vmem:[%s6036_s1 + $0x10] sm:$0xff] }
  0x13   : > { %6114 = vst [vmem:[#allocation2_spill] sm:$0xff] %v4769_v12  ;;  %4354 = vmatpush3.bf16.msra.mxu0 %v4756_v7  ;;  %4324 = vmatprep.subr.bf16.mxu1 %v4323_v8  ;;  %s4787_s20 = scalar_lea.vmem %s6035_s0, %s4651_s17  ;;  %v4359_v17 = vpack.c.bf16 %v3344_v15, %v3343_v14  ;;  %v256_v33 = vld [vmem:[%s6036_s1 + $0x18] sm:$0xff]  ;;  %v4363_v39 = vpack.c.bf16 %v3346_v19, %v3345_v18  ;;  %v3379_v40 = vld [vmem:[%s6036_s1 + $0xc0] sm:$0xff]  ;;  %v3380_v54 = vld [vmem:[%s6036_s1 + $0xc8] sm:$0xff] }
  0x14   : > { %4356 = vmatprep.subr.bf16.mxu0 %v4769_v12  ;;  %v4796_v20 = vld [vmem:[%s4787_s20] sm:$0xff]  ;;  %v4799_v21 = vld [vmem:[%s4787_s20 + $0x8] sm:$0xff]  ;;  %v4802_v22 = vld [vmem:[%s4787_s20 + $0x18] sm:$0xff]  ;;  %v4331_v53 = vpack.c.bf16 %v256_v33, %v255_v23  ;;  %v4893_v0 = vpack.c.bf16 %v3380_v54, %v3379_v40 }
  0x15   : > { %6115 = vst [vmem:[#allocation3_spill] sm:$0xff] %v4802_v22  ;;  %v306_v24 = vrot.slane %v4796_v20, 1  ;;  %v307_v25 = vrot.slane %v4799_v21, 1  ;;  %v4810_v26 = vld [vmem:[%s4787_s20 + $0x20] sm:$0xff]  ;;  %v311_v27 = vrot.slane %v4802_v22, 1  ;;  %v4823_v32 = vld [vmem:[%s4787_s20 + $0x30] sm:$0xff] }
  0x16   : > { %4326 = vmatpush3.bf16.msra.mxu1 %v4323_v8  ;;  %6116 = vst [vmem:[#allocation4_spill] sm:$0xff] %v4810_v26  ;;  %v4814_v28 = vld [vmem:[%s4787_s20 + $0x10] sm:$0x3]  ;;  %v312_v29 = vrot.slane %v4810_v26, 1  ;;  %v4820_v31 = vld [vmem:[%s4787_s20 + $0x28] sm:$0x3] }
  0x17   : > { %4358 = vmatpush3.bf16.msra.mxu0 %v4769_v12  ;;  %4328 = vmatprep.subr.bf16.mxu1 %v4327_v16  ;;  %v309_v30 = vrot.slane %v4814_v28, 1  ;;  %v308_v34 = vsel %vm305_vm0, %v306_v24, %v307_v25  ;;  %v314_v35 = vrot.slane %v4820_v31, 1  ;;  %v4831_v36 = vld [vmem:[%s4787_s20 + $0x38] sm:$0xff]  ;;  %v316_v37 = vrot.slane %v4823_v32, 1  ;;  %v4835_v38 = vld [vmem:[%s4787_s20 + $0x40] sm:$0x3] }
  0x18   : > { %4360 = vmatprep.subr.bf16.mxu0 %v4359_v17  ;;  %3823 = vmatprep.mubr.msk.f32.mxu1 %vm391_vm1, %v308_v34  ;;  %v313_v41 = vsel %vm305_vm0, %v311_v27, %v312_v29  ;;  %v317_v43 = vrot.slane %v4831_v36, 1  ;;  %v319_v44 = vrot.slane %v4835_v38, 1  ;;  %v4846_v45 = vld [vmem:[%s4787_s20 + $0x48] sm:$0xff]  ;;  %v4849_v46 = vld [vmem:[%s4787_s20 + $0x50] sm:$0xff]  ;;  %v4852_v47 = vld [vmem:[%s4787_s20 + $0x58] sm:$0x3] }
  0x19   : > { %v310_v42 = vsel %vm305_vm0, %v307_v25, %v309_v30  ;;  %4047 = vmatprep.mubr.msk.f32.mxu0 %vm391_vm1, %v313_v41  ;;  %v315_v48 = vsel %vm305_vm0, %v312_v29, %v314_v35  ;;  %v321_v49 = vrot.slane %v4846_v45, 1  ;;  %v322_v50 = vrot.slane %v4849_v46, 1  ;;  %v4860_v51 = vld [vmem:[%s4787_s20 + $0x60] sm:$0xff]  ;;  %v4863_v52 = vld [vmem:[%s4787_s20 + $0x68] sm:$0xff]  ;;  %v4891_v63 = vld [vmem:[%s4787_s20 + $0x70] sm:$0x3] }
  0x1a   : > { %3824 = vmatmul.mubr.msk.f32.vlgmr.msra.gmra.mrb[0].mxu1 %vm391_vm1, %v310_v42  ;;  %4048 = vmatmul.mubr.msk.f32.vlgmr.msra.gmra.mrb[0].mxu0 %vm391_vm1, %v315_v48  ;;  %v4870_v55 = vsel %vm305_vm0, %v316_v37, %v317_v43  ;;  %v3235_v56 = vld [vmem:[%s6036_s1 + $0x40] sm:$0xff]  ;;  %v3236_v57 = vld [vmem:[%s6036_s1 + $0x48] sm:$0xff]  ;;  %v4880_v58 = vsel %vm305_vm0, %v317_v43, %v319_v44  ;;  %v324_v59 = vrot.slane %v4852_v47, 1  ;;  %v326_v61 = vrot.slane %v4860_v51, 1  ;;  %v4897_v1 = vld [vmem:[%s4787_s20 + $0x78] sm:$0xff] }
  0x1b   : > { %4330 = vmatpush3.bf16.msra.mxu1 %v4327_v16  ;;  %6117 = vst [vmem:[#allocation5_spill] sm:$0xff] %v4870_v55  ;;  %4362 = vmatpush3.bf16.msra.mxu0 %v4359_v17  ;;  %6118 = vst [vmem:[#allocation6_spill] sm:$0xff] %v4880_v58  ;;  %v4886_v60 = vsel %vm305_vm0, %v321_v49, %v322_v50  ;;  %v327_v62 = vrot.slane %v4863_v52, 1  ;;  %v4900_v2 = vld [vmem:[%s4787_s20 + $0x80] sm:$0xff]  ;;  %v4902_v3 = vpack.c.bf16 %v3236_v57, %v3235_v56  ;;  %v4920_v10 = vld [vmem:[%s4787_s20 + $0x88] sm:$0x3] }
  0x1c   : > { %3826 = vmatprep.mubr.msk.f32.mxu1 %vm391_vm1, %v313_v41  ;;  %4050 = vmatprep.mubr.msk.f32.mxu0 %vm391_vm1, %v4870_v55  ;;  %6119 = vst [vmem:[#allocation7_spill] sm:$0xff] %v4886_v60  ;;  %v4911_v4 = vsel %vm305_vm0, %v322_v50, %v324_v59  ;;  %v329_v5 = vrot.slane %v4891_v63, 1  ;;  %v331_v8 = vrot.slane %v4897_v1, 1  ;;  %v332_v9 = vrot.slane %v4900_v2, 1  ;;  %v4926_v11 = vld [vmem:[%s4787_s20 + $0x90] sm:$0xff]  ;;  %v4929_v13 = vld [vmem:[%s4787_s20 + $0x98] sm:$0xff] }
  0x1d   : > { %4364 = vmatprep.subr.bf16.mxu0 %v4363_v39  ;;  %4332 = vmatprep.subr.bf16.mxu1 %v4331_v53  ;;  %6120 = vst [vmem:[#allocation8_spill] sm:$0xff] %v4911_v4  ;;  %v4915_v6 = vsel %vm305_vm0, %v326_v61, %v327_v62  ;;  %v334_v15 = vrot.slane %v4920_v10, 1  ;;  %v336_v17 = vrot.slane %v4926_v11, 1  ;;  %v337_v18 = vrot.slane %v4929_v13, 1  ;;  %v4948_v19 = vld [vmem:[%s4787_s20 + $0xa0] sm:$0x3] }
  0x1e   : > { %3827 = vmatmul.mubr.msk.f32.gmra.mrb[2].mxu1 %vm391_vm1, %v315_v48  ;;  %4051 = vmatmul.mubr.msk.f32.gmra.mrb[2].mxu0 %vm391_vm1, %v4880_v58  ;;  %6121 = vst [vmem:[#allocation9_spill] sm:$0xff] %v4915_v6  ;;  %v4939_v14 = vsel %vm305_vm0, %v327_v62, %v329_v5  ;;  %v4943_v16 = vsel %vm305_vm0, %v331_v8, %v332_v9  ;;  %v4953_v23 = vld [vmem:[%s4787_s20 + $0xa8] sm:$0xff]  ;;  %v4956_v24 = vld [vmem:[%s4787_s20 + $0xb0] sm:$0xff]  ;;  %v339_v27 = vrot.slane %v4948_v19, 1  ;;  %v4974_v34 = vld [vmem:[%s4787_s20 + $0xb8] sm:$0x3] }
  0x1f   : > { %3829 = vmatprep.mubr.msk.f32.mxu1 %vm391_vm1, %v4870_v55  ;;  %4053 = vmatprep.mubr.msk.f32.mxu0 %vm391_vm1, %v4886_v60  ;;  %6122 = vst [vmem:[#allocation10_spill] sm:$0xff] %v4939_v14  ;;  %6123 = vst [vmem:[#allocation11_spill] sm:$0xff] %v4943_v16  ;;  %v4965_v25 = vsel %vm305_vm0, %v332_v9, %v334_v15  ;;  %v4969_v29 = vsel %vm305_vm0, %v336_v17, %v337_v18  ;;  %v341_v30 = vrot.slane %v4953_v23, 1  ;;  %v4979_v35 = vld [vmem:[%s4787_s20 + $0xc0] sm:$0xff]  ;;  %v4982_v37 = vld [vmem:[%s4787_s20 + $0xc8] sm:$0xff] }
  0x20   : > { %4366 = vmatpush3.bf16.msra.mxu0 %v4363_v39  ;;  %4334 = vmatpush3.bf16.msra.mxu1 %v4331_v53  ;;  %6124 = vst [vmem:[#allocation12_spill] sm:$0xff] %v4965_v25  ;;  %6125 = vst [vmem:[#allocation13_spill] sm:$0xff] %v4969_v29  ;;  %v342_v33 = vrot.slane %v4956_v24, 1  ;;  %v4991_v39 = vsel %vm305_vm0, %v337_v18, %v339_v27  ;;  %v344_v40 = vrot.slane %v4974_v34, 1  ;;  %v346_v42 = vrot.slane %v4979_v35, 1  ;;  %v5020_v56 = vld [vmem:[%s4787_s20 + $0xd8] sm:$0xff] }
  0x21   : > { %4368 = vmatprep.subr.bf16.mxu0 %v4893_v0  ;;  %4336 = vmatprep.subr.bf16.mxu1 %v4902_v3  ;;  %6126 = vst [vmem:[#allocation14_spill] sm:$0xff] %v4991_v39  ;;  %v347_v43 = vrot.slane %v4982_v37, 1  ;;  %v5000_v44 = vld [vmem:[%s4787_s20 + $0xd0] sm:$0x3]  ;;  %v976_v53 = vrot.slane %v4802_v22, 2  ;;  %v977_v54 = vrot.slane %v4810_v26, 2 }
  0x22   : > { %3830 = vmatmul.mubr.msk.f32.gmra.mrb[4].mxu1 %vm391_vm1, %v4880_v58  ;;  %4054 = vmatmul.mubr.msk.f32.gmra.mrb[4].mxu0 %vm391_vm1, %v4911_v4  ;;  %v4995_v41 = vsel %vm305_vm0, %v341_v30, %v342_v33  ;;  %v5011_v48 = vsel %vm305_vm0, %v342_v33, %v344_v40  ;;  %v349_v49 = vrot.slane %v5000_v44, 1  ;;  %v5023_v57 = vld [vmem:[%s4787_s20 + $0xe0] sm:$0xff]  ;;  %v979_v59 = vrot.slane %v4820_v31, 2  ;;  %v5040_v8 = vld [vmem:[%s4787_s20 + $0xe8] sm:$0x3]  ;;  %v5048_v17 = vld [vmem:[%s4787_s20 + $0xf0] sm:$0xff] }
  0x23   : > { %3832 = vmatprep.mubr.msk.f32.mxu1 %vm391_vm1, %v4886_v60  ;;  %4056 = vmatprep.mubr.msk.f32.mxu0 %vm391_vm1, %v4915_v6  ;;  %6127 = vst [vmem:[#allocation15_spill] sm:$0xff] %v4995_v41  ;;  %6128 = vst [vmem:[#allocation16_spill] sm:$0xff] %v5011_v48  ;;  %v5015_v50 = vsel %vm305_vm0, %v346_v42, %v347_v43  ;;  %v351_v62 = vrot.slane %v5020_v56, 1  ;;  %v352_v5 = vrot.slane %v5023_v57, 1  ;;  %v981_v15 = vrot.slane %v4823_v32, 2  ;;  %v5051_v18 = vld [vmem:[%s4787_s20 + $0xf8] sm:$0xff] }
  0x24   : > { %6129 = vst [vmem:[#allocation17_spill] sm:$0xff] %v5015_v50  ;;  %v5035_v61 = vsel %vm305_vm0, %v347_v43, %v349_v49  ;;  %v5043_v9 = vsel %vm970_vm2, %v976_v53, %v977_v54  ;;  %v982_v31 = vrot.slane %v4831_v36, 2  ;;  %v3381_v27 = vld [vmem:[%s6036_s1 + $0xd0] sm:$0xff]  ;;  %v3382_v30 = vld [vmem:[%s6036_s1 + $0xd8] sm:$0xff]  ;;  %v354_v33 = vrot.slane %v5040_v8, 1 }
  0x25   : > { %6130 = vst [vmem:[#allocation18_spill] sm:$0xff] %v5035_v61  ;;  %v984_v40 = vrot.slane %v4835_v38, 2  ;;  %v5070_v42 = vsel %vm970_vm2, %v977_v54, %v979_v59  ;;  %v5073_v43 = vsel %vm305_vm0, %v351_v62, %v352_v5  ;;  %v356_v49 = vrot.slane %v5048_v17, 1  ;;  %v5078_v12 = vld [vmem:[%s4787_s20 + $0x100] sm:$0x3]  ;;  %v5089_v54 = vld [vmem:[%s4787_s20 + $0x110] sm:$0xff] }
  0x26   : > { %3833 = vmatmul.mubr.msk.f32.gmra.mrb[6].mxu1 %vm391_vm1, %v4911_v4  ;;  %4057 = vmatmul.mubr.msk.f32.gmra.mrb[6].mxu0 %vm391_vm1, %v4939_v14  ;;  %6131 = vst [vmem:[#allocation19_spill] sm:$0xff] %v5073_v43  ;;  %v357_v53 = vrot.slane %v5051_v18, 1  ;;  %v986_v38 = vrot.slane %v4846_v45, 2  ;;  %v4371_v59 = vpack.c.bf16 %v3382_v30, %v3381_v27  ;;  %v5098_v62 = vsel %vm305_vm0, %v352_v5, %v354_v33  ;;  %v3415_v27 = vld [vmem:[%s6036_s1 + $0xe0] sm:$0xff]  ;;  %v3416_v30 = vld [vmem:[%s6036_s1 + $0xe8] sm:$0xff] }
  0x27   : > { %3835 = vmatprep.mubr.msk.f32.mxu1 %vm391_vm1, %v4915_v6  ;;  %4059 = vmatprep.mubr.msk.f32.mxu0 %vm391_vm1, %v4943_v16  ;;  %6132 = vst [vmem:[#allocation20_spill] sm:$0xff] %v5098_v62  ;;  %v5157_v6 = vld [vmem:[%s4787_s20 + $0x130] sm:$0x3]  ;;  %v999_v4 = vrot.slane %v4920_v10, 2  ;;  %v5193_v58 = vld [vmem:[%s4787_s20 + $0x148] sm:$0x3] }
  0x28   : > { %v5114_v5 = vsel %vm305_vm0, %v356_v49, %v357_v53  ;;  %v5131_v49 = vld [vmem:[%s4787_s20 + $0x128] sm:$0xff]  ;;  %v1004_v55 = vrot.slane %v4948_v19, 2  ;;  %v1006_v19 = vrot.slane %v4953_v23, 2 }
  0x29   : > { %6134 = vst [vmem:[#allocation22_spill] sm:$0xff] %v5114_v5 }
  0x2a   : > { %3836 = vmatmul.mubr.msk.f32.gmra.mrb[8].mxu1 %vm391_vm1, %v4939_v14  ;;  %4060 = vmatmul.mubr.msk.f32.gmra.mrb[8].mxu0 %vm391_vm1, %v4965_v25  ;;  %v994_v14 = vrot.slane %v4891_v63, 2  ;;  %v996_v63 = vrot.slane %v4897_v1, 2 }
  0x2b   : > { %3838 = vmatprep.mubr.msk.f32.mxu1 %vm391_vm1, %v4943_v16  ;;  %4062 = vmatprep.mubr.msk.f32.mxu0 %vm391_vm1, %v4969_v29 }
  0x2e   : > { %3839 = vmatmul.mubr.msk.f32.gmra.mrb[10].mxu1 %vm391_vm1, %v4965_v25  ;;  %4063 = vmatmul.mubr.msk.f32.gmra.mrb[10].mxu0 %vm391_vm1, %v4991_v39  ;;  %v5128_v25 = vld [vmem:[%s4787_s20 + $0x120] sm:$0xff] }
  0x2f   : > { %3841 = vmatprep.mubr.msk.f32.mxu1 %vm391_vm1, %v4969_v29  ;;  %4065 = vmatprep.mubr.msk.f32.mxu0 %vm391_vm1, %v4995_v41  ;;  %v991_v29 = vrot.slane %v4860_v51, 2 }
  0x32   : > { %3842 = vmatmul.mubr.msk.f32.gmra.mrb[12].mxu1 %vm391_vm1, %v4991_v39  ;;  %4066 = vmatmul.mubr.msk.f32.gmra.mrb[12].mxu0 %vm391_vm1, %v5011_v48  ;;  %v359_v39 = vrot.slane %v5078_v12, 1 }
  0x33   : > { %3844 = vmatprep.mubr.msk.f32.mxu1 %vm391_vm1, %v4995_v41  ;;  %4068 = vmatprep.mubr.msk.f32.mxu0 %vm391_vm1, %v5015_v50  ;;  %v5086_v41 = vld [vmem:[%s4787_s20 + $0x108] sm:$0xff] }
  0x34   : > { %v361_v33 = vrot.slane %v5086_v41, 1 }
  0x36   : > { %3845 = vmatmul.mubr.msk.f32.gmra.mrb[14].mxu1 %vm391_vm1, %v5011_v48  ;;  %4069 = vmatmul.mubr.msk.f32.gmra.mrb[14].mxu0 %vm391_vm1, %v5035_v61  ;;  %v987_v48 = vrot.slane %v4849_v46, 2 }
  0x37   : > { %3847 = vmatprep.mubr.msk.f32.mxu1 %vm391_vm1, %v5015_v50  ;;  %4103 = vmatprep.mubr.msk.f32.mxu0 %vm391_vm1, %v5043_v9  ;;  %v5081_v50 = vsel %vm970_vm2, %v981_v15, %v982_v31  ;;  %v5101_v15 = vsel %vm970_vm2, %v982_v31, %v984_v40  ;;  %v989_v31 = vrot.slane %v4852_v47, 2  ;;  %v362_v40 = vrot.slane %v5089_v54, 1 }
  0x38   : > { %6133 = vst [vmem:[#allocation21_spill] sm:$0xff] %v5101_v15  ;;  %v5135_v47 = vpack.c.bf16 %v3416_v30, %v3415_v27 }
  0x39   : > { %v5149_v27 = vsel %vm970_vm2, %v987_v48, %v989_v31  ;;  %v5152_v30 = vsel %vm305_vm0, %v361_v33, %v362_v40  ;;  %v5168_v31 = vld [vmem:[%s4787_s20 + $0x140] sm:$0xff]  ;;  %v369_v33 = vrot.slane %v5157_v6, 1 }
  0x3a   : > { %3848 = vmatmul.mubr.msk.f32.gmra.mrb[16].mxu1 %vm391_vm1, %v5035_v61  ;;  %4104 = vmatmul.mubr.msk.f32.vlgmr.msra.gmra.mrb[0].mxu0 %vm391_vm1, %v5070_v42  ;;  %v5123_v61 = vsel %vm970_vm2, %v986_v38, %v987_v48  ;;  %v5142_v38 = vsel %vm305_vm0, %v357_v53, %v359_v39  ;;  %6137 = vst [vmem:[#allocation25_spill] sm:$0xff] %v5149_v27  ;;  %6138 = vst [vmem:[#allocation26_spill] sm:$0xff] %v5152_v30  ;;  %v997_v53 = vrot.slane %v4900_v2, 2  ;;  %v5165_v48 = vld [vmem:[%s4787_s20 + $0x138] sm:$0xff] }
  0x3b   : > { %3850 = vmatprep.mubr.msk.f32.mxu1 %vm391_vm1, %v5073_v43  ;;  %4370 = vmatpush3.bf16.msra.mxu0 %v4893_v0  ;;  %v5120_v43 = vld [vmem:[%s4787_s20 + $0x118] sm:$0x3]  ;;  %6135 = vst [vmem:[#allocation23_spill] sm:$0xff] %v5123_v61  ;;  %v992_v0 = vrot.slane %v4863_v52, 2  ;;  %6136 = vst [vmem:[#allocation24_spill] sm:$0xff] %v5142_v38  ;;  %v371_v60 = vrot.slane %v5165_v48, 1 }
  0x3c   : > { %4106 = vmatprep.mubr.msk.f32.mxu0 %vm391_vm1, %v5081_v50  ;;  %4372 = vmatprep.subr.bf16.mxu0 %v4371_v59  ;;  %v364_v16 = vrot.slane %v5120_v43, 1 }
  0x3d   : > { %v5160_v39 = vsel %vm970_vm2, %v991_v29, %v992_v0 }
  0x3e   : > { %3851 = vmatmul.mubr.msk.f32.gmra.mrb[18].mxu1 %vm391_vm1, %v5098_v62  ;;  %4107 = vmatmul.mubr.msk.f32.gmra.mrb[2].mxu0 %vm391_vm1, %v5101_v15  ;;  %v366_v62 = vrot.slane %v5128_v25, 1  ;;  %6139 = vst [vmem:[#allocation27_spill] sm:$0xff] %v5160_v39  ;;  %v5178_v29 = vsel %vm305_vm0, %v362_v40, %v364_v16  ;;  %v5196_v16 = vsel %vm970_vm2, %v996_v63, %v997_v53  ;;  %v1002_v40 = vrot.slane %v4929_v13, 2  ;;  %v5263_v15 = vld [vmem:[%s4787_s20 + $0x178] sm:$0x3] }
  0x3f   : > { %3853 = vmatprep.mubr.msk.f32.mxu1 %vm391_vm1, %v5114_v5  ;;  %4109 = vmatprep.mubr.msk.f32.mxu0 %vm391_vm1, %v5123_v61  ;;  %v367_v5 = vrot.slane %v5131_v49, 1  ;;  %6140 = vst [vmem:[#allocation28_spill] sm:$0xff] %v5178_v29  ;;  %6143 = vst [vmem:[#allocation31_spill] sm:$0xff] %v5196_v16  ;;  %v374_v63 = vrot.slane %v5193_v58, 1 }
  0x40   : > { %4374 = vmatpush3.bf16.msra.mxu0 %v4371_v59  ;;  %v5181_v59 = vsel %vm970_vm2, %v992_v0, %v994_v14  ;;  %v1001_v14 = vrot.slane %v4926_v11, 2  ;;  %v5201_v0 = vld [vmem:[%s4787_s20 + $0x150] sm:$0xff] }
  0x41   : > { %4376 = vmatprep.subr.bf16.mxu0 %v5135_v47  ;;  %6141 = vst [vmem:[#allocation29_spill] sm:$0xff] %v5181_v59  ;;  %v5213_v10 = vsel %vm305_vm0, %v367_v5, %v369_v33  ;;  %v1007_v33 = vrot.slane %v4956_v24, 2 }
  0x42   : > { %3854 = vmatmul.mubr.msk.f32.gmra.mrb[20].mxu1 %vm391_vm1, %v5142_v38  ;;  %4110 = vmatmul.mubr.msk.f32.gmra.mrb[4].mxu0 %vm391_vm1, %v5149_v27  ;;  %v5187_v38 = vsel %vm305_vm0, %v366_v62, %v367_v5  ;;  %v5204_v62 = vld [vmem:[%s4787_s20 + $0x158] sm:$0xff]  ;;  %6144 = vst [vmem:[#allocation32_spill] sm:$0xff] %v5213_v10  ;;  %v5228_v27 = vld [vmem:[%s4787_s20 + $0x160] sm:$0x3]  ;;  %v5231_v5 = vsel %vm970_vm2, %v1001_v14, %v1002_v40 }
  0x43   : > { %3856 = vmatprep.mubr.msk.f32.mxu1 %vm391_vm1, %v5152_v30  ;;  %4112 = vmatprep.mubr.msk.f32.mxu0 %vm391_vm1, %v5160_v39  ;;  %6142 = vst [vmem:[#allocation30_spill] sm:$0xff] %v5187_v38  ;;  %v372_v30 = vrot.slane %v5168_v31, 1  ;;  %v5220_v39 = vsel %vm970_vm2, %v997_v53, %v999_v4  ;;  %v5239_v4 = vld [vmem:[%s4787_s20 + $0x170] sm:$0xff]  ;;  %v5251_v53 = vsel %vm970_vm2, %v1002_v40, %v1004_v55  ;;  %v379_v14 = vrot.slane %v5228_v27, 1 }
  0x44   : > { %6145 = vst [vmem:[#allocation33_spill] sm:$0xff] %v5220_v39  ;;  %6148 = vst [vmem:[#allocation36_spill] sm:$0xff] %v5239_v4  ;;  %v1011_v55 = vrot.slane %v4979_v35, 2  ;;  %v1012_v40 = vrot.slane %v4982_v37, 2 }
  0x45   : > { %6150 = vst [vmem:[#allocation38_spill] sm:$0xff] %v5251_v53 }
  0x46   : > { %3857 = vmatmul.mubr.msk.f32.gmra.mrb[22].mxu1 %vm391_vm1, %v5178_v29  ;;  %4113 = vmatmul.mubr.msk.f32.gmra.mrb[6].mxu0 %vm391_vm1, %v5181_v59  ;;  %v5223_v29 = vsel %vm305_vm0, %v371_v60, %v372_v30  ;;  %v376_v59 = vrot.slane %v5201_v0, 1  ;;  %v5248_v60 = vsel %vm305_vm0, %v372_v30, %v374_v63  ;;  %v5266_v30 = vsel %vm970_vm2, %v1006_v19, %v1007_v33 }
  0x47   : > { %3859 = vmatprep.mubr.msk.f32.mxu1 %vm391_vm1, %v5187_v38  ;;  %4115 = vmatprep.mubr.msk.f32.mxu0 %vm391_vm1, %v5196_v16  ;;  %6146 = vst [vmem:[#allocation34_spill] sm:$0xff] %v5223_v29  ;;  %v377_v38 = vrot.slane %v5204_v62, 1  ;;  %v5236_v16 = vld [vmem:[%s4787_s20 + $0x168] sm:$0xff]  ;;  %6149 = vst [vmem:[#allocation37_spill] sm:$0xff] %v5248_v60 }
  0x48   : > { %6147 = vst [vmem:[#allocation35_spill] sm:$0xff] %v5236_v16 }
  0x49   : > { %v5257_v61 = vsel %vm305_vm0, %v376_v59, %v377_v38  ;;  %v384_v59 = vrot.slane %v5263_v15, 1 }
  0x4a   : > { %3860 = vmatmul.mubr.msk.f32.gmra.mrb[24].mxu1 %vm391_vm1, %v5213_v10  ;;  %4116 = vmatmul.mubr.msk.f32.gmra.mrb[8].mxu0 %vm391_vm1, %v5220_v39  ;;  %6151 = vst [vmem:[#allocation39_spill] sm:$0xff] %v5257_v61  ;;  %v1009_v10 = vrot.slane %v4974_v34, 2  ;;  %v381_v39 = vrot.slane %v5236_v16, 1  ;;  %v5277_v34 = vsel %vm305_vm0, %v377_v38, %v379_v14  ;;  %v1017_v38 = vrot.slane %v5023_v57, 2 }
  0x4b   : > { %3862 = vmatprep.mubr.msk.f32.mxu1 %vm391_vm1, %v5223_v29  ;;  %4118 = vmatprep.mubr.msk.f32.mxu0 %vm391_vm1, %v5231_v5  ;;  %v382_v29 = vrot.slane %v5239_v4, 1  ;;  %6152 = vst [vmem:[#allocation40_spill] sm:$0xff] %v5277_v34  ;;  %v1021_v14 = vrot.slane %v5048_v17, 2 }
  0x4c   : > { %v5283_v63 = vsel %vm970_vm2, %v1007_v33, %v1009_v10  ;;  %v1019_v10 = vrot.slane %v5040_v8, 2  ;;  %v1024_v8 = vrot.slane %v5078_v12, 2 }
  0x4d   : > { %6153 = vst [vmem:[#allocation41_spill] sm:$0xff] %v5283_v63  ;;  %v5286_v19 = vsel %vm305_vm0, %v381_v39, %v382_v29  ;;  %v5301_v39 = vsel %vm305_vm0, %v382_v29, %v384_v59  ;;  %v3237_v29 = vld [vmem:[%s6036_s1 + $0x50] sm:$0xff]  ;;  %v1026_v59 = vrot.slane %v5086_v41, 2 }
  0x4e   : > { %3863 = vmatmul.mubr.msk.f32.gmra.mrb[26].mxu1 %vm391_vm1, %v5248_v60  ;;  %4119 = vmatmul.mubr.msk.f32.gmra.mrb[10].mxu0 %vm391_vm1, %v5251_v53  ;;  %6154 = vst [vmem:[#allocation42_spill] sm:$0xff] %v5286_v19  ;;  %v1014_v60 = vrot.slane %v5000_v44, 2  ;;  %v5290_v53 = vsel %vm970_vm2, %v1011_v55, %v1012_v40  ;;  %6155 = vst [vmem:[#allocation43_spill] sm:$0xff] %v5301_v39  ;;  %v1022_v55 = vrot.slane %v5051_v18, 2 }
  0x4f   : > { %3865 = vmatprep.mubr.msk.f32.mxu1 %vm391_vm1, %v5257_v61  ;;  %4121 = vmatprep.mubr.msk.f32.mxu0 %vm391_vm1, %v5266_v30  ;;  %v1016_v61 = vrot.slane %v5020_v56, 2 }
  0x50   : > { %v5306_v44 = vsel %vm970_vm2, %v1012_v40, %v1014_v60  ;;  %v3238_v60 = vld [vmem:[%s6036_s1 + $0x58] sm:$0xff]  ;;  %v5333_v40 = vsel %vm970_vm2, %v1021_v14, %v1022_v55  ;;  %v5353_v12 = vsel %vm970_vm2, %v1022_v55, %v1024_v8  ;;  %v1034_v55 = vrot.slane %v5157_v6, 2 }
  0x51   : > { %v5310_v33 = vsel %vm970_vm2, %v1016_v61, %v1017_v38  ;;  %v5329_v61 = vsel %vm970_vm2, %v1017_v38, %v1019_v10  ;;  %v3272_v38 = vld [vmem:[%s6036_s1 + $0x68] sm:$0xff]  ;;  %v1029_v10 = vrot.slane %v5120_v43, 2  ;;  %v1036_v8 = vrot.slane %v5165_v48, 2 }
  0x52   : > { %3866 = vmatmul.mubr.msk.f32.gmra.mrb[28].mxu1 %vm391_vm1, %v5277_v34  ;;  %4122 = vmatmul.mubr.msk.f32.gmra.mrb[12].mxu0 %vm391_vm1, %v5283_v63  ;;  %v3271_v34 = vld [vmem:[%s6036_s1 + $0x60] sm:$0xff] }
  0x53   : > { %3868 = vmatprep.mubr.msk.f32.mxu1 %vm391_vm1, %v5286_v19  ;;  %4124 = vmatprep.mubr.msk.f32.mxu0 %vm391_vm1, %v5290_v53  ;;  %v4339_v19 = vpack.c.bf16 %v3238_v60, %v3237_v29  ;;  %v1031_v29 = vrot.slane %v5128_v25, 2  ;;  %v5361_v60 = vpack.c.bf16 %v3272_v38, %v3271_v34  ;;  %v1041_v38 = vrot.slane %v5201_v0, 2 }
  0x56   : > { %3869 = vmatmul.mubr.msk.f32.gmra.mrb[30].mxu1 %vm391_vm1, %v5301_v39  ;;  %4125 = vmatmul.mubr.msk.f32.gmra.mrb[14].mxu0 %vm391_vm1, %v5306_v44  ;;  %v1027_v39 = vrot.slane %v5089_v54, 2 }
  0x57   : > { %3879 = vmatprep.mubr.msk.f32.mxu1 %vm391_vm1, %v4796_v20  ;;  %4127 = vmatprep.mubr.msk.f32.mxu0 %vm391_vm1, %v5310_v33 }
  0x58   : > { %v5357_v14 = vsel %vm970_vm2, %v1026_v59, %v1027_v39  ;;  %v5372_v43 = vsel %vm970_vm2, %v1027_v39, %v1029_v10  ;;  %v1037_v59 = vrot.slane %v5168_v31, 2  ;;  %v1042_v10 = vrot.slane %v5204_v62, 2 }
  0x5a   : > { %3880 = vmatmul.mubr.msk.f32.vlgmr.msra.gmra.mrb[0].mxu1 %vm391_vm1, %v4799_v21  ;;  %4128 = vmatmul.mubr.msk.f32.gmra.mrb[16].mxu0 %vm391_vm1, %v5329_v61  ;;  %v5394_v39 = vsel %vm970_vm2, %v1036_v8, %v1037_v59  ;;  %v1047_v8 = vrot.slane %v5239_v4, 2 }
  0x5b   : > { %4338 = vmatpush3.bf16.msra.mxu1 %v4902_v3  ;;  %3882 = vmatprep.mubr.msk.f32.mxu1 %vm391_vm1, %v4802_v22  ;;  %v1032_v3 = vrot.slane %v5131_v49, 2  ;;  %6157 = vst [vmem:[#allocation45_spill] sm:$0xff] %v5394_v39  ;;  %v5421_v22 = vld [vmem:[%s4787_s20 + $0x188] sm:$0xff] }
  0x5c   : > { %4130 = vmatprep.mubr.msk.f32.mxu0 %vm391_vm1, %v5333_v40  ;;  %4340 = vmatprep.subr.bf16.mxu1 %v4339_v19 }
  0x5d   : > { %v5376_v34 = vsel %vm970_vm2, %v1031_v29, %v1032_v3  ;;  %v5390_v6 = vsel %vm970_vm2, %v1032_v3, %v1034_v55  ;;  %v1044_v29 = vrot.slane %v5228_v27, 2  ;;  %v5411_v3 = vsel %vm970_vm2, %v1041_v38, %v1042_v10 }
  0x5e   : > { %3883 = vmatmul.mubr.msk.f32.gmra.mrb[2].mxu1 %vm391_vm1, %v4810_v26  ;;  %4131 = vmatmul.mubr.msk.f32.gmra.mrb[18].mxu0 %vm391_vm1, %v5353_v12  ;;  %6156 = vst [vmem:[#allocation44_spill] sm:$0xff] %v5390_v6  ;;  %6158 = vst [vmem:[#allocation46_spill] sm:$0xff] %v5411_v3  ;;  %v1046_v55 = vrot.slane %v5236_v16, 2  ;;  %v5418_v26 = vld [vmem:[%s4787_s20 + $0x180] sm:$0xff] }
  0x5f   : > { %3885 = vmatprep.mubr.msk.f32.mxu1 %vm391_vm1, %v4823_v32  ;;  %4133 = vmatprep.mubr.msk.f32.mxu0 %vm391_vm1, %v5357_v14  ;;  %v5430_v27 = vsel %vm970_vm2, %v1042_v10, %v1044_v29  ;;  %v1917_v38 = vrot.slane %v5418_v26, 2 }
  0x60   : > { %4342 = vmatpush3.bf16.msra.mxu1 %v4339_v19  ;;  %v1039_v19 = vrot.slane %v5193_v58, 2  ;;  %6159 = vst [vmem:[#allocation47_spill] sm:$0xff] %v5430_v27 }
  0x61   : > { %4344 = vmatprep.subr.bf16.mxu1 %v5361_v60 }
  0x62   : > { %3886 = vmatmul.mubr.msk.f32.gmra.mrb[4].mxu1 %vm391_vm1, %v4831_v36  ;;  %4134 = vmatmul.mubr.msk.f32.gmra.mrb[20].mxu0 %vm391_vm1, %v5372_v43  ;;  %v5407_v58 = vsel %vm970_vm2, %v1037_v59, %v1039_v19  ;;  %v1049_v59 = vrot.slane %v5263_v15, 2  ;;  %v5434_v19 = vsel %vm970_vm2, %v1046_v55, %v1047_v8 }
  0x63   : > { %3888 = vmatprep.mubr.msk.f32.mxu1 %vm391_vm1, %v4846_v45  ;;  %4136 = vmatprep.mubr.msk.f32.mxu0 %vm391_vm1, %v5376_v34  ;;  %6160 = vst [vmem:[#allocation48_spill] sm:$0xff] %v5434_v19 }
  0x64   : > { %v5450_v15 = vsel %vm970_vm2, %v1047_v8, %v1049_v59  ;;  %v3417_v8 = vld [vmem:[%s6036_s1 + $0xf0] sm:$0xff]  ;;  %v3418_v59 = vld [vmem:[%s6036_s1 + $0xf8] sm:$0xff] }
  0x65   : > { %6161 = vst [vmem:[#allocation49_spill] sm:$0xff] %v5450_v15 }
  0x66   : > { %3889 = vmatmul.mubr.msk.f32.gmra.mrb[6].mxu1 %vm391_vm1, %v4849_v46  ;;  %4137 = vmatmul.mubr.msk.f32.gmra.mrb[22].mxu0 %vm391_vm1, %v5390_v6  ;;  %v5439_v6 = vld [vmem:[%s4787_s20 + $0x190] sm:$0x3] }
  0x67   : > { %3891 = vmatprep.mubr.msk.f32.mxu1 %vm391_vm1, %v4860_v51  ;;  %4139 = vmatprep.mubr.msk.f32.mxu0 %vm391_vm1, %v5394_v39  ;;  %v1918_v39 = vrot.slane %v5421_v22, 2  ;;  %v1920_v10 = vrot.slane %v5439_v6, 2 }
  0x69   : > { %v5454_v29 = vsel %vm970_vm2, %v1917_v38, %v1918_v39  ;;  %v5465_v55 = vsel %vm970_vm2, %v1918_v39, %v1920_v10  ;;  %v4379_v39 = vpack.c.bf16 %v3418_v59, %v3417_v8  ;;  %v3451_v38 = vld [vmem:[%s6036_s1 + $0x100] sm:$0xff]  ;;  %v3452_v10 = vld [vmem:[%s6036_s1 + $0x108] sm:$0xff]  ;;  %v972_v59 = vrot.slane %v4799_v21, 2  ;;  %v3274_v21 = vld [vmem:[%s6036_s1 + $0x78] sm:$0xff] }
  0x6a   : > { %3892 = vmatmul.mubr.msk.f32.gmra.mrb[8].mxu1 %vm391_vm1, %v4863_v52  ;;  %4140 = vmatmul.mubr.msk.f32.gmra.mrb[24].mxu0 %vm391_vm1, %v5407_v58  ;;  %6162 = vst [vmem:[#allocation50_spill] sm:$0xff] %v5454_v29  ;;  %6163 = vst [vmem:[#allocation51_spill] sm:$0xff] %v5465_v55  ;;  %v5496_v8 = vpack.c.bf16 %v3452_v10, %v3451_v38 }
  0x6b   : > { %3894 = vmatprep.mubr.msk.f32.mxu1 %vm391_vm1, %v4897_v1  ;;  %4142 = vmatprep.mubr.msk.f32.mxu0 %vm391_vm1, %v5411_v3 }
  0x6e   : > { %3895 = vmatmul.mubr.msk.f32.gmra.mrb[10].mxu1 %vm391_vm1, %v4900_v2  ;;  %4143 = vmatmul.mubr.msk.f32.gmra.mrb[26].mxu0 %vm391_vm1, %v5430_v27 }
  0x6f   : > { %3897 = vmatprep.mubr.msk.f32.mxu1 %vm391_vm1, %v4926_v11  ;;  %4145 = vmatprep.mubr.msk.f32.mxu0 %vm391_vm1, %v5434_v19 }
  0x72   : > { %3898 = vmatmul.mubr.msk.f32.gmra.mrb[12].mxu1 %vm391_vm1, %v4929_v13  ;;  %4146 = vmatmul.mubr.msk.f32.gmra.mrb[28].mxu0 %vm391_vm1, %v5450_v15 }
  0x73   : > { %3900 = vmatprep.mubr.msk.f32.mxu1 %vm391_vm1, %v4953_v23  ;;  %4148 = vmatprep.mubr.msk.f32.mxu0 %vm391_vm1, %v5454_v29  ;;  %v6172_v29 = vld [vmem:[#allocation5_spill] sm:$0xff] }
  0x76   : > { %3901 = vmatmul.mubr.msk.f32.gmra.mrb[14].mxu1 %vm391_vm1, %v4956_v24  ;;  %4149 = vmatmul.mubr.msk.f32.gmra.mrb[30].mxu0 %vm391_vm1, %v5465_v55  ;;  %v3454_v55 = vld [vmem:[%s6036_s1 + $0x118] sm:$0xff] }
  0x77   : > { %3903 = vmatprep.mubr.msk.f32.mxu1 %vm391_vm1, %v4979_v35  ;;  %4159 = vmatprep.mubr.msk.f32.mxu0 %vm391_vm1, %v4823_v32 }
  0x7a   : > { %3904 = vmatmul.mubr.msk.f32.gmra.mrb[16].mxu1 %vm391_vm1, %v4982_v37  ;;  %4160 = vmatmul.mubr.msk.f32.vlgmr.msra.gmra.mrb[0].mxu0 %vm391_vm1, %v4831_v36 }
  0x7b   : > { %3906 = vmatprep.mubr.msk.f32.mxu1 %vm391_vm1, %v5020_v56  ;;  %4378 = vmatpush3.bf16.msra.mxu0 %v5135_v47  ;;  %v971_v47 = vrot.slane %v4796_v20, 2  ;;  %v3273_v20 = vld [vmem:[%s6036_s1 + $0x70] sm:$0xff] }
  0x7c   : > { %4162 = vmatprep.mubr.msk.f32.mxu0 %vm391_vm1, %v4846_v45  ;;  %4380 = vmatprep.subr.bf16.mxu0 %v4379_v39  ;;  %v4347_v10 = vpack.c.bf16 %v3274_v21, %v3273_v20  ;;  %v5615_v20 = vld [vmem:[%s4787_s20 + $0x198] sm:$0xff]  ;;  %v6171_v21 = vld [vmem:[#allocation38_spill] sm:$0xff] }
  0x7d   : > { %v973_v38 = vsel %vm970_vm2, %v971_v47, %v972_v59  ;;  %v6167_v47 = vld [vmem:[#allocation27_spill] sm:$0xff] }
  0x7e   : > { %3907 = vmatmul.mubr.msk.f32.gmra.mrb[18].mxu1 %vm391_vm1, %v5023_v57  ;;  %4163 = vmatmul.mubr.msk.f32.gmra.mrb[2].mxu0 %vm391_vm1, %v4849_v46 }
  0x7f   : > { %3909 = vmatprep.mubr.msk.f32.mxu1 %vm391_vm1, %v5048_v17  ;;  %4165 = vmatprep.mubr.msk.f32.mxu0 %vm391_vm1, %v4860_v51 }
  0x80   : > { %4382 = vmatpush3.bf16.msra.mxu0 %v4379_v39  ;;  %v974_v39 = vrot.slane %v4814_v28, 2 }
  0x81   : > { %4384 = vmatprep.subr.bf16.mxu0 %v5496_v8 }
  0x82   : > { %3910 = vmatmul.mubr.msk.f32.gmra.mrb[20].mxu1 %vm391_vm1, %v5051_v18  ;;  %4166 = vmatmul.mubr.msk.f32.gmra.mrb[4].mxu0 %vm391_vm1, %v4863_v52  ;;  %v975_v28 = vsel %vm970_vm2, %v972_v59, %v974_v39  ;;  %v6168_v59 = vld [vmem:[#allocation29_spill] sm:$0xff]  ;;  %v6169_v39 = vld [vmem:[#allocation31_spill] sm:$0xff] }
  0x83   : > { %3912 = vmatprep.mubr.msk.f32.mxu1 %vm391_vm1, %v5086_v41  ;;  %4168 = vmatprep.mubr.msk.f32.mxu0 %vm391_vm1, %v4897_v1 }
  0x86   : > { %3913 = vmatmul.mubr.msk.f32.gmra.mrb[22].mxu1 %vm391_vm1, %v5089_v54  ;;  %4169 = vmatmul.mubr.msk.f32.gmra.mrb[6].mxu0 %vm391_vm1, %v4900_v2 }
  0x87   : > { %3915 = vmatprep.mubr.msk.f32.mxu1 %vm391_vm1, %v5128_v25  ;;  %4171 = vmatprep.mubr.msk.f32.mxu0 %vm391_vm1, %v4926_v11 }
  0x8a   : > { %3916 = vmatmul.mubr.msk.f32.gmra.mrb[24].mxu1 %vm391_vm1, %v5131_v49  ;;  %4172 = vmatmul.mubr.msk.f32.gmra.mrb[8].mxu0 %vm391_vm1, %v4929_v13 }
  0x8b   : > { %3918 = vmatprep.mubr.msk.f32.mxu1 %vm391_vm1, %v5165_v48  ;;  %4174 = vmatprep.mubr.msk.f32.mxu0 %vm391_vm1, %v4953_v23 }
  0x8e   : > { %3919 = vmatmul.mubr.msk.f32.gmra.mrb[26].mxu1 %vm391_vm1, %v5168_v31  ;;  %4175 = vmatmul.mubr.msk.f32.gmra.mrb[10].mxu0 %vm391_vm1, %v4956_v24 }
  0x8f   : > { %3921 = vmatprep.mubr.msk.f32.mxu1 %vm391_vm1, %v5201_v0  ;;  %4177 = vmatprep.mubr.msk.f32.mxu0 %vm391_vm1, %v4979_v35 }
  0x92   : > { %3922 = vmatmul.mubr.msk.f32.gmra.mrb[28].mxu1 %vm391_vm1, %v5204_v62  ;;  %4178 = vmatmul.mubr.msk.f32.gmra.mrb[12].mxu0 %vm391_vm1, %v4982_v37 }
  0x93   : > { %3924 = vmatprep.mubr.msk.f32.mxu1 %vm391_vm1, %v5236_v16  ;;  %4180 = vmatprep.mubr.msk.f32.mxu0 %vm391_vm1, %v5020_v56 }
  0x96   : > { %3925 = vmatmul.mubr.msk.f32.gmra.mrb[30].mxu1 %vm391_vm1, %v5239_v4  ;;  %4181 = vmatmul.mubr.msk.f32.gmra.mrb[14].mxu0 %vm391_vm1, %v5023_v57 }
  0x97   : > { %3935 = vmatprep.mubr.msk.f32.mxu1 %vm391_vm1, %v973_v38  ;;  %4183 = vmatprep.mubr.msk.f32.mxu0 %vm391_vm1, %v5048_v17  ;;  %v6170_v38 = vld [vmem:[#allocation33_spill] sm:$0xff] }
  0x9a   : > { %3936 = vmatmul.mubr.msk.f32.vlgmr.msra.gmra.mrb[0].mxu1 %vm391_vm1, %v975_v28  ;;  %4184 = vmatmul.mubr.msk.f32.gmra.mrb[16].mxu0 %vm391_vm1, %v5051_v18  ;;  %v5626_v28 = vld [vmem:[%s4787_s20 + $0x1a0] sm:$0xff] }
  0x9b   : > { %4346 = vmatpush3.bf16.msra.mxu1 %v5361_v60  ;;  %3938 = vmatprep.mubr.msk.f32.mxu1 %vm391_vm1, %v5043_v9  ;;  %v6164_v9 = vld [vmem:[#allocation21_spill] sm:$0xff] }
  0x9c   : > { %4186 = vmatprep.mubr.msk.f32.mxu0 %vm391_vm1, %v5086_v41  ;;  %4348 = vmatprep.subr.bf16.mxu1 %v4347_v10  ;;  %v6166_v60 = vld [vmem:[#allocation25_spill] sm:$0xff] }
  0x9e   : > { %3939 = vmatmul.mubr.msk.f32.gmra.mrb[2].mxu1 %vm391_vm1, %v5070_v42  ;;  %4187 = vmatmul.mubr.msk.f32.gmra.mrb[18].mxu0 %vm391_vm1, %v5089_v54  ;;  %v6165_v42 = vld [vmem:[#allocation23_spill] sm:$0xff] }
  0x9f   : > { %3941 = vmatprep.mubr.msk.f32.mxu1 %vm391_vm1, %v5081_v50  ;;  %4189 = vmatprep.mubr.msk.f32.mxu0 %vm391_vm1, %v5128_v25 }
  0xa0   : > { %4350 = vmatpush3.bf16.msra.mxu1 %v4347_v10  ;;  %v3453_v10 = vld [vmem:[%s6036_s1 + $0x110] sm:$0xff] }
  0xa1   : > { %4391 = vmatprep.subr.bf16.mxu1 %v4756_v7 }
  0xa2   : > { %3942 = vmatmul.mubr.msk.f32.gmra.mrb[4].mxu1 %vm391_vm1, %v6164_v9  ;;  %4190 = vmatmul.mubr.msk.f32.gmra.mrb[20].mxu0 %vm391_vm1, %v5131_v49 }
  0xa3   : > { %3944 = vmatprep.mubr.msk.f32.mxu1 %vm391_vm1, %v6165_v42  ;;  %4192 = vmatprep.mubr.msk.f32.mxu0 %vm391_vm1, %v5165_v48 }
  0xa6   : > { %3945 = vmatmul.mubr.msk.f32.gmra.mrb[6].mxu1 %vm391_vm1, %v6166_v60  ;;  %4193 = vmatmul.mubr.msk.f32.gmra.mrb[22].mxu0 %vm391_vm1, %v5168_v31 }
  0xa7   : > { %3947 = vmatprep.mubr.msk.f32.mxu1 %vm391_vm1, %v6167_v47  ;;  %4195 = vmatprep.mubr.msk.f32.mxu0 %vm391_vm1, %v5201_v0 }
  0xaa   : > { %3948 = vmatmul.mubr.msk.f32.gmra.mrb[8].mxu1 %vm391_vm1, %v6168_v59  ;;  %4196 = vmatmul.mubr.msk.f32.gmra.mrb[24].mxu0 %vm391_vm1, %v5204_v62 }
  0xab   : > { %3950 = vmatprep.mubr.msk.f32.mxu1 %vm391_vm1, %v6169_v39  ;;  %4198 = vmatprep.mubr.msk.f32.mxu0 %vm391_vm1, %v5236_v16  ;;  %v6173_v16 = vld [vmem:[#allocation6_spill] sm:$0xff] }
  0xae   : > { %3951 = vmatmul.mubr.msk.f32.gmra.mrb[10].mxu1 %vm391_vm1, %v6170_v38  ;;  %4199 = vmatmul.mubr.msk.f32.gmra.mrb[26].mxu0 %vm391_vm1, %v5239_v4  ;;  %v4387_v4 = vpack.c.bf16 %v3454_v55, %v3453_v10  ;;  %v6176_v55 = vld [vmem:[#allocation9_spill] sm:$0xff]  ;;  %v6181_v10 = vld [vmem:[#allocation44_spill] sm:$0xff] }
  0xaf   : > { %3953 = vmatprep.mubr.msk.f32.mxu1 %vm391_vm1, %v5231_v5  ;;  %4201 = vmatprep.mubr.msk.f32.mxu0 %vm391_vm1, %v5418_v26 }
  0xb2   : > { %3954 = vmatmul.mubr.msk.f32.gmra.mrb[12].mxu1 %vm391_vm1, %v6171_v21  ;;  %4202 = vmatmul.mubr.msk.f32.gmra.mrb[28].mxu0 %vm391_vm1, %v5421_v22 }
  0xb3   : > { %3956 = vmatprep.mubr.msk.f32.mxu1 %vm391_vm1, %v5266_v30  ;;  %4204 = vmatprep.mubr.msk.f32.mxu0 %vm391_vm1, %v5615_v20 }
  0xb6   : > { %3957 = vmatmul.mubr.msk.f32.gmra.mrb[14].mxu1 %vm391_vm1, %v5283_v63  ;;  %4205 = vmatmul.mubr.msk.f32.gmra.mrb[30].mxu0 %vm391_vm1, %v5626_v28  ;;  %v6174_v63 = vld [vmem:[#allocation7_spill] sm:$0xff] }
  0xb7   : > { %3959 = vmatprep.mubr.msk.f32.mxu1 %vm391_vm1, %v5290_v53  ;;  %4215 = vmatprep.mubr.msk.f32.mxu0 %vm391_vm1, %v6172_v29  ;;  %v6175_v29 = vld [vmem:[#allocation8_spill] sm:$0xff] }
  0xba   : > { %3960 = vmatmul.mubr.msk.f32.gmra.mrb[16].mxu1 %vm391_vm1, %v5306_v44  ;;  %4216 = vmatmul.mubr.msk.f32.vlgmr.msra.gmra.mrb[0].mxu0 %vm391_vm1, %v6173_v16  ;;  %v6177_v16 = vld [vmem:[#allocation10_spill] sm:$0xff] }
  0xbb   : > { %3962 = vmatprep.mubr.msk.f32.mxu1 %vm391_vm1, %v5310_v33  ;;  %4386 = vmatpush3.bf16.msra.mxu0 %v5496_v8  ;;  %v6179_v8 = vld [vmem:[#allocation12_spill] sm:$0xff] }
  0xbc   : > { %4218 = vmatprep.mubr.msk.f32.mxu0 %vm391_vm1, %v6174_v63  ;;  %4388 = vmatprep.subr.bf16.mxu0 %v4387_v4  ;;  %v6178_v63 = vld [vmem:[#allocation11_spill] sm:$0xff] }
  0xbe   : > { %3963 = vmatmul.mubr.msk.f32.gmra.mrb[18].mxu1 %vm391_vm1, %v5329_v61  ;;  %4219 = vmatmul.mubr.msk.f32.gmra.mrb[2].mxu0 %vm391_vm1, %v6175_v29  ;;  %v6182_v29 = vld [vmem:[#allocation14_spill] sm:$0xff] }
  0xbf   : > { %3965 = vmatprep.mubr.msk.f32.mxu1 %vm391_vm1, %v5333_v40  ;;  %4221 = vmatprep.mubr.msk.f32.mxu0 %vm391_vm1, %v6176_v55  ;;  %v6183_v55 = vld [vmem:[#allocation45_spill] sm:$0xff] }
  0xc0   : > { %4390 = vmatpush3.bf16.msra.mxu0 %v4387_v4  ;;  %v6180_v4 = vld [vmem:[#allocation13_spill] sm:$0xff] }
  0xc2   : > { %3966 = vmatmul.mubr.msk.f32.gmra.mrb[20].mxu1 %vm391_vm1, %v5353_v12  ;;  %4222 = vmatmul.mubr.msk.f32.gmra.mrb[4].mxu0 %vm391_vm1, %v6177_v16  ;;  %v6184_v16 = vld [vmem:[#allocation15_spill] sm:$0xff] }
  0xc3   : > { %3968 = vmatprep.mubr.msk.f32.mxu1 %vm391_vm1, %v5357_v14  ;;  %4224 = vmatprep.mubr.msk.f32.mxu0 %vm391_vm1, %v6178_v63  ;;  %v6185_v63 = vld [vmem:[#allocation16_spill] sm:$0xff] }
  0xc6   : > { %3969 = vmatmul.mubr.msk.f32.gmra.mrb[22].mxu1 %vm391_vm1, %v5372_v43  ;;  %4225 = vmatmul.mubr.msk.f32.gmra.mrb[6].mxu0 %vm391_vm1, %v6179_v8  ;;  %v6186_v8 = vld [vmem:[#allocation17_spill] sm:$0xff] }
  0xc7   : > { %3971 = vmatprep.mubr.msk.f32.mxu1 %vm391_vm1, %v5376_v34  ;;  %4227 = vmatprep.mubr.msk.f32.mxu0 %vm391_vm1, %v6180_v4  ;;  %v6187_v4 = vld [vmem:[#allocation18_spill] sm:$0xff] }
  0xca   : > { %3972 = vmatmul.mubr.msk.f32.gmra.mrb[24].mxu1 %vm391_vm1, %v6181_v10  ;;  %4228 = vmatmul.mubr.msk.f32.gmra.mrb[8].mxu0 %vm391_vm1, %v6182_v29  ;;  %v6188_v29 = vld [vmem:[#allocation19_spill] sm:$0xff] }
  0xcb   : > { %3974 = vmatprep.mubr.msk.f32.mxu1 %vm391_vm1, %v6183_v55  ;;  %4230 = vmatprep.mubr.msk.f32.mxu0 %vm391_vm1, %v6184_v16  ;;  %v6189_v16 = vld [vmem:[#allocation20_spill] sm:$0xff] }
  0xce   : > { %3975 = vmatmul.mubr.msk.f32.gmra.mrb[26].mxu1 %vm391_vm1, %v5407_v58  ;;  %4231 = vmatmul.mubr.msk.f32.gmra.mrb[10].mxu0 %vm391_vm1, %v6185_v63  ;;  %v6190_v63 = vld [vmem:[#allocation3_spill] sm:$0xff] }
  0xcf   : > { %3977 = vmatprep.mubr.msk.f32.mxu1 %vm391_vm1, %v5411_v3  ;;  %4233 = vmatprep.mubr.msk.f32.mxu0 %vm391_vm1, %v6186_v8  ;;  %v6191_v8 = vld [vmem:[#allocation22_spill] sm:$0xff] }
  0xd2   : > { %3978 = vmatmul.mubr.msk.f32.gmra.mrb[28].mxu1 %vm391_vm1, %v5430_v27  ;;  %4234 = vmatmul.mubr.msk.f32.gmra.mrb[12].mxu0 %vm391_vm1, %v6187_v4  ;;  %v6192_v27 = vld [vmem:[#allocation4_spill] sm:$0xff] }
  0xd3   : > { %3980 = vmatprep.mubr.msk.f32.mxu1 %vm391_vm1, %v5434_v19  ;;  %4236 = vmatprep.mubr.msk.f32.mxu0 %vm391_vm1, %v6188_v29  ;;  %v6193_v4 = vld [vmem:[#allocation24_spill] sm:$0xff]  ;;  %v6195_v19 = vld [vmem:[#allocation2_spill] sm:$0xff] }
  0xd6   : > { %3981 = vmatmul.mubr.msk.f32.gmra.mrb[30].mxu1 %vm391_vm1, %v5450_v15  ;;  %4237 = vmatmul.mubr.msk.f32.gmra.mrb[14].mxu0 %vm391_vm1, %v6189_v16  ;;  %v6194_v15 = vld [vmem:[#allocation26_spill] sm:$0xff] }
  0xd7   : > { %3991 = vmatprep.mubr.msk.f32.mxu1 %vm391_vm1, %v6190_v63  ;;  %4239 = vmatprep.mubr.msk.f32.mxu0 %vm391_vm1, %v6191_v8  ;;  %v6196_v63 = vld [vmem:[#allocation28_spill] sm:$0xff] }
  0xda   : > { %3992 = vmatmul.mubr.msk.f32.vlgmr.msra.gmra.mrb[0].mxu1 %vm391_vm1, %v6192_v27  ;;  %4240 = vmatmul.mubr.msk.f32.gmra.mrb[16].mxu0 %vm391_vm1, %v6193_v4  ;;  %v1646_v27 = vrot.slane %v5418_v26, 1 }
  0xdb   : > { %4393 = vmatpush3.bf16.msra.mxu1 %v4756_v7  ;;  %3994 = vmatprep.mubr.msk.f32.mxu1 %vm391_vm1, %v4823_v32  ;;  %v6197_v7 = vld [vmem:[#allocation30_spill] sm:$0xff]  ;;  %v6198_v32 = vld [vmem:[#allocation32_spill] sm:$0xff] }
  0xdc   : > { %4242 = vmatprep.mubr.msk.f32.mxu0 %vm391_vm1, %v6194_v15  ;;  %4392 = vmatprep.subr.bf16.mxu1 %v6195_v19 }
  0xde   : > { %3995 = vmatmul.mubr.msk.f32.gmra.mrb[2].mxu1 %vm391_vm1, %v4831_v36  ;;  %4243 = vmatmul.mubr.msk.f32.gmra.mrb[18].mxu0 %vm391_vm1, %v6196_v63  ;;  %v6199_v36 = vld [vmem:[#allocation34_spill] sm:$0xff] }
  0xdf   : > { %3997 = vmatprep.mubr.msk.f32.mxu1 %vm391_vm1, %v4846_v45  ;;  %4245 = vmatprep.mubr.msk.f32.mxu0 %vm391_vm1, %v6197_v7  ;;  %v6200_v45 = vld [vmem:[#allocation37_spill] sm:$0xff] }
  0xe0   : > { %4394 = vmatpush3.bf16.msra.mxu1 %v6195_v19  ;;  %v6202_v19 = vld [vmem:[#allocation40_spill] sm:$0xff] }
  0xe2   : > { %3998 = vmatmul.mubr.msk.f32.gmra.mrb[4].mxu1 %vm391_vm1, %v4849_v46  ;;  %4246 = vmatmul.mubr.msk.f32.gmra.mrb[20].mxu0 %vm391_vm1, %v6198_v32  ;;  %v6201_v46 = vld [vmem:[#allocation39_spill] sm:$0xff] }
  0xe3   : > { %4000 = vmatprep.mubr.msk.f32.mxu1 %vm391_vm1, %v4860_v51  ;;  %4248 = vmatprep.mubr.msk.f32.mxu0 %vm391_vm1, %v6199_v36  ;;  %v1647_v51 = vrot.slane %v5421_v22, 1  ;;  %v5759_v36 = vld [vmem:[%s4787_s20 + $0x1a8] sm:$0x3]  ;;  %s3490_s20 = sshll.u32 %s6222_s12, 8 }
  0xe4   : > { %s5927_s29 = scalar_lea.vmem %s6038_s3, %s3490_s20 }
  0xe5   : > { %v5756_v3 = vsel %vm305_vm0, %v1646_v27, %v1647_v51 }
  0xe6   : > { %4001 = vmatmul.mubr.msk.f32.gmra.mrb[6].mxu1 %vm391_vm1, %v4863_v52  ;;  %4249 = vmatmul.mubr.msk.f32.gmra.mrb[22].mxu0 %vm391_vm1, %v6200_v45  ;;  %v6203_v52 = vld [vmem:[#allocation42_spill] sm:$0xff]  ;;  %v2458_v45 = vrot.slane %v5626_v28, 1 }
  0xe7   : > { %4003 = vmatprep.mubr.msk.f32.mxu1 %vm391_vm1, %v4897_v1  ;;  %4251 = vmatprep.mubr.msk.f32.mxu0 %vm391_vm1, %v6201_v46  ;;  %v1649_v1 = vrot.slane %v5439_v6, 1  ;;  %v2457_v46 = vrot.slane %v5615_v20, 1  ;;  %v2460_v6 = vrot.slane %v5759_v36, 1 }
  0xe9   : > { %v2459_v27 = vsel %vm305_vm0, %v2457_v46, %v2458_v45 }
  0xea   : > { %4004 = vmatmul.mubr.msk.f32.gmra.mrb[8].mxu1 %vm391_vm1, %v4900_v2  ;;  %4252 = vmatmul.mubr.msk.f32.gmra.mrb[24].mxu0 %vm391_vm1, %v6202_v19  ;;  %v6204_v2 = vld [vmem:[#allocation43_spill] sm:$0xff] }
  0xeb   : > { %4006 = vmatprep.mubr.msk.f32.mxu1 %vm391_vm1, %v4926_v11  ;;  %4254 = vmatprep.mubr.msk.f32.mxu0 %vm391_vm1, %v6203_v52  ;;  %v5770_v11 = vsel %vm305_vm0, %v1647_v51, %v1649_v1 }
  0xee   : > { %4007 = vmatmul.mubr.msk.f32.gmra.mrb[10].mxu1 %vm391_vm1, %v4929_v13  ;;  %4255 = vmatmul.mubr.msk.f32.gmra.mrb[26].mxu0 %vm391_vm1, %v6204_v2  ;;  %v2461_v13 = vsel %vm305_vm0, %v2458_v45, %v2460_v6 }
  0xef   : > { %4009 = vmatprep.mubr.msk.f32.mxu1 %vm391_vm1, %v4953_v23  ;;  %4257 = vmatprep.mubr.msk.f32.mxu0 %vm391_vm1, %v5756_v3  ;;  %v6205_v23 = vld [vmem:[#allocation41_spill] sm:$0xff] }
  0xf2   : > { %4010 = vmatmul.mubr.msk.f32.gmra.mrb[12].mxu1 %vm391_vm1, %v4956_v24  ;;  %4258 = vmatmul.mubr.msk.f32.gmra.mrb[28].mxu0 %vm391_vm1, %v5770_v11  ;;  %v6206_v24 = vld [vmem:[#allocation35_spill] sm:$0xff] }
  0xf3   : > { %4012 = vmatprep.mubr.msk.f32.mxu1 %vm391_vm1, %v4979_v35  ;;  %4260 = vmatprep.mubr.msk.f32.mxu0 %vm391_vm1, %v2459_v27  ;;  %v6210_v35 = vld [vmem:[#allocation37_spill] sm:$0xff] }
  0xf6   : > { %4013 = vmatmul.mubr.msk.f32.gmra.mrb[14].mxu1 %vm391_vm1, %v4982_v37  ;;  %4261 = vmatmul.mubr.msk.f32.gmra.mrb[30].mxu0 %vm391_vm1, %v2461_v13  ;;  %v6211_v37 = vld [vmem:[#allocation47_spill] sm:$0xff] }
  0xf7   : > { %4015 = vmatprep.mubr.msk.f32.mxu1 %vm391_vm1, %v5020_v56  ;;  %4271 = vmatprep.mubr.msk.f32.mxu0 %vm391_vm1, %v5081_v50  ;;  %v6213_v50 = vld [vmem:[#allocation48_spill] sm:$0xff]  ;;  %v2728_v56 = vrot.slane %v5615_v20, 2 }
  0xfa   : > { %4016 = vmatmul.mubr.msk.f32.gmra.mrb[16].mxu1 %vm391_vm1, %v5023_v57  ;;  %4272 = vmatmul.mubr.msk.f32.vlgmr.msra.gmra.mrb[0].mxu0 %vm391_vm1, %v6164_v9  ;;  %v2729_v57 = vrot.slane %v5626_v28, 2 }
  0xfb   : > { %4018 = vmatprep.mubr.msk.f32.mxu1 %vm391_vm1, %v5048_v17  ;;  %4274 = vmatprep.mubr.msk.f32.mxu0 %vm391_vm1, %v6165_v42  ;;  %v6214_v17 = vld [vmem:[#allocation49_spill] sm:$0xff]  ;;  %v5922_v42 = vld [vmem:[%s6037_s2] ss:$0 sm:$0xff] }
  0xfe   : > { %4019 = vmatmul.mubr.msk.f32.gmra.mrb[18].mxu1 %vm391_vm1, %v5051_v18  ;;  %4275 = vmatmul.mubr.msk.f32.gmra.mrb[2].mxu0 %vm391_vm1, %v6166_v60  ;;  %v6215_v18 = vld [vmem:[#allocation50_spill] sm:$0xff] }
  0xff   : > { %4021 = vmatprep.mubr.msk.f32.mxu1 %vm391_vm1, %v5086_v41  ;;  %4277 = vmatprep.mubr.msk.f32.mxu0 %vm391_vm1, %v6167_v47  ;;  %v6212_v41 = vld [vmem:[#allocation39_spill] sm:$0xff] }
 0x102   : > { %4022 = vmatmul.mubr.msk.f32.gmra.mrb[20].mxu1 %vm391_vm1, %v5089_v54  ;;  %4278 = vmatmul.mubr.msk.f32.gmra.mrb[4].mxu0 %vm391_vm1, %v6168_v59  ;;  %v2731_v54 = vrot.slane %v5759_v36, 2 }
 0x103   : > { %4024 = vmatprep.mubr.msk.f32.mxu1 %vm391_vm1, %v5128_v25  ;;  %4280 = vmatprep.mubr.msk.f32.mxu0 %vm391_vm1, %v6169_v39  ;;  %v6207_v25 = vld [vmem:[#allocation36_spill] sm:$0xff] }
 0x106   : > { %4025 = vmatmul.mubr.msk.f32.gmra.mrb[22].mxu1 %vm391_vm1, %v5131_v49  ;;  %4281 = vmatmul.mubr.msk.f32.gmra.mrb[6].mxu0 %vm391_vm1, %v6170_v38  ;;  %v2730_v49 = vsel %vm970_vm2, %v2728_v56, %v2729_v57 }
 0x107   : > { %4027 = vmatprep.mubr.msk.f32.mxu1 %vm391_vm1, %v5165_v48  ;;  %4283 = vmatprep.mubr.msk.f32.mxu0 %vm391_vm1, %v5231_v5  ;;  %v6216_v48 = vld [vmem:[#allocation51_spill] sm:$0xff] }
 0x10a   : > { %4028 = vmatmul.mubr.msk.f32.gmra.mrb[24].mxu1 %vm391_vm1, %v5168_v31  ;;  %4284 = vmatmul.mubr.msk.f32.gmra.mrb[8].mxu0 %vm391_vm1, %v6171_v21  ;;  %v2732_v31 = vsel %vm970_vm2, %v2729_v57, %v2731_v54 }
 0x10b   : > { %4030 = vmatprep.mubr.msk.f32.mxu1 %vm391_vm1, %v5201_v0  ;;  %4286 = vmatprep.mubr.msk.f32.mxu0 %vm391_vm1, %v5266_v30 }
 0x10e   : > { %4031 = vmatmul.mubr.msk.f32.gmra.mrb[26].mxu1 %vm391_vm1, %v5204_v62  ;;  %4287 = vmatmul.mubr.msk.f32.gmra.mrb[10].mxu0 %vm391_vm1, %v6205_v23 }
 0x10f   : > { %4033 = vmatprep.mubr.msk.f32.mxu1 %vm391_vm1, %v6206_v24  ;;  %4289 = vmatprep.mubr.msk.f32.mxu0 %vm391_vm1, %v5290_v53 }
 0x112   : > { %4034 = vmatmul.mubr.msk.f32.gmra.mrb[28].mxu1 %vm391_vm1, %v6207_v25  ;;  %4290 = vmatmul.mubr.msk.f32.gmra.mrb[12].mxu0 %vm391_vm1, %v5306_v44 }
 0x113   : > { %4036 = vmatprep.mubr.msk.f32.mxu1 %vm391_vm1, %v5418_v26  ;;  %4292 = vmatprep.mubr.msk.f32.mxu0 %vm391_vm1, %v5310_v33  ;;  %v6209_v26 = vld [vmem:[#allocation46_spill] sm:$0xff] }
 0x116   : > { %4037 = vmatmul.mubr.msk.f32.gmra.mrb[30].mxu1 %vm391_vm1, %v5421_v22  ;;  %4293 = vmatmul.mubr.msk.f32.gmra.mrb[14].mxu0 %vm391_vm1, %v5329_v61  ;;  %v6208_v22 = vld [vmem:[#allocation34_spill] sm:$0xff] }
 0x117   : > { %4071 = vmatprep.mubr.msk.f32.mxu1 %vm391_vm1, %v6188_v29  ;;  %4295 = vmatprep.mubr.msk.f32.mxu0 %vm391_vm1, %v5333_v40 }
 0x11a   : > { %4072 = vmatmul.mubr.msk.f32.vlgmr.msra.gmra.mrb[16].mxu1 %vm391_vm1, %v6189_v16  ;;  %4296 = vmatmul.mubr.msk.f32.gmra.mrb[16].mxu0 %vm391_vm1, %v5353_v12 }
 0x11b   : > { %4074 = vmatprep.mubr.msk.f32.mxu1 %vm391_vm1, %v6191_v8  ;;  %4298 = vmatprep.mubr.msk.f32.mxu0 %vm391_vm1, %v5357_v14 }
 0x11e   : > { %4075 = vmatmul.mubr.msk.f32.gmra.mrb[18].mxu1 %vm391_vm1, %v6193_v4  ;;  %4299 = vmatmul.mubr.msk.f32.gmra.mrb[18].mxu0 %vm391_vm1, %v5372_v43 }
 0x11f   : > { %4077 = vmatprep.mubr.msk.f32.mxu1 %vm391_vm1, %v6194_v15  ;;  %4301 = vmatprep.mubr.msk.f32.mxu0 %vm391_vm1, %v5376_v34 }
 0x122   : > { %4078 = vmatmul.mubr.msk.f32.gmra.mrb[20].mxu1 %vm391_vm1, %v6196_v63  ;;  %4302 = vmatmul.mubr.msk.f32.gmra.mrb[20].mxu0 %vm391_vm1, %v6181_v10 }
 0x123   : > { %4080 = vmatprep.mubr.msk.f32.mxu1 %vm391_vm1, %v6197_v7  ;;  %4304 = vmatprep.mubr.msk.f32.mxu0 %vm391_vm1, %v6183_v55 }
 0x126   : > { %4081 = vmatmul.mubr.msk.f32.gmra.mrb[22].mxu1 %vm391_vm1, %v6198_v32  ;;  %4305 = vmatmul.mubr.msk.f32.gmra.mrb[22].mxu0 %vm391_vm1, %v5407_v58 }
 0x127   : > { %4083 = vmatprep.mubr.msk.f32.mxu1 %vm391_vm1, %v6208_v22  ;;  %4307 = vmatprep.mubr.msk.f32.mxu0 %vm391_vm1, %v6209_v26 }
 0x12a   : > { %4084 = vmatmul.mubr.msk.f32.gmra.mrb[24].mxu1 %vm391_vm1, %v6210_v35  ;;  %4308 = vmatmul.mubr.msk.f32.gmra.mrb[24].mxu0 %vm391_vm1, %v6211_v37 }
 0x12b   : > { %4086 = vmatprep.mubr.msk.f32.mxu1 %vm391_vm1, %v6212_v41  ;;  %4310 = vmatprep.mubr.msk.f32.mxu0 %vm391_vm1, %v6213_v50 }
 0x12e   : > { %4087 = vmatmul.mubr.msk.f32.gmra.mrb[26].mxu1 %vm391_vm1, %v6202_v19  ;;  %4311 = vmatmul.mubr.msk.f32.gmra.mrb[26].mxu0 %vm391_vm1, %v6214_v17 }
 0x12f   : > { %4089 = vmatprep.mubr.msk.f32.mxu1 %vm391_vm1, %v6203_v52  ;;  %4313 = vmatprep.mubr.msk.f32.mxu0 %vm391_vm1, %v6215_v18 }
 0x132   : > { %4090 = vmatmul.mubr.msk.f32.gmra.mrb[28].mxu1 %vm391_vm1, %v6204_v2  ;;  %4314 = vmatmul.mubr.msk.f32.gmra.mrb[28].mxu0 %vm391_vm1, %v6216_v48 }
 0x133   : > { %4092 = vmatprep.mubr.msk.f32.mxu1 %vm391_vm1, %v5756_v3  ;;  %4316 = vmatprep.mubr.msk.f32.mxu0 %vm391_vm1, %v2730_v49 }
 0x136   : > { %4093 = vmatmul.mubr.msk.f32.gmra.mrb[30].mxu1 %vm391_vm1, %v5770_v11  ;;  %4317 = vmatmul.mubr.msk.f32.gmra.mrb[30].mxu0 %vm391_vm1, %v2732_v31 }
 0x1ad   : > { %v3993_v0 = vpop.f32.mrb[0].mxu1 }
 0x1ae   : > { %v1454_v62 = vpop.f32.mrb[1].mxu1 }
 0x1b1   : > { %v3996_v5 = vpop.f32.mrb[2].mxu1 }
 0x1b2   : > { %v1464_v53 = vpop.f32.mrb[3].mxu1 }
 0x1b5   : > { %v3999_v30 = vpop.f32.mrb[4].mxu1 }
 0x1b6   : > { %v1474_v44 = vpop.f32.mrb[5].mxu1 }
 0x1b9   : > { %v4002_v33 = vpop.f32.mrb[6].mxu1 }
 0x1ba   : > { %v1484_v61 = vpop.f32.mrb[7].mxu1 }
 0x1bd   : > { %v4005_v40 = vpop.f32.mrb[8].mxu1 }
 0x1be   : > { %v1494_v12 = vpop.f32.mrb[9].mxu1 }
 0x1c1   : > { %v4008_v14 = vpop.f32.mrb[10].mxu1 }
 0x1c2   : > { %v1504_v43 = vpop.f32.mrb[11].mxu1 }
 0x1c5   : > { %v4011_v34 = vpop.f32.mrb[12].mxu1 }
 0x1c6   : > { %v1514_v58 = vpop.f32.mrb[13].mxu1 }
 0x1c9   : > { %v4014_v3 = vpop.f32.mrb[14].mxu1 }
 0x1ca   : > { %v5916_v15 = vpop.f32.mrb[15].mxu1 }
 0x1cd   : > { %v4273_v9 = vpop.f32.mrb[0].mxu0 }
 0x1ce   : > { %v4395_v60 = vadd.f32 %v4273_v9, %v3993_v0  ;;  %v2808_v47 = vpop.f32.mrb[1].mxu0 }
 0x1cf   : > { %v4396_v59 = vadd.f32 %v2808_v47, %v1454_v62 }
 0x1d0   : > { %v3007_v39 = vadd.f32 %v4395_v60, %v5922_v42 }
 0x1d1   : > { %v3006_v38 = vadd.f32 %v4396_v59, %v5922_v42  ;;  %v4276_v20 = vpop.f32.mrb[2].mxu0 }
 0x1d2   : > { %3039 = vst.msk [vmem:[%s5927_s29 + $0x8] sm:$0xff] %vm391_vm1, %v3007_v39  ;;  %v4397_v21 = vadd.f32 %v4276_v20, %v3996_v5  ;;  %v2818_v28 = vpop.f32.mrb[3].mxu0 }
 0x1d3   : > { %3038 = vst.msk [vmem:[%s5927_s29] sm:$0xff] %vm391_vm1, %v3006_v38  ;;  %v4398_v10 = vadd.f32 %v2818_v28, %v1464_v53 }
 0x1d4   : > { %v3009_v55 = vadd.f32 %v4397_v21, %v5922_v42 }
 0x1d5   : > { %v3008_v29 = vadd.f32 %v4398_v10, %v5922_v42  ;;  %v4279_v16 = vpop.f32.mrb[4].mxu0 }
 0x1d6   : > { %3041 = vst.msk [vmem:[%s5927_s29 + $0x18] sm:$0xff] %vm391_vm1, %v3009_v55  ;;  %v4399_v8 = vadd.f32 %v4279_v16, %v3999_v30  ;;  %v2828_v4 = vpop.f32.mrb[5].mxu0 }
 0x1d7   : > { %3040 = vst.msk [vmem:[%s5927_s29 + $0x10] sm:$0xff] %vm391_vm1, %v3008_v29  ;;  %v4400_v63 = vadd.f32 %v2828_v4, %v1474_v44 }
 0x1d8   : > { %v3011_v7 = vadd.f32 %v4399_v8, %v5922_v42 }
 0x1d9   : > { %v3010_v32 = vadd.f32 %v4400_v63, %v5922_v42  ;;  %v4282_v36 = vpop.f32.mrb[6].mxu0 }
 0x1da   : > { %3043 = vst.msk [vmem:[%s5927_s29 + $0x28] sm:$0xff] %vm391_vm1, %v3011_v7  ;;  %v4401_v45 = vadd.f32 %v4282_v36, %v4002_v33  ;;  %v2838_v46 = vpop.f32.mrb[7].mxu0 }
 0x1db   : > { %3042 = vst.msk [vmem:[%s5927_s29 + $0x20] sm:$0xff] %vm391_vm1, %v3010_v32  ;;  %v4402_v51 = vadd.f32 %v2838_v46, %v1484_v61 }
 0x1dc   : > { %v3013_v19 = vadd.f32 %v4401_v45, %v5922_v42 }
 0x1dd   : > { %v3012_v52 = vadd.f32 %v4402_v51, %v5922_v42  ;;  %v4285_v1 = vpop.f32.mrb[8].mxu0 }
 0x1de   : > { %3045 = vst.msk [vmem:[%s5927_s29 + $0x38] sm:$0xff] %vm391_vm1, %v3013_v19  ;;  %v4403_v2 = vadd.f32 %v4285_v1, %v4005_v40  ;;  %v2848_v11 = vpop.f32.mrb[9].mxu0 }
 0x1df   : > { %3044 = vst.msk [vmem:[%s5927_s29 + $0x30] sm:$0xff] %vm391_vm1, %v3012_v52  ;;  %v4404_v6 = vadd.f32 %v2848_v11, %v1494_v12 }
 0x1e0   : > { %v3015_v27 = vadd.f32 %v4403_v2, %v5922_v42 }
 0x1e1   : > { %v3014_v13 = vadd.f32 %v4404_v6, %v5922_v42  ;;  %v4288_v23 = vpop.f32.mrb[10].mxu0 }
 0x1e2   : > { %3047 = vst.msk [vmem:[%s5927_s29 + $0x48] sm:$0xff] %vm391_vm1, %v3015_v27  ;;  %v4405_v24 = vadd.f32 %v4288_v23, %v4008_v14  ;;  %v2858_v25 = vpop.f32.mrb[11].mxu0 }
 0x1e3   : > { %3046 = vst.msk [vmem:[%s5927_s29 + $0x40] sm:$0xff] %vm391_vm1, %v3014_v13  ;;  %v4406_v22 = vadd.f32 %v2858_v25, %v1504_v43 }
 0x1e4   : > { %v3017_v26 = vadd.f32 %v4405_v24, %v5922_v42 }
 0x1e5   : > { %v3016_v35 = vadd.f32 %v4406_v22, %v5922_v42  ;;  %v4291_v37 = vpop.f32.mrb[12].mxu0 }
 0x1e6   : > { %3049 = vst.msk [vmem:[%s5927_s29 + $0x58] sm:$0xff] %vm391_vm1, %v3017_v26  ;;  %v4407_v41 = vadd.f32 %v4291_v37, %v4011_v34  ;;  %v2868_v50 = vpop.f32.mrb[13].mxu0 }
 0x1e7   : > { %3048 = vst.msk [vmem:[%s5927_s29 + $0x50] sm:$0xff] %vm391_vm1, %v3016_v35  ;;  %v4408_v56 = vadd.f32 %v2868_v50, %v1514_v58 }
 0x1e8   : > { %v3019_v57 = vadd.f32 %v4407_v41, %v5922_v42 }
 0x1e9   : > { %v3018_v17 = vadd.f32 %v4408_v56, %v5922_v42  ;;  %v4294_v18 = vpop.f32.mrb[14].mxu0 }
 0x1ea   : > { %3051 = vst.msk [vmem:[%s5927_s29 + $0x68] sm:$0xff] %vm391_vm1, %v3019_v57  ;;  %v4409_v54 = vadd.f32 %v4294_v18, %v4014_v3  ;;  %v2878_v49 = vpop.f32.mrb[15].mxu0 }
 0x1eb   : > { %3050 = vst.msk [vmem:[%s5927_s29 + $0x60] sm:$0xff] %vm391_vm1, %v3018_v17  ;;  %v4410_v48 = vadd.f32 %v2878_v49, %v5916_v15 }
 0x1ec   : > { %v3021_v31 = vadd.f32 %v4409_v54, %v5922_v42 }
 0x1ed   : > { %v4073_v0 = vpop.f32.mrb[16].mxu1  ;;  %v3020_v62 = vadd.f32 %v4410_v48, %v5922_v42  ;;  %v4297_v5 = vpop.f32.mrb[16].mxu0 }
 0x1ee   : > { %v1806_v53 = vpop.f32.mrb[17].mxu1  ;;  %3053 = vst.msk [vmem:[%s5927_s29 + $0x78] sm:$0xff] %vm391_vm1, %v3021_v31  ;;  %v4411_v30 = vadd.f32 %v4297_v5, %v4073_v0  ;;  %v2888_v44 = vpop.f32.mrb[17].mxu0 }
 0x1ef   : > { %3052 = vst.msk [vmem:[%s5927_s29 + $0x70] sm:$0xff] %vm391_vm1, %v3020_v62  ;;  %v4412_v33 = vadd.f32 %v2888_v44, %v1806_v53 }
 0x1f0   : > { %v3023_v61 = vadd.f32 %v4411_v30, %v5922_v42 }
 0x1f1   : > { %v4076_v40 = vpop.f32.mrb[18].mxu1  ;;  %v3022_v12 = vadd.f32 %v4412_v33, %v5922_v42  ;;  %v4300_v14 = vpop.f32.mrb[18].mxu0 }
 0x1f2   : > { %v1816_v43 = vpop.f32.mrb[19].mxu1  ;;  %3055 = vst.msk [vmem:[%s5927_s29 + $0x88] sm:$0xff] %vm391_vm1, %v3023_v61  ;;  %v4413_v34 = vadd.f32 %v4300_v14, %v4076_v40  ;;  %v2898_v58 = vpop.f32.mrb[19].mxu0 }
 0x1f3   : > { %3054 = vst.msk [vmem:[%s5927_s29 + $0x80] sm:$0xff] %vm391_vm1, %v3022_v12  ;;  %v4414_v3 = vadd.f32 %v2898_v58, %v1816_v43 }
 0x1f4   : > { %v3025_v15 = vadd.f32 %v4413_v34, %v5922_v42 }
 0x1f5   : > { %v4079_v9 = vpop.f32.mrb[20].mxu1  ;;  %v3024_v60 = vadd.f32 %v4414_v3, %v5922_v42  ;;  %v4303_v47 = vpop.f32.mrb[20].mxu0 }
 0x1f6   : > { %v1826_v59 = vpop.f32.mrb[21].mxu1  ;;  %3057 = vst.msk [vmem:[%s5927_s29 + $0x98] sm:$0xff] %vm391_vm1, %v3025_v15  ;;  %v4415_v39 = vadd.f32 %v4303_v47, %v4079_v9  ;;  %v2908_v38 = vpop.f32.mrb[21].mxu0 }
 0x1f7   : > { %3056 = vst.msk [vmem:[%s5927_s29 + $0x90] sm:$0xff] %vm391_vm1, %v3024_v60  ;;  %v4416_v20 = vadd.f32 %v2908_v38, %v1826_v59 }
 0x1f8   : > { %v3027_v21 = vadd.f32 %v4415_v39, %v5922_v42 }
 0x1f9   : > { %v4082_v28 = vpop.f32.mrb[22].mxu1  ;;  %v3026_v10 = vadd.f32 %v4416_v20, %v5922_v42  ;;  %v4306_v55 = vpop.f32.mrb[22].mxu0 }
 0x1fa   : > { %v1836_v29 = vpop.f32.mrb[23].mxu1  ;;  %3059 = vst.msk [vmem:[%s5927_s29 + $0xa8] sm:$0xff] %vm391_vm1, %v3027_v21  ;;  %v4417_v16 = vadd.f32 %v4306_v55, %v4082_v28  ;;  %v2918_v8 = vpop.f32.mrb[23].mxu0 }
 0x1fb   : > { %3058 = vst.msk [vmem:[%s5927_s29 + $0xa0] sm:$0xff] %vm391_vm1, %v3026_v10  ;;  %v4418_v4 = vadd.f32 %v2918_v8, %v1836_v29 }
 0x1fc   : > { %v3029_v63 = vadd.f32 %v4417_v16, %v5922_v42 }
 0x1fd   : > { %v4085_v7 = vpop.f32.mrb[24].mxu1  ;;  %v3028_v32 = vadd.f32 %v4418_v4, %v5922_v42  ;;  %v4309_v36 = vpop.f32.mrb[24].mxu0 }
 0x1fe   : > { %v1846_v45 = vpop.f32.mrb[25].mxu1  ;;  %3061 = vst.msk [vmem:[%s5927_s29 + $0xb8] sm:$0xff] %vm391_vm1, %v3029_v63  ;;  %v4419_v46 = vadd.f32 %v4309_v36, %v4085_v7  ;;  %v2928_v51 = vpop.f32.mrb[25].mxu0 }
 0x1ff   : > { %3060 = vst.msk [vmem:[%s5927_s29 + $0xb0] sm:$0xff] %vm391_vm1, %v3028_v32  ;;  %v4420_v19 = vadd.f32 %v2928_v51, %v1846_v45 }
 0x200   : > { %v3031_v52 = vadd.f32 %v4419_v46, %v5922_v42 }
 0x201   : > { %v4088_v1 = vpop.f32.mrb[26].mxu1  ;;  %v3030_v2 = vadd.f32 %v4420_v19, %v5922_v42  ;;  %v4312_v11 = vpop.f32.mrb[26].mxu0 }
 0x202   : > { %v1856_v6 = vpop.f32.mrb[27].mxu1  ;;  %3063 = vst.msk [vmem:[%s5927_s29 + $0xc8] sm:$0xff] %vm391_vm1, %v3031_v52  ;;  %v4421_v27 = vadd.f32 %v4312_v11, %v4088_v1  ;;  %v2938_v13 = vpop.f32.mrb[27].mxu0 }
 0x203   : > { %3062 = vst.msk [vmem:[%s5927_s29 + $0xc0] sm:$0xff] %vm391_vm1, %v3030_v2  ;;  %v4422_v23 = vadd.f32 %v2938_v13, %v1856_v6 }
 0x204   : > { %v3033_v24 = vadd.f32 %v4421_v27, %v5922_v42 }
 0x205   : > { %v4091_v25 = vpop.f32.mrb[28].mxu1  ;;  %v3032_v22 = vadd.f32 %v4422_v23, %v5922_v42  ;;  %v4315_v26 = vpop.f32.mrb[28].mxu0 }
 0x206   : > { %v1866_v35 = vpop.f32.mrb[29].mxu1  ;;  %3065 = vst.msk [vmem:[%s5927_s29 + $0xd8] sm:$0xff] %vm391_vm1, %v3033_v24  ;;  %v4423_v37 = vadd.f32 %v4315_v26, %v4091_v25  ;;  %v2948_v41 = vpop.f32.mrb[29].mxu0 }
 0x207   : > { %3064 = vst.msk [vmem:[%s5927_s29 + $0xd0] sm:$0xff] %vm391_vm1, %v3032_v22  ;;  %v4424_v50 = vadd.f32 %v2948_v41, %v1866_v35 }
 0x208   : > { %v3035_v56 = vadd.f32 %v4423_v37, %v5922_v42 }
 0x209   : > { %v4094_v57 = vpop.f32.mrb[30].mxu1  ;;  %v3034_v17 = vadd.f32 %v4424_v50, %v5922_v42  ;;  %v4318_v18 = vpop.f32.mrb[30].mxu0 }
 0x20a   : > { %v1876_v54 = vpop.f32.mrb[31].mxu1  ;;  %3067 = vst.msk [vmem:[%s5927_s29 + $0xe8] sm:$0xff] %vm391_vm1, %v3035_v56  ;;  %v4425_v49 = vadd.f32 %v4318_v18, %v4094_v57  ;;  %v2958_v48 = vpop.f32.mrb[31].mxu0 }
 0x20b   : > { %3066 = vst.msk [vmem:[%s5927_s29 + $0xe0] sm:$0xff] %vm391_vm1, %v3034_v17  ;;  %v4426_v31 = vadd.f32 %v2958_v48, %v1876_v54 }
 0x20c   : > { %v3037_v0 = vadd.f32 %v4425_v49, %v5922_v42 }
 0x20d   : > { %v3036_v62 = vadd.f32 %v4426_v31, %v5922_v42 }
 0x20e   : > { %3069 = vst.msk [vmem:[%s5927_s29 + $0xf8] sm:$0xff] %vm391_vm1, %v3037_v0 }
 0x20f   : > { %3068 = vst.msk [vmem:[%s5927_s29 + $0xf0] sm:$0xff] %vm391_vm1, %v3036_v62 }
 0x210 PF: > { %s13_s14 = sadd.s32 1, %s4698_s14   ;;  %s6217_s12 = smov %s4694_s13 }
 0x211   : > { %p10_p5 = scmp.ge.s32.totalorder %s13_s14, 4   ;;  %s6218_s13 = smov %s6220_s15 }
 0x213   :  { %12 = sbr.rel (!%p10_p5) target bundleno = 2 (0x2), region = 71 }

// kernel: lte_forward.8
= control target key start
LH: loop header
LB: loop body
LE: loop exit
PB: predicated region body
PF: predicated region fallthrough
CT: control target
= control target key end

     0   :  { %s4752_s12 = smov 0   ;;  %s4754_s13 = smov 0   ;;  %s6076_s0 = inlined_call_operand.vmem [shape: f32[2,18,18,32], index: 0, kind: input, shape index: {}]   ;;  %s6077_s1 = inlined_call_operand.vmem [shape: f32[9,32,32], index: 1, kind: input, shape index: {}]   ;;  %s6078_s2 = inlined_call_operand.vmem [shape: f32[1,32], index: 2, kind: input, shape index: {}]   ;;  %s6079_s3 = inlined_call_operand.vmem [shape: f32[2,16,16,32], index: 3, kind: output, shape index: {}]  }
   0x1   :  { %s4756_s14 = smov 0  }
   0x2 LB: > { %s25_s15 = sadd.s32 1, %s4726_s13  ;;  %p3195_p0 = scmp.ge.s32.totalorder %s4730_s14, 1  ;;  %s4730_s14 = sphi %s4756_s14, %s13_s14   ;;  %s4726_s13 = sphi %s4754_s13, %s6259_s13   ;;  %s4722_s12 = sphi %s4752_s12, %s6258_s12  }
   0x3   : > { %p27_p1 = scmp.ge.s32.totalorder %s25_s15, 2  ;;  %p151_p2 = scmp.lt.s32.totalorder %s4730_s14, 3 }
   0x5   : > { %s6261_s15 = smov (%p27_p1, %s25_s15), 0  ;;  %p152_p3 = pnand %p3195_p0, %p151_p2 }
   0x7   : > { %155 = sbr.rel (%p152_p3) target bundleno = 530 (0x212), region = 32 }
   0xe   : > { %v3199_v0 = vld [vmem:[%s6077_s1 + $0x20] sm:$0xff]  ;;  %v3200_v1 = vld [vmem:[%s6077_s1 + $0x28] sm:$0xff]  ;;  %p180_p4 = scmp.lt.s32.totalorder %s4722_s12, 1  ;;  %v3201_v5 = vld [vmem:[%s6077_s1 + $0x30] sm:$0xff]  ;;  %vm305_vm0 = vcmask 1046528   ;;  %vm391_vm1 = vcmask 261120  }
   0xf   : > { %v3339_v2 = vld [vmem:[%s6077_s1 + $0x80] sm:$0xff]  ;;  %v4351_v3 = vpack.c.bf16 %v3200_v1, %v3199_v0  ;;  %v3340_v4 = vld [vmem:[%s6077_s1 + $0x88] sm:$0xff]  ;;  %v3202_v6 = vld [vmem:[%s6077_s1 + $0x38] sm:$0xff]  ;;  %vm970_vm2 = vcmask 1045504  }
  0x10   : > { %v4788_v7 = vpack.c.bf16 %v3340_v4, %v3339_v2  ;;  %v4355_v8 = vpack.c.bf16 %v3202_v6, %v3201_v5  ;;  %v3341_v9 = vld [vmem:[%s6077_s1 + $0x90] sm:$0xff]  ;;  %v3342_v10 = vld [vmem:[%s6077_s1 + $0x98] sm:$0xff]  ;;  %s6263_s12 = smov (!%p180_p4, %s4722_s12), 1  ;;  %v253_v11 = vld [vmem:[%s6077_s1] sm:$0xff] }
  0x11   : > { %4352 = vmatprep.subr.bf16.mxu1 %v4351_v3  ;;  %v4801_v12 = vpack.c.bf16 %v3342_v10, %v3341_v9  ;;  %v254_v13 = vld [vmem:[%s6077_s1 + $0x8] sm:$0xff]  ;;  %v3375_v14 = vld [vmem:[%s6077_s1 + $0xa0] sm:$0xff]  ;;  %s4683_s17 = smul.u32 432, %s6263_s12  ;;  %v3377_v18 = vld [vmem:[%s6077_s1 + $0xb0] sm:$0xff]  ;;  %s3522_s26 = sshll.u32 %s6263_s12, 8 }
  0x12   : > { %v3376_v15 = vld [vmem:[%s6077_s1 + $0xa8] sm:$0xff]  ;;  %4384 = vmatprep.subr.bf16.mxu0 %v4788_v7  ;;  %4354 = vmatpush3.bf16.msra.mxu1 %v4351_v3  ;;  %v4359_v16 = vpack.c.bf16 %v254_v13, %v253_v11  ;;  %v3378_v19 = vld [vmem:[%s6077_s1 + $0xb8] sm:$0xff]  ;;  %v255_v23 = vld [vmem:[%s6077_s1 + $0x10] sm:$0xff]  ;;  %s5966_s29 = scalar_lea.vmem %s6079_s3, %s3522_s26 }
  0x13   : > { %6155 = vst [vmem:[#allocation2_spill] sm:$0xff] %v4801_v12  ;;  %4386 = vmatpush3.bf16.msra.mxu0 %v4788_v7  ;;  %4356 = vmatprep.subr.bf16.mxu1 %v4355_v8  ;;  %s4819_s20 = scalar_lea.vmem %s6076_s0, %s4683_s17  ;;  %v4391_v17 = vpack.c.bf16 %v3376_v15, %v3375_v14  ;;  %v256_v33 = vld [vmem:[%s6077_s1 + $0x18] sm:$0xff]  ;;  %v4395_v39 = vpack.c.bf16 %v3378_v19, %v3377_v18  ;;  %v3411_v40 = vld [vmem:[%s6077_s1 + $0xc0] sm:$0xff]  ;;  %v3412_v54 = vld [vmem:[%s6077_s1 + $0xc8] sm:$0xff] }
  0x14   : > { %4388 = vmatprep.subr.bf16.mxu0 %v4801_v12  ;;  %v4828_v20 = vld [vmem:[%s4819_s20] sm:$0xff]  ;;  %v4831_v21 = vld [vmem:[%s4819_s20 + $0x8] sm:$0xff]  ;;  %v4834_v22 = vld [vmem:[%s4819_s20 + $0x18] sm:$0xff]  ;;  %v4363_v53 = vpack.c.bf16 %v256_v33, %v255_v23  ;;  %v4925_v0 = vpack.c.bf16 %v3412_v54, %v3411_v40 }
  0x15   : > { %6156 = vst [vmem:[#allocation3_spill] sm:$0xff] %v4834_v22  ;;  %v306_v24 = vrot.slane %v4828_v20, 1  ;;  %v307_v25 = vrot.slane %v4831_v21, 1  ;;  %v4842_v26 = vld [vmem:[%s4819_s20 + $0x20] sm:$0xff]  ;;  %v311_v27 = vrot.slane %v4834_v22, 1  ;;  %v4855_v32 = vld [vmem:[%s4819_s20 + $0x30] sm:$0xff] }
  0x16   : > { %4358 = vmatpush3.bf16.msra.mxu1 %v4355_v8  ;;  %6157 = vst [vmem:[#allocation4_spill] sm:$0xff] %v4842_v26  ;;  %v4846_v28 = vld [vmem:[%s4819_s20 + $0x10] sm:$0x3]  ;;  %v312_v29 = vrot.slane %v4842_v26, 1  ;;  %v4852_v31 = vld [vmem:[%s4819_s20 + $0x28] sm:$0x3] }
  0x17   : > { %4390 = vmatpush3.bf16.msra.mxu0 %v4801_v12  ;;  %4360 = vmatprep.subr.bf16.mxu1 %v4359_v16  ;;  %v309_v30 = vrot.slane %v4846_v28, 1  ;;  %v308_v34 = vsel %vm305_vm0, %v306_v24, %v307_v25  ;;  %v314_v35 = vrot.slane %v4852_v31, 1  ;;  %v4863_v36 = vld [vmem:[%s4819_s20 + $0x38] sm:$0xff]  ;;  %v316_v37 = vrot.slane %v4855_v32, 1  ;;  %v4867_v38 = vld [vmem:[%s4819_s20 + $0x40] sm:$0x3] }
  0x18   : > { %4392 = vmatprep.subr.bf16.mxu0 %v4391_v17  ;;  %3855 = vmatprep.mubr.msk.f32.mxu1 %vm391_vm1, %v308_v34  ;;  %v313_v41 = vsel %vm305_vm0, %v311_v27, %v312_v29  ;;  %v317_v43 = vrot.slane %v4863_v36, 1  ;;  %v319_v44 = vrot.slane %v4867_v38, 1  ;;  %v4878_v45 = vld [vmem:[%s4819_s20 + $0x48] sm:$0xff]  ;;  %v4881_v46 = vld [vmem:[%s4819_s20 + $0x50] sm:$0xff]  ;;  %v4884_v47 = vld [vmem:[%s4819_s20 + $0x58] sm:$0x3] }
  0x19   : > { %v310_v42 = vsel %vm305_vm0, %v307_v25, %v309_v30  ;;  %4079 = vmatprep.mubr.msk.f32.mxu0 %vm391_vm1, %v313_v41  ;;  %v315_v48 = vsel %vm305_vm0, %v312_v29, %v314_v35  ;;  %v321_v49 = vrot.slane %v4878_v45, 1  ;;  %v322_v50 = vrot.slane %v4881_v46, 1  ;;  %v4892_v51 = vld [vmem:[%s4819_s20 + $0x60] sm:$0xff]  ;;  %v4895_v52 = vld [vmem:[%s4819_s20 + $0x68] sm:$0xff]  ;;  %v4923_v63 = vld [vmem:[%s4819_s20 + $0x70] sm:$0x3] }
  0x1a   : > { %3856 = vmatmul.mubr.msk.f32.vlgmr.msra.gmra.mrb[0].mxu1 %vm391_vm1, %v310_v42  ;;  %4080 = vmatmul.mubr.msk.f32.vlgmr.msra.gmra.mrb[0].mxu0 %vm391_vm1, %v315_v48  ;;  %v4902_v55 = vsel %vm305_vm0, %v316_v37, %v317_v43  ;;  %v3267_v56 = vld [vmem:[%s6077_s1 + $0x40] sm:$0xff]  ;;  %v3268_v57 = vld [vmem:[%s6077_s1 + $0x48] sm:$0xff]  ;;  %v4912_v58 = vsel %vm305_vm0, %v317_v43, %v319_v44  ;;  %v324_v59 = vrot.slane %v4884_v47, 1  ;;  %v326_v61 = vrot.slane %v4892_v51, 1  ;;  %v4929_v1 = vld [vmem:[%s4819_s20 + $0x78] sm:$0xff] }
  0x1b   : > { %4362 = vmatpush3.bf16.msra.mxu1 %v4359_v16  ;;  %6158 = vst [vmem:[#allocation5_spill] sm:$0xff] %v4902_v55  ;;  %4394 = vmatpush3.bf16.msra.mxu0 %v4391_v17  ;;  %6159 = vst [vmem:[#allocation6_spill] sm:$0xff] %v4912_v58  ;;  %v4918_v60 = vsel %vm305_vm0, %v321_v49, %v322_v50  ;;  %v327_v62 = vrot.slane %v4895_v52, 1  ;;  %v4932_v2 = vld [vmem:[%s4819_s20 + $0x80] sm:$0xff]  ;;  %v4934_v3 = vpack.c.bf16 %v3268_v57, %v3267_v56  ;;  %v4952_v10 = vld [vmem:[%s4819_s20 + $0x88] sm:$0x3] }
  0x1c   : > { %3858 = vmatprep.mubr.msk.f32.mxu1 %vm391_vm1, %v313_v41  ;;  %4082 = vmatprep.mubr.msk.f32.mxu0 %vm391_vm1, %v4902_v55  ;;  %6160 = vst [vmem:[#allocation7_spill] sm:$0xff] %v4918_v60  ;;  %v4943_v4 = vsel %vm305_vm0, %v322_v50, %v324_v59  ;;  %v329_v5 = vrot.slane %v4923_v63, 1  ;;  %v331_v8 = vrot.slane %v4929_v1, 1  ;;  %v332_v9 = vrot.slane %v4932_v2, 1  ;;  %v4958_v11 = vld [vmem:[%s4819_s20 + $0x90] sm:$0xff]  ;;  %v4961_v13 = vld [vmem:[%s4819_s20 + $0x98] sm:$0xff] }
  0x1d   : > { %4396 = vmatprep.subr.bf16.mxu0 %v4395_v39  ;;  %4364 = vmatprep.subr.bf16.mxu1 %v4363_v53  ;;  %6161 = vst [vmem:[#allocation8_spill] sm:$0xff] %v4943_v4  ;;  %v4947_v6 = vsel %vm305_vm0, %v326_v61, %v327_v62  ;;  %v334_v15 = vrot.slane %v4952_v10, 1  ;;  %v336_v17 = vrot.slane %v4958_v11, 1  ;;  %v337_v18 = vrot.slane %v4961_v13, 1  ;;  %v4980_v19 = vld [vmem:[%s4819_s20 + $0xa0] sm:$0x3] }
  0x1e   : > { %3859 = vmatmul.mubr.msk.f32.gmra.mrb[2].mxu1 %vm391_vm1, %v315_v48  ;;  %4083 = vmatmul.mubr.msk.f32.gmra.mrb[2].mxu0 %vm391_vm1, %v4912_v58  ;;  %6162 = vst [vmem:[#allocation9_spill] sm:$0xff] %v4947_v6  ;;  %v4971_v14 = vsel %vm305_vm0, %v327_v62, %v329_v5  ;;  %v4975_v16 = vsel %vm305_vm0, %v331_v8, %v332_v9  ;;  %v4985_v23 = vld [vmem:[%s4819_s20 + $0xa8] sm:$0xff]  ;;  %v4988_v24 = vld [vmem:[%s4819_s20 + $0xb0] sm:$0xff]  ;;  %v339_v27 = vrot.slane %v4980_v19, 1  ;;  %v5006_v34 = vld [vmem:[%s4819_s20 + $0xb8] sm:$0x3] }
  0x1f   : > { %3861 = vmatprep.mubr.msk.f32.mxu1 %vm391_vm1, %v4902_v55  ;;  %4085 = vmatprep.mubr.msk.f32.mxu0 %vm391_vm1, %v4918_v60  ;;  %6163 = vst [vmem:[#allocation10_spill] sm:$0xff] %v4971_v14  ;;  %6164 = vst [vmem:[#allocation11_spill] sm:$0xff] %v4975_v16  ;;  %v4997_v25 = vsel %vm305_vm0, %v332_v9, %v334_v15  ;;  %v5001_v29 = vsel %vm305_vm0, %v336_v17, %v337_v18  ;;  %v341_v30 = vrot.slane %v4985_v23, 1  ;;  %v5011_v35 = vld [vmem:[%s4819_s20 + $0xc0] sm:$0xff]  ;;  %v5014_v37 = vld [vmem:[%s4819_s20 + $0xc8] sm:$0xff] }
  0x20   : > { %4398 = vmatpush3.bf16.msra.mxu0 %v4395_v39  ;;  %4366 = vmatpush3.bf16.msra.mxu1 %v4363_v53  ;;  %6165 = vst [vmem:[#allocation12_spill] sm:$0xff] %v4997_v25  ;;  %6166 = vst [vmem:[#allocation13_spill] sm:$0xff] %v5001_v29  ;;  %v342_v33 = vrot.slane %v4988_v24, 1  ;;  %v5023_v39 = vsel %vm305_vm0, %v337_v18, %v339_v27  ;;  %v344_v40 = vrot.slane %v5006_v34, 1  ;;  %v346_v42 = vrot.slane %v5011_v35, 1  ;;  %v5052_v56 = vld [vmem:[%s4819_s20 + $0xd8] sm:$0xff] }
  0x21   : > { %4400 = vmatprep.subr.bf16.mxu0 %v4925_v0  ;;  %4368 = vmatprep.subr.bf16.mxu1 %v4934_v3  ;;  %6167 = vst [vmem:[#allocation14_spill] sm:$0xff] %v5023_v39  ;;  %v347_v43 = vrot.slane %v5014_v37, 1  ;;  %v5032_v44 = vld [vmem:[%s4819_s20 + $0xd0] sm:$0x3]  ;;  %v976_v53 = vrot.slane %v4834_v22, 2  ;;  %v977_v54 = vrot.slane %v4842_v26, 2 }
  0x22   : > { %3862 = vmatmul.mubr.msk.f32.gmra.mrb[4].mxu1 %vm391_vm1, %v4912_v58  ;;  %4086 = vmatmul.mubr.msk.f32.gmra.mrb[4].mxu0 %vm391_vm1, %v4943_v4  ;;  %v5027_v41 = vsel %vm305_vm0, %v341_v30, %v342_v33  ;;  %v5043_v48 = vsel %vm305_vm0, %v342_v33, %v344_v40  ;;  %v349_v49 = vrot.slane %v5032_v44, 1  ;;  %v5055_v57 = vld [vmem:[%s4819_s20 + $0xe0] sm:$0xff]  ;;  %v979_v59 = vrot.slane %v4852_v31, 2  ;;  %v5072_v8 = vld [vmem:[%s4819_s20 + $0xe8] sm:$0x3]  ;;  %v5080_v17 = vld [vmem:[%s4819_s20 + $0xf0] sm:$0xff] }
  0x23   : > { %3864 = vmatprep.mubr.msk.f32.mxu1 %vm391_vm1, %v4918_v60  ;;  %4088 = vmatprep.mubr.msk.f32.mxu0 %vm391_vm1, %v4947_v6  ;;  %6168 = vst [vmem:[#allocation15_spill] sm:$0xff] %v5027_v41  ;;  %6169 = vst [vmem:[#allocation16_spill] sm:$0xff] %v5043_v48  ;;  %v5047_v50 = vsel %vm305_vm0, %v346_v42, %v347_v43  ;;  %v351_v62 = vrot.slane %v5052_v56, 1  ;;  %v352_v5 = vrot.slane %v5055_v57, 1  ;;  %v981_v15 = vrot.slane %v4855_v32, 2  ;;  %v5083_v18 = vld [vmem:[%s4819_s20 + $0xf8] sm:$0xff] }
  0x24   : > { %6170 = vst [vmem:[#allocation17_spill] sm:$0xff] %v5047_v50  ;;  %v5067_v61 = vsel %vm305_vm0, %v347_v43, %v349_v49  ;;  %v5075_v9 = vsel %vm970_vm2, %v976_v53, %v977_v54  ;;  %v982_v31 = vrot.slane %v4863_v36, 2  ;;  %v3413_v27 = vld [vmem:[%s6077_s1 + $0xd0] sm:$0xff]  ;;  %v3414_v30 = vld [vmem:[%s6077_s1 + $0xd8] sm:$0xff]  ;;  %v354_v33 = vrot.slane %v5072_v8, 1 }
  0x25   : > { %6171 = vst [vmem:[#allocation18_spill] sm:$0xff] %v5067_v61  ;;  %v984_v40 = vrot.slane %v4867_v38, 2  ;;  %v5102_v42 = vsel %vm970_vm2, %v977_v54, %v979_v59  ;;  %v5105_v43 = vsel %vm305_vm0, %v351_v62, %v352_v5  ;;  %v356_v49 = vrot.slane %v5080_v17, 1  ;;  %v5110_v12 = vld [vmem:[%s4819_s20 + $0x100] sm:$0x3]  ;;  %v5121_v54 = vld [vmem:[%s4819_s20 + $0x110] sm:$0xff] }
  0x26   : > { %3865 = vmatmul.mubr.msk.f32.gmra.mrb[6].mxu1 %vm391_vm1, %v4943_v4  ;;  %4089 = vmatmul.mubr.msk.f32.gmra.mrb[6].mxu0 %vm391_vm1, %v4971_v14  ;;  %6172 = vst [vmem:[#allocation19_spill] sm:$0xff] %v5105_v43  ;;  %v357_v53 = vrot.slane %v5083_v18, 1  ;;  %v986_v38 = vrot.slane %v4878_v45, 2  ;;  %v4403_v59 = vpack.c.bf16 %v3414_v30, %v3413_v27  ;;  %v5130_v62 = vsel %vm305_vm0, %v352_v5, %v354_v33  ;;  %v3447_v27 = vld [vmem:[%s6077_s1 + $0xe0] sm:$0xff]  ;;  %v3448_v30 = vld [vmem:[%s6077_s1 + $0xe8] sm:$0xff] }
  0x27   : > { %3867 = vmatprep.mubr.msk.f32.mxu1 %vm391_vm1, %v4947_v6  ;;  %4091 = vmatprep.mubr.msk.f32.mxu0 %vm391_vm1, %v4975_v16  ;;  %6173 = vst [vmem:[#allocation20_spill] sm:$0xff] %v5130_v62  ;;  %v5189_v6 = vld [vmem:[%s4819_s20 + $0x130] sm:$0x3]  ;;  %v999_v4 = vrot.slane %v4952_v10, 2  ;;  %v5225_v58 = vld [vmem:[%s4819_s20 + $0x148] sm:$0x3] }
  0x28   : > { %v5146_v5 = vsel %vm305_vm0, %v356_v49, %v357_v53  ;;  %v5163_v49 = vld [vmem:[%s4819_s20 + $0x128] sm:$0xff]  ;;  %v1004_v55 = vrot.slane %v4980_v19, 2  ;;  %v1006_v19 = vrot.slane %v4985_v23, 2 }
  0x29   : > { %6175 = vst [vmem:[#allocation22_spill] sm:$0xff] %v5146_v5 }
  0x2a   : > { %3868 = vmatmul.mubr.msk.f32.gmra.mrb[8].mxu1 %vm391_vm1, %v4971_v14  ;;  %4092 = vmatmul.mubr.msk.f32.gmra.mrb[8].mxu0 %vm391_vm1, %v4997_v25  ;;  %v994_v14 = vrot.slane %v4923_v63, 2  ;;  %v996_v63 = vrot.slane %v4929_v1, 2 }
  0x2b   : > { %3870 = vmatprep.mubr.msk.f32.mxu1 %vm391_vm1, %v4975_v16  ;;  %4094 = vmatprep.mubr.msk.f32.mxu0 %vm391_vm1, %v5001_v29 }
  0x2e   : > { %3871 = vmatmul.mubr.msk.f32.gmra.mrb[10].mxu1 %vm391_vm1, %v4997_v25  ;;  %4095 = vmatmul.mubr.msk.f32.gmra.mrb[10].mxu0 %vm391_vm1, %v5023_v39  ;;  %v5160_v25 = vld [vmem:[%s4819_s20 + $0x120] sm:$0xff] }
  0x2f   : > { %3873 = vmatprep.mubr.msk.f32.mxu1 %vm391_vm1, %v5001_v29  ;;  %4097 = vmatprep.mubr.msk.f32.mxu0 %vm391_vm1, %v5027_v41  ;;  %v991_v29 = vrot.slane %v4892_v51, 2 }
  0x32   : > { %3874 = vmatmul.mubr.msk.f32.gmra.mrb[12].mxu1 %vm391_vm1, %v5023_v39  ;;  %4098 = vmatmul.mubr.msk.f32.gmra.mrb[12].mxu0 %vm391_vm1, %v5043_v48  ;;  %v359_v39 = vrot.slane %v5110_v12, 1 }
  0x33   : > { %3876 = vmatprep.mubr.msk.f32.mxu1 %vm391_vm1, %v5027_v41  ;;  %4100 = vmatprep.mubr.msk.f32.mxu0 %vm391_vm1, %v5047_v50  ;;  %v5118_v41 = vld [vmem:[%s4819_s20 + $0x108] sm:$0xff] }
  0x34   : > { %v361_v33 = vrot.slane %v5118_v41, 1 }
  0x36   : > { %3877 = vmatmul.mubr.msk.f32.gmra.mrb[14].mxu1 %vm391_vm1, %v5043_v48  ;;  %4101 = vmatmul.mubr.msk.f32.gmra.mrb[14].mxu0 %vm391_vm1, %v5067_v61  ;;  %v987_v48 = vrot.slane %v4881_v46, 2 }
  0x37   : > { %3879 = vmatprep.mubr.msk.f32.mxu1 %vm391_vm1, %v5047_v50  ;;  %4135 = vmatprep.mubr.msk.f32.mxu0 %vm391_vm1, %v5075_v9  ;;  %v5113_v50 = vsel %vm970_vm2, %v981_v15, %v982_v31  ;;  %v5133_v15 = vsel %vm970_vm2, %v982_v31, %v984_v40  ;;  %v989_v31 = vrot.slane %v4884_v47, 2  ;;  %v362_v40 = vrot.slane %v5121_v54, 1 }
  0x38   : > { %6174 = vst [vmem:[#allocation21_spill] sm:$0xff] %v5133_v15  ;;  %v5167_v47 = vpack.c.bf16 %v3448_v30, %v3447_v27 }
  0x39   : > { %v5181_v27 = vsel %vm970_vm2, %v987_v48, %v989_v31  ;;  %v5184_v30 = vsel %vm305_vm0, %v361_v33, %v362_v40  ;;  %v5200_v31 = vld [vmem:[%s4819_s20 + $0x140] sm:$0xff]  ;;  %v369_v33 = vrot.slane %v5189_v6, 1 }
  0x3a   : > { %3880 = vmatmul.mubr.msk.f32.gmra.mrb[16].mxu1 %vm391_vm1, %v5067_v61  ;;  %4136 = vmatmul.mubr.msk.f32.vlgmr.msra.gmra.mrb[0].mxu0 %vm391_vm1, %v5102_v42  ;;  %v5155_v61 = vsel %vm970_vm2, %v986_v38, %v987_v48  ;;  %v5174_v38 = vsel %vm305_vm0, %v357_v53, %v359_v39  ;;  %6178 = vst [vmem:[#allocation25_spill] sm:$0xff] %v5181_v27  ;;  %6179 = vst [vmem:[#allocation26_spill] sm:$0xff] %v5184_v30  ;;  %v997_v53 = vrot.slane %v4932_v2, 2  ;;  %v5197_v48 = vld [vmem:[%s4819_s20 + $0x138] sm:$0xff] }
  0x3b   : > { %3882 = vmatprep.mubr.msk.f32.mxu1 %vm391_vm1, %v5105_v43  ;;  %4402 = vmatpush3.bf16.msra.mxu0 %v4925_v0  ;;  %v5152_v43 = vld [vmem:[%s4819_s20 + $0x118] sm:$0x3]  ;;  %6176 = vst [vmem:[#allocation23_spill] sm:$0xff] %v5155_v61  ;;  %v992_v0 = vrot.slane %v4895_v52, 2  ;;  %6177 = vst [vmem:[#allocation24_spill] sm:$0xff] %v5174_v38  ;;  %v371_v60 = vrot.slane %v5197_v48, 1 }
  0x3c   : > { %4138 = vmatprep.mubr.msk.f32.mxu0 %vm391_vm1, %v5113_v50  ;;  %4404 = vmatprep.subr.bf16.mxu0 %v4403_v59  ;;  %v364_v16 = vrot.slane %v5152_v43, 1 }
  0x3d   : > { %v5192_v39 = vsel %vm970_vm2, %v991_v29, %v992_v0 }
  0x3e   : > { %3883 = vmatmul.mubr.msk.f32.gmra.mrb[18].mxu1 %vm391_vm1, %v5130_v62  ;;  %4139 = vmatmul.mubr.msk.f32.gmra.mrb[2].mxu0 %vm391_vm1, %v5133_v15  ;;  %v366_v62 = vrot.slane %v5160_v25, 1  ;;  %6180 = vst [vmem:[#allocation27_spill] sm:$0xff] %v5192_v39  ;;  %v5210_v29 = vsel %vm305_vm0, %v362_v40, %v364_v16  ;;  %v5228_v16 = vsel %vm970_vm2, %v996_v63, %v997_v53  ;;  %v1002_v40 = vrot.slane %v4961_v13, 2  ;;  %v5295_v15 = vld [vmem:[%s4819_s20 + $0x178] sm:$0x3] }
  0x3f   : > { %3885 = vmatprep.mubr.msk.f32.mxu1 %vm391_vm1, %v5146_v5  ;;  %4141 = vmatprep.mubr.msk.f32.mxu0 %vm391_vm1, %v5155_v61  ;;  %v367_v5 = vrot.slane %v5163_v49, 1  ;;  %6181 = vst [vmem:[#allocation28_spill] sm:$0xff] %v5210_v29  ;;  %6184 = vst [vmem:[#allocation31_spill] sm:$0xff] %v5228_v16  ;;  %v374_v63 = vrot.slane %v5225_v58, 1 }
  0x40   : > { %4406 = vmatpush3.bf16.msra.mxu0 %v4403_v59  ;;  %v5213_v59 = vsel %vm970_vm2, %v992_v0, %v994_v14  ;;  %v1001_v14 = vrot.slane %v4958_v11, 2  ;;  %v5233_v0 = vld [vmem:[%s4819_s20 + $0x150] sm:$0xff] }
  0x41   : > { %4408 = vmatprep.subr.bf16.mxu0 %v5167_v47  ;;  %6182 = vst [vmem:[#allocation29_spill] sm:$0xff] %v5213_v59  ;;  %v5245_v10 = vsel %vm305_vm0, %v367_v5, %v369_v33  ;;  %v1007_v33 = vrot.slane %v4988_v24, 2 }
  0x42   : > { %3886 = vmatmul.mubr.msk.f32.gmra.mrb[20].mxu1 %vm391_vm1, %v5174_v38  ;;  %4142 = vmatmul.mubr.msk.f32.gmra.mrb[4].mxu0 %vm391_vm1, %v5181_v27  ;;  %v5219_v38 = vsel %vm305_vm0, %v366_v62, %v367_v5  ;;  %v5236_v62 = vld [vmem:[%s4819_s20 + $0x158] sm:$0xff]  ;;  %6185 = vst [vmem:[#allocation32_spill] sm:$0xff] %v5245_v10  ;;  %v5260_v27 = vld [vmem:[%s4819_s20 + $0x160] sm:$0x3]  ;;  %v5263_v5 = vsel %vm970_vm2, %v1001_v14, %v1002_v40 }
  0x43   : > { %3888 = vmatprep.mubr.msk.f32.mxu1 %vm391_vm1, %v5184_v30  ;;  %4144 = vmatprep.mubr.msk.f32.mxu0 %vm391_vm1, %v5192_v39  ;;  %6183 = vst [vmem:[#allocation30_spill] sm:$0xff] %v5219_v38  ;;  %v372_v30 = vrot.slane %v5200_v31, 1  ;;  %v5252_v39 = vsel %vm970_vm2, %v997_v53, %v999_v4  ;;  %v5271_v4 = vld [vmem:[%s4819_s20 + $0x170] sm:$0xff]  ;;  %v5283_v53 = vsel %vm970_vm2, %v1002_v40, %v1004_v55  ;;  %v379_v14 = vrot.slane %v5260_v27, 1 }
  0x44   : > { %6186 = vst [vmem:[#allocation33_spill] sm:$0xff] %v5252_v39  ;;  %6189 = vst [vmem:[#allocation36_spill] sm:$0xff] %v5271_v4  ;;  %v1011_v55 = vrot.slane %v5011_v35, 2  ;;  %v1012_v40 = vrot.slane %v5014_v37, 2 }
  0x45   : > { %6191 = vst [vmem:[#allocation38_spill] sm:$0xff] %v5283_v53 }
  0x46   : > { %3889 = vmatmul.mubr.msk.f32.gmra.mrb[22].mxu1 %vm391_vm1, %v5210_v29  ;;  %4145 = vmatmul.mubr.msk.f32.gmra.mrb[6].mxu0 %vm391_vm1, %v5213_v59  ;;  %v5255_v29 = vsel %vm305_vm0, %v371_v60, %v372_v30  ;;  %v376_v59 = vrot.slane %v5233_v0, 1  ;;  %v5280_v60 = vsel %vm305_vm0, %v372_v30, %v374_v63  ;;  %v5298_v30 = vsel %vm970_vm2, %v1006_v19, %v1007_v33 }
  0x47   : > { %3891 = vmatprep.mubr.msk.f32.mxu1 %vm391_vm1, %v5219_v38  ;;  %4147 = vmatprep.mubr.msk.f32.mxu0 %vm391_vm1, %v5228_v16  ;;  %6187 = vst [vmem:[#allocation34_spill] sm:$0xff] %v5255_v29  ;;  %v377_v38 = vrot.slane %v5236_v62, 1  ;;  %v5268_v16 = vld [vmem:[%s4819_s20 + $0x168] sm:$0xff]  ;;  %6190 = vst [vmem:[#allocation37_spill] sm:$0xff] %v5280_v60 }
  0x48   : > { %6188 = vst [vmem:[#allocation35_spill] sm:$0xff] %v5268_v16 }
  0x49   : > { %v5289_v61 = vsel %vm305_vm0, %v376_v59, %v377_v38  ;;  %v384_v59 = vrot.slane %v5295_v15, 1 }
  0x4a   : > { %3892 = vmatmul.mubr.msk.f32.gmra.mrb[24].mxu1 %vm391_vm1, %v5245_v10  ;;  %4148 = vmatmul.mubr.msk.f32.gmra.mrb[8].mxu0 %vm391_vm1, %v5252_v39  ;;  %6192 = vst [vmem:[#allocation39_spill] sm:$0xff] %v5289_v61  ;;  %v1009_v10 = vrot.slane %v5006_v34, 2  ;;  %v381_v39 = vrot.slane %v5268_v16, 1  ;;  %v5309_v34 = vsel %vm305_vm0, %v377_v38, %v379_v14  ;;  %v1017_v38 = vrot.slane %v5055_v57, 2 }
  0x4b   : > { %3894 = vmatprep.mubr.msk.f32.mxu1 %vm391_vm1, %v5255_v29  ;;  %4150 = vmatprep.mubr.msk.f32.mxu0 %vm391_vm1, %v5263_v5  ;;  %v382_v29 = vrot.slane %v5271_v4, 1  ;;  %6193 = vst [vmem:[#allocation40_spill] sm:$0xff] %v5309_v34  ;;  %v1021_v14 = vrot.slane %v5080_v17, 2 }
  0x4c   : > { %v5315_v63 = vsel %vm970_vm2, %v1007_v33, %v1009_v10  ;;  %v1019_v10 = vrot.slane %v5072_v8, 2  ;;  %v1024_v8 = vrot.slane %v5110_v12, 2 }
  0x4d   : > { %6194 = vst [vmem:[#allocation41_spill] sm:$0xff] %v5315_v63  ;;  %v5318_v19 = vsel %vm305_vm0, %v381_v39, %v382_v29  ;;  %v5333_v39 = vsel %vm305_vm0, %v382_v29, %v384_v59  ;;  %v3269_v29 = vld [vmem:[%s6077_s1 + $0x50] sm:$0xff]  ;;  %v1026_v59 = vrot.slane %v5118_v41, 2 }
  0x4e   : > { %3895 = vmatmul.mubr.msk.f32.gmra.mrb[26].mxu1 %vm391_vm1, %v5280_v60  ;;  %4151 = vmatmul.mubr.msk.f32.gmra.mrb[10].mxu0 %vm391_vm1, %v5283_v53  ;;  %6195 = vst [vmem:[#allocation42_spill] sm:$0xff] %v5318_v19  ;;  %v1014_v60 = vrot.slane %v5032_v44, 2  ;;  %v5322_v53 = vsel %vm970_vm2, %v1011_v55, %v1012_v40  ;;  %6196 = vst [vmem:[#allocation43_spill] sm:$0xff] %v5333_v39  ;;  %v1022_v55 = vrot.slane %v5083_v18, 2 }
  0x4f   : > { %3897 = vmatprep.mubr.msk.f32.mxu1 %vm391_vm1, %v5289_v61  ;;  %4153 = vmatprep.mubr.msk.f32.mxu0 %vm391_vm1, %v5298_v30  ;;  %v1016_v61 = vrot.slane %v5052_v56, 2 }
  0x50   : > { %v5338_v44 = vsel %vm970_vm2, %v1012_v40, %v1014_v60  ;;  %v3270_v60 = vld [vmem:[%s6077_s1 + $0x58] sm:$0xff]  ;;  %v5365_v40 = vsel %vm970_vm2, %v1021_v14, %v1022_v55  ;;  %v5385_v12 = vsel %vm970_vm2, %v1022_v55, %v1024_v8  ;;  %v1034_v55 = vrot.slane %v5189_v6, 2 }
  0x51   : > { %v5342_v33 = vsel %vm970_vm2, %v1016_v61, %v1017_v38  ;;  %v5361_v61 = vsel %vm970_vm2, %v1017_v38, %v1019_v10  ;;  %v3304_v38 = vld [vmem:[%s6077_s1 + $0x68] sm:$0xff]  ;;  %v1029_v10 = vrot.slane %v5152_v43, 2  ;;  %v1036_v8 = vrot.slane %v5197_v48, 2 }
  0x52   : > { %3898 = vmatmul.mubr.msk.f32.gmra.mrb[28].mxu1 %vm391_vm1, %v5309_v34  ;;  %4154 = vmatmul.mubr.msk.f32.gmra.mrb[12].mxu0 %vm391_vm1, %v5315_v63  ;;  %v3303_v34 = vld [vmem:[%s6077_s1 + $0x60] sm:$0xff] }
  0x53   : > { %3900 = vmatprep.mubr.msk.f32.mxu1 %vm391_vm1, %v5318_v19  ;;  %4156 = vmatprep.mubr.msk.f32.mxu0 %vm391_vm1, %v5322_v53  ;;  %v4371_v19 = vpack.c.bf16 %v3270_v60, %v3269_v29  ;;  %v1031_v29 = vrot.slane %v5160_v25, 2  ;;  %v5393_v60 = vpack.c.bf16 %v3304_v38, %v3303_v34  ;;  %v1041_v38 = vrot.slane %v5233_v0, 2 }
  0x56   : > { %3901 = vmatmul.mubr.msk.f32.gmra.mrb[30].mxu1 %vm391_vm1, %v5333_v39  ;;  %4157 = vmatmul.mubr.msk.f32.gmra.mrb[14].mxu0 %vm391_vm1, %v5338_v44  ;;  %v1027_v39 = vrot.slane %v5121_v54, 2 }
  0x57   : > { %3911 = vmatprep.mubr.msk.f32.mxu1 %vm391_vm1, %v4828_v20  ;;  %4159 = vmatprep.mubr.msk.f32.mxu0 %vm391_vm1, %v5342_v33 }
  0x58   : > { %v5389_v14 = vsel %vm970_vm2, %v1026_v59, %v1027_v39  ;;  %v5404_v43 = vsel %vm970_vm2, %v1027_v39, %v1029_v10  ;;  %v1037_v59 = vrot.slane %v5200_v31, 2  ;;  %v1042_v10 = vrot.slane %v5236_v62, 2 }
  0x5a   : > { %3912 = vmatmul.mubr.msk.f32.vlgmr.msra.gmra.mrb[0].mxu1 %vm391_vm1, %v4831_v21  ;;  %4160 = vmatmul.mubr.msk.f32.gmra.mrb[16].mxu0 %vm391_vm1, %v5361_v61  ;;  %v5426_v39 = vsel %vm970_vm2, %v1036_v8, %v1037_v59  ;;  %v1047_v8 = vrot.slane %v5271_v4, 2 }
  0x5b   : > { %4370 = vmatpush3.bf16.msra.mxu1 %v4934_v3  ;;  %3914 = vmatprep.mubr.msk.f32.mxu1 %vm391_vm1, %v4834_v22  ;;  %v1032_v3 = vrot.slane %v5163_v49, 2  ;;  %6198 = vst [vmem:[#allocation45_spill] sm:$0xff] %v5426_v39  ;;  %v5453_v22 = vld [vmem:[%s4819_s20 + $0x188] sm:$0xff] }
  0x5c   : > { %4162 = vmatprep.mubr.msk.f32.mxu0 %vm391_vm1, %v5365_v40  ;;  %4372 = vmatprep.subr.bf16.mxu1 %v4371_v19 }
  0x5d   : > { %v5408_v34 = vsel %vm970_vm2, %v1031_v29, %v1032_v3  ;;  %v5422_v6 = vsel %vm970_vm2, %v1032_v3, %v1034_v55  ;;  %v1044_v29 = vrot.slane %v5260_v27, 2  ;;  %v5443_v3 = vsel %vm970_vm2, %v1041_v38, %v1042_v10 }
  0x5e   : > { %3915 = vmatmul.mubr.msk.f32.gmra.mrb[2].mxu1 %vm391_vm1, %v4842_v26  ;;  %4163 = vmatmul.mubr.msk.f32.gmra.mrb[18].mxu0 %vm391_vm1, %v5385_v12  ;;  %6197 = vst [vmem:[#allocation44_spill] sm:$0xff] %v5422_v6  ;;  %6199 = vst [vmem:[#allocation46_spill] sm:$0xff] %v5443_v3  ;;  %v1046_v55 = vrot.slane %v5268_v16, 2  ;;  %v5450_v26 = vld [vmem:[%s4819_s20 + $0x180] sm:$0xff] }
  0x5f   : > { %3917 = vmatprep.mubr.msk.f32.mxu1 %vm391_vm1, %v4855_v32  ;;  %4165 = vmatprep.mubr.msk.f32.mxu0 %vm391_vm1, %v5389_v14  ;;  %v5462_v27 = vsel %vm970_vm2, %v1042_v10, %v1044_v29  ;;  %v1917_v38 = vrot.slane %v5450_v26, 2 }
  0x60   : > { %4374 = vmatpush3.bf16.msra.mxu1 %v4371_v19  ;;  %v1039_v19 = vrot.slane %v5225_v58, 2  ;;  %6200 = vst [vmem:[#allocation47_spill] sm:$0xff] %v5462_v27 }
  0x61   : > { %4376 = vmatprep.subr.bf16.mxu1 %v5393_v60 }
  0x62   : > { %3918 = vmatmul.mubr.msk.f32.gmra.mrb[4].mxu1 %vm391_vm1, %v4863_v36  ;;  %4166 = vmatmul.mubr.msk.f32.gmra.mrb[20].mxu0 %vm391_vm1, %v5404_v43  ;;  %v5439_v58 = vsel %vm970_vm2, %v1037_v59, %v1039_v19  ;;  %v1049_v59 = vrot.slane %v5295_v15, 2  ;;  %v5466_v19 = vsel %vm970_vm2, %v1046_v55, %v1047_v8 }
  0x63   : > { %3920 = vmatprep.mubr.msk.f32.mxu1 %vm391_vm1, %v4878_v45  ;;  %4168 = vmatprep.mubr.msk.f32.mxu0 %vm391_vm1, %v5408_v34  ;;  %6201 = vst [vmem:[#allocation48_spill] sm:$0xff] %v5466_v19 }
  0x64   : > { %v5482_v15 = vsel %vm970_vm2, %v1047_v8, %v1049_v59  ;;  %v3449_v8 = vld [vmem:[%s6077_s1 + $0xf0] sm:$0xff]  ;;  %v3450_v59 = vld [vmem:[%s6077_s1 + $0xf8] sm:$0xff] }
  0x65   : > { %6202 = vst [vmem:[#allocation49_spill] sm:$0xff] %v5482_v15 }
  0x66   : > { %3921 = vmatmul.mubr.msk.f32.gmra.mrb[6].mxu1 %vm391_vm1, %v4881_v46  ;;  %4169 = vmatmul.mubr.msk.f32.gmra.mrb[22].mxu0 %vm391_vm1, %v5422_v6  ;;  %v5471_v6 = vld [vmem:[%s4819_s20 + $0x190] sm:$0x3] }
  0x67   : > { %3923 = vmatprep.mubr.msk.f32.mxu1 %vm391_vm1, %v4892_v51  ;;  %4171 = vmatprep.mubr.msk.f32.mxu0 %vm391_vm1, %v5426_v39  ;;  %v1918_v39 = vrot.slane %v5453_v22, 2  ;;  %v1920_v10 = vrot.slane %v5471_v6, 2 }
  0x69   : > { %v5486_v29 = vsel %vm970_vm2, %v1917_v38, %v1918_v39  ;;  %v5497_v55 = vsel %vm970_vm2, %v1918_v39, %v1920_v10  ;;  %v4411_v39 = vpack.c.bf16 %v3450_v59, %v3449_v8  ;;  %v3483_v38 = vld [vmem:[%s6077_s1 + $0x100] sm:$0xff]  ;;  %v3484_v10 = vld [vmem:[%s6077_s1 + $0x108] sm:$0xff]  ;;  %v972_v59 = vrot.slane %v4831_v21, 2  ;;  %v3306_v21 = vld [vmem:[%s6077_s1 + $0x78] sm:$0xff] }
  0x6a   : > { %3924 = vmatmul.mubr.msk.f32.gmra.mrb[8].mxu1 %vm391_vm1, %v4895_v52  ;;  %4172 = vmatmul.mubr.msk.f32.gmra.mrb[24].mxu0 %vm391_vm1, %v5439_v58  ;;  %6203 = vst [vmem:[#allocation50_spill] sm:$0xff] %v5486_v29  ;;  %6204 = vst [vmem:[#allocation51_spill] sm:$0xff] %v5497_v55  ;;  %v5528_v8 = vpack.c.bf16 %v3484_v10, %v3483_v38 }
  0x6b   : > { %3926 = vmatprep.mubr.msk.f32.mxu1 %vm391_vm1, %v4929_v1  ;;  %4174 = vmatprep.mubr.msk.f32.mxu0 %vm391_vm1, %v5443_v3 }
  0x6e   : > { %3927 = vmatmul.mubr.msk.f32.gmra.mrb[10].mxu1 %vm391_vm1, %v4932_v2  ;;  %4175 = vmatmul.mubr.msk.f32.gmra.mrb[26].mxu0 %vm391_vm1, %v5462_v27 }
  0x6f   : > { %3929 = vmatprep.mubr.msk.f32.mxu1 %vm391_vm1, %v4958_v11  ;;  %4177 = vmatprep.mubr.msk.f32.mxu0 %vm391_vm1, %v5466_v19 }
  0x72   : > { %3930 = vmatmul.mubr.msk.f32.gmra.mrb[12].mxu1 %vm391_vm1, %v4961_v13  ;;  %4178 = vmatmul.mubr.msk.f32.gmra.mrb[28].mxu0 %vm391_vm1, %v5482_v15 }
  0x73   : > { %3932 = vmatprep.mubr.msk.f32.mxu1 %vm391_vm1, %v4985_v23  ;;  %4180 = vmatprep.mubr.msk.f32.mxu0 %vm391_vm1, %v5486_v29  ;;  %v6213_v29 = vld [vmem:[#allocation5_spill] sm:$0xff] }
  0x76   : > { %3933 = vmatmul.mubr.msk.f32.gmra.mrb[14].mxu1 %vm391_vm1, %v4988_v24  ;;  %4181 = vmatmul.mubr.msk.f32.gmra.mrb[30].mxu0 %vm391_vm1, %v5497_v55  ;;  %v3486_v55 = vld [vmem:[%s6077_s1 + $0x118] sm:$0xff] }
  0x77   : > { %3935 = vmatprep.mubr.msk.f32.mxu1 %vm391_vm1, %v5011_v35  ;;  %4191 = vmatprep.mubr.msk.f32.mxu0 %vm391_vm1, %v4855_v32 }
  0x7a   : > { %3936 = vmatmul.mubr.msk.f32.gmra.mrb[16].mxu1 %vm391_vm1, %v5014_v37  ;;  %4192 = vmatmul.mubr.msk.f32.vlgmr.msra.gmra.mrb[0].mxu0 %vm391_vm1, %v4863_v36 }
  0x7b   : > { %3938 = vmatprep.mubr.msk.f32.mxu1 %vm391_vm1, %v5052_v56  ;;  %4410 = vmatpush3.bf16.msra.mxu0 %v5167_v47  ;;  %v971_v47 = vrot.slane %v4828_v20, 2  ;;  %v3305_v20 = vld [vmem:[%s6077_s1 + $0x70] sm:$0xff] }
  0x7c   : > { %4194 = vmatprep.mubr.msk.f32.mxu0 %vm391_vm1, %v4878_v45  ;;  %4412 = vmatprep.subr.bf16.mxu0 %v4411_v39  ;;  %v4379_v10 = vpack.c.bf16 %v3306_v21, %v3305_v20  ;;  %v5647_v20 = vld [vmem:[%s4819_s20 + $0x198] sm:$0xff]  ;;  %v6212_v21 = vld [vmem:[#allocation38_spill] sm:$0xff] }
  0x7d   : > { %v973_v38 = vsel %vm970_vm2, %v971_v47, %v972_v59  ;;  %v6208_v47 = vld [vmem:[#allocation27_spill] sm:$0xff] }
  0x7e   : > { %3939 = vmatmul.mubr.msk.f32.gmra.mrb[18].mxu1 %vm391_vm1, %v5055_v57  ;;  %4195 = vmatmul.mubr.msk.f32.gmra.mrb[2].mxu0 %vm391_vm1, %v4881_v46 }
  0x7f   : > { %3941 = vmatprep.mubr.msk.f32.mxu1 %vm391_vm1, %v5080_v17  ;;  %4197 = vmatprep.mubr.msk.f32.mxu0 %vm391_vm1, %v4892_v51 }
  0x80   : > { %4414 = vmatpush3.bf16.msra.mxu0 %v4411_v39  ;;  %v974_v39 = vrot.slane %v4846_v28, 2 }
  0x81   : > { %4416 = vmatprep.subr.bf16.mxu0 %v5528_v8 }
  0x82   : > { %3942 = vmatmul.mubr.msk.f32.gmra.mrb[20].mxu1 %vm391_vm1, %v5083_v18  ;;  %4198 = vmatmul.mubr.msk.f32.gmra.mrb[4].mxu0 %vm391_vm1, %v4895_v52  ;;  %v975_v28 = vsel %vm970_vm2, %v972_v59, %v974_v39  ;;  %v6209_v59 = vld [vmem:[#allocation29_spill] sm:$0xff]  ;;  %v6210_v39 = vld [vmem:[#allocation31_spill] sm:$0xff] }
  0x83   : > { %3944 = vmatprep.mubr.msk.f32.mxu1 %vm391_vm1, %v5118_v41  ;;  %4200 = vmatprep.mubr.msk.f32.mxu0 %vm391_vm1, %v4929_v1 }
  0x86   : > { %3945 = vmatmul.mubr.msk.f32.gmra.mrb[22].mxu1 %vm391_vm1, %v5121_v54  ;;  %4201 = vmatmul.mubr.msk.f32.gmra.mrb[6].mxu0 %vm391_vm1, %v4932_v2 }
  0x87   : > { %3947 = vmatprep.mubr.msk.f32.mxu1 %vm391_vm1, %v5160_v25  ;;  %4203 = vmatprep.mubr.msk.f32.mxu0 %vm391_vm1, %v4958_v11 }
  0x8a   : > { %3948 = vmatmul.mubr.msk.f32.gmra.mrb[24].mxu1 %vm391_vm1, %v5163_v49  ;;  %4204 = vmatmul.mubr.msk.f32.gmra.mrb[8].mxu0 %vm391_vm1, %v4961_v13 }
  0x8b   : > { %3950 = vmatprep.mubr.msk.f32.mxu1 %vm391_vm1, %v5197_v48  ;;  %4206 = vmatprep.mubr.msk.f32.mxu0 %vm391_vm1, %v4985_v23 }
  0x8e   : > { %3951 = vmatmul.mubr.msk.f32.gmra.mrb[26].mxu1 %vm391_vm1, %v5200_v31  ;;  %4207 = vmatmul.mubr.msk.f32.gmra.mrb[10].mxu0 %vm391_vm1, %v4988_v24 }
  0x8f   : > { %3953 = vmatprep.mubr.msk.f32.mxu1 %vm391_vm1, %v5233_v0  ;;  %4209 = vmatprep.mubr.msk.f32.mxu0 %vm391_vm1, %v5011_v35 }
  0x92   : > { %3954 = vmatmul.mubr.msk.f32.gmra.mrb[28].mxu1 %vm391_vm1, %v5236_v62  ;;  %4210 = vmatmul.mubr.msk.f32.gmra.mrb[12].mxu0 %vm391_vm1, %v5014_v37 }
  0x93   : > { %3956 = vmatprep.mubr.msk.f32.mxu1 %vm391_vm1, %v5268_v16  ;;  %4212 = vmatprep.mubr.msk.f32.mxu0 %vm391_vm1, %v5052_v56 }
  0x96   : > { %3957 = vmatmul.mubr.msk.f32.gmra.mrb[30].mxu1 %vm391_vm1, %v5271_v4  ;;  %4213 = vmatmul.mubr.msk.f32.gmra.mrb[14].mxu0 %vm391_vm1, %v5055_v57 }
  0x97   : > { %3967 = vmatprep.mubr.msk.f32.mxu1 %vm391_vm1, %v973_v38  ;;  %4215 = vmatprep.mubr.msk.f32.mxu0 %vm391_vm1, %v5080_v17  ;;  %v6211_v38 = vld [vmem:[#allocation33_spill] sm:$0xff] }
  0x9a   : > { %3968 = vmatmul.mubr.msk.f32.vlgmr.msra.gmra.mrb[0].mxu1 %vm391_vm1, %v975_v28  ;;  %4216 = vmatmul.mubr.msk.f32.gmra.mrb[16].mxu0 %vm391_vm1, %v5083_v18  ;;  %v5658_v28 = vld [vmem:[%s4819_s20 + $0x1a0] sm:$0xff] }
  0x9b   : > { %4378 = vmatpush3.bf16.msra.mxu1 %v5393_v60  ;;  %3970 = vmatprep.mubr.msk.f32.mxu1 %vm391_vm1, %v5075_v9  ;;  %v6205_v9 = vld [vmem:[#allocation21_spill] sm:$0xff] }
  0x9c   : > { %4218 = vmatprep.mubr.msk.f32.mxu0 %vm391_vm1, %v5118_v41  ;;  %4380 = vmatprep.subr.bf16.mxu1 %v4379_v10  ;;  %v6207_v60 = vld [vmem:[#allocation25_spill] sm:$0xff] }
  0x9e   : > { %3971 = vmatmul.mubr.msk.f32.gmra.mrb[2].mxu1 %vm391_vm1, %v5102_v42  ;;  %4219 = vmatmul.mubr.msk.f32.gmra.mrb[18].mxu0 %vm391_vm1, %v5121_v54  ;;  %v6206_v42 = vld [vmem:[#allocation23_spill] sm:$0xff] }
  0x9f   : > { %3973 = vmatprep.mubr.msk.f32.mxu1 %vm391_vm1, %v5113_v50  ;;  %4221 = vmatprep.mubr.msk.f32.mxu0 %vm391_vm1, %v5160_v25 }
  0xa0   : > { %4382 = vmatpush3.bf16.msra.mxu1 %v4379_v10  ;;  %v3485_v10 = vld [vmem:[%s6077_s1 + $0x110] sm:$0xff] }
  0xa1   : > { %4423 = vmatprep.subr.bf16.mxu1 %v4788_v7 }
  0xa2   : > { %3974 = vmatmul.mubr.msk.f32.gmra.mrb[4].mxu1 %vm391_vm1, %v6205_v9  ;;  %4222 = vmatmul.mubr.msk.f32.gmra.mrb[20].mxu0 %vm391_vm1, %v5163_v49 }
  0xa3   : > { %3976 = vmatprep.mubr.msk.f32.mxu1 %vm391_vm1, %v6206_v42  ;;  %4224 = vmatprep.mubr.msk.f32.mxu0 %vm391_vm1, %v5197_v48 }
  0xa6   : > { %3977 = vmatmul.mubr.msk.f32.gmra.mrb[6].mxu1 %vm391_vm1, %v6207_v60  ;;  %4225 = vmatmul.mubr.msk.f32.gmra.mrb[22].mxu0 %vm391_vm1, %v5200_v31 }
  0xa7   : > { %3979 = vmatprep.mubr.msk.f32.mxu1 %vm391_vm1, %v6208_v47  ;;  %4227 = vmatprep.mubr.msk.f32.mxu0 %vm391_vm1, %v5233_v0 }
  0xaa   : > { %3980 = vmatmul.mubr.msk.f32.gmra.mrb[8].mxu1 %vm391_vm1, %v6209_v59  ;;  %4228 = vmatmul.mubr.msk.f32.gmra.mrb[24].mxu0 %vm391_vm1, %v5236_v62 }
  0xab   : > { %3982 = vmatprep.mubr.msk.f32.mxu1 %vm391_vm1, %v6210_v39  ;;  %4230 = vmatprep.mubr.msk.f32.mxu0 %vm391_vm1, %v5268_v16  ;;  %v6214_v16 = vld [vmem:[#allocation6_spill] sm:$0xff] }
  0xae   : > { %3983 = vmatmul.mubr.msk.f32.gmra.mrb[10].mxu1 %vm391_vm1, %v6211_v38  ;;  %4231 = vmatmul.mubr.msk.f32.gmra.mrb[26].mxu0 %vm391_vm1, %v5271_v4  ;;  %v4419_v4 = vpack.c.bf16 %v3486_v55, %v3485_v10  ;;  %v6217_v55 = vld [vmem:[#allocation9_spill] sm:$0xff]  ;;  %v6222_v10 = vld [vmem:[#allocation44_spill] sm:$0xff] }
  0xaf   : > { %3985 = vmatprep.mubr.msk.f32.mxu1 %vm391_vm1, %v5263_v5  ;;  %4233 = vmatprep.mubr.msk.f32.mxu0 %vm391_vm1, %v5450_v26 }
  0xb2   : > { %3986 = vmatmul.mubr.msk.f32.gmra.mrb[12].mxu1 %vm391_vm1, %v6212_v21  ;;  %4234 = vmatmul.mubr.msk.f32.gmra.mrb[28].mxu0 %vm391_vm1, %v5453_v22 }
  0xb3   : > { %3988 = vmatprep.mubr.msk.f32.mxu1 %vm391_vm1, %v5298_v30  ;;  %4236 = vmatprep.mubr.msk.f32.mxu0 %vm391_vm1, %v5647_v20 }
  0xb6   : > { %3989 = vmatmul.mubr.msk.f32.gmra.mrb[14].mxu1 %vm391_vm1, %v5315_v63  ;;  %4237 = vmatmul.mubr.msk.f32.gmra.mrb[30].mxu0 %vm391_vm1, %v5658_v28  ;;  %v6215_v63 = vld [vmem:[#allocation7_spill] sm:$0xff] }
  0xb7   : > { %3991 = vmatprep.mubr.msk.f32.mxu1 %vm391_vm1, %v5322_v53  ;;  %4247 = vmatprep.mubr.msk.f32.mxu0 %vm391_vm1, %v6213_v29  ;;  %v6216_v29 = vld [vmem:[#allocation8_spill] sm:$0xff] }
  0xba   : > { %3992 = vmatmul.mubr.msk.f32.gmra.mrb[16].mxu1 %vm391_vm1, %v5338_v44  ;;  %4248 = vmatmul.mubr.msk.f32.vlgmr.msra.gmra.mrb[0].mxu0 %vm391_vm1, %v6214_v16  ;;  %v6218_v16 = vld [vmem:[#allocation10_spill] sm:$0xff] }
  0xbb   : > { %3994 = vmatprep.mubr.msk.f32.mxu1 %vm391_vm1, %v5342_v33  ;;  %4418 = vmatpush3.bf16.msra.mxu0 %v5528_v8  ;;  %v6220_v8 = vld [vmem:[#allocation12_spill] sm:$0xff] }
  0xbc   : > { %4250 = vmatprep.mubr.msk.f32.mxu0 %vm391_vm1, %v6215_v63  ;;  %4420 = vmatprep.subr.bf16.mxu0 %v4419_v4  ;;  %v6219_v63 = vld [vmem:[#allocation11_spill] sm:$0xff] }
  0xbe   : > { %3995 = vmatmul.mubr.msk.f32.gmra.mrb[18].mxu1 %vm391_vm1, %v5361_v61  ;;  %4251 = vmatmul.mubr.msk.f32.gmra.mrb[2].mxu0 %vm391_vm1, %v6216_v29  ;;  %v6223_v29 = vld [vmem:[#allocation14_spill] sm:$0xff] }
  0xbf   : > { %3997 = vmatprep.mubr.msk.f32.mxu1 %vm391_vm1, %v5365_v40  ;;  %4253 = vmatprep.mubr.msk.f32.mxu0 %vm391_vm1, %v6217_v55  ;;  %v6224_v55 = vld [vmem:[#allocation45_spill] sm:$0xff] }
  0xc0   : > { %4422 = vmatpush3.bf16.msra.mxu0 %v4419_v4  ;;  %v6221_v4 = vld [vmem:[#allocation13_spill] sm:$0xff] }
  0xc2   : > { %3998 = vmatmul.mubr.msk.f32.gmra.mrb[20].mxu1 %vm391_vm1, %v5385_v12  ;;  %4254 = vmatmul.mubr.msk.f32.gmra.mrb[4].mxu0 %vm391_vm1, %v6218_v16  ;;  %v6225_v16 = vld [vmem:[#allocation15_spill] sm:$0xff] }
  0xc3   : > { %4000 = vmatprep.mubr.msk.f32.mxu1 %vm391_vm1, %v5389_v14  ;;  %4256 = vmatprep.mubr.msk.f32.mxu0 %vm391_vm1, %v6219_v63  ;;  %v6226_v63 = vld [vmem:[#allocation16_spill] sm:$0xff] }
  0xc6   : > { %4001 = vmatmul.mubr.msk.f32.gmra.mrb[22].mxu1 %vm391_vm1, %v5404_v43  ;;  %4257 = vmatmul.mubr.msk.f32.gmra.mrb[6].mxu0 %vm391_vm1, %v6220_v8  ;;  %v6227_v8 = vld [vmem:[#allocation17_spill] sm:$0xff] }
  0xc7   : > { %4003 = vmatprep.mubr.msk.f32.mxu1 %vm391_vm1, %v5408_v34  ;;  %4259 = vmatprep.mubr.msk.f32.mxu0 %vm391_vm1, %v6221_v4  ;;  %v6228_v4 = vld [vmem:[#allocation18_spill] sm:$0xff] }
  0xca   : > { %4004 = vmatmul.mubr.msk.f32.gmra.mrb[24].mxu1 %vm391_vm1, %v6222_v10  ;;  %4260 = vmatmul.mubr.msk.f32.gmra.mrb[8].mxu0 %vm391_vm1, %v6223_v29  ;;  %v6229_v29 = vld [vmem:[#allocation19_spill] sm:$0xff] }
  0xcb   : > { %4006 = vmatprep.mubr.msk.f32.mxu1 %vm391_vm1, %v6224_v55  ;;  %4262 = vmatprep.mubr.msk.f32.mxu0 %vm391_vm1, %v6225_v16  ;;  %v6230_v16 = vld [vmem:[#allocation20_spill] sm:$0xff] }
  0xce   : > { %4007 = vmatmul.mubr.msk.f32.gmra.mrb[26].mxu1 %vm391_vm1, %v5439_v58  ;;  %4263 = vmatmul.mubr.msk.f32.gmra.mrb[10].mxu0 %vm391_vm1, %v6226_v63  ;;  %v6231_v63 = vld [vmem:[#allocation3_spill] sm:$0xff] }
  0xcf   : > { %4009 = vmatprep.mubr.msk.f32.mxu1 %vm391_vm1, %v5443_v3  ;;  %4265 = vmatprep.mubr.msk.f32.mxu0 %vm391_vm1, %v6227_v8  ;;  %v6232_v8 = vld [vmem:[#allocation22_spill] sm:$0xff] }
  0xd2   : > { %4010 = vmatmul.mubr.msk.f32.gmra.mrb[28].mxu1 %vm391_vm1, %v5462_v27  ;;  %4266 = vmatmul.mubr.msk.f32.gmra.mrb[12].mxu0 %vm391_vm1, %v6228_v4  ;;  %v6233_v27 = vld [vmem:[#allocation4_spill] sm:$0xff] }
  0xd3   : > { %4012 = vmatprep.mubr.msk.f32.mxu1 %vm391_vm1, %v5466_v19  ;;  %4268 = vmatprep.mubr.msk.f32.mxu0 %vm391_vm1, %v6229_v29  ;;  %v6234_v4 = vld [vmem:[#allocation24_spill] sm:$0xff]  ;;  %v6236_v19 = vld [vmem:[#allocation2_spill] sm:$0xff] }
  0xd6   : > { %4013 = vmatmul.mubr.msk.f32.gmra.mrb[30].mxu1 %vm391_vm1, %v5482_v15  ;;  %4269 = vmatmul.mubr.msk.f32.gmra.mrb[14].mxu0 %vm391_vm1, %v6230_v16  ;;  %v6235_v15 = vld [vmem:[#allocation26_spill] sm:$0xff] }
  0xd7   : > { %4023 = vmatprep.mubr.msk.f32.mxu1 %vm391_vm1, %v6231_v63  ;;  %4271 = vmatprep.mubr.msk.f32.mxu0 %vm391_vm1, %v6232_v8  ;;  %v6237_v63 = vld [vmem:[#allocation28_spill] sm:$0xff] }
  0xda   : > { %4024 = vmatmul.mubr.msk.f32.vlgmr.msra.gmra.mrb[0].mxu1 %vm391_vm1, %v6233_v27  ;;  %4272 = vmatmul.mubr.msk.f32.gmra.mrb[16].mxu0 %vm391_vm1, %v6234_v4  ;;  %v1646_v27 = vrot.slane %v5450_v26, 1 }
  0xdb   : > { %4425 = vmatpush3.bf16.msra.mxu1 %v4788_v7  ;;  %4026 = vmatprep.mubr.msk.f32.mxu1 %vm391_vm1, %v4855_v32  ;;  %v6238_v7 = vld [vmem:[#allocation30_spill] sm:$0xff]  ;;  %v6239_v32 = vld [vmem:[#allocation32_spill] sm:$0xff] }
  0xdc   : > { %4274 = vmatprep.mubr.msk.f32.mxu0 %vm391_vm1, %v6235_v15  ;;  %4424 = vmatprep.subr.bf16.mxu1 %v6236_v19 }
  0xde   : > { %4027 = vmatmul.mubr.msk.f32.gmra.mrb[2].mxu1 %vm391_vm1, %v4863_v36  ;;  %4275 = vmatmul.mubr.msk.f32.gmra.mrb[18].mxu0 %vm391_vm1, %v6237_v63  ;;  %v6240_v36 = vld [vmem:[#allocation34_spill] sm:$0xff] }
  0xdf   : > { %4029 = vmatprep.mubr.msk.f32.mxu1 %vm391_vm1, %v4878_v45  ;;  %4277 = vmatprep.mubr.msk.f32.mxu0 %vm391_vm1, %v6238_v7  ;;  %v6241_v45 = vld [vmem:[#allocation37_spill] sm:$0xff] }
  0xe0   : > { %4426 = vmatpush3.bf16.msra.mxu1 %v6236_v19  ;;  %v6243_v19 = vld [vmem:[#allocation40_spill] sm:$0xff] }
  0xe2   : > { %4030 = vmatmul.mubr.msk.f32.gmra.mrb[4].mxu1 %vm391_vm1, %v4881_v46  ;;  %4278 = vmatmul.mubr.msk.f32.gmra.mrb[20].mxu0 %vm391_vm1, %v6239_v32  ;;  %v6242_v46 = vld [vmem:[#allocation39_spill] sm:$0xff] }
  0xe3   : > { %4032 = vmatprep.mubr.msk.f32.mxu1 %vm391_vm1, %v4892_v51  ;;  %4280 = vmatprep.mubr.msk.f32.mxu0 %vm391_vm1, %v6240_v36  ;;  %v1647_v51 = vrot.slane %v5453_v22, 1  ;;  %v5791_v36 = vld [vmem:[%s4819_s20 + $0x1a8] sm:$0x3] }
  0xe5   : > { %v5788_v3 = vsel %vm305_vm0, %v1646_v27, %v1647_v51 }
  0xe6   : > { %4033 = vmatmul.mubr.msk.f32.gmra.mrb[6].mxu1 %vm391_vm1, %v4895_v52  ;;  %4281 = vmatmul.mubr.msk.f32.gmra.mrb[22].mxu0 %vm391_vm1, %v6241_v45  ;;  %v6244_v52 = vld [vmem:[#allocation42_spill] sm:$0xff]  ;;  %v2458_v45 = vrot.slane %v5658_v28, 1 }
  0xe7   : > { %4035 = vmatprep.mubr.msk.f32.mxu1 %vm391_vm1, %v4929_v1  ;;  %4283 = vmatprep.mubr.msk.f32.mxu0 %vm391_vm1, %v6242_v46  ;;  %v1649_v1 = vrot.slane %v5471_v6, 1  ;;  %v2457_v46 = vrot.slane %v5647_v20, 1  ;;  %v2460_v6 = vrot.slane %v5791_v36, 1 }
  0xe9   : > { %v2459_v27 = vsel %vm305_vm0, %v2457_v46, %v2458_v45 }
  0xea   : > { %4036 = vmatmul.mubr.msk.f32.gmra.mrb[8].mxu1 %vm391_vm1, %v4932_v2  ;;  %4284 = vmatmul.mubr.msk.f32.gmra.mrb[24].mxu0 %vm391_vm1, %v6243_v19  ;;  %v6245_v2 = vld [vmem:[#allocation43_spill] sm:$0xff] }
  0xeb   : > { %4038 = vmatprep.mubr.msk.f32.mxu1 %vm391_vm1, %v4958_v11  ;;  %4286 = vmatprep.mubr.msk.f32.mxu0 %vm391_vm1, %v6244_v52  ;;  %v5802_v11 = vsel %vm305_vm0, %v1647_v51, %v1649_v1 }
  0xee   : > { %4039 = vmatmul.mubr.msk.f32.gmra.mrb[10].mxu1 %vm391_vm1, %v4961_v13  ;;  %4287 = vmatmul.mubr.msk.f32.gmra.mrb[26].mxu0 %vm391_vm1, %v6245_v2  ;;  %v2461_v13 = vsel %vm305_vm0, %v2458_v45, %v2460_v6 }
  0xef   : > { %4041 = vmatprep.mubr.msk.f32.mxu1 %vm391_vm1, %v4985_v23  ;;  %4289 = vmatprep.mubr.msk.f32.mxu0 %vm391_vm1, %v5788_v3  ;;  %v6246_v23 = vld [vmem:[#allocation41_spill] sm:$0xff] }
  0xf2   : > { %4042 = vmatmul.mubr.msk.f32.gmra.mrb[12].mxu1 %vm391_vm1, %v4988_v24  ;;  %4290 = vmatmul.mubr.msk.f32.gmra.mrb[28].mxu0 %vm391_vm1, %v5802_v11  ;;  %v6247_v24 = vld [vmem:[#allocation35_spill] sm:$0xff] }
  0xf3   : > { %4044 = vmatprep.mubr.msk.f32.mxu1 %vm391_vm1, %v5011_v35  ;;  %4292 = vmatprep.mubr.msk.f32.mxu0 %vm391_vm1, %v2459_v27  ;;  %v6251_v35 = vld [vmem:[#allocation37_spill] sm:$0xff] }
  0xf6   : > { %4045 = vmatmul.mubr.msk.f32.gmra.mrb[14].mxu1 %vm391_vm1, %v5014_v37  ;;  %4293 = vmatmul.mubr.msk.f32.gmra.mrb[30].mxu0 %vm391_vm1, %v2461_v13  ;;  %v6252_v37 = vld [vmem:[#allocation47_spill] sm:$0xff] }
  0xf7   : > { %4047 = vmatprep.mubr.msk.f32.mxu1 %vm391_vm1, %v5052_v56  ;;  %4303 = vmatprep.mubr.msk.f32.mxu0 %vm391_vm1, %v5113_v50  ;;  %v6254_v50 = vld [vmem:[#allocation48_spill] sm:$0xff]  ;;  %v2728_v56 = vrot.slane %v5647_v20, 2 }
  0xfa   : > { %4048 = vmatmul.mubr.msk.f32.gmra.mrb[16].mxu1 %vm391_vm1, %v5055_v57  ;;  %4304 = vmatmul.mubr.msk.f32.vlgmr.msra.gmra.mrb[0].mxu0 %vm391_vm1, %v6205_v9  ;;  %v2729_v57 = vrot.slane %v5658_v28, 2 }
  0xfb   : > { %4050 = vmatprep.mubr.msk.f32.mxu1 %vm391_vm1, %v5080_v17  ;;  %4306 = vmatprep.mubr.msk.f32.mxu0 %vm391_vm1, %v6206_v42  ;;  %v6255_v17 = vld [vmem:[#allocation49_spill] sm:$0xff]  ;;  %v5959_v42 = vld [vmem:[%s6078_s2] ss:$0 sm:$0xff] }
  0xfe   : > { %4051 = vmatmul.mubr.msk.f32.gmra.mrb[18].mxu1 %vm391_vm1, %v5083_v18  ;;  %4307 = vmatmul.mubr.msk.f32.gmra.mrb[2].mxu0 %vm391_vm1, %v6207_v60  ;;  %v6256_v18 = vld [vmem:[#allocation50_spill] sm:$0xff] }
  0xff   : > { %4053 = vmatprep.mubr.msk.f32.mxu1 %vm391_vm1, %v5118_v41  ;;  %4309 = vmatprep.mubr.msk.f32.mxu0 %vm391_vm1, %v6208_v47  ;;  %v6253_v41 = vld [vmem:[#allocation39_spill] sm:$0xff] }
 0x102   : > { %4054 = vmatmul.mubr.msk.f32.gmra.mrb[20].mxu1 %vm391_vm1, %v5121_v54  ;;  %4310 = vmatmul.mubr.msk.f32.gmra.mrb[4].mxu0 %vm391_vm1, %v6209_v59  ;;  %v2731_v54 = vrot.slane %v5791_v36, 2 }
 0x103   : > { %4056 = vmatprep.mubr.msk.f32.mxu1 %vm391_vm1, %v5160_v25  ;;  %4312 = vmatprep.mubr.msk.f32.mxu0 %vm391_vm1, %v6210_v39  ;;  %v6248_v25 = vld [vmem:[#allocation36_spill] sm:$0xff] }
 0x106   : > { %4057 = vmatmul.mubr.msk.f32.gmra.mrb[22].mxu1 %vm391_vm1, %v5163_v49  ;;  %4313 = vmatmul.mubr.msk.f32.gmra.mrb[6].mxu0 %vm391_vm1, %v6211_v38  ;;  %v2730_v49 = vsel %vm970_vm2, %v2728_v56, %v2729_v57 }
 0x107   : > { %4059 = vmatprep.mubr.msk.f32.mxu1 %vm391_vm1, %v5197_v48  ;;  %4315 = vmatprep.mubr.msk.f32.mxu0 %vm391_vm1, %v5263_v5  ;;  %v6257_v48 = vld [vmem:[#allocation51_spill] sm:$0xff] }
 0x10a   : > { %4060 = vmatmul.mubr.msk.f32.gmra.mrb[24].mxu1 %vm391_vm1, %v5200_v31  ;;  %4316 = vmatmul.mubr.msk.f32.gmra.mrb[8].mxu0 %vm391_vm1, %v6212_v21  ;;  %v2732_v31 = vsel %vm970_vm2, %v2729_v57, %v2731_v54 }
 0x10b   : > { %4062 = vmatprep.mubr.msk.f32.mxu1 %vm391_vm1, %v5233_v0  ;;  %4318 = vmatprep.mubr.msk.f32.mxu0 %vm391_vm1, %v5298_v30 }
 0x10e   : > { %4063 = vmatmul.mubr.msk.f32.gmra.mrb[26].mxu1 %vm391_vm1, %v5236_v62  ;;  %4319 = vmatmul.mubr.msk.f32.gmra.mrb[10].mxu0 %vm391_vm1, %v6246_v23 }
 0x10f   : > { %4065 = vmatprep.mubr.msk.f32.mxu1 %vm391_vm1, %v6247_v24  ;;  %4321 = vmatprep.mubr.msk.f32.mxu0 %vm391_vm1, %v5322_v53 }
 0x112   : > { %4066 = vmatmul.mubr.msk.f32.gmra.mrb[28].mxu1 %vm391_vm1, %v6248_v25  ;;  %4322 = vmatmul.mubr.msk.f32.gmra.mrb[12].mxu0 %vm391_vm1, %v5338_v44 }
 0x113   : > { %4068 = vmatprep.mubr.msk.f32.mxu1 %vm391_vm1, %v5450_v26  ;;  %4324 = vmatprep.mubr.msk.f32.mxu0 %vm391_vm1, %v5342_v33  ;;  %v6250_v26 = vld [vmem:[#allocation46_spill] sm:$0xff] }
 0x116   : > { %4069 = vmatmul.mubr.msk.f32.gmra.mrb[30].mxu1 %vm391_vm1, %v5453_v22  ;;  %4325 = vmatmul.mubr.msk.f32.gmra.mrb[14].mxu0 %vm391_vm1, %v5361_v61  ;;  %v6249_v22 = vld [vmem:[#allocation34_spill] sm:$0xff] }
 0x117   : > { %4103 = vmatprep.mubr.msk.f32.mxu1 %vm391_vm1, %v6229_v29  ;;  %4327 = vmatprep.mubr.msk.f32.mxu0 %vm391_vm1, %v5365_v40 }
 0x11a   : > { %4104 = vmatmul.mubr.msk.f32.vlgmr.msra.gmra.mrb[16].mxu1 %vm391_vm1, %v6230_v16  ;;  %4328 = vmatmul.mubr.msk.f32.gmra.mrb[16].mxu0 %vm391_vm1, %v5385_v12 }
 0x11b   : > { %4106 = vmatprep.mubr.msk.f32.mxu1 %vm391_vm1, %v6232_v8  ;;  %4330 = vmatprep.mubr.msk.f32.mxu0 %vm391_vm1, %v5389_v14 }
 0x11e   : > { %4107 = vmatmul.mubr.msk.f32.gmra.mrb[18].mxu1 %vm391_vm1, %v6234_v4  ;;  %4331 = vmatmul.mubr.msk.f32.gmra.mrb[18].mxu0 %vm391_vm1, %v5404_v43 }
 0x11f   : > { %4109 = vmatprep.mubr.msk.f32.mxu1 %vm391_vm1, %v6235_v15  ;;  %4333 = vmatprep.mubr.msk.f32.mxu0 %vm391_vm1, %v5408_v34 }
 0x122   : > { %4110 = vmatmul.mubr.msk.f32.gmra.mrb[20].mxu1 %vm391_vm1, %v6237_v63  ;;  %4334 = vmatmul.mubr.msk.f32.gmra.mrb[20].mxu0 %vm391_vm1, %v6222_v10 }
 0x123   : > { %4112 = vmatprep.mubr.msk.f32.mxu1 %vm391_vm1, %v6238_v7  ;;  %4336 = vmatprep.mubr.msk.f32.mxu0 %vm391_vm1, %v6224_v55 }
 0x126   : > { %4113 = vmatmul.mubr.msk.f32.gmra.mrb[22].mxu1 %vm391_vm1, %v6239_v32  ;;  %4337 = vmatmul.mubr.msk.f32.gmra.mrb[22].mxu0 %vm391_vm1, %v5439_v58 }
 0x127   : > { %4115 = vmatprep.mubr.msk.f32.mxu1 %vm391_vm1, %v6249_v22  ;;  %4339 = vmatprep.mubr.msk.f32.mxu0 %vm391_vm1, %v6250_v26 }
 0x12a   : > { %4116 = vmatmul.mubr.msk.f32.gmra.mrb[24].mxu1 %vm391_vm1, %v6251_v35  ;;  %4340 = vmatmul.mubr.msk.f32.gmra.mrb[24].mxu0 %vm391_vm1, %v6252_v37 }
 0x12b   : > { %4118 = vmatprep.mubr.msk.f32.mxu1 %vm391_vm1, %v6253_v41  ;;  %4342 = vmatprep.mubr.msk.f32.mxu0 %vm391_vm1, %v6254_v50 }
 0x12e   : > { %4119 = vmatmul.mubr.msk.f32.gmra.mrb[26].mxu1 %vm391_vm1, %v6243_v19  ;;  %4343 = vmatmul.mubr.msk.f32.gmra.mrb[26].mxu0 %vm391_vm1, %v6255_v17 }
 0x12f   : > { %4121 = vmatprep.mubr.msk.f32.mxu1 %vm391_vm1, %v6244_v52  ;;  %4345 = vmatprep.mubr.msk.f32.mxu0 %vm391_vm1, %v6256_v18 }
 0x132   : > { %4122 = vmatmul.mubr.msk.f32.gmra.mrb[28].mxu1 %vm391_vm1, %v6245_v2  ;;  %4346 = vmatmul.mubr.msk.f32.gmra.mrb[28].mxu0 %vm391_vm1, %v6257_v48 }
 0x133   : > { %4124 = vmatprep.mubr.msk.f32.mxu1 %vm391_vm1, %v5788_v3  ;;  %4348 = vmatprep.mubr.msk.f32.mxu0 %vm391_vm1, %v2730_v49 }
 0x136   : > { %4125 = vmatmul.mubr.msk.f32.gmra.mrb[30].mxu1 %vm391_vm1, %v5802_v11  ;;  %4349 = vmatmul.mubr.msk.f32.gmra.mrb[30].mxu0 %vm391_vm1, %v2732_v31 }
 0x1ad   : > { %v4025_v0 = vpop.f32.mrb[0].mxu1 }
 0x1ae   : > { %v1454_v62 = vpop.f32.mrb[1].mxu1 }
 0x1b1   : > { %v4028_v5 = vpop.f32.mrb[2].mxu1 }
 0x1b2   : > { %v1464_v53 = vpop.f32.mrb[3].mxu1 }
 0x1b5   : > { %v4031_v30 = vpop.f32.mrb[4].mxu1 }
 0x1b6   : > { %v1474_v44 = vpop.f32.mrb[5].mxu1 }
 0x1b9   : > { %v4034_v33 = vpop.f32.mrb[6].mxu1 }
 0x1ba   : > { %v1484_v61 = vpop.f32.mrb[7].mxu1 }
 0x1bd   : > { %v4037_v40 = vpop.f32.mrb[8].mxu1 }
 0x1be   : > { %v1494_v12 = vpop.f32.mrb[9].mxu1 }
 0x1c1   : > { %v4040_v14 = vpop.f32.mrb[10].mxu1 }
 0x1c2   : > { %v1504_v43 = vpop.f32.mrb[11].mxu1 }
 0x1c5   : > { %v5948_v34 = vpop.f32.mrb[12].mxu1 }
 0x1c6   : > { %v5950_v58 = vpop.f32.mrb[13].mxu1 }
 0x1c9   : > { %v5952_v3 = vpop.f32.mrb[14].mxu1 }
 0x1ca   : > { %v5954_v15 = vpop.f32.mrb[15].mxu1 }
 0x1cd   : > { %v4305_v9 = vpop.f32.mrb[0].mxu0 }
 0x1ce   : > { %v4427_v60 = vadd.f32 %v4305_v9, %v4025_v0  ;;  %v2808_v47 = vpop.f32.mrb[1].mxu0 }
 0x1cf   : > { %v4428_v59 = vadd.f32 %v2808_v47, %v1454_v62 }
 0x1d0   : > { %v3007_v39 = vadd.f32 %v4427_v60, %v5959_v42 }
 0x1d1   : > { %v3006_v38 = vadd.f32 %v4428_v59, %v5959_v42  ;;  %v4308_v20 = vpop.f32.mrb[2].mxu0 }
 0x1d2   : > { %v3039_v21 = vmax.f32 %v3007_v39, 0.0  ;;  %v4429_v28 = vadd.f32 %v4308_v20, %v4028_v5  ;;  %v2818_v10 = vpop.f32.mrb[3].mxu0 }
 0x1d3   : > { %v3038_v55 = vmax.f32 %v3006_v38, 0.0  ;;  %v4430_v29 = vadd.f32 %v2818_v10, %v1464_v53 }
 0x1d4   : > { %3071 = vst.msk [vmem:[%s5966_s29 + $0x8] sm:$0xff] %vm391_vm1, %v3039_v21  ;;  %v3009_v16 = vadd.f32 %v4429_v28, %v5959_v42 }
 0x1d5   : > { %3070 = vst.msk [vmem:[%s5966_s29] sm:$0xff] %vm391_vm1, %v3038_v55  ;;  %v3008_v8 = vadd.f32 %v4430_v29, %v5959_v42  ;;  %v4311_v4 = vpop.f32.mrb[4].mxu0 }
 0x1d6   : > { %v3041_v63 = vmax.f32 %v3009_v16, 0.0  ;;  %v4431_v7 = vadd.f32 %v4311_v4, %v4031_v30  ;;  %v2828_v32 = vpop.f32.mrb[5].mxu0 }
 0x1d7   : > { %v3040_v36 = vmax.f32 %v3008_v8, 0.0  ;;  %v4432_v45 = vadd.f32 %v2828_v32, %v1474_v44 }
 0x1d8   : > { %3073 = vst.msk [vmem:[%s5966_s29 + $0x18] sm:$0xff] %vm391_vm1, %v3041_v63  ;;  %v3011_v46 = vadd.f32 %v4431_v7, %v5959_v42 }
 0x1d9   : > { %3072 = vst.msk [vmem:[%s5966_s29 + $0x10] sm:$0xff] %vm391_vm1, %v3040_v36  ;;  %v3010_v51 = vadd.f32 %v4432_v45, %v5959_v42  ;;  %v4314_v19 = vpop.f32.mrb[6].mxu0 }
 0x1da   : > { %v3043_v52 = vmax.f32 %v3011_v46, 0.0  ;;  %v4433_v1 = vadd.f32 %v4314_v19, %v4034_v33  ;;  %v2838_v2 = vpop.f32.mrb[7].mxu0 }
 0x1db   : > { %v3042_v11 = vmax.f32 %v3010_v51, 0.0  ;;  %v4434_v6 = vadd.f32 %v2838_v2, %v1484_v61 }
 0x1dc   : > { %3075 = vst.msk [vmem:[%s5966_s29 + $0x28] sm:$0xff] %vm391_vm1, %v3043_v52  ;;  %v3013_v27 = vadd.f32 %v4433_v1, %v5959_v42 }
 0x1dd   : > { %3074 = vst.msk [vmem:[%s5966_s29 + $0x20] sm:$0xff] %vm391_vm1, %v3042_v11  ;;  %v3012_v13 = vadd.f32 %v4434_v6, %v5959_v42  ;;  %v4317_v23 = vpop.f32.mrb[8].mxu0 }
 0x1de   : > { %v3045_v24 = vmax.f32 %v3013_v27, 0.0  ;;  %v4435_v25 = vadd.f32 %v4317_v23, %v4037_v40  ;;  %v2848_v22 = vpop.f32.mrb[9].mxu0 }
 0x1df   : > { %v3044_v26 = vmax.f32 %v3012_v13, 0.0  ;;  %v4436_v35 = vadd.f32 %v2848_v22, %v1494_v12 }
 0x1e0   : > { %3077 = vst.msk [vmem:[%s5966_s29 + $0x38] sm:$0xff] %vm391_vm1, %v3045_v24  ;;  %v3015_v37 = vadd.f32 %v4435_v25, %v5959_v42 }
 0x1e1   : > { %3076 = vst.msk [vmem:[%s5966_s29 + $0x30] sm:$0xff] %vm391_vm1, %v3044_v26  ;;  %v3014_v41 = vadd.f32 %v4436_v35, %v5959_v42  ;;  %v4320_v50 = vpop.f32.mrb[10].mxu0 }
 0x1e2   : > { %v3047_v56 = vmax.f32 %v3015_v37, 0.0  ;;  %v4437_v57 = vadd.f32 %v4320_v50, %v4040_v14  ;;  %v2858_v17 = vpop.f32.mrb[11].mxu0 }
 0x1e3   : > { %v3046_v18 = vmax.f32 %v3014_v41, 0.0  ;;  %v4438_v54 = vadd.f32 %v2858_v17, %v1504_v43 }
 0x1e4   : > { %3079 = vst.msk [vmem:[%s5966_s29 + $0x48] sm:$0xff] %vm391_vm1, %v3047_v56  ;;  %v3017_v49 = vadd.f32 %v4437_v57, %v5959_v42 }
 0x1e5   : > { %3078 = vst.msk [vmem:[%s5966_s29 + $0x40] sm:$0xff] %vm391_vm1, %v3046_v18  ;;  %v3016_v48 = vadd.f32 %v4438_v54, %v5959_v42  ;;  %v4323_v31 = vpop.f32.mrb[12].mxu0 }
 0x1e6   : > { %v3049_v0 = vmax.f32 %v3017_v49, 0.0  ;;  %v4439_v62 = vadd.f32 %v4323_v31, %v5948_v34  ;;  %v2868_v5 = vpop.f32.mrb[13].mxu0 }
 0x1e7   : > { %v3048_v53 = vmax.f32 %v3016_v48, 0.0  ;;  %v4440_v30 = vadd.f32 %v2868_v5, %v5950_v58 }
 0x1e8   : > { %3081 = vst.msk [vmem:[%s5966_s29 + $0x58] sm:$0xff] %vm391_vm1, %v3049_v0  ;;  %v3019_v44 = vadd.f32 %v4439_v62, %v5959_v42 }
 0x1e9   : > { %3080 = vst.msk [vmem:[%s5966_s29 + $0x50] sm:$0xff] %vm391_vm1, %v3048_v53  ;;  %v3018_v33 = vadd.f32 %v4440_v30, %v5959_v42  ;;  %v4326_v61 = vpop.f32.mrb[14].mxu0 }
 0x1ea   : > { %v3051_v40 = vmax.f32 %v3019_v44, 0.0  ;;  %v4441_v12 = vadd.f32 %v4326_v61, %v5952_v3  ;;  %v2878_v14 = vpop.f32.mrb[15].mxu0 }
 0x1eb   : > { %v3050_v43 = vmax.f32 %v3018_v33, 0.0  ;;  %v4442_v34 = vadd.f32 %v2878_v14, %v5954_v15 }
 0x1ec   : > { %3083 = vst.msk [vmem:[%s5966_s29 + $0x68] sm:$0xff] %vm391_vm1, %v3051_v40  ;;  %v3021_v58 = vadd.f32 %v4441_v12, %v5959_v42 }
 0x1ed   : > { %v4105_v9 = vpop.f32.mrb[16].mxu1  ;;  %3082 = vst.msk [vmem:[%s5966_s29 + $0x60] sm:$0xff] %vm391_vm1, %v3050_v43  ;;  %v3020_v60 = vadd.f32 %v4442_v34, %v5959_v42  ;;  %v4329_v47 = vpop.f32.mrb[16].mxu0 }
 0x1ee   : > { %v1806_v59 = vpop.f32.mrb[17].mxu1  ;;  %v3053_v39 = vmax.f32 %v3021_v58, 0.0  ;;  %v4443_v38 = vadd.f32 %v4329_v47, %v4105_v9  ;;  %v2888_v3 = vpop.f32.mrb[17].mxu0 }
 0x1ef   : > { %v3052_v20 = vmax.f32 %v3020_v60, 0.0  ;;  %v4444_v21 = vadd.f32 %v2888_v3, %v1806_v59 }
 0x1f0   : > { %3085 = vst.msk [vmem:[%s5966_s29 + $0x78] sm:$0xff] %vm391_vm1, %v3053_v39  ;;  %v3023_v15 = vadd.f32 %v4443_v38, %v5959_v42 }
 0x1f1   : > { %v4108_v28 = vpop.f32.mrb[18].mxu1  ;;  %3084 = vst.msk [vmem:[%s5966_s29 + $0x70] sm:$0xff] %vm391_vm1, %v3052_v20  ;;  %v3022_v10 = vadd.f32 %v4444_v21, %v5959_v42  ;;  %v4332_v55 = vpop.f32.mrb[18].mxu0 }
 0x1f2   : > { %v1816_v29 = vpop.f32.mrb[19].mxu1  ;;  %v3055_v16 = vmax.f32 %v3023_v15, 0.0  ;;  %v4445_v8 = vadd.f32 %v4332_v55, %v4108_v28  ;;  %v2898_v4 = vpop.f32.mrb[19].mxu0 }
 0x1f3   : > { %v3054_v63 = vmax.f32 %v3022_v10, 0.0  ;;  %v4446_v7 = vadd.f32 %v2898_v4, %v1816_v29 }
 0x1f4   : > { %3087 = vst.msk [vmem:[%s5966_s29 + $0x88] sm:$0xff] %vm391_vm1, %v3055_v16  ;;  %v3025_v32 = vadd.f32 %v4445_v8, %v5959_v42 }
 0x1f5   : > { %v4111_v36 = vpop.f32.mrb[20].mxu1  ;;  %3086 = vst.msk [vmem:[%s5966_s29 + $0x80] sm:$0xff] %vm391_vm1, %v3054_v63  ;;  %v3024_v45 = vadd.f32 %v4446_v7, %v5959_v42  ;;  %v4335_v46 = vpop.f32.mrb[20].mxu0 }
 0x1f6   : > { %v1826_v51 = vpop.f32.mrb[21].mxu1  ;;  %v3057_v19 = vmax.f32 %v3025_v32, 0.0  ;;  %v4447_v52 = vadd.f32 %v4335_v46, %v4111_v36  ;;  %v2908_v1 = vpop.f32.mrb[21].mxu0 }
 0x1f7   : > { %v3056_v2 = vmax.f32 %v3024_v45, 0.0  ;;  %v4448_v11 = vadd.f32 %v2908_v1, %v1826_v51 }
 0x1f8   : > { %3089 = vst.msk [vmem:[%s5966_s29 + $0x98] sm:$0xff] %vm391_vm1, %v3057_v19  ;;  %v3027_v6 = vadd.f32 %v4447_v52, %v5959_v42 }
 0x1f9   : > { %v4114_v27 = vpop.f32.mrb[22].mxu1  ;;  %3088 = vst.msk [vmem:[%s5966_s29 + $0x90] sm:$0xff] %vm391_vm1, %v3056_v2  ;;  %v3026_v13 = vadd.f32 %v4448_v11, %v5959_v42  ;;  %v4338_v23 = vpop.f32.mrb[22].mxu0 }
 0x1fa   : > { %v1836_v24 = vpop.f32.mrb[23].mxu1  ;;  %v3059_v25 = vmax.f32 %v3027_v6, 0.0  ;;  %v4449_v22 = vadd.f32 %v4338_v23, %v4114_v27  ;;  %v2918_v26 = vpop.f32.mrb[23].mxu0 }
 0x1fb   : > { %v3058_v35 = vmax.f32 %v3026_v13, 0.0  ;;  %v4450_v37 = vadd.f32 %v2918_v26, %v1836_v24 }
 0x1fc   : > { %3091 = vst.msk [vmem:[%s5966_s29 + $0xa8] sm:$0xff] %vm391_vm1, %v3059_v25  ;;  %v3029_v41 = vadd.f32 %v4449_v22, %v5959_v42 }
 0x1fd   : > { %v4117_v50 = vpop.f32.mrb[24].mxu1  ;;  %3090 = vst.msk [vmem:[%s5966_s29 + $0xa0] sm:$0xff] %vm391_vm1, %v3058_v35  ;;  %v3028_v56 = vadd.f32 %v4450_v37, %v5959_v42  ;;  %v4341_v57 = vpop.f32.mrb[24].mxu0 }
 0x1fe   : > { %v1846_v17 = vpop.f32.mrb[25].mxu1  ;;  %v3061_v18 = vmax.f32 %v3029_v41, 0.0  ;;  %v4451_v54 = vadd.f32 %v4341_v57, %v4117_v50  ;;  %v2928_v49 = vpop.f32.mrb[25].mxu0 }
 0x1ff   : > { %v3060_v48 = vmax.f32 %v3028_v56, 0.0  ;;  %v4452_v31 = vadd.f32 %v2928_v49, %v1846_v17 }
 0x200   : > { %3093 = vst.msk [vmem:[%s5966_s29 + $0xb8] sm:$0xff] %vm391_vm1, %v3061_v18  ;;  %v3031_v0 = vadd.f32 %v4451_v54, %v5959_v42 }
 0x201   : > { %v4120_v62 = vpop.f32.mrb[26].mxu1  ;;  %3092 = vst.msk [vmem:[%s5966_s29 + $0xb0] sm:$0xff] %vm391_vm1, %v3060_v48  ;;  %v3030_v5 = vadd.f32 %v4452_v31, %v5959_v42  ;;  %v4344_v53 = vpop.f32.mrb[26].mxu0 }
 0x202   : > { %v1856_v30 = vpop.f32.mrb[27].mxu1  ;;  %v3063_v44 = vmax.f32 %v3031_v0, 0.0  ;;  %v4453_v33 = vadd.f32 %v4344_v53, %v4120_v62  ;;  %v2938_v61 = vpop.f32.mrb[27].mxu0 }
 0x203   : > { %v3062_v40 = vmax.f32 %v3030_v5, 0.0  ;;  %v4454_v12 = vadd.f32 %v2938_v61, %v1856_v30 }
 0x204   : > { %3095 = vst.msk [vmem:[%s5966_s29 + $0xc8] sm:$0xff] %vm391_vm1, %v3063_v44  ;;  %v3033_v14 = vadd.f32 %v4453_v33, %v5959_v42 }
 0x205   : > { %v4123_v43 = vpop.f32.mrb[28].mxu1  ;;  %3094 = vst.msk [vmem:[%s5966_s29 + $0xc0] sm:$0xff] %vm391_vm1, %v3062_v40  ;;  %v3032_v34 = vadd.f32 %v4454_v12, %v5959_v42  ;;  %v4347_v58 = vpop.f32.mrb[28].mxu0 }
 0x206   : > { %v1866_v9 = vpop.f32.mrb[29].mxu1  ;;  %v3065_v60 = vmax.f32 %v3033_v14, 0.0  ;;  %v4455_v47 = vadd.f32 %v4347_v58, %v4123_v43  ;;  %v2948_v59 = vpop.f32.mrb[29].mxu0 }
 0x207   : > { %v3064_v39 = vmax.f32 %v3032_v34, 0.0  ;;  %v4456_v38 = vadd.f32 %v2948_v59, %v1866_v9 }
 0x208   : > { %3097 = vst.msk [vmem:[%s5966_s29 + $0xd8] sm:$0xff] %vm391_vm1, %v3065_v60  ;;  %v3035_v3 = vadd.f32 %v4455_v47, %v5959_v42 }
 0x209   : > { %v4126_v20 = vpop.f32.mrb[30].mxu1  ;;  %3096 = vst.msk [vmem:[%s5966_s29 + $0xd0] sm:$0xff] %vm391_vm1, %v3064_v39  ;;  %v3034_v21 = vadd.f32 %v4456_v38, %v5959_v42  ;;  %v4350_v15 = vpop.f32.mrb[30].mxu0 }
 0x20a   : > { %v1876_v28 = vpop.f32.mrb[31].mxu1  ;;  %v3067_v10 = vmax.f32 %v3035_v3, 0.0  ;;  %v4457_v55 = vadd.f32 %v4350_v15, %v4126_v20  ;;  %v2958_v29 = vpop.f32.mrb[31].mxu0 }
 0x20b   : > { %v3066_v16 = vmax.f32 %v3034_v21, 0.0  ;;  %v4458_v8 = vadd.f32 %v2958_v29, %v1876_v28 }
 0x20c   : > { %3099 = vst.msk [vmem:[%s5966_s29 + $0xe8] sm:$0xff] %vm391_vm1, %v3067_v10  ;;  %v3037_v4 = vadd.f32 %v4457_v55, %v5959_v42 }
 0x20d   : > { %3098 = vst.msk [vmem:[%s5966_s29 + $0xe0] sm:$0xff] %vm391_vm1, %v3066_v16  ;;  %v3036_v63 = vadd.f32 %v4458_v8, %v5959_v42 }
 0x20e   : > { %v3069_v7 = vmax.f32 %v3037_v4, 0.0 }
 0x20f   : > { %v3068_v32 = vmax.f32 %v3036_v63, 0.0 }
 0x210   : > { %3101 = vst.msk [vmem:[%s5966_s29 + $0xf8] sm:$0xff] %vm391_vm1, %v3069_v7 }
 0x211   : > { %3100 = vst.msk [vmem:[%s5966_s29 + $0xf0] sm:$0xff] %vm391_vm1, %v3068_v32 }
 0x212 PF: > { %s13_s14 = sadd.s32 1, %s4730_s14   ;;  %s6258_s12 = smov %s4726_s13 }
 0x213   : > { %p10_p5 = scmp.ge.s32.totalorder %s13_s14, 4   ;;  %s6259_s13 = smov %s6261_s15 }
 0x215   :  { %12 = sbr.rel (!%p10_p5) target bundleno = 2 (0x2), region = 71 }

// kernel: lte_forward.12
= control target key start
LH: loop header
LB: loop body
LE: loop exit
PB: predicated region body
PF: predicated region fallthrough
CT: control target
= control target key end

     0   :  { %s568_s12 = smov 0   ;;  %s570_s13 = smov 0   ;;  %s628_s0 = inlined_call_operand.vmem [shape: f32[2,4,16,32], index: 0, kind: input, shape index: {}]   ;;  %s629_s1 = inlined_call_operand.vmem [shape: f32[1,32,32], index: 1, kind: input, shape index: {}]   ;;  %s630_s2 = inlined_call_operand.vmem [shape: f32[1,32], index: 2, kind: input, shape index: {}]   ;;  %s631_s3 = inlined_call_operand.vmem [shape: f32[2,4,4,32], index: 3, kind: output, shape index: {}]  }
   0x1   :  { %s572_s14 = smov 0  }
   0x2 LB: > { %s25_s15 = sadd.s32 1, %s542_s13  ;;  %p438_p0 = scmp.ge.s32.totalorder %s546_s14, 1  ;;  %s546_s14 = sphi %s572_s14, %s13_s14   ;;  %s542_s13 = sphi %s570_s13, %s633_s13   ;;  %s538_s12 = sphi %s568_s12, %s632_s12  }
   0x3   : > { %p27_p1 = scmp.ge.s32.totalorder %s25_s15, 2  ;;  %p151_p2 = scmp.lt.s32.totalorder %s546_s14, 3 }
   0x5   : > { %s635_s15 = smov (%p27_p1, %s25_s15), 0  ;;  %p152_p3 = pnand %p438_p0, %p151_p2 }
   0x6   : > { %v205_v0 = vld [vmem:[%s629_s1] sm:$0xff] (!%p152_p3)  ;;  %v206_v1 = vld [vmem:[%s629_s1 + $0x8] sm:$0xff] (!%p152_p3)  ;;  %v207_v2 = vld [vmem:[%s629_s1 + $0x10] sm:$0xff] (!%p152_p3)  ;;  %p179_p4 = scmp.lt.s32.totalorder (!%p152_p3), %s538_s12, 1  ;;  %vm216_vm0 = vcmask (!%p152_p3), 261120   ;;  %vm346_vm1 = vcmask (!%p152_p3), 257024  }
   0x7   : > { %155 = sbr.rel (%p152_p3) target bundleno = 242 (0xf2), region = 32  ;;  %v488_v3 = vpack.c.bf16 (!%p152_p3), %v206_v1, %v205_v0  ;;  %v208_v4 = vld [vmem:[%s629_s1 + $0x18] sm:$0xff] (!%p152_p3)  ;;  %v443_v14 = vld [vmem:[%s630_s2] ss:$0 sm:$0xff] (!%p152_p3) }
   0x8   : > { %v492_v5 = vpack.c.bf16 (!%p152_p3), %v208_v4, %v207_v2 }
   0x9   : > { %489 = vmatprep.subr.bf16.mxu0 (!%p152_p3), %v488_v3  ;;  %496 = vmatprep.subr.bf16.mxu1 (!%p152_p3), %v488_v3 }
   0xa   : > { %491 = vmatpush3.bf16.msra.mxu0 (!%p152_p3), %v488_v3  ;;  %498 = vmatpush3.bf16.msra.mxu1 (!%p152_p3), %v488_v3 }
   0xb   : > { %493 = vmatprep.subr.bf16.mxu0 (!%p152_p3), %v492_v5  ;;  %497 = vmatprep.subr.bf16.mxu1 (!%p152_p3), %v492_v5 }
   0xe   : > { %s637_s12 = smov (!%p179_p4, %s538_s12), 1  ;;  %495 = vmatpush3.bf16.msra.mxu0 %v492_v5  ;;  %499 = vmatpush3.bf16.msra.mxu1 %v492_v5 }
   0xf   : > { %s454_s24 = sshll.u32 %s637_s12, 6  ;;  %s455_s30 = sshll.u32 %s637_s12, 4 }
  0x10   : > { %s183_s27 = scalar_lea.vmem %s628_s0, %s454_s24  ;;  %s192_s6 = scalar_lea.vmem %s631_s3, %s455_s30 }
  0x11   : > { %v197_v6 = vld [vmem:[%s183_s27] sm:$0xff]  ;;  %v198_v8 = vld [vmem:[%s183_s27 + $0x8] sm:$0xff]  ;;  %v199_v10 = vld [vmem:[%s183_s27 + $0x10] sm:$0xff] }
  0x12   : > { %v201_v7 = vld [vmem:[%s183_s27 + $0x20] sm:$0xff]  ;;  %476 = vmatprep.mubr.msk.f32.mxu0 %vm216_vm0, %v197_v6  ;;  %v202_v9 = vld [vmem:[%s183_s27 + $0x28] sm:$0xff]  ;;  %v203_v11 = vld [vmem:[%s183_s27 + $0x30] sm:$0xff] }
  0x13   : > { %482 = vmatprep.mubr.msk.f32.mxu1 %vm216_vm0, %v201_v7  ;;  %477 = vmatmul.mubr.msk.f32.vlgmr.msra.gmra.mrb[0].mxu0 %vm216_vm0, %v198_v8  ;;  %v200_v12 = vld [vmem:[%s183_s27 + $0x18] sm:$0xff] }
  0x14   : > { %483 = vmatmul.mubr.msk.f32.vlgmr.msra.gmra.mrb[0].mxu1 %vm216_vm0, %v202_v9  ;;  %479 = vmatprep.mubr.msk.f32.mxu0 %vm216_vm0, %v199_v10  ;;  %v204_v13 = vld [vmem:[%s183_s27 + $0x38] sm:$0xff] }
  0x15   : > { %485 = vmatprep.mubr.msk.f32.mxu1 %vm216_vm0, %v203_v11 }
  0x17   : > { %480 = vmatmul.mubr.msk.f32.gmra.mrb[2].mxu0 %vm216_vm0, %v200_v12 }
  0x18   : > { %486 = vmatmul.mubr.msk.f32.gmra.mrb[2].mxu1 %vm216_vm0, %v204_v13 }
  0xe6   : > { %v478_v15 = vpop.f32.mrb[0].mxu0 }
  0xe7   : > { %v484_v16 = vpop.f32.mrb[0].mxu1  ;;  %v307_v17 = vpop.f32.mrb[1].mxu0 }
  0xe8   : > { %v325_v18 = vpop.f32.mrb[1].mxu1  ;;  %v308_v19 = vadd.f32 %v443_v14, %v307_v17 }
  0xe9   : > { %v326_v20 = vadd.f32 %v443_v14, %v325_v18 }
  0xea   : > { %v342_v21 = vmax.f32 %v308_v19, 0.0  ;;  %v481_v23 = vpop.f32.mrb[2].mxu0 }
  0xeb   : > { %v344_v22 = vmax.f32 %v326_v20, 0.0  ;;  %v487_v24 = vpop.f32.mrb[2].mxu1  ;;  %v316_v25 = vpop.f32.mrb[3].mxu0 }
  0xec   : > { %v334_v26 = vpop.f32.mrb[3].mxu1  ;;  %347 = vst.msk [vmem:[%s192_s6] sm:$0xf] %vm346_vm1, %v342_v21  ;;  %v317_v27 = vadd.f32 %v443_v14, %v316_v25 }
  0xed   : > { %349 = vst.msk [vmem:[%s192_s6 + $0x8] sm:$0xf] %vm346_vm1, %v344_v22  ;;  %v335_v28 = vadd.f32 %v443_v14, %v334_v26 }
  0xee   : > { %v343_v29 = vmax.f32 %v317_v27, 0.0 }
  0xef   : > { %v345_v30 = vmax.f32 %v335_v28, 0.0 }
  0xf0   : > { %348 = vst.msk [vmem:[%s192_s6 + $0x4] sm:$0xf] %vm346_vm1, %v343_v29 }
  0xf1   : > { %350 = vst.msk [vmem:[%s192_s6 + $0xc] sm:$0xf] %vm346_vm1, %v345_v30 }
  0xf2 PF: > { %s13_s14 = sadd.s32 1, %s546_s14   ;;  %s632_s12 = smov %s542_s13 }
  0xf3   : > { %p10_p5 = scmp.ge.s32.totalorder %s13_s14, 4   ;;  %s633_s13 = smov %s635_s15 }
  0xf5   :  { %12 = sbr.rel (!%p10_p5) target bundleno = 2 (0x2), region = 63 }

// kernel: lte_forward.11
= control target key start
LH: loop header
LB: loop body
LE: loop exit
PB: predicated region body
PF: predicated region fallthrough
CT: control target
= control target key end

     0   :  { %s2720_s12 = smov 0   ;;  %s2722_s13 = smov 0   ;;  %s3450_s0 = inlined_call_operand.vmem [shape: f32[2,10,18,32], index: 0, kind: input, shape index: {}]   ;;  %s3451_s1 = inlined_call_operand.vmem [shape: f32[9,32,32], index: 1, kind: input, shape index: {}]   ;;  %s3452_s2 = inlined_call_operand.vmem [shape: f32[1,32], index: 2, kind: input, shape index: {}]   ;;  %s3453_s3 = inlined_call_operand.vmem [shape: f32[2,8,8,32], index: 3, kind: output, shape index: {}]  }
   0x1   :  { %s2724_s14 = smov 0  }
   0x2 LB: > { %s25_s15 = sadd.s32 1, %s2694_s13  ;;  %p1923_p0 = scmp.ge.s32.totalorder %s2698_s14, 1  ;;  %s2698_s14 = sphi %s2724_s14, %s13_s14   ;;  %s2694_s13 = sphi %s2722_s13, %s3455_s13   ;;  %s2690_s12 = sphi %s2720_s12, %s3454_s12  }
   0x3   : > { %p27_p1 = scmp.ge.s32.totalorder %s25_s15, 2  ;;  %p151_p2 = scmp.lt.s32.totalorder %s2698_s14, 3 }
   0x5   : > { %s3457_s15 = smov (%p27_p1, %s25_s15), 0  ;;  %p152_p3 = pnand %p1923_p0, %p151_p2 }
   0x6   : > { %v1927_v0 = vld [vmem:[%s3451_s1 + $0x20] sm:$0xff] (!%p152_p3)  ;;  %v1928_v1 = vld [vmem:[%s3451_s1 + $0x28] sm:$0xff] (!%p152_p3)  ;;  %v1929_v2 = vld [vmem:[%s3451_s1 + $0x30] sm:$0xff] (!%p152_p3)  ;;  %p179_p4 = scmp.lt.s32.totalorder (!%p152_p3), %s2690_s12, 1  ;;  %vm255_vm0 = vcmask (!%p152_p3), 1046528   ;;  %vm301_vm1 = vcmask (!%p152_p3), 261120  }
   0x7   : > { %155 = sbr.rel (%p152_p3) target bundleno = 383 (0x17f), region = 32  ;;  %v2575_v3 = vpack.c.bf16 (!%p152_p3), %v1928_v1, %v1927_v0  ;;  %v1930_v4 = vld [vmem:[%s3451_s1 + $0x38] sm:$0xff] (!%p152_p3)  ;;  %v227_v5 = vld [vmem:[%s3451_s1] sm:$0xff] (!%p152_p3)  ;;  %v228_v7 = vld [vmem:[%s3451_s1 + $0x8] sm:$0xff] (!%p152_p3)  ;;  %vm640_vm2 = vcmask (!%p152_p3), 1045504  }
   0x8   : > { %v2579_v6 = vpack.c.bf16 (!%p152_p3), %v1930_v4, %v1929_v2  ;;  %v1963_v8 = vld [vmem:[%s3451_s1 + $0x40] sm:$0xff] (!%p152_p3)  ;;  %v1964_v9 = vld [vmem:[%s3451_s1 + $0x48] sm:$0xff] (!%p152_p3)  ;;  %v229_v10 = vld [vmem:[%s3451_s1 + $0x10] sm:$0xff] (!%p152_p3)  ;;  %v2583_v12 = vpack.c.bf16 (!%p152_p3), %v228_v7, %v227_v5 }
   0x9   : > { %2647 = vmatprep.subr.bf16.mxu1 (!%p152_p3), %v2575_v3  ;;  %2576 = vmatprep.subr.bf16.mxu0 (!%p152_p3), %v2575_v3  ;;  %v230_v11 = vld [vmem:[%s3451_s1 + $0x18] sm:$0xff] (!%p152_p3)  ;;  %v2591_v13 = vpack.c.bf16 (!%p152_p3), %v1964_v9, %v1963_v8  ;;  %v1965_v14 = vld [vmem:[%s3451_s1 + $0x50] sm:$0xff] (!%p152_p3)  ;;  %v1983_v16 = vld [vmem:[%s3451_s1 + $0x60] sm:$0xff] (!%p152_p3) }
   0xa   : > { %2649 = vmatpush3.bf16.msra.mxu1 (!%p152_p3), %v2575_v3  ;;  %2578 = vmatpush3.bf16.msra.mxu0 (!%p152_p3), %v2575_v3  ;;  %v1966_v15 = vld [vmem:[%s3451_s1 + $0x58] sm:$0xff] (!%p152_p3)  ;;  %v1984_v17 = vld [vmem:[%s3451_s1 + $0x68] sm:$0xff] (!%p152_p3)  ;;  %v2003_v18 = vld [vmem:[%s3451_s1 + $0x80] sm:$0xff] (!%p152_p3)  ;;  %v2812_v28 = vpack.c.bf16 (!%p152_p3), %v230_v11, %v229_v10 }
   0xb   : > { %2648 = vmatprep.subr.bf16.mxu1 (!%p152_p3), %v2579_v6  ;;  %2580 = vmatprep.subr.bf16.mxu0 (!%p152_p3), %v2579_v6  ;;  %v2004_v19 = vld [vmem:[%s3451_s1 + $0x88] sm:$0xff] (!%p152_p3)  ;;  %v2825_v34 = vpack.c.bf16 (!%p152_p3), %v1966_v15, %v1965_v14  ;;  %v2827_v35 = vpack.c.bf16 (!%p152_p3), %v1984_v17, %v1983_v16 }
   0xc   : > { %v2843_v42 = vpack.c.bf16 (!%p152_p3), %v2004_v19, %v2003_v18 }
   0xe   : > { %s3459_s12 = smov (!%p179_p4, %s2690_s12), 1  ;;  %2650 = vmatpush3.bf16.msra.mxu1 %v2579_v6  ;;  %2582 = vmatpush3.bf16.msra.mxu0 %v2579_v6 }
   0xf   : > { %s2651_s5 = smul.u32 240, %s3459_s12  ;;  %2584 = vmatprep.subr.bf16.mxu1 %v2583_v12  ;;  %2592 = vmatprep.subr.bf16.mxu0 %v2591_v13  ;;  %s2106_s23 = sshll.u32 %s3459_s12, 6 }
  0x10   : > { %s3423_s28 = scalar_lea.vmem %s3453_s3, %s2106_s23 }
  0x11   : > { %s2783_s22 = scalar_lea.vmem %s3450_s0, %s2651_s5 }
  0x12   : > { %v2795_v20 = vld [vmem:[%s2783_s22 + $0x60] sm:$0xff]  ;;  %v2798_v21 = vld [vmem:[%s2783_s22 + $0x68] sm:$0xff]  ;;  %v2810_v27 = vld [vmem:[%s2783_s22 + $0x70] sm:$0x3] }
  0x13   : > { %v2801_v22 = vld [vmem:[%s2783_s22] sm:$0xff]  ;;  %v276_v23 = vrot.slane %v2795_v20, 1  ;;  %v277_v24 = vrot.slane %v2798_v21, 1  ;;  %v2806_v25 = vld [vmem:[%s2783_s22 + $0x8] sm:$0xff]  ;;  %v279_v30 = vrot.slane %v2810_v27, 1  ;;  %v2820_v32 = vld [vmem:[%s2783_s22 + $0x78] sm:$0xff] }
  0x14   : > { %v256_v26 = vrot.slane %v2801_v22, 1  ;;  %v257_v29 = vrot.slane %v2806_v25, 1  ;;  %v2817_v31 = vld [vmem:[%s2783_s22 + $0x10] sm:$0x3]  ;;  %v2823_v33 = vld [vmem:[%s2783_s22 + $0x80] sm:$0xff]  ;;  %v281_v38 = vrot.slane %v2820_v32, 1 }
  0x15   : > { %v2830_v36 = vsel %vm255_vm0, %v276_v23, %v277_v24  ;;  %v259_v37 = vrot.slane %v2817_v31, 1  ;;  %v2835_v39 = vld [vmem:[%s2783_s22 + $0x18] sm:$0xff]  ;;  %v2838_v40 = vld [vmem:[%s2783_s22 + $0x20] sm:$0xff]  ;;  %v2841_v41 = vld [vmem:[%s2783_s22 + $0x90] sm:$0xff]  ;;  %v2849_v44 = vsel %vm255_vm0, %v277_v24, %v279_v30  ;;  %v282_v45 = vrot.slane %v2823_v33, 1 }
  0x16   : > { %2307 = vmatprep.mubr.msk.f32.mxu1 %vm301_vm1, %v2830_v36  ;;  %v258_v43 = vsel %vm255_vm0, %v256_v26, %v257_v29  ;;  %v261_v46 = vrot.slane %v2835_v39, 1  ;;  %v2854_v47 = vld [vmem:[%s2783_s22 + $0x88] sm:$0x3]  ;;  %v262_v50 = vrot.slane %v2838_v40, 1  ;;  %v2867_v53 = vld [vmem:[%s2783_s22 + $0x98] sm:$0xff]  ;;  %v2870_v54 = vld [vmem:[%s2783_s22 + $0x30] sm:$0xff] }
  0x17   : > { %v2857_v48 = vld [vmem:[%s2783_s22 + $0x28] sm:$0x3]  ;;  %2295 = vmatprep.mubr.msk.f32.mxu0 %vm301_vm1, %v258_v43  ;;  %2308 = vmatmul.mubr.msk.f32.vlgmr.msra.gmra.mrb[0].mxu1 %vm301_vm1, %v2849_v44  ;;  %v260_v49 = vsel %vm255_vm0, %v257_v29, %v259_v37  ;;  %v284_v51 = vrot.slane %v2854_v47, 1  ;;  %v2873_v55 = vld [vmem:[%s2783_s22 + $0x38] sm:$0xff]  ;;  %v2877_v56 = vsel %vm255_vm0, %v281_v38, %v282_v45  ;;  %v286_v57 = vrot.slane %v2841_v41, 1  ;;  %v2904_v3 = vld [vmem:[%s2783_s22 + $0xb0] sm:$0xff] }
  0x18   : > { %v264_v52 = vrot.slane %v2857_v48, 1  ;;  %2586 = vmatpush3.bf16.msra.mxu1 %v2583_v12  ;;  %2296 = vmatmul.mubr.msk.f32.vlgmr.msra.gmra.mrb[0].mxu0 %vm301_vm1, %v260_v49  ;;  %v287_v58 = vrot.slane %v2867_v53, 1  ;;  %v266_v59 = vrot.slane %v2870_v54, 1  ;;  %v2883_v60 = vld [vmem:[%s2783_s22 + $0xa0] sm:$0x3]  ;;  %v2886_v61 = vld [vmem:[%s2783_s22 + $0xa8] sm:$0xff]  ;;  %v2891_v62 = vsel %vm255_vm0, %v261_v46, %v262_v50 }
  0x19   : > { %2594 = vmatpush3.bf16.msra.mxu0 %v2591_v13  ;;  %2310 = vmatprep.mubr.msk.f32.mxu1 %vm301_vm1, %v2877_v56  ;;  %v2894_v63 = vsel %vm255_vm0, %v282_v45, %v284_v51  ;;  %v267_v1 = vrot.slane %v2873_v55, 1  ;;  %v2901_v2 = vld [vmem:[%s2783_s22 + $0x40] sm:$0x3]  ;;  %v2907_v4 = vld [vmem:[%s2783_s22 + $0x48] sm:$0xff]  ;;  %v289_v6 = vrot.slane %v2883_v60, 1  ;;  %v291_v8 = vrot.slane %v2886_v61, 1 }
  0x1a   : > { %v2897_v0 = vsel %vm255_vm0, %v262_v50, %v264_v52  ;;  %2298 = vmatprep.mubr.msk.f32.mxu0 %vm301_vm1, %v2891_v62  ;;  %v2912_v5 = vsel %vm255_vm0, %v286_v57, %v287_v58  ;;  %2588 = vmatprep.subr.bf16.mxu1 %v2812_v28  ;;  %v269_v7 = vrot.slane %v2901_v2, 1  ;;  %v2919_v9 = vld [vmem:[%s2783_s22 + $0x50] sm:$0xff]  ;;  %v2922_v10 = vld [vmem:[%s2783_s22 + $0xb8] sm:$0x3]  ;;  %v292_v12 = vrot.slane %v2904_v3, 1  ;;  %v3002_v52 = vld [vmem:[%s2783_s22 + $0xc0] sm:$0xff] }
  0x1b   : > { %2311 = vmatmul.mubr.msk.f32.gmra.mrb[2].mxu1 %vm301_vm1, %v2894_v63  ;;  %v2927_v11 = vsel %vm255_vm0, %v266_v59, %v267_v1  ;;  %2596 = vmatprep.subr.bf16.mxu0 %v2825_v34  ;;  %v271_v13 = vrot.slane %v2907_v4, 1  ;;  %v272_v14 = vrot.slane %v2919_v9, 1  ;;  %v2934_v15 = vld [vmem:[%s2783_s22 + $0x58] sm:$0x3]  ;;  %v2941_v16 = vsel %vm255_vm0, %v287_v58, %v289_v6  ;;  %v2005_v49 = vld [vmem:[%s3451_s1 + $0x90] sm:$0xff] }
  0x1c   : > { %2299 = vmatmul.mubr.msk.f32.gmra.mrb[2].mxu0 %vm301_vm1, %v2897_v0  ;;  %2313 = vmatprep.mubr.msk.f32.mxu1 %vm301_vm1, %v2912_v5  ;;  %v294_v17 = vrot.slane %v2922_v10, 1  ;;  %v2948_v18 = vsel %vm255_vm0, %v267_v1, %v269_v7  ;;  %v2951_v19 = vsel %vm255_vm0, %v291_v8, %v292_v12  ;;  %v274_v23 = vrot.slane %v2934_v15, 1  ;;  %v1986_v45 = vld [vmem:[%s3451_s1 + $0x78] sm:$0xff]  ;;  %v223_v59 = vld [vmem:[%s2783_s22 + $0xd0] sm:$0x3]  ;;  %v2023_v8 = vld [vmem:[%s3451_s1 + $0xa0] sm:$0xff] }
  0x1d   : > { %2301 = vmatprep.mubr.msk.f32.mxu0 %vm301_vm1, %v2927_v11  ;;  %2590 = vmatpush3.bf16.msra.mxu1 %v2812_v28  ;;  %v2956_v24 = vsel %vm255_vm0, %v271_v13, %v272_v14  ;;  %v641_v26 = vrot.slane %v2801_v22, 2  ;;  %v642_v29 = vrot.slane %v2806_v25, 2  ;;  %v644_v30 = vrot.slane %v2817_v31, 2  ;;  %v1985_v31 = vld [vmem:[%s3451_s1 + $0x70] sm:$0xff]  ;;  %v2006_v50 = vld [vmem:[%s3451_s1 + $0x98] sm:$0xff] }
  0x1e   : > { %2598 = vmatpush3.bf16.msra.mxu0 %v2825_v34  ;;  %2600 = vmatprep.subr.bf16.mxu1 %v2827_v35  ;;  %v2969_v28 = vsel %vm255_vm0, %v292_v12, %v294_v17  ;;  %v2975_v34 = vsel %vm255_vm0, %v272_v14, %v274_v23  ;;  %v646_v38 = vrot.slane %v2835_v39, 2  ;;  %v647_v43 = vrot.slane %v2838_v40, 2  ;;  %v2024_v12 = vld [vmem:[%s3451_s1 + $0xa8] sm:$0xff]  ;;  %v2043_v14 = vld [vmem:[%s3451_s1 + $0xc0] sm:$0xff] }
  0x1f   : > { %2314 = vmatmul.mubr.msk.f32.gmra.mrb[4].mxu1 %vm301_vm1, %v2941_v16  ;;  %2608 = vmatprep.subr.bf16.mxu0 %v2843_v42  ;;  %v643_v37 = vsel %vm640_vm2, %v641_v26, %v642_v29  ;;  %v649_v46 = vrot.slane %v2857_v48, 2  ;;  %v645_v51 = vsel %vm640_vm2, %v642_v29, %v644_v30  ;;  %v651_v57 = vrot.slane %v2870_v54, 2  ;;  %v3007_v48 = vld [vmem:[%s2783_s22 + $0xc8] sm:$0xff] }
  0x20   : > { %2302 = vmatmul.mubr.msk.f32.gmra.mrb[4].mxu0 %vm301_vm1, %v2948_v18  ;;  %2316 = vmatprep.mubr.msk.f32.mxu1 %vm301_vm1, %v2951_v19  ;;  %v2603_v58 = vpack.c.bf16 %v1986_v45, %v1985_v31  ;;  %v3013_v1 = vsel %vm640_vm2, %v646_v38, %v647_v43  ;;  %v654_v6 = vrot.slane %v2901_v2, 2  ;;  %v2611_v7 = vpack.c.bf16 %v2006_v50, %v2005_v49  ;;  %v2044_v17 = vld [vmem:[%s3451_s1 + $0xc8] sm:$0xff]  ;;  %v3051_v31 = vld [vmem:[%s2783_s22 + $0xd8] sm:$0xff] }
  0x21   : > { %2304 = vmatprep.mubr.msk.f32.mxu0 %vm301_vm1, %v2956_v24  ;;  %v656_v13 = vrot.slane %v2907_v4, 2  ;;  %v657_v2 = vrot.slane %v2919_v9, 2  ;;  %v1179_v23 = vrot.slane %v3002_v52, 2  ;;  %v1021_v26 = vrot.slane %v3007_v48, 1  ;;  %v226_v45 = vld [vmem:[%s2783_s22 + $0xe8] sm:$0x3] }
  0x22   : > { %v1180_v29 = vrot.slane %v3007_v48, 2  ;;  %v1023_v30 = vrot.slane %v223_v59, 1  ;;  %v659_v38 = vrot.slane %v2934_v15, 2  ;;  %v1495_v15 = vrot.slane %v3051_v31, 1 }
  0x23   : > { %2317 = vmatmul.mubr.msk.f32.gmra.mrb[6].mxu1 %vm301_vm1, %v2969_v28 }
  0x24   : > { %2305 = vmatmul.mubr.msk.f32.gmra.mrb[6].mxu0 %vm301_vm1, %v2975_v34  ;;  %2327 = vmatprep.mubr.msk.f32.mxu1 %vm301_vm1, %v2801_v22  ;;  %v652_v22 = vrot.slane %v2873_v55, 2  ;;  %v3062_v50 = vsel %vm255_vm0, %v1021_v26, %v1023_v30  ;;  %v662_v30 = vrot.slane %v2798_v21, 2 }
  0x25   : > { %2359 = vmatprep.mubr.msk.f32.mxu0 %vm301_vm1, %v643_v37 }
  0x26   : > { %v3045_v37 = vsel %vm640_vm2, %v651_v57, %v652_v22  ;;  %v3073_v57 = vsel %vm640_vm2, %v1179_v23, %v1180_v29  ;;  %v3087_v23 = vsel %vm640_vm2, %v656_v13, %v657_v2  ;;  %v664_v13 = vrot.slane %v2810_v27, 2 }
  0x27   : > { %2328 = vmatmul.mubr.msk.f32.vlgmr.msra.gmra.mrb[8].mxu1 %vm301_vm1, %v2806_v25  ;;  %v3025_v25 = vsel %vm640_vm2, %v647_v43, %v649_v46  ;;  %v1182_v43 = vrot.slane %v223_v59, 2  ;;  %v3056_v46 = vpack.c.bf16 %v2044_v17, %v2043_v14  ;;  %v3083_v14 = vsel %vm640_vm2, %v652_v22, %v654_v6 }
  0x28   : > { %2602 = vmatpush3.bf16.msra.mxu1 %v2827_v35  ;;  %2360 = vmatmul.mubr.msk.f32.vlgmr.msra.gmra.mrb[8].mxu0 %vm301_vm1, %v645_v51  ;;  %v1020_v35 = vrot.slane %v3002_v52, 1  ;;  %v3066_v51 = vld [vmem:[%s2783_s22 + $0xe0] sm:$0xff]  ;;  %v3131_v27 = vsel %vm640_vm2, %v662_v30, %v664_v13  ;;  %v679_v13 = vrot.slane %v2922_v10, 2  ;;  %v2025_v10 = vld [vmem:[%s3451_s1 + $0xb0] sm:$0xff] }
  0x29   : > { %2610 = vmatpush3.bf16.msra.mxu0 %v2843_v42  ;;  %2330 = vmatprep.mubr.msk.f32.mxu1 %vm301_vm1, %v2835_v39  ;;  %v3048_v42 = vpack.c.bf16 %v2024_v12, %v2023_v8  ;;  %v3076_v59 = vsel %vm640_vm2, %v1180_v29, %v1182_v43  ;;  %v1654_v8 = vrot.slane %v3051_v31, 2  ;;  %v1496_v12 = vrot.slane %v3066_v51, 1 }
  0x2a   : > { %2362 = vmatprep.mubr.msk.f32.mxu0 %vm301_vm1, %v3013_v1  ;;  %2604 = vmatprep.subr.bf16.mxu1 %v2603_v58  ;;  %v3059_v49 = vsel %vm255_vm0, %v1020_v35, %v1021_v26  ;;  %v1655_v17 = vrot.slane %v3066_v51, 2  ;;  %v1498_v35 = vrot.slane %v226_v45, 1  ;;  %v1657_v26 = vrot.slane %v226_v45, 2 }
  0x2b   : > { %2331 = vmatmul.mubr.msk.f32.gmra.mrb[10].mxu1 %vm301_vm1, %v2838_v40  ;;  %2612 = vmatprep.subr.bf16.mxu0 %v2611_v7  ;;  %v661_v29 = vrot.slane %v2795_v20, 2  ;;  %v3093_v43 = vsel %vm255_vm0, %v1495_v15, %v1496_v12  ;;  %v666_v15 = vrot.slane %v2820_v32, 2 }
  0x2c   : > { %2363 = vmatmul.mubr.msk.f32.gmra.mrb[10].mxu0 %vm301_vm1, %v3025_v25  ;;  %2333 = vmatprep.mubr.msk.f32.mxu1 %vm301_vm1, %v2870_v54  ;;  %v3099_v22 = vsel %vm255_vm0, %v1496_v12, %v1498_v35  ;;  %v3105_v6 = vsel %vm640_vm2, %v1655_v17, %v1657_v26  ;;  %v671_v12 = vrot.slane %v2841_v41, 2  ;;  %v674_v35 = vrot.slane %v2883_v60, 2 }
  0x2d   : > { %2365 = vmatprep.mubr.msk.f32.mxu0 %vm301_vm1, %v3045_v37  ;;  %2606 = vmatpush3.bf16.msra.mxu1 %v2603_v58  ;;  %v3102_v58 = vsel %vm640_vm2, %v1654_v8, %v1655_v17  ;;  %v3118_v45 = vsel %vm640_vm2, %v661_v29, %v662_v30  ;;  %v667_v8 = vrot.slane %v2823_v33, 2  ;;  %v672_v17 = vrot.slane %v2867_v53, 2 }
  0x2e   : > { %2614 = vmatpush3.bf16.msra.mxu0 %v2611_v7  ;;  %2616 = vmatprep.subr.bf16.mxu1 %v3048_v42  ;;  %v3114_v7 = vsel %vm640_vm2, %v657_v2, %v659_v38  ;;  %v669_v2 = vrot.slane %v2854_v47, 2  ;;  %v676_v29 = vrot.slane %v2886_v61, 2  ;;  %v677_v30 = vrot.slane %v2904_v3, 2 }
  0x2f   : > { %2334 = vmatmul.mubr.msk.f32.gmra.mrb[12].mxu1 %vm301_vm1, %v2873_v55  ;;  %2624 = vmatprep.subr.bf16.mxu0 %v3056_v46  ;;  %v3135_v38 = vsel %vm640_vm2, %v666_v15, %v667_v8  ;;  %v3152_v26 = vsel %vm640_vm2, %v671_v12, %v672_v17  ;;  %v3165_v60 = vsel %vm640_vm2, %v672_v17, %v674_v35  ;;  %v2045_v12 = vld [vmem:[%s3451_s1 + $0xd0] sm:$0xff]  ;;  %v2046_v17 = vld [vmem:[%s3451_s1 + $0xd8] sm:$0xff] }
  0x30   : > { %2366 = vmatmul.mubr.msk.f32.gmra.mrb[12].mxu0 %vm301_vm1, %v3083_v14  ;;  %2336 = vmatprep.mubr.msk.f32.mxu1 %vm301_vm1, %v2907_v4  ;;  %v3148_v47 = vsel %vm640_vm2, %v667_v8, %v669_v2  ;;  %v3169_v15 = vsel %vm640_vm2, %v676_v29, %v677_v30  ;;  %v3180_v8 = vsel %vm640_vm2, %v677_v30, %v679_v13  ;;  %v2026_v2 = vld [vmem:[%s3451_s1 + $0xb8] sm:$0xff]  ;;  %v2064_v30 = vld [vmem:[%s3451_s1 + $0xe8] sm:$0xff] }
  0x31   : > { %2368 = vmatprep.mubr.msk.f32.mxu0 %vm301_vm1, %v3087_v23  ;;  %v2619_v35 = vpack.c.bf16 %v2026_v2, %v2025_v10  ;;  %v2627_v29 = vpack.c.bf16 %v2046_v17, %v2045_v12  ;;  %v2066_v13 = vld [vmem:[%s3451_s1 + $0xf8] sm:$0xff]  ;;  %v2085_v10 = vld [vmem:[%s3451_s1 + $0x110] sm:$0xff] }
  0x32   : > { %v2086_v2 = vld [vmem:[%s3451_s1 + $0x118] sm:$0xff] }
  0x33   : > { %2337 = vmatmul.mubr.msk.f32.gmra.mrb[14].mxu1 %vm301_vm1, %v2919_v9  ;;  %v2643_v17 = vpack.c.bf16 %v2086_v2, %v2085_v10 }
  0x34   : > { %2369 = vmatmul.mubr.msk.f32.gmra.mrb[14].mxu0 %vm301_vm1, %v3114_v7  ;;  %2339 = vmatprep.mubr.msk.f32.mxu1 %vm301_vm1, %v2795_v20 }
  0x35   : > { %2371 = vmatprep.mubr.msk.f32.mxu0 %vm301_vm1, %v3118_v45 }
  0x37   : > { %2340 = vmatmul.mubr.msk.f32.gmra.mrb[16].mxu1 %vm301_vm1, %v2798_v21 }
  0x38   : > { %2372 = vmatmul.mubr.msk.f32.gmra.mrb[16].mxu0 %vm301_vm1, %v3131_v27  ;;  %2342 = vmatprep.mubr.msk.f32.mxu1 %vm301_vm1, %v2820_v32 }
  0x39   : > { %2374 = vmatprep.mubr.msk.f32.mxu0 %vm301_vm1, %v3135_v38 }
  0x3b   : > { %2343 = vmatmul.mubr.msk.f32.gmra.mrb[18].mxu1 %vm301_vm1, %v2823_v33 }
  0x3c   : > { %2375 = vmatmul.mubr.msk.f32.gmra.mrb[18].mxu0 %vm301_vm1, %v3148_v47  ;;  %2345 = vmatprep.mubr.msk.f32.mxu1 %vm301_vm1, %v2841_v41 }
  0x3d   : > { %2377 = vmatprep.mubr.msk.f32.mxu0 %vm301_vm1, %v3152_v26 }
  0x3f   : > { %2346 = vmatmul.mubr.msk.f32.gmra.mrb[20].mxu1 %vm301_vm1, %v2867_v53 }
  0x40   : > { %2378 = vmatmul.mubr.msk.f32.gmra.mrb[20].mxu0 %vm301_vm1, %v3165_v60  ;;  %2348 = vmatprep.mubr.msk.f32.mxu1 %vm301_vm1, %v2886_v61 }
  0x41   : > { %2380 = vmatprep.mubr.msk.f32.mxu0 %vm301_vm1, %v3169_v15 }
  0x43   : > { %2349 = vmatmul.mubr.msk.f32.gmra.mrb[22].mxu1 %vm301_vm1, %v2904_v3 }
  0x44   : > { %2381 = vmatmul.mubr.msk.f32.gmra.mrb[22].mxu0 %vm301_vm1, %v3180_v8  ;;  %2391 = vmatprep.mubr.msk.f32.mxu1 %vm301_vm1, %v2835_v39  ;;  %v2063_v39 = vld [vmem:[%s3451_s1 + $0xe0] sm:$0xff] }
  0x45   : > { %2423 = vmatprep.mubr.msk.f32.mxu0 %vm301_vm1, %v2891_v62  ;;  %v2083_v62 = vld [vmem:[%s3451_s1 + $0x100] sm:$0xff] }
  0x47   : > { %2392 = vmatmul.mubr.msk.f32.vlgmr.msra.gmra.mrb[24].mxu1 %vm301_vm1, %v2838_v40  ;;  %v2084_v40 = vld [vmem:[%s3451_s1 + $0x108] sm:$0xff] }
  0x48   : > { %2618 = vmatpush3.bf16.msra.mxu1 %v3048_v42  ;;  %2424 = vmatmul.mubr.msk.f32.vlgmr.msra.gmra.mrb[24].mxu0 %vm301_vm1, %v2897_v0  ;;  %v2631_v42 = vpack.c.bf16 %v2064_v30, %v2063_v39  ;;  %v2639_v0 = vpack.c.bf16 %v2084_v40, %v2083_v62 }
  0x49   : > { %2626 = vmatpush3.bf16.msra.mxu0 %v3056_v46  ;;  %2394 = vmatprep.mubr.msk.f32.mxu1 %vm301_vm1, %v2870_v54  ;;  %v2065_v46 = vld [vmem:[%s3451_s1 + $0xf0] sm:$0xff] }
  0x4a   : > { %2426 = vmatprep.mubr.msk.f32.mxu0 %vm301_vm1, %v2927_v11  ;;  %2620 = vmatprep.subr.bf16.mxu1 %v2619_v35  ;;  %v2635_v12 = vpack.c.bf16 %v2066_v13, %v2065_v46 }
  0x4b   : > { %2395 = vmatmul.mubr.msk.f32.gmra.mrb[26].mxu1 %vm301_vm1, %v2873_v55  ;;  %2628 = vmatprep.subr.bf16.mxu0 %v2627_v29 }
  0x4c   : > { %2427 = vmatmul.mubr.msk.f32.gmra.mrb[26].mxu0 %vm301_vm1, %v2948_v18  ;;  %2397 = vmatprep.mubr.msk.f32.mxu1 %vm301_vm1, %v2907_v4 }
  0x4d   : > { %2429 = vmatprep.mubr.msk.f32.mxu0 %vm301_vm1, %v2956_v24  ;;  %2622 = vmatpush3.bf16.msra.mxu1 %v2619_v35 }
  0x4e   : > { %2630 = vmatpush3.bf16.msra.mxu0 %v2627_v29  ;;  %2632 = vmatprep.subr.bf16.mxu1 %v2631_v42 }
  0x4f   : > { %2398 = vmatmul.mubr.msk.f32.gmra.mrb[28].mxu1 %vm301_vm1, %v2919_v9  ;;  %2640 = vmatprep.subr.bf16.mxu0 %v2639_v0 }
  0x50   : > { %2430 = vmatmul.mubr.msk.f32.gmra.mrb[28].mxu0 %vm301_vm1, %v2975_v34  ;;  %2400 = vmatprep.mubr.msk.f32.mxu1 %vm301_vm1, %v2795_v20 }
  0x51   : > { %2432 = vmatprep.mubr.msk.f32.mxu0 %vm301_vm1, %v2830_v36 }
  0x53   : > { %2401 = vmatmul.mubr.msk.f32.gmra.mrb[30].mxu1 %vm301_vm1, %v2798_v21 }
  0x54   : > { %2433 = vmatmul.mubr.msk.f32.gmra.mrb[30].mxu0 %vm301_vm1, %v2849_v44  ;;  %2403 = vmatprep.mubr.msk.f32.mxu1 %vm301_vm1, %v2820_v32 }
  0x55   : > { %2435 = vmatprep.mubr.msk.f32.mxu0 %vm301_vm1, %v2877_v56 }
  0x57   : > { %2404 = vmatmul.mubr.msk.f32.gmra.mrb[32].mxu1 %vm301_vm1, %v2823_v33 }
  0x58   : > { %2436 = vmatmul.mubr.msk.f32.gmra.mrb[32].mxu0 %vm301_vm1, %v2894_v63  ;;  %2406 = vmatprep.mubr.msk.f32.mxu1 %vm301_vm1, %v2841_v41 }
  0x59   : > { %2438 = vmatprep.mubr.msk.f32.mxu0 %vm301_vm1, %v2912_v5 }
  0x5b   : > { %2407 = vmatmul.mubr.msk.f32.gmra.mrb[34].mxu1 %vm301_vm1, %v2867_v53 }
  0x5c   : > { %2439 = vmatmul.mubr.msk.f32.gmra.mrb[34].mxu0 %vm301_vm1, %v2941_v16  ;;  %2409 = vmatprep.mubr.msk.f32.mxu1 %vm301_vm1, %v2886_v61 }
  0x5d   : > { %2441 = vmatprep.mubr.msk.f32.mxu0 %vm301_vm1, %v2951_v19 }
  0x5f   : > { %2410 = vmatmul.mubr.msk.f32.gmra.mrb[36].mxu1 %vm301_vm1, %v2904_v3 }
  0x60   : > { %2442 = vmatmul.mubr.msk.f32.gmra.mrb[36].mxu0 %vm301_vm1, %v2969_v28  ;;  %2412 = vmatprep.mubr.msk.f32.mxu1 %vm301_vm1, %v3002_v52 }
  0x61   : > { %2444 = vmatprep.mubr.msk.f32.mxu0 %vm301_vm1, %v3059_v49 }
  0x63   : > { %2413 = vmatmul.mubr.msk.f32.gmra.mrb[38].mxu1 %vm301_vm1, %v3007_v48 }
  0x64   : > { %2445 = vmatmul.mubr.msk.f32.gmra.mrb[38].mxu0 %vm301_vm1, %v3062_v50  ;;  %2455 = vmatprep.mubr.msk.f32.mxu1 %vm301_vm1, %v3013_v1 }
  0x65   : > { %2487 = vmatprep.mubr.msk.f32.mxu0 %vm301_vm1, %v2870_v54 }
  0x67   : > { %2456 = vmatmul.mubr.msk.f32.vlgmr.msra.gmra.mrb[40].mxu1 %vm301_vm1, %v3025_v25 }
  0x68   : > { %2634 = vmatpush3.bf16.msra.mxu1 %v2631_v42  ;;  %2488 = vmatmul.mubr.msk.f32.vlgmr.msra.gmra.mrb[40].mxu0 %vm301_vm1, %v2873_v55 }
  0x69   : > { %2642 = vmatpush3.bf16.msra.mxu0 %v2639_v0  ;;  %2458 = vmatprep.mubr.msk.f32.mxu1 %vm301_vm1, %v3045_v37 }
  0x6a   : > { %2490 = vmatprep.mubr.msk.f32.mxu0 %vm301_vm1, %v2907_v4  ;;  %2636 = vmatprep.subr.bf16.mxu1 %v2635_v12 }
  0x6b   : > { %2459 = vmatmul.mubr.msk.f32.gmra.mrb[42].mxu1 %vm301_vm1, %v3083_v14  ;;  %2644 = vmatprep.subr.bf16.mxu0 %v2643_v17 }
  0x6c   : > { %2491 = vmatmul.mubr.msk.f32.gmra.mrb[42].mxu0 %vm301_vm1, %v2919_v9  ;;  %2461 = vmatprep.mubr.msk.f32.mxu1 %vm301_vm1, %v3087_v23 }
  0x6d   : > { %2493 = vmatprep.mubr.msk.f32.mxu0 %vm301_vm1, %v2795_v20  ;;  %2638 = vmatpush3.bf16.msra.mxu1 %v2635_v12 }
  0x6e   : > { %2646 = vmatpush3.bf16.msra.mxu0 %v2643_v17 }
  0x6f   : > { %2462 = vmatmul.mubr.msk.f32.gmra.mrb[44].mxu1 %vm301_vm1, %v3114_v7 }
  0x70   : > { %2494 = vmatmul.mubr.msk.f32.gmra.mrb[44].mxu0 %vm301_vm1, %v2798_v21  ;;  %2464 = vmatprep.mubr.msk.f32.mxu1 %vm301_vm1, %v3118_v45 }
  0x71   : > { %2496 = vmatprep.mubr.msk.f32.mxu0 %vm301_vm1, %v2820_v32 }
  0x73   : > { %2465 = vmatmul.mubr.msk.f32.gmra.mrb[46].mxu1 %vm301_vm1, %v3131_v27 }
  0x74   : > { %2497 = vmatmul.mubr.msk.f32.gmra.mrb[46].mxu0 %vm301_vm1, %v2823_v33  ;;  %2467 = vmatprep.mubr.msk.f32.mxu1 %vm301_vm1, %v3135_v38 }
  0x75   : > { %2499 = vmatprep.mubr.msk.f32.mxu0 %vm301_vm1, %v2841_v41 }
  0x77   : > { %2468 = vmatmul.mubr.msk.f32.gmra.mrb[48].mxu1 %vm301_vm1, %v3148_v47 }
  0x78   : > { %2500 = vmatmul.mubr.msk.f32.gmra.mrb[48].mxu0 %vm301_vm1, %v2867_v53  ;;  %2470 = vmatprep.mubr.msk.f32.mxu1 %vm301_vm1, %v3152_v26 }
  0x79   : > { %2502 = vmatprep.mubr.msk.f32.mxu0 %vm301_vm1, %v2886_v61 }
  0x7b   : > { %2471 = vmatmul.mubr.msk.f32.gmra.mrb[50].mxu1 %vm301_vm1, %v3165_v60 }
  0x7c   : > { %2503 = vmatmul.mubr.msk.f32.gmra.mrb[50].mxu0 %vm301_vm1, %v2904_v3  ;;  %2473 = vmatprep.mubr.msk.f32.mxu1 %vm301_vm1, %v3169_v15 }
  0x7d   : > { %2505 = vmatprep.mubr.msk.f32.mxu0 %vm301_vm1, %v3002_v52 }
  0x7f   : > { %2474 = vmatmul.mubr.msk.f32.gmra.mrb[52].mxu1 %vm301_vm1, %v3180_v8 }
  0x80   : > { %2506 = vmatmul.mubr.msk.f32.gmra.mrb[52].mxu0 %vm301_vm1, %v3007_v48  ;;  %2476 = vmatprep.mubr.msk.f32.mxu1 %vm301_vm1, %v3073_v57 }
  0x81   : > { %2508 = vmatprep.mubr.msk.f32.mxu0 %vm301_vm1, %v3051_v31 }
  0x83   : > { %2477 = vmatmul.mubr.msk.f32.gmra.mrb[54].mxu1 %vm301_vm1, %v3076_v59 }
  0x84   : > { %2509 = vmatmul.mubr.msk.f32.gmra.mrb[54].mxu0 %vm301_vm1, %v3066_v51  ;;  %2519 = vmatprep.mubr.msk.f32.mxu1 %vm301_vm1, %v2927_v11 }
  0x85   : > { %2551 = vmatprep.mubr.msk.f32.mxu0 %vm301_vm1, %v3045_v37 }
  0x87   : > { %2520 = vmatmul.mubr.msk.f32.vlgmr.msra.gmra.mrb[56].mxu1 %vm301_vm1, %v2948_v18 }
  0x88   : > { %2552 = vmatmul.mubr.msk.f32.vlgmr.msra.gmra.mrb[56].mxu0 %vm301_vm1, %v3083_v14  ;;  %2522 = vmatprep.mubr.msk.f32.mxu1 %vm301_vm1, %v2956_v24 }
  0x89   : > { %2554 = vmatprep.mubr.msk.f32.mxu0 %vm301_vm1, %v3087_v23 }
  0x8b   : > { %2523 = vmatmul.mubr.msk.f32.gmra.mrb[58].mxu1 %vm301_vm1, %v2975_v34 }
  0x8c   : > { %2555 = vmatmul.mubr.msk.f32.gmra.mrb[58].mxu0 %vm301_vm1, %v3114_v7  ;;  %2525 = vmatprep.mubr.msk.f32.mxu1 %vm301_vm1, %v2830_v36 }
  0x8d   : > { %2557 = vmatprep.mubr.msk.f32.mxu0 %vm301_vm1, %v3118_v45 }
  0x8f   : > { %2526 = vmatmul.mubr.msk.f32.gmra.mrb[60].mxu1 %vm301_vm1, %v2849_v44 }
  0x90   : > { %2558 = vmatmul.mubr.msk.f32.gmra.mrb[60].mxu0 %vm301_vm1, %v3131_v27  ;;  %2528 = vmatprep.mubr.msk.f32.mxu1 %vm301_vm1, %v2877_v56 }
  0x91   : > { %2560 = vmatprep.mubr.msk.f32.mxu0 %vm301_vm1, %v3135_v38 }
  0x93   : > { %2529 = vmatmul.mubr.msk.f32.gmra.mrb[62].mxu1 %vm301_vm1, %v2894_v63 }
  0x94   : > { %2561 = vmatmul.mubr.msk.f32.gmra.mrb[62].mxu0 %vm301_vm1, %v3148_v47  ;;  %2531 = vmatprep.mubr.msk.f32.mxu1 %vm301_vm1, %v2912_v5 }
  0x95   : > { %2563 = vmatprep.mubr.msk.f32.mxu0 %vm301_vm1, %v3152_v26 }
  0x97   : > { %2532 = vmatmul.mubr.msk.f32.gmra.mrb[64].mxu1 %vm301_vm1, %v2941_v16 }
  0x98   : > { %2564 = vmatmul.mubr.msk.f32.gmra.mrb[64].mxu0 %vm301_vm1, %v3165_v60  ;;  %2534 = vmatprep.mubr.msk.f32.mxu1 %vm301_vm1, %v2951_v19 }
  0x99   : > { %2566 = vmatprep.mubr.msk.f32.mxu0 %vm301_vm1, %v3169_v15 }
  0x9b   : > { %2535 = vmatmul.mubr.msk.f32.gmra.mrb[66].mxu1 %vm301_vm1, %v2969_v28 }
  0x9c   : > { %2567 = vmatmul.mubr.msk.f32.gmra.mrb[66].mxu0 %vm301_vm1, %v3180_v8  ;;  %2537 = vmatprep.mubr.msk.f32.mxu1 %vm301_vm1, %v3059_v49 }
  0x9d   : > { %2569 = vmatprep.mubr.msk.f32.mxu0 %vm301_vm1, %v3073_v57 }
  0x9f   : > { %2538 = vmatmul.mubr.msk.f32.gmra.mrb[68].mxu1 %vm301_vm1, %v3062_v50 }
  0xa0   : > { %2570 = vmatmul.mubr.msk.f32.gmra.mrb[68].mxu0 %vm301_vm1, %v3076_v59  ;;  %2540 = vmatprep.mubr.msk.f32.mxu1 %vm301_vm1, %v3093_v43 }
  0xa1   : > { %2572 = vmatprep.mubr.msk.f32.mxu0 %vm301_vm1, %v3102_v58 }
  0xa3   : > { %2541 = vmatmul.mubr.msk.f32.gmra.mrb[70].mxu1 %vm301_vm1, %v3099_v22 }
  0xa4   : > { %2573 = vmatmul.mubr.msk.f32.gmra.mrb[70].mxu0 %vm301_vm1, %v3105_v6 }
  0xea   : > { %v2309_v20 = vpop.f32.mrb[0].mxu1 }
  0xeb   : > { %v2297_v21 = vpop.f32.mrb[0].mxu0  ;;  %v436_v32 = vpop.f32.mrb[1].mxu1 }
  0xec   : > { %v400_v33 = vpop.f32.mrb[1].mxu0 }
  0xee   : > { %v2312_v36 = vpop.f32.mrb[2].mxu1 }
  0xef   : > { %v2300_v41 = vpop.f32.mrb[2].mxu0  ;;  %v445_v44 = vpop.f32.mrb[3].mxu1 }
  0xf0   : > { %v409_v53 = vpop.f32.mrb[3].mxu0 }
  0xf2   : > { %v2315_v54 = vpop.f32.mrb[4].mxu1 }
  0xf3   : > { %v2303_v55 = vpop.f32.mrb[4].mxu0  ;;  %v454_v56 = vpop.f32.mrb[5].mxu1 }
  0xf4   : > { %v418_v61 = vpop.f32.mrb[5].mxu0 }
  0xf6   : > { %v2318_v63 = vpop.f32.mrb[6].mxu1 }
  0xf7   : > { %v2306_v3 = vpop.f32.mrb[6].mxu0  ;;  %v463_v4 = vpop.f32.mrb[7].mxu1 }
  0xf8   : > { %v427_v5 = vpop.f32.mrb[7].mxu0 }
  0xfa   : > { %v2329_v9 = vpop.f32.mrb[8].mxu1 }
  0xfb   : > { %v569_v11 = vpop.f32.mrb[9].mxu1  ;;  %v2361_v16 = vpop.f32.mrb[8].mxu0 }
  0xfc   : > { %v570_v18 = vadd.f32 %v569_v11, %v400_v33  ;;  %v784_v19 = vpop.f32.mrb[9].mxu0 }
  0xfe   : > { %v855_v24 = vadd.f32 %v784_v19, %v570_v18  ;;  %v2332_v28 = vpop.f32.mrb[10].mxu1 }
  0xff   : > { %v578_v34 = vpop.f32.mrb[11].mxu1  ;;  %v2364_v52 = vpop.f32.mrb[10].mxu0 }
 0x100   : > { %v579_v48 = vadd.f32 %v578_v34, %v409_v53  ;;  %v793_v1 = vpop.f32.mrb[11].mxu0 }
 0x102   : > { %v856_v25 = vadd.f32 %v793_v1, %v579_v48  ;;  %v2335_v37 = vpop.f32.mrb[12].mxu1 }
 0x103   : > { %v587_v31 = vpop.f32.mrb[13].mxu1  ;;  %v2367_v49 = vpop.f32.mrb[12].mxu0 }
 0x104   : > { %v588_v50 = vadd.f32 %v587_v31, %v418_v61  ;;  %v802_v51 = vpop.f32.mrb[13].mxu0 }
 0x106   : > { %v857_v57 = vadd.f32 %v802_v51, %v588_v50  ;;  %v2338_v59 = vpop.f32.mrb[14].mxu1 }
 0x107   : > { %v596_v14 = vpop.f32.mrb[15].mxu1  ;;  %v2370_v23 = vpop.f32.mrb[14].mxu0 }
 0x108   : > { %v597_v43 = vadd.f32 %v596_v14, %v427_v5  ;;  %v811_v22 = vpop.f32.mrb[15].mxu0 }
 0x10a   : > { %v858_v58 = vadd.f32 %v811_v22, %v597_v43  ;;  %v2341_v6 = vpop.f32.mrb[16].mxu1 }
 0x10b   : > { %v605_v7 = vpop.f32.mrb[17].mxu1  ;;  %v2373_v45 = vpop.f32.mrb[16].mxu0 }
 0x10c   : > { %v606_v27 = vadd.f32 %v605_v7, %v436_v32  ;;  %v820_v38 = vpop.f32.mrb[17].mxu0 }
 0x10e   : > { %v859_v47 = vadd.f32 %v820_v38, %v606_v27  ;;  %v2344_v26 = vpop.f32.mrb[18].mxu1 }
 0x10f   : > { %v614_v60 = vpop.f32.mrb[19].mxu1  ;;  %v2376_v15 = vpop.f32.mrb[18].mxu0 }
 0x110   : > { %v615_v8 = vadd.f32 %v614_v60, %v445_v44  ;;  %v829_v35 = vpop.f32.mrb[19].mxu0 }
 0x112   : > { %v860_v29 = vadd.f32 %v829_v35, %v615_v8  ;;  %v2347_v39 = vpop.f32.mrb[20].mxu1 }
 0x113   : > { %v623_v30 = vpop.f32.mrb[21].mxu1  ;;  %v2379_v62 = vpop.f32.mrb[20].mxu0 }
 0x114   : > { %v624_v40 = vadd.f32 %v623_v30, %v454_v56  ;;  %v838_v42 = vpop.f32.mrb[21].mxu0 }
 0x116   : > { %v861_v0 = vadd.f32 %v838_v42, %v624_v40  ;;  %v2350_v46 = vpop.f32.mrb[22].mxu1 }
 0x117   : > { %v632_v13 = vpop.f32.mrb[23].mxu1  ;;  %v2382_v10 = vpop.f32.mrb[22].mxu0 }
 0x118   : > { %v633_v2 = vadd.f32 %v632_v13, %v463_v4  ;;  %v847_v12 = vpop.f32.mrb[23].mxu0 }
 0x11a   : > { %v862_v17 = vadd.f32 %v847_v12, %v633_v2  ;;  %v2393_v20 = vpop.f32.mrb[24].mxu1 }
 0x11b   : > { %v940_v21 = vpop.f32.mrb[25].mxu1  ;;  %v2425_v32 = vpop.f32.mrb[24].mxu0 }
 0x11c   : > { %v1011_v33 = vadd.f32 %v940_v21, %v855_v24  ;;  %v1100_v36 = vpop.f32.mrb[25].mxu0 }
 0x11e   : > { %v1171_v41 = vadd.f32 %v1100_v36, %v1011_v33  ;;  %v2396_v44 = vpop.f32.mrb[26].mxu1 }
 0x11f   : > { %v949_v53 = vpop.f32.mrb[27].mxu1  ;;  %v2428_v54 = vpop.f32.mrb[26].mxu0 }
 0x120   : > { %v1012_v55 = vadd.f32 %v949_v53, %v856_v25  ;;  %v1109_v61 = vpop.f32.mrb[27].mxu0 }
 0x122   : > { %v1172_v56 = vadd.f32 %v1109_v61, %v1012_v55  ;;  %v2399_v63 = vpop.f32.mrb[28].mxu1 }
 0x123   : > { %v958_v3 = vpop.f32.mrb[29].mxu1  ;;  %v2431_v5 = vpop.f32.mrb[28].mxu0 }
 0x124   : > { %v1013_v9 = vadd.f32 %v958_v3, %v857_v57  ;;  %v1118_v11 = vpop.f32.mrb[29].mxu0 }
 0x126   : > { %v1173_v4 = vadd.f32 %v1118_v11, %v1013_v9  ;;  %v2402_v16 = vpop.f32.mrb[30].mxu1 }
 0x127   : > { %v967_v18 = vpop.f32.mrb[31].mxu1  ;;  %v2434_v19 = vpop.f32.mrb[30].mxu0 }
 0x128   : > { %v1014_v28 = vadd.f32 %v967_v18, %v858_v58  ;;  %v1127_v34 = vpop.f32.mrb[31].mxu0 }
 0x12a   : > { %v1174_v24 = vadd.f32 %v1127_v34, %v1014_v28  ;;  %v2405_v52 = vpop.f32.mrb[32].mxu1 }
 0x12b   : > { %v976_v48 = vpop.f32.mrb[33].mxu1  ;;  %v2437_v1 = vpop.f32.mrb[32].mxu0 }
 0x12c   : > { %v1015_v37 = vadd.f32 %v976_v48, %v859_v47  ;;  %v1136_v31 = vpop.f32.mrb[33].mxu0 }
 0x12e   : > { %v1175_v25 = vadd.f32 %v1136_v31, %v1015_v37  ;;  %v2408_v49 = vpop.f32.mrb[34].mxu1 }
 0x12f   : > { %v985_v50 = vpop.f32.mrb[35].mxu1  ;;  %v2440_v51 = vpop.f32.mrb[34].mxu0 }
 0x130   : > { %v1016_v59 = vadd.f32 %v985_v50, %v860_v29  ;;  %v1145_v14 = vpop.f32.mrb[35].mxu0 }
 0x132   : > { %v1176_v57 = vadd.f32 %v1145_v14, %v1016_v59  ;;  %v2411_v23 = vpop.f32.mrb[36].mxu1 }
 0x133   : > { %v994_v43 = vpop.f32.mrb[37].mxu1  ;;  %v2443_v22 = vpop.f32.mrb[36].mxu0 }
 0x134   : > { %v1017_v6 = vadd.f32 %v994_v43, %v861_v0  ;;  %v1154_v7 = vpop.f32.mrb[37].mxu0  ;;  %v2103_v43 = vld [vmem:[%s3452_s2] ss:$0 sm:$0xff] }
 0x136   : > { %v1177_v58 = vadd.f32 %v1154_v7, %v1017_v6  ;;  %v2414_v45 = vpop.f32.mrb[38].mxu1 }
 0x137   : > { %v1003_v27 = vpop.f32.mrb[39].mxu1  ;;  %v2446_v38 = vpop.f32.mrb[38].mxu0 }
 0x138   : > { %v1018_v26 = vadd.f32 %v1003_v27, %v862_v17  ;;  %v1163_v60 = vpop.f32.mrb[39].mxu0 }
 0x13a   : > { %v1178_v47 = vadd.f32 %v1163_v60, %v1018_v26  ;;  %v2457_v15 = vpop.f32.mrb[40].mxu1 }
 0x13b   : > { %v1259_v8 = vpop.f32.mrb[41].mxu1  ;;  %v2489_v35 = vpop.f32.mrb[40].mxu0 }
 0x13c   : > { %v1330_v39 = vadd.f32 %v1259_v8, %v1171_v41  ;;  %v1415_v30 = vpop.f32.mrb[41].mxu0 }
 0x13e   : > { %v1486_v29 = vadd.f32 %v1415_v30, %v1330_v39  ;;  %v2460_v62 = vpop.f32.mrb[42].mxu1 }
 0x13f   : > { %v1268_v40 = vpop.f32.mrb[43].mxu1  ;;  %v2492_v42 = vpop.f32.mrb[42].mxu0 }
 0x140   : > { %v1331_v46 = vadd.f32 %v1268_v40, %v1172_v56  ;;  %v1424_v13 = vpop.f32.mrb[43].mxu0 }
 0x142   : > { %v1487_v0 = vadd.f32 %v1424_v13, %v1331_v46  ;;  %v2463_v10 = vpop.f32.mrb[44].mxu1 }
 0x143   : > { %v1277_v2 = vpop.f32.mrb[45].mxu1  ;;  %v2495_v12 = vpop.f32.mrb[44].mxu0 }
 0x144   : > { %v1332_v20 = vadd.f32 %v1277_v2, %v1173_v4  ;;  %v1433_v21 = vpop.f32.mrb[45].mxu0 }
 0x146   : > { %v1488_v17 = vadd.f32 %v1433_v21, %v1332_v20  ;;  %v2466_v32 = vpop.f32.mrb[46].mxu1 }
 0x147   : > { %v1286_v33 = vpop.f32.mrb[47].mxu1  ;;  %v2498_v36 = vpop.f32.mrb[46].mxu0 }
 0x148   : > { %v1333_v44 = vadd.f32 %v1286_v33, %v1174_v24  ;;  %v1442_v53 = vpop.f32.mrb[47].mxu0 }
 0x14a   : > { %v1489_v41 = vadd.f32 %v1442_v53, %v1333_v44  ;;  %v2469_v54 = vpop.f32.mrb[48].mxu1 }
 0x14b   : > { %v1295_v55 = vpop.f32.mrb[49].mxu1  ;;  %v2501_v61 = vpop.f32.mrb[48].mxu0 }
 0x14c   : > { %v1334_v63 = vadd.f32 %v1295_v55, %v1175_v25  ;;  %v1451_v3 = vpop.f32.mrb[49].mxu0 }
 0x14e   : > { %v1490_v56 = vadd.f32 %v1451_v3, %v1334_v63  ;;  %v2472_v5 = vpop.f32.mrb[50].mxu1 }
 0x14f   : > { %v1304_v9 = vpop.f32.mrb[51].mxu1  ;;  %v2504_v11 = vpop.f32.mrb[50].mxu0 }
 0x150   : > { %v1335_v16 = vadd.f32 %v1304_v9, %v1176_v57  ;;  %v1460_v18 = vpop.f32.mrb[51].mxu0 }
 0x152   : > { %v1491_v4 = vadd.f32 %v1460_v18, %v1335_v16  ;;  %v2475_v19 = vpop.f32.mrb[52].mxu1 }
 0x153   : > { %v1313_v28 = vpop.f32.mrb[53].mxu1  ;;  %v2507_v34 = vpop.f32.mrb[52].mxu0 }
 0x154   : > { %v1336_v52 = vadd.f32 %v1313_v28, %v1177_v58  ;;  %v1469_v24 = vpop.f32.mrb[53].mxu0 }
 0x156   : > { %v1492_v48 = vadd.f32 %v1469_v24, %v1336_v52  ;;  %v2478_v1 = vpop.f32.mrb[54].mxu1 }
 0x157   : > { %v1322_v37 = vpop.f32.mrb[55].mxu1  ;;  %v2510_v31 = vpop.f32.mrb[54].mxu0 }
 0x158   : > { %v1337_v49 = vadd.f32 %v1322_v37, %v1178_v47  ;;  %v1478_v25 = vpop.f32.mrb[55].mxu0 }
 0x15a   : > { %v1493_v50 = vadd.f32 %v1478_v25, %v1337_v49  ;;  %v2521_v51 = vpop.f32.mrb[56].mxu1 }
 0x15b   : > { %v1575_v59 = vpop.f32.mrb[57].mxu1  ;;  %v2553_v14 = vpop.f32.mrb[56].mxu0 }
 0x15c   : > { %v1646_v23 = vadd.f32 %v1575_v59, %v1486_v29  ;;  %v1734_v57 = vpop.f32.mrb[57].mxu0 }
 0x15e   : > { %v1805_v22 = vadd.f32 %v1734_v57, %v1646_v23  ;;  %v2524_v6 = vpop.f32.mrb[58].mxu1 }
 0x15f   : > { %v1584_v7 = vpop.f32.mrb[59].mxu1  ;;  %v2556_v58 = vpop.f32.mrb[58].mxu0 }
 0x160   : > { %v1820_v45 = vadd.f32 %v2103_v43, %v1805_v22  ;;  %v1647_v27 = vadd.f32 %v1584_v7, %v1487_v0  ;;  %v1743_v38 = vpop.f32.mrb[59].mxu0 }
 0x162   : > { %1828 = vst.msk [vmem:[%s3423_s28] sm:$0xff] %vm301_vm1, %v1820_v45  ;;  %v1806_v26 = vadd.f32 %v1743_v38, %v1647_v27  ;;  %v2527_v60 = vpop.f32.mrb[60].mxu1 }
 0x163   : > { %v1593_v47 = vpop.f32.mrb[61].mxu1  ;;  %v2559_v15 = vpop.f32.mrb[60].mxu0 }
 0x164   : > { %v1821_v8 = vadd.f32 %v2103_v43, %v1806_v26  ;;  %v1648_v35 = vadd.f32 %v1593_v47, %v1488_v17  ;;  %v1752_v39 = vpop.f32.mrb[61].mxu0 }
 0x166   : > { %1829 = vst.msk [vmem:[%s3423_s28 + $0x8] sm:$0xff] %vm301_vm1, %v1821_v8  ;;  %v1807_v30 = vadd.f32 %v1752_v39, %v1648_v35  ;;  %v2530_v29 = vpop.f32.mrb[62].mxu1 }
 0x167   : > { %v1602_v62 = vpop.f32.mrb[63].mxu1  ;;  %v2562_v40 = vpop.f32.mrb[62].mxu0 }
 0x168   : > { %v1822_v42 = vadd.f32 %v2103_v43, %v1807_v30  ;;  %v1649_v46 = vadd.f32 %v1602_v62, %v1489_v41  ;;  %v1761_v13 = vpop.f32.mrb[63].mxu0 }
 0x16a   : > { %1830 = vst.msk [vmem:[%s3423_s28 + $0x10] sm:$0xff] %vm301_vm1, %v1822_v42  ;;  %v1808_v0 = vadd.f32 %v1761_v13, %v1649_v46  ;;  %v2533_v10 = vpop.f32.mrb[64].mxu1 }
 0x16b   : > { %v1611_v2 = vpop.f32.mrb[65].mxu1  ;;  %v2565_v12 = vpop.f32.mrb[64].mxu0 }
 0x16c   : > { %v1823_v20 = vadd.f32 %v2103_v43, %v1808_v0  ;;  %v1650_v21 = vadd.f32 %v1611_v2, %v1490_v56  ;;  %v1770_v17 = vpop.f32.mrb[65].mxu0 }
 0x16e   : > { %1831 = vst.msk [vmem:[%s3423_s28 + $0x18] sm:$0xff] %vm301_vm1, %v1823_v20  ;;  %v1809_v32 = vadd.f32 %v1770_v17, %v1650_v21  ;;  %v2536_v33 = vpop.f32.mrb[66].mxu1 }
 0x16f   : > { %v1620_v36 = vpop.f32.mrb[67].mxu1  ;;  %v2568_v44 = vpop.f32.mrb[66].mxu0 }
 0x170   : > { %v1824_v53 = vadd.f32 %v2103_v43, %v1809_v32  ;;  %v1651_v41 = vadd.f32 %v1620_v36, %v1491_v4  ;;  %v1779_v54 = vpop.f32.mrb[67].mxu0 }
 0x172   : > { %1832 = vst.msk [vmem:[%s3423_s28 + $0x20] sm:$0xff] %vm301_vm1, %v1824_v53  ;;  %v1810_v55 = vadd.f32 %v1779_v54, %v1651_v41  ;;  %v2539_v61 = vpop.f32.mrb[68].mxu1 }
 0x173   : > { %v1629_v63 = vpop.f32.mrb[69].mxu1  ;;  %v2571_v3 = vpop.f32.mrb[68].mxu0 }
 0x174   : > { %v1825_v56 = vadd.f32 %v2103_v43, %v1810_v55  ;;  %v1652_v5 = vadd.f32 %v1629_v63, %v1492_v48  ;;  %v1788_v9 = vpop.f32.mrb[69].mxu0 }
 0x176   : > { %1833 = vst.msk [vmem:[%s3423_s28 + $0x28] sm:$0xff] %vm301_vm1, %v1825_v56  ;;  %v1811_v11 = vadd.f32 %v1788_v9, %v1652_v5  ;;  %v2542_v16 = vpop.f32.mrb[70].mxu1 }
 0x177   : > { %v1638_v18 = vpop.f32.mrb[71].mxu1  ;;  %v2574_v19 = vpop.f32.mrb[70].mxu0 }
 0x178   : > { %v1826_v28 = vadd.f32 %v2103_v43, %v1811_v11  ;;  %v1653_v4 = vadd.f32 %v1638_v18, %v1493_v50  ;;  %v1797_v34 = vpop.f32.mrb[71].mxu0 }
 0x17a   : > { %1834 = vst.msk [vmem:[%s3423_s28 + $0x30] sm:$0xff] %vm301_vm1, %v1826_v28  ;;  %v1812_v52 = vadd.f32 %v1797_v34, %v1653_v4 }
 0x17c   : > { %v1827_v24 = vadd.f32 %v2103_v43, %v1812_v52 }
 0x17e   : > { %1835 = vst.msk [vmem:[%s3423_s28 + $0x38] sm:$0xff] %vm301_vm1, %v1827_v24 }
 0x17f PF: > { %s13_s14 = sadd.s32 1, %s2698_s14   ;;  %s3454_s12 = smov %s2694_s13 }
 0x180   : > { %p10_p5 = scmp.ge.s32.totalorder %s13_s14, 4   ;;  %s3455_s13 = smov %s3457_s15 }
 0x182   :  { %12 = sbr.rel (!%p10_p5) target bundleno = 2 (0x2), region = 71 }

// kernel: lte_forward.13
= control target key start
LH: loop header
LB: loop body
LE: loop exit
PB: predicated region body
PF: predicated region fallthrough
CT: control target
= control target key end

     0   :  { %8 = vsyncpa [#allocation3], 0  ;;  %s2581_s0 = inlined_call_operand.vmem [shape: f32[2,6,18,32], index: 0, kind: input, shape index: {}]   ;;  %s2582_s1 = inlined_call_operand.vmem [shape: f32[9,32,32], index: 1, kind: input, shape index: {}]   ;;  %s2583_s2 = inlined_call_operand.vmem [shape: f32[1,32], index: 2, kind: input, shape index: {}]   ;;  %s2584_s3 = inlined_call_operand.hbm [shape: f32[2,4,4,32], index: 3, kind: output, shape index: {}]  }
   0x1   :  { %10 = vsyncpa [#allocation3 + $0x1], 0  ;;  %s2089_s12 = smov 0   ;;  %s2091_s13 = smov 0  }
   0x2   :  { %s2093_s14 = smov 0   ;;  %s2095_s15 = smov 0  }
   0x3   :  { %s2097_s16 = smov 0   ;;  %s2099_s17 = smov 0  }
   0x4 LB: > { %s1446_s18 = sadd.s32 4294967295, %s2064_s17   ;;  %s1447_s19 = sadd.s32 4294967294, %s2064_s17   ;;  %s2064_s17 = sphi %s2099_s17, %s16_s17   ;;  %s2060_s16 = sphi %s2097_s16, %s2591_s16   ;;  %s2056_s15 = sphi %s2095_s15, %s2590_s15   ;;  %s2052_s14 = sphi %s2093_s14, %s2589_s14   ;;  %s2048_s13 = sphi %s2091_s13, %s2588_s13   ;;  %s2044_s12 = sphi %s2089_s12, %s2587_s12  }
   0x5   : > { %s28_s20 = sadd.s32 1, %s2060_s16  ;;  %s105_s21 = sadd.s32 1, %s2052_s14 }
   0x6   : > { %p30_p0 = scmp.ge.s32.totalorder %s28_s20, 2  ;;  %p115_p1 = scmp.ne.s32.totalorder %s2052_s14, %s2048_s13 }
   0x7   : > { %p116_p2 = scmp.eq.s32.totalorder %s1446_s18, 1  ;;  %p121_p3 = scmp.ne.s32.totalorder %s2048_s13, %s2044_s12 }
   0x8   : > { %s2593_s20 = smov (%p30_p0, %s28_s20), 0  ;;  %p122_p5 = scmp.eq.s32.totalorder %s1447_s19, 1 }
   0x9   : > { %p2129_p4 = por %p116_p2, %p115_p1  ;;  %s100_s23 = ssub.s32 %s2060_s16, %s2593_s20 }
   0xa   : > { %p1450_p6 = scmp.ge.s32.totalorder %s2064_s17, 1  ;;  %p103_p7 = scmp.eq.s32.totalorder %s100_s23, 0 }
   0xb   : > { %p2136_p8 = por %p122_p5, %p121_p3  ;;  %p154_p9 = scmp.lt.s32.totalorder %s2064_s17, 3 }
   0xc   : > { %s2142_s25 = scalar_select %p103_p7, %s2052_s14, %s105_s21  }
   0xd   : > { %p155_p10 = pnand %p1450_p6, %p154_p9 }
   0xe   : > { %v1453_v0 = vld [vmem:[%s2582_s1 + $0x20] sm:$0xff] (!%p155_p10)  ;;  %v1454_v1 = vld [vmem:[%s2582_s1 + $0x28] sm:$0xff] (!%p155_p10)  ;;  %v1455_v2 = vld [vmem:[%s2582_s1 + $0x30] sm:$0xff] (!%p155_p10)  ;;  %p178_p11 = scmp.lt.s32.totalorder (!%p155_p10), %s2056_s15, 1  ;;  %vm221_vm0 = vcmask (!%p155_p10), 1046528   ;;  %vm247_vm1 = vcmask (!%p155_p10), 261120  }
   0xf   : > { %158 = sbr.rel (%p155_p10) target bundleno = 334 (0x14e), region = 32  ;;  %v1852_v3 = vpack.c.bf16 (!%p155_p10), %v1454_v1, %v1453_v0  ;;  %v1456_v4 = vld [vmem:[%s2582_s1 + $0x38] sm:$0xff] (!%p155_p10)  ;;  %v205_v5 = vld [vmem:[%s2582_s1] sm:$0xff] (!%p155_p10)  ;;  %v206_v7 = vld [vmem:[%s2582_s1 + $0x8] sm:$0xff] (!%p155_p10)  ;;  %vm482_vm2 = vcmask (!%p155_p10), 1045504   ;;  %vm1350_vm3 = vcmask (!%p155_p10), 257024  }
  0x10   : > { %v1856_v6 = vpack.c.bf16 (!%p155_p10), %v1456_v4, %v1455_v2  ;;  %v1473_v8 = vld [vmem:[%s2582_s1 + $0x40] sm:$0xff] (!%p155_p10)  ;;  %v1474_v9 = vld [vmem:[%s2582_s1 + $0x48] sm:$0xff] (!%p155_p10)  ;;  %v1860_v10 = vpack.c.bf16 (!%p155_p10), %v206_v7, %v205_v5  ;;  %v207_v12 = vld [vmem:[%s2582_s1 + $0x10] sm:$0xff] (!%p155_p10)  ;;  %s2066_s5 = smov (!%p155_p10), [#allocation2]  }
  0x11   : > { %1924 = vmatprep.subr.bf16.mxu1 (!%p155_p10), %v1852_v3  ;;  %1853 = vmatprep.subr.bf16.mxu0 (!%p155_p10), %v1852_v3  ;;  %v1868_v11 = vpack.c.bf16 (!%p155_p10), %v1474_v9, %v1473_v8  ;;  %v208_v13 = vld [vmem:[%s2582_s1 + $0x18] sm:$0xff] (!%p155_p10)  ;;  %v1475_v14 = vld [vmem:[%s2582_s1 + $0x50] sm:$0xff] (!%p155_p10)  ;;  %v1485_v46 = vld [vmem:[%s2582_s1 + $0x60] sm:$0xff] (!%p155_p10)  ;;  %s1990_s6 = sshll.u32 (!%p155_p10), %s2066_s5, 4  ;;  %s1991_s6 = int_to_ptr.vmem [resolvable:$false] %s1990_s6 }
  0x12   : > { %1926 = vmatpush3.bf16.msra.mxu1 (!%p155_p10), %v1852_v3  ;;  %1855 = vmatpush3.bf16.msra.mxu0 (!%p155_p10), %v1852_v3  ;;  %v1476_v15 = vld [vmem:[%s2582_s1 + $0x58] sm:$0xff] (!%p155_p10)  ;;  %v1864_v29 = vpack.c.bf16 (!%p155_p10), %v208_v13, %v207_v12  ;;  %v1486_v47 = vld [vmem:[%s2582_s1 + $0x68] sm:$0xff] (!%p155_p10)  ;;  %v1497_v51 = vld [vmem:[%s2582_s1 + $0x80] sm:$0xff] (!%p155_p10)  ;;  %s1992_s7 = scalar_lea.vmem (!%p155_p10), %s1991_s6, 512 }
  0x13   : > { %1925 = vmatprep.subr.bf16.mxu1 (!%p155_p10), %v1856_v6  ;;  %1857 = vmatprep.subr.bf16.mxu0 (!%p155_p10), %v1856_v6  ;;  %v1872_v35 = vpack.c.bf16 (!%p155_p10), %v1476_v15, %v1475_v14  ;;  %v1498_v52 = vld [vmem:[%s2582_s1 + $0x88] sm:$0xff] (!%p155_p10)  ;;  %v1876_v57 = vpack.c.bf16 (!%p155_p10), %v1486_v47, %v1485_v46  ;;  %v1487_v62 = vld [vmem:[%s2582_s1 + $0x70] sm:$0xff] (!%p155_p10)  ;;  %v1488_v63 = vld [vmem:[%s2582_s1 + $0x78] sm:$0xff] (!%p155_p10) }
  0x14   : > { %v1884_v59 = vpack.c.bf16 (!%p155_p10), %v1498_v52, %v1497_v51  ;;  %v1499_v0 = vld [vmem:[%s2582_s1 + $0x90] sm:$0xff] (!%p155_p10)  ;;  %v1500_v1 = vld [vmem:[%s2582_s1 + $0x98] sm:$0xff] (!%p155_p10)  ;;  %v1880_v4 = vpack.c.bf16 (!%p155_p10), %v1488_v63, %v1487_v62  ;;  %v1509_v9 = vld [vmem:[%s2582_s1 + $0xa0] sm:$0xff] (!%p155_p10) }
  0x15   : > { %v1888_v8 = vpack.c.bf16 (!%p155_p10), %v1500_v1, %v1499_v0  ;;  %v1522_v12 = vld [vmem:[%s2582_s1 + $0xc8] sm:$0xff] (!%p155_p10)  ;;  %v1545_v46 = vld [vmem:[%s2582_s1 + $0x100] sm:$0xff] (!%p155_p10) }
  0x16   : > { %s179_s9 = scalar_select %p178_p11, %s2056_s15, 1  ;;  %1927 = vmatpush3.bf16.msra.mxu1 %v1856_v6  ;;  %1859 = vmatpush3.bf16.msra.mxu0 %v1856_v6 }
  0x17   : > { %1861 = vmatprep.subr.bf16.mxu1 %v1860_v10  ;;  %1869 = vmatprep.subr.bf16.mxu0 %v1868_v11 }
  0x18   : > { %s1928_s26 = smul.u32 144, %s179_s9 }
  0x1a   : > { %s2176_s4 = scalar_lea.vmem %s2581_s0, %s1928_s26  ;;  %s1563_s26 = sshll.u32 %s2056_s15, 8 }
  0x1b   : > { %v2188_v16 = vld [vmem:[%s2176_s4 + $0x30] sm:$0xff]  ;;  %v2191_v17 = vld [vmem:[%s2176_s4 + $0x38] sm:$0xff]  ;;  %v2194_v18 = vld [vmem:[%s2176_s4] sm:$0xff]  ;;  %s2528_s29 = scalar_lea.hbm %s2584_s3, %s1563_s26 }
  0x1c   : > { %v232_v19 = vrot.slane %v2188_v16, 1  ;;  %v233_v20 = vrot.slane %v2191_v17, 1  ;;  %v2199_v21 = vld [vmem:[%s2176_s4 + $0x8] sm:$0xff]  ;;  %v222_v22 = vrot.slane %v2194_v18, 1  ;;  %v2203_v23 = vld [vmem:[%s2176_s4 + $0x40] sm:$0x3] }
  0x1d   : > { %v223_v24 = vrot.slane %v2199_v21, 1  ;;  %v235_v25 = vrot.slane %v2203_v23, 1  ;;  %v189_v26 = vld [vmem:[%s2176_s4 + $0x10] sm:$0x3]  ;;  %v2209_v27 = vld [vmem:[%s2176_s4 + $0x48] sm:$0xff]  ;;  %v2219_v33 = vld [vmem:[%s2176_s4 + $0x18] sm:$0xff] }
  0x1e   : > { %v2212_v28 = vld [vmem:[%s2176_s4 + $0x50] sm:$0xff]  ;;  %v2215_v30 = vsel %vm221_vm0, %v232_v19, %v233_v20  ;;  %v225_v31 = vrot.slane %v189_v26, 1  ;;  %v237_v32 = vrot.slane %v2209_v27, 1  ;;  %v2222_v34 = vld [vmem:[%s2176_s4 + $0x20] sm:$0xff]  ;;  %v227_v39 = vrot.slane %v2219_v33, 1 }
  0x1f   : > { %1686 = vmatprep.mubr.msk.f32.mxu1 %vm247_vm1, %v2215_v30  ;;  %v224_v36 = vsel %vm221_vm0, %v222_v22, %v223_v24  ;;  %v2228_v37 = vsel %vm221_vm0, %v233_v20, %v235_v25  ;;  %v238_v38 = vrot.slane %v2212_v28, 1  ;;  %v2233_v40 = vld [vmem:[%s2176_s4 + $0x58] sm:$0x3]  ;;  %v192_v41 = vld [vmem:[%s2176_s4 + $0x28] sm:$0x3]  ;;  %v228_v43 = vrot.slane %v2222_v34, 1 }
  0x20   : > { %1680 = vmatprep.mubr.msk.f32.mxu0 %vm247_vm1, %v224_v36  ;;  %1687 = vmatmul.mubr.msk.f32.vlgmr.msra.gmra.mrb[0].mxu1 %vm247_vm1, %v2228_v37  ;;  %v226_v42 = vsel %vm221_vm0, %v223_v24, %v225_v31  ;;  %v240_v44 = vrot.slane %v2233_v40, 1  ;;  %v230_v45 = vrot.slane %v192_v41, 1  ;;  %v483_v49 = vrot.slane %v2194_v18, 2  ;;  %v2317_v13 = vld [vmem:[%s2176_s4 + $0x88] sm:$0x3]  ;;  %v2327_v19 = vld [vmem:[%s2176_s4 + $0x80] sm:$0xff] }
  0x21   : > { %1863 = vmatpush3.bf16.msra.mxu1 %v1860_v10  ;;  %1681 = vmatmul.mubr.msk.f32.vlgmr.msra.gmra.mrb[0].mxu0 %vm247_vm1, %v226_v42  ;;  %v2250_v48 = vsel %vm221_vm0, %v237_v32, %v238_v38  ;;  %v484_v50 = vrot.slane %v2199_v21, 2  ;;  %v486_v53 = vrot.slane %v189_v26, 2  ;;  %v2263_v54 = vsel %vm221_vm0, %v227_v39, %v228_v43  ;;  %v1510_v10 = vld [vmem:[%s2582_s1 + $0xa8] sm:$0xff]  ;;  %v1511_v36 = vld [vmem:[%s2582_s1 + $0xb0] sm:$0xff]  ;;  %v2389_v42 = vld [vmem:[%s2176_s4 + $0x60] sm:$0xff] }
  0x22   : > { %1871 = vmatpush3.bf16.msra.mxu0 %v1868_v11  ;;  %1689 = vmatprep.mubr.msk.f32.mxu1 %vm247_vm1, %v2250_v48  ;;  %v2266_v55 = vsel %vm221_vm0, %v238_v38, %v240_v44  ;;  %v2269_v56 = vsel %vm221_vm0, %v228_v43, %v230_v45  ;;  %v488_v60 = vrot.slane %v2219_v33, 2  ;;  %v489_v61 = vrot.slane %v2222_v34, 2  ;;  %v1521_v11 = vld [vmem:[%s2582_s1 + $0xc0] sm:$0xff]  ;;  %v1512_v38 = vld [vmem:[%s2582_s1 + $0xb8] sm:$0xff]  ;;  %v1523_v39 = vld [vmem:[%s2582_s1 + $0xd0] sm:$0xff] }
  0x23   : > { %1865 = vmatprep.subr.bf16.mxu1 %v1864_v29  ;;  %1683 = vmatprep.mubr.msk.f32.mxu0 %vm247_vm1, %v2263_v54  ;;  %v485_v58 = vsel %vm482_vm2, %v483_v49, %v484_v50  ;;  %v487_v2 = vsel %vm482_vm2, %v484_v50, %v486_v53  ;;  %v491_v3 = vrot.slane %v192_v41, 2  ;;  %v493_v5 = vrot.slane %v2188_v16, 2  ;;  %v1533_v44 = vld [vmem:[%s2582_s1 + $0xe0] sm:$0xff]  ;;  %v1534_v45 = vld [vmem:[%s2582_s1 + $0xe8] sm:$0xff]  ;;  %v201_v50 = vld [vmem:[%s2176_s4 + $0x70] sm:$0x3] }
  0x24   : > { %1690 = vmatmul.mubr.msk.f32.gmra.mrb[2].mxu1 %vm247_vm1, %v2266_v55  ;;  %1873 = vmatprep.subr.bf16.mxu0 %v1872_v35  ;;  %v494_v6 = vrot.slane %v2191_v17, 2  ;;  %v2301_v7 = vsel %vm482_vm2, %v488_v60, %v489_v61  ;;  %v496_v15 = vrot.slane %v2203_v23, 2  ;;  %v1892_v22 = vpack.c.bf16 %v1510_v10, %v1509_v9  ;;  %v1548_v60 = vld [vmem:[%s2582_s1 + $0x118] sm:$0xff] }
  0x25   : > { %1867 = vmatpush3.bf16.msra.mxu1 %v1864_v29  ;;  %1684 = vmatmul.mubr.msk.f32.gmra.mrb[2].mxu0 %vm247_vm1, %v2269_v56  ;;  %v2322_v14 = vsel %vm482_vm2, %v489_v61, %v491_v3  ;;  %v1102_v24 = vrot.slane %v2327_v19, 1  ;;  %v1900_v23 = vpack.c.bf16 %v1522_v12, %v1521_v11  ;;  %v1104_v25 = vrot.slane %v2317_v13, 1 }
  0x26   : > { %1875 = vmatpush3.bf16.msra.mxu0 %v1872_v35  ;;  %1700 = vmatprep.mubr.msk.f32.mxu1 %vm247_vm1, %v2194_v18  ;;  %v498_v18 = vrot.slane %v2209_v27, 2  ;;  %v2332_v20 = vsel %vm482_vm2, %v493_v5, %v494_v6  ;;  %v2346_v26 = vsel %vm482_vm2, %v494_v6, %v496_v15  ;;  %v501_v29 = vrot.slane %v2233_v40, 2  ;;  %v1524_v40 = vld [vmem:[%s2582_s1 + $0xd8] sm:$0xff] }
  0x27   : > { %1877 = vmatprep.subr.bf16.mxu1 %v1876_v57  ;;  %1720 = vmatprep.mubr.msk.f32.mxu0 %vm247_vm1, %v485_v58  ;;  %v2352_v31 = vsel %vm221_vm0, %v1102_v24, %v1104_v25  ;;  %v1896_v41 = vpack.c.bf16 %v1512_v38, %v1511_v36  ;;  %v1904_v43 = vpack.c.bf16 %v1524_v40, %v1523_v39  ;;  %v746_v47 = vrot.slane %v2389_v42, 1  ;;  %v1536_v58 = vld [vmem:[%s2582_s1 + $0xf8] sm:$0xff] }
  0x28   : > { %1701 = vmatmul.mubr.msk.f32.vlgmr.msra.gmra.mrb[4].mxu1 %vm247_vm1, %v2199_v21  ;;  %1885 = vmatprep.subr.bf16.mxu0 %v1884_v59  ;;  %v499_v21 = vrot.slane %v2212_v28, 2  ;;  %v1908_v51 = vpack.c.bf16 %v1534_v45, %v1533_v44  ;;  %v749_v53 = vrot.slane %v201_v50, 1  ;;  %v865_v63 = vrot.slane %v2389_v42, 2 }
  0x29   : > { %1879 = vmatpush3.bf16.msra.mxu1 %v1876_v57  ;;  %1721 = vmatmul.mubr.msk.f32.vlgmr.msra.gmra.mrb[4].mxu0 %vm247_vm1, %v487_v2  ;;  %v1535_v57 = vld [vmem:[%s2582_s1 + $0xf0] sm:$0xff]  ;;  %v1221_v3 = vrot.slane %v2327_v19, 2 }
  0x2a   : > { %1887 = vmatpush3.bf16.msra.mxu0 %v1884_v59  ;;  %1703 = vmatprep.mubr.msk.f32.mxu1 %vm247_vm1, %v2219_v33  ;;  %v2355_v32 = vsel %vm482_vm2, %v498_v18, %v499_v21  ;;  %v2366_v35 = vsel %vm482_vm2, %v499_v21, %v501_v29  ;;  %v1547_v59 = vld [vmem:[%s2582_s1 + $0x110] sm:$0xff]  ;;  %v1912_v61 = vpack.c.bf16 %v1536_v58, %v1535_v57 }
  0x2b   : > { %1723 = vmatprep.mubr.msk.f32.mxu0 %vm247_vm1, %v2301_v7  ;;  %1881 = vmatprep.subr.bf16.mxu1 %v1880_v4  ;;  %v1920_v62 = vpack.c.bf16 %v1548_v60, %v1547_v59 }
  0x2c   : > { %1704 = vmatmul.mubr.msk.f32.gmra.mrb[6].mxu1 %vm247_vm1, %v2222_v34  ;;  %1889 = vmatprep.subr.bf16.mxu0 %v1888_v8 }
  0x2d   : > { %1724 = vmatmul.mubr.msk.f32.gmra.mrb[6].mxu0 %vm247_vm1, %v2322_v14  ;;  %1706 = vmatprep.mubr.msk.f32.mxu1 %vm247_vm1, %v2188_v16 }
  0x2e   : > { %1726 = vmatprep.mubr.msk.f32.mxu0 %vm247_vm1, %v2332_v20  ;;  %1883 = vmatpush3.bf16.msra.mxu1 %v1880_v4 }
  0x2f   : > { %1891 = vmatpush3.bf16.msra.mxu0 %v1888_v8  ;;  %1893 = vmatprep.subr.bf16.mxu1 %v1892_v22 }
  0x30   : > { %1707 = vmatmul.mubr.msk.f32.gmra.mrb[8].mxu1 %vm247_vm1, %v2191_v17  ;;  %1901 = vmatprep.subr.bf16.mxu0 %v1900_v23 }
  0x31   : > { %1727 = vmatmul.mubr.msk.f32.gmra.mrb[8].mxu0 %vm247_vm1, %v2346_v26  ;;  %1709 = vmatprep.mubr.msk.f32.mxu1 %vm247_vm1, %v2209_v27 }
  0x32   : > { %1729 = vmatprep.mubr.msk.f32.mxu0 %vm247_vm1, %v2355_v32 }
  0x34   : > { %1710 = vmatmul.mubr.msk.f32.gmra.mrb[10].mxu1 %vm247_vm1, %v2212_v28 }
  0x35   : > { %1730 = vmatmul.mubr.msk.f32.gmra.mrb[10].mxu0 %vm247_vm1, %v2366_v35  ;;  %1740 = vmatprep.mubr.msk.f32.mxu1 %vm247_vm1, %v2219_v33  ;;  %v2394_v33 = vld [vmem:[%s2176_s4 + $0x68] sm:$0xff] }
  0x36   : > { %1760 = vmatprep.mubr.msk.f32.mxu0 %vm247_vm1, %v2263_v54  ;;  %v747_v49 = vrot.slane %v2394_v33, 1  ;;  %v866_v0 = vrot.slane %v2394_v33, 2 }
  0x38   : > { %1741 = vmatmul.mubr.msk.f32.vlgmr.msra.gmra.mrb[12].mxu1 %vm247_vm1, %v2222_v34  ;;  %v1546_v34 = vld [vmem:[%s2582_s1 + $0x108] sm:$0xff]  ;;  %v748_v54 = vsel %vm221_vm0, %v746_v47, %v747_v49 }
  0x39   : > { %1895 = vmatpush3.bf16.msra.mxu1 %v1892_v22  ;;  %1761 = vmatmul.mubr.msk.f32.vlgmr.msra.gmra.mrb[12].mxu0 %vm247_vm1, %v2269_v56  ;;  %v1916_v52 = vpack.c.bf16 %v1546_v34, %v1545_v46  ;;  %v750_v56 = vsel %vm221_vm0, %v747_v49, %v749_v53 }
  0x3a   : > { %1903 = vmatpush3.bf16.msra.mxu0 %v1900_v23  ;;  %1743 = vmatprep.mubr.msk.f32.mxu1 %vm247_vm1, %v2188_v16 }
  0x3b   : > { %1763 = vmatprep.mubr.msk.f32.mxu0 %vm247_vm1, %v2215_v30  ;;  %1897 = vmatprep.subr.bf16.mxu1 %v1896_v41 }
  0x3c   : > { %1744 = vmatmul.mubr.msk.f32.gmra.mrb[14].mxu1 %vm247_vm1, %v2191_v17  ;;  %1905 = vmatprep.subr.bf16.mxu0 %v1904_v43 }
  0x3d   : > { %1764 = vmatmul.mubr.msk.f32.gmra.mrb[14].mxu0 %vm247_vm1, %v2228_v37  ;;  %1746 = vmatprep.mubr.msk.f32.mxu1 %vm247_vm1, %v2209_v27 }
  0x3e   : > { %1766 = vmatprep.mubr.msk.f32.mxu0 %vm247_vm1, %v2250_v48  ;;  %1899 = vmatpush3.bf16.msra.mxu1 %v1896_v41 }
  0x3f   : > { %1907 = vmatpush3.bf16.msra.mxu0 %v1904_v43  ;;  %1909 = vmatprep.subr.bf16.mxu1 %v1908_v51 }
  0x40   : > { %1747 = vmatmul.mubr.msk.f32.gmra.mrb[16].mxu1 %vm247_vm1, %v2212_v28  ;;  %1917 = vmatprep.subr.bf16.mxu0 %v1916_v52 }
  0x41   : > { %1767 = vmatmul.mubr.msk.f32.gmra.mrb[16].mxu0 %vm247_vm1, %v2266_v55  ;;  %1749 = vmatprep.mubr.msk.f32.mxu1 %vm247_vm1, %v2389_v42 }
  0x42   : > { %1769 = vmatprep.mubr.msk.f32.mxu0 %vm247_vm1, %v748_v54 }
  0x44   : > { %1750 = vmatmul.mubr.msk.f32.gmra.mrb[18].mxu1 %vm247_vm1, %v2394_v33 }
  0x45   : > { %1770 = vmatmul.mubr.msk.f32.gmra.mrb[18].mxu0 %vm247_vm1, %v750_v56  ;;  %1780 = vmatprep.mubr.msk.f32.mxu1 %vm247_vm1, %v2301_v7 }
  0x46   : > { %1800 = vmatprep.mubr.msk.f32.mxu0 %vm247_vm1, %v2188_v16  ;;  %v868_v16 = vrot.slane %v201_v50, 2 }
  0x48   : > { %1781 = vmatmul.mubr.msk.f32.vlgmr.msra.gmra.mrb[20].mxu1 %vm247_vm1, %v2322_v14 }
  0x49   : > { %1911 = vmatpush3.bf16.msra.mxu1 %v1908_v51  ;;  %1801 = vmatmul.mubr.msk.f32.vlgmr.msra.gmra.mrb[20].mxu0 %vm247_vm1, %v2191_v17  ;;  %v867_v17 = vsel %vm482_vm2, %v865_v63, %v866_v0 }
  0x4a   : > { %1919 = vmatpush3.bf16.msra.mxu0 %v1916_v52  ;;  %1783 = vmatprep.mubr.msk.f32.mxu1 %vm247_vm1, %v2332_v20 }
  0x4b   : > { %1803 = vmatprep.mubr.msk.f32.mxu0 %vm247_vm1, %v2209_v27  ;;  %1913 = vmatprep.subr.bf16.mxu1 %v1912_v61  ;;  %v202_v27 = vld [vmem:[%s2176_s4 + $0x78] sm:$0xff]  ;;  %s175_s4 = sand.u32 1, %s2048_s13  }
  0x4c   : > { %1784 = vmatmul.mubr.msk.f32.gmra.mrb[22].mxu1 %vm247_vm1, %v2346_v26  ;;  %1921 = vmatprep.subr.bf16.mxu0 %v1920_v62  ;;  %v1101_v1 = vrot.slane %v202_v27, 1  ;;  %v1220_v2 = vrot.slane %v202_v27, 2  ;;  %s1451_s11 = sshll.u32 %s175_s4, 4  ;;  %s2535_s30 = scalar_lea.sflag [#allocation3], %s175_s4 }
  0x4d   : > { %1804 = vmatmul.mubr.msk.f32.gmra.mrb[22].mxu0 %vm247_vm1, %v2212_v28  ;;  %1786 = vmatprep.mubr.msk.f32.mxu1 %vm247_vm1, %v2355_v32  ;;  %v869_v28 = vsel %vm482_vm2, %v866_v0, %v868_v16  ;;  %s177_s21 = scalar_lea.vmem [#allocation2], %s1451_s11 }
  0x4e   : > { %1806 = vmatprep.mubr.msk.f32.mxu0 %vm247_vm1, %v2389_v42  ;;  %1915 = vmatpush3.bf16.msra.mxu1 %v1912_v61  ;;  %s1371_s23 = sshll.u32 %s177_s21, 4  ;;  %s2530_s23 = int_to_ptr.vmem [resolvable:$true] %s1371_s23 }
  0x4f   : > { %1923 = vmatpush3.bf16.msra.mxu0 %v1920_v62  ;;  %s1986_s15 = scalar_lea.vmem %s2530_s23, 256  ;;  %p1993_p1 = scmp.lt.s32.totalorder %s2530_s23, %s1991_s6 }
  0x50   : > { %1787 = vmatmul.mubr.msk.f32.gmra.mrb[24].mxu1 %vm247_vm1, %v2366_v35  ;;  %p1987_p12 = scmp.ne.s32.totalorder %s2530_s23, %s1986_s15  ;;  %p1994_p2 = scmp.lt.s32.totalorder %s1992_s7, %s1986_s15 }
  0x51   : > { %1807 = vmatmul.mubr.msk.f32.gmra.mrb[24].mxu0 %vm247_vm1, %v2394_v33  ;;  %1789 = vmatprep.mubr.msk.f32.mxu1 %vm247_vm1, %v867_v17 }
  0x52   : > { %1809 = vmatprep.mubr.msk.f32.mxu0 %vm247_vm1, %v202_v27  ;;  %p1988_p13 = pnand %p1987_p12, %p2129_p4  ;;  %p1995_p3 = por %p1994_p2, %p1993_p1 }
  0x54   : > { %1790 = vmatmul.mubr.msk.f32.gmra.mrb[26].mxu1 %vm247_vm1, %v869_v28  ;;  %p1989_p0 = pneg %p1988_p13 }
  0x55   : > { %1810 = vmatmul.mubr.msk.f32.gmra.mrb[26].mxu0 %vm247_vm1, %v2327_v19  ;;  %1820 = vmatprep.mubr.msk.f32.mxu1 %vm247_vm1, %v2215_v30  ;;  %v1103_v30 = vsel %vm221_vm0, %v1101_v1, %v1102_v24 }
  0x56   : > { %1840 = vmatprep.mubr.msk.f32.mxu0 %vm247_vm1, %v2332_v20  ;;  %p1996_p5 = pnand %p1995_p3, %p1989_p0 }
  0x58   : > { %1821 = vmatmul.mubr.msk.f32.vlgmr.msra.gmra.mrb[28].mxu1 %vm247_vm1, %v2228_v37  ;;  %v1223_v37 = vrot.slane %v2317_v13, 2 }
  0x59   : > { %1841 = vmatmul.mubr.msk.f32.vlgmr.msra.gmra.mrb[28].mxu0 %vm247_vm1, %v2346_v26  ;;  %1823 = vmatprep.mubr.msk.f32.mxu1 %vm247_vm1, %v2250_v48  ;;  %v1222_v48 = vsel %vm482_vm2, %v1220_v2, %v1221_v3 }
  0x5a   : > { %1843 = vmatprep.mubr.msk.f32.mxu0 %vm247_vm1, %v2355_v32 }
  0x5c   : > { %1824 = vmatmul.mubr.msk.f32.gmra.mrb[30].mxu1 %vm247_vm1, %v2266_v55  ;;  %v1224_v55 = vsel %vm482_vm2, %v1221_v3, %v1223_v37 }
  0x5d   : > { %1844 = vmatmul.mubr.msk.f32.gmra.mrb[30].mxu0 %vm247_vm1, %v2366_v35  ;;  %1826 = vmatprep.mubr.msk.f32.mxu1 %vm247_vm1, %v748_v54 }
  0x5e   : > { %1846 = vmatprep.mubr.msk.f32.mxu0 %vm247_vm1, %v867_v17 }
  0x60   : > { %1827 = vmatmul.mubr.msk.f32.gmra.mrb[32].mxu1 %vm247_vm1, %v750_v56 }
  0x61   : > { %1847 = vmatmul.mubr.msk.f32.gmra.mrb[32].mxu0 %vm247_vm1, %v869_v28  ;;  %1829 = vmatprep.mubr.msk.f32.mxu1 %vm247_vm1, %v1103_v30 }
  0x62   : > { %1849 = vmatprep.mubr.msk.f32.mxu0 %vm247_vm1, %v1222_v48 }
  0x64   : > { %1830 = vmatmul.mubr.msk.f32.gmra.mrb[34].mxu1 %vm247_vm1, %v2352_v31 }
  0x65   : > { %1850 = vmatmul.mubr.msk.f32.gmra.mrb[34].mxu0 %vm247_vm1, %v1224_v55 }
  0xf3   : > { %v1688_v4 = vpop.f32.mrb[0].mxu1 }
  0xf4   : > { %v1682_v5 = vpop.f32.mrb[0].mxu0  ;;  %v348_v6 = vpop.f32.mrb[1].mxu1 }
  0xf5   : > { %v330_v7 = vpop.f32.mrb[1].mxu0 }
  0xf7   : > { %v1691_v8 = vpop.f32.mrb[2].mxu1 }
  0xf8   : > { %v1685_v9 = vpop.f32.mrb[2].mxu0  ;;  %v357_v10 = vpop.f32.mrb[3].mxu1 }
  0xf9   : > { %v339_v11 = vpop.f32.mrb[3].mxu0 }
  0xfb   : > { %v1702_v12 = vpop.f32.mrb[4].mxu1 }
  0xfc   : > { %v447_v13 = vpop.f32.mrb[5].mxu1  ;;  %v1722_v14 = vpop.f32.mrb[4].mxu0 }
  0xfd   : > { %v448_v15 = vadd.f32 %v447_v13, %v330_v7  ;;  %v590_v18 = vpop.f32.mrb[5].mxu0 }
  0xff   : > { %v625_v19 = vadd.f32 %v590_v18, %v448_v15  ;;  %v1705_v20 = vpop.f32.mrb[6].mxu1 }
 0x100   : > { %v456_v21 = vpop.f32.mrb[7].mxu1  ;;  %v1725_v22 = vpop.f32.mrb[6].mxu0 }
 0x101   : > { %v457_v24 = vadd.f32 %v456_v21, %v339_v11  ;;  %v599_v23 = vpop.f32.mrb[7].mxu0 }
 0x103   : > { %v626_v25 = vadd.f32 %v599_v23, %v457_v24  ;;  %v1708_v26 = vpop.f32.mrb[8].mxu1 }
 0x104   : > { %v465_v29 = vpop.f32.mrb[9].mxu1  ;;  %v1728_v31 = vpop.f32.mrb[8].mxu0 }
 0x105   : > { %v466_v32 = vadd.f32 %v465_v29, %v348_v6  ;;  %v608_v35 = vpop.f32.mrb[9].mxu0  ;;  %v1557_v29 = vld [vmem:[%s2583_s2] ss:$0 sm:$0xff] }
 0x107   : > { %v627_v36 = vadd.f32 %v608_v35, %v466_v32  ;;  %v1711_v38 = vpop.f32.mrb[10].mxu1 }
 0x108   : > { %v474_v39 = vpop.f32.mrb[11].mxu1  ;;  %v1731_v40 = vpop.f32.mrb[10].mxu0 }
 0x109   : > { %v475_v41 = vadd.f32 %v474_v39, %v357_v10  ;;  %v617_v42 = vpop.f32.mrb[11].mxu0 }
 0x10b   : > { %v628_v43 = vadd.f32 %v617_v42, %v475_v41  ;;  %v1742_v33 = vpop.f32.mrb[12].mxu1 }
 0x10c   : > { %v706_v44 = vpop.f32.mrb[13].mxu1  ;;  %v1762_v45 = vpop.f32.mrb[12].mxu0 }
 0x10d   : > { %v741_v46 = vadd.f32 %v706_v44, %v625_v19  ;;  %v826_v34 = vpop.f32.mrb[13].mxu0 }
 0x10f   : > { %v861_v47 = vadd.f32 %v826_v34, %v741_v46  ;;  %v1745_v49 = vpop.f32.mrb[14].mxu1 }
 0x110   : > { %v715_v50 = vpop.f32.mrb[15].mxu1  ;;  %v1765_v51 = vpop.f32.mrb[14].mxu0 }
 0x111   : > { %v742_v52 = vadd.f32 %v715_v50, %v626_v25  ;;  %v835_v53 = vpop.f32.mrb[15].mxu0 }
 0x113   : > { %v862_v54 = vadd.f32 %v835_v53, %v742_v52  ;;  %v1748_v56 = vpop.f32.mrb[16].mxu1 }
 0x114   : > { %v724_v57 = vpop.f32.mrb[17].mxu1  ;;  %v1768_v58 = vpop.f32.mrb[16].mxu0 }
 0x115   : > { %v743_v59 = vadd.f32 %v724_v57, %v627_v36  ;;  %v844_v60 = vpop.f32.mrb[17].mxu0 }
 0x117   : > { %v863_v61 = vadd.f32 %v844_v60, %v743_v59  ;;  %v1751_v62 = vpop.f32.mrb[18].mxu1 }
 0x118   : > { %v733_v63 = vpop.f32.mrb[19].mxu1  ;;  %v1771_v0 = vpop.f32.mrb[18].mxu0 }
 0x119   : > { %v744_v16 = vadd.f32 %v733_v63, %v628_v43  ;;  %v853_v17 = vpop.f32.mrb[19].mxu0 }
 0x11b   : > { %v864_v27 = vadd.f32 %v853_v17, %v744_v16  ;;  %v1782_v28 = vpop.f32.mrb[20].mxu1 }
 0x11c   : > { %v945_v1 = vpop.f32.mrb[21].mxu1  ;;  %v1802_v2 = vpop.f32.mrb[20].mxu0 }
 0x11d   : > { %v980_v3 = vadd.f32 %v945_v1, %v861_v47  ;;  %v1061_v30 = vpop.f32.mrb[21].mxu0 }
 0x11f   : > { %v1096_v37 = vadd.f32 %v1061_v30, %v980_v3  ;;  %v1785_v48 = vpop.f32.mrb[22].mxu1 }
 0x120   : > { %v954_v55 = vpop.f32.mrb[23].mxu1  ;;  %v1805_v4 = vpop.f32.mrb[22].mxu0 }
 0x121   : > { %v981_v5 = vadd.f32 %v954_v55, %v862_v54  ;;  %v1070_v6 = vpop.f32.mrb[23].mxu0 }
 0x123   : > { %v1097_v7 = vadd.f32 %v1070_v6, %v981_v5  ;;  %v1788_v8 = vpop.f32.mrb[24].mxu1 }
 0x124   : > { %v963_v9 = vpop.f32.mrb[25].mxu1  ;;  %v1808_v10 = vpop.f32.mrb[24].mxu0 }
 0x125   : > { %v982_v11 = vadd.f32 %v963_v9, %v863_v61  ;;  %v1079_v12 = vpop.f32.mrb[25].mxu0 }
 0x127   : > { %v1098_v13 = vadd.f32 %v1079_v12, %v982_v11  ;;  %v1791_v14 = vpop.f32.mrb[26].mxu1 }
 0x128   : > { %v972_v15 = vpop.f32.mrb[27].mxu1  ;;  %v1811_v18 = vpop.f32.mrb[26].mxu0 }
 0x129   : > { %v983_v19 = vadd.f32 %v972_v15, %v864_v27  ;;  %v1088_v20 = vpop.f32.mrb[27].mxu0 }
 0x12b   : > { %v1099_v21 = vadd.f32 %v1088_v20, %v983_v19  ;;  %v1822_v22 = vpop.f32.mrb[28].mxu1 }
 0x12c   : > { %v1181_v24 = vpop.f32.mrb[29].mxu1  ;;  %v1842_v23 = vpop.f32.mrb[28].mxu0 }
 0x12d   : > { %v1216_v25 = vadd.f32 %v1181_v24, %v1096_v37  ;;  %v1300_v26 = vpop.f32.mrb[29].mxu0 }
 0x12f   : > { %v1335_v31 = vadd.f32 %v1300_v26, %v1216_v25  ;;  %v1825_v32 = vpop.f32.mrb[30].mxu1 }
 0x130   : > { %v1190_v35 = vpop.f32.mrb[31].mxu1  ;;  %v1845_v36 = vpop.f32.mrb[30].mxu0 }
 0x131   : > { %v1346_v38 = vadd.f32 %v1557_v29, %v1335_v31  ;;  %v1217_v39 = vadd.f32 %v1190_v35, %v1097_v7  ;;  %v1309_v40 = vpop.f32.mrb[31].mxu0 }
 0x133   : > { %1351 = vst.msk [vmem:[%s177_s21] sm:$0xf] %vm1350_vm3, %v1346_v38  ;;  %v1336_v41 = vadd.f32 %v1309_v40, %v1217_v39  ;;  %v1828_v42 = vpop.f32.mrb[32].mxu1 }
 0x134   : > { %v1199_v43 = vpop.f32.mrb[33].mxu1  ;;  %v1848_v33 = vpop.f32.mrb[32].mxu0 }
 0x135   : > { %v1347_v44 = vadd.f32 %v1557_v29, %v1336_v41  ;;  %v1218_v45 = vadd.f32 %v1199_v43, %v1098_v13  ;;  %v1318_v46 = vpop.f32.mrb[33].mxu0 }
 0x137   : > { %1352 = vst.msk [vmem:[%s177_s21 + $0x4] sm:$0xf] %vm1350_vm3, %v1347_v44  ;;  %v1337_v34 = vadd.f32 %v1318_v46, %v1218_v45  ;;  %v1831_v47 = vpop.f32.mrb[34].mxu1 }
 0x138   : > { %v1208_v49 = vpop.f32.mrb[35].mxu1  ;;  %v1851_v50 = vpop.f32.mrb[34].mxu0 }
 0x139   : > { %v1348_v51 = vadd.f32 %v1557_v29, %v1337_v34  ;;  %v1219_v52 = vadd.f32 %v1208_v49, %v1099_v21  ;;  %v1327_v53 = vpop.f32.mrb[35].mxu0 }
 0x13b   : > { %1353 = vst.msk [vmem:[%s177_s21 + $0x8] sm:$0xf] %vm1350_vm3, %v1348_v51  ;;  %v1338_v54 = vadd.f32 %v1327_v53, %v1219_v52 }
 0x13d   : > { %v1349_v56 = vadd.f32 %v1557_v29, %v1338_v54 }
 0x13f   : > { %1354 = vst.msk [vmem:[%s177_s21 + $0xc] sm:$0xf] %vm1350_vm3, %v1349_v56 }
 0x140   : > { %1999 = shalt.err (!%p1996_p5)
}
 0x141   : > { %s2000_s8 = scalar_lea.hbm %s2528_s29, 256  ;;  %s2004_s4 = scalar_lea.hbm %s2584_s3, 512 }
 0x142   : > { %p2001_p6 = scmp.ne.s32.totalorder %s2528_s29, %s2000_s8  ;;  %p2005_p10 = scmp.lt.u32.totalorder %s2528_s29, %s2584_s3 }
 0x143   : > { %p2006_p11 = scmp.lt.u32.totalorder %s2004_s4, %s2000_s8  ;;  %p2008_p13 = scmp.lt.u32.totalorder %s2000_s8, %s2528_s29 }
 0x144   : > { %p2002_p7 = pnand %p2001_p6, %p2129_p4 }
 0x145   : > { %p2007_p12 = por %p2006_p11, %p2005_p10 }
 0x146   : > { %p2003_p9 = pneg %p2002_p7 }
 0x147   : > { %p2009_p0 = por %p2008_p13, %p2007_p12 }
 0x149   : > { %p2010_p1 = pnand %p2009_p0, %p2003_p9 }
 0x14b   : > { %2013 = shalt.err (!%p2010_p1)
}
 0x14c   : > { %s2067_s19 = smov 64   ;;  %s2068_s21 = smov 4  }
 0x14d   : > { %1929 = dma.vmem_to_hbm [thread:$0]  (%p2129_p4), %s2530_s23, 256, %s2528_s29, %s2535_s30, %s2067_s19, %s2067_s19, %s2068_s21  }
 0x14e PF: > { %p1935_p2 = scmp.ge.s32.totalorder %s2064_s17, 2  ;;  %s1386_s26 = sand.u32 1, %s2044_s12  }
 0x14f   : > { %s1387_s27 = scalar_lea.sflag [#allocation3], %s1386_s26 }
 0x150   : > { %p1932_p3 = pnand %p1935_p2, %p2136_p8 }
 0x152   : > { %2039 = dma.done.wait (!%p1932_p3), %s1387_s27, 256  }
 0x153   : > { %2041 = vsyncadd (!%p1932_p3), %s1387_s27, 4294967040  ;;  %s16_s17 = sadd.s32 1, %s2064_s17   ;;  %s2587_s12 = smov %s2048_s13 }
 0x154   : > { %p13_p5 = scmp.ge.s32.totalorder %s16_s17, 4   ;;  %s2588_s13 = smov %s2052_s14 }
 0x155   : > { %s2589_s14 = smov %s2142_s25  ;;  %s2590_s15 = smov %s2060_s16 }
 0x156   : > { %s2591_s16 = smov %s2593_s20  ;;  %15 = sbr.rel (!%p13_p5) target bundleno = 4 (0x4), region = 76 }
 0x15d   :  { %1392 = vsyncpa [#allocation3], 1 }
 0x15e   :  { %1394 = vsyncpa [#allocation3 + $0x1], 1 }

</bundles_post_ra>
